<compile_context>
chip_gen: v6e
topology: v6e:2x2x1
jax: 0.10.0
libtpu: 0.0.40
codegen_flags: <defaults>
</compile_context>

<pallas_src>
import math
from functools import partial

import jax
import jax.numpy as jnp
from jax import lax
from jax.experimental import pallas as pl
from jax.experimental.pallas import tpu as pltpu


# ------------------------------------------------------------------
# Fused kernel: full TwoWayTransformer forward for one batch element
# ------------------------------------------------------------------

def _fused_two_way_kernel(*refs, treedef, n_params, depth, num_heads):
    qpe_ref, img_ref, imgpe_ref = refs[:3]
    param_refs = refs[3:3 + n_params]
    q_out_ref, k_out_ref, slab_q_ref, slab_k_ref = refs[3 + n_params:]
    p = jax.tree_util.tree_unflatten(treedef, list(param_refs))

    f32 = jnp.float32
    bf16 = jnp.bfloat16

    q_pe = qpe_ref[0]          # (Nq, D)  point_embedding (also initial queries)
    k_pe = imgpe_ref[0]        # (Nk, D)
    keys = img_ref[0]          # (Nk, D)  residual stream kept in f32
    queries = q_pe

    def layer_norm(x, nrm, l):
        w = nrm["w"][l]        # (1, D)
        b = nrm["b"][l]        # (1, D)
        mu = jnp.mean(x, axis=-1, keepdims=True)
        var = jnp.mean(jnp.square(x - mu), axis=-1, keepdims=True)
        return (x - mu) * lax.rsqrt(var + 1e-5) * w + b

    def mha(ap, l, q, k, v, slab_ref):
        # ap["wq"/"wk"/"wv"]: (L, D, internal) bf16, ap["b*"]: (L, 1, internal) f32
        # ap["wo"]: (L, internal, D) bf16,          ap["bo"]: (L, 1, D) f32
        wq = ap["wq"][l]
        wk = ap["wk"][l]
        wv = ap["wv"][l]
        wo = ap["wo"][l]
        internal = wq.shape[-1]
        hd = internal // num_heads
        scale = 1.0 / math.sqrt(hd)

        # Full-width projections: lane-dense MXU matmuls, f32 accumulation.
        qf = (jnp.dot(q.astype(bf16), wq, preferred_element_type=f32)
              + ap["bq"][l]).astype(bf16)
        kf = (jnp.dot(k.astype(bf16), wk, preferred_element_type=f32)
              + ap["bk"][l]).astype(bf16)
        vf = (jnp.dot(v.astype(bf16), wv, preferred_element_type=f32)
              + ap["bv"][l]).astype(bf16)

        # Per-head score / P·V; head outputs land in a bf16 VMEM slab at lane
        # offset h*hd so the output projection is one K=internal matmul.
        for h in range(num_heads):
            lo = h * hd
            qh = qf[:, lo:lo + hd]
            kh = kf[:, lo:lo + hd]
            vh = vf[:, lo:lo + hd]
            # contract last dims directly — no kh.T relayout
            s = lax.dot_general(qh, kh, (((1,), (1,)), ((), ())),
                                preferred_element_type=f32) * scale
            s = s - jnp.max(s, axis=-1, keepdims=True)          # stable softmax
            e = jnp.exp(s)
            prob = e * pl.reciprocal(jnp.sum(e, axis=-1, keepdims=True),
                                     approx=True)
            oh = jnp.dot(prob.astype(bf16), vh, preferred_element_type=f32)
            slab_ref[:, lo:lo + hd] = oh.astype(bf16)

        o_all = slab_ref[:, :internal]                           # (N, internal) bf16
        return jnp.dot(o_all, wo, preferred_element_type=f32) + ap["bo"][l]

    for l in range(depth):
        # (1) self-attention on sparse inputs (+ residual, fused LayerNorm)
        if l == 0:  # skip_first_layer_pe: no PE, no residual
            queries = mha(p["sa"], l, queries, queries, queries, slab_q_ref)
        else:
            q = queries + q_pe
            queries = queries + mha(p["sa"], l, q, q, queries, slab_q_ref)
        queries = layer_norm(queries, p["norm1"], l)

        # (2) cross attention: tokens -> image
        # TODO(synk): at real SAM sizes (Nk=4096) chunk the Nk axis here with
        # an online-softmax accumulator to bound VMEM on v7x.
        q = queries + q_pe
        k = keys + k_pe
        queries = queries + mha(p["t2i"], l, q, k, keys, slab_q_ref)
        queries = layer_norm(queries, p["norm2"], l)

        # (3) MLP on sparse inputs
        h1 = jnp.dot(queries.astype(bf16), p["mlp"]["w1"][l],
                     preferred_element_type=f32) + p["mlp"]["b1"][l]
        h1 = jnp.maximum(h1, 0.0)                                # ReLU
        mlp_out = jnp.dot(h1.astype(bf16), p["mlp"]["w2"][l],
                          preferred_element_type=f32) + p["mlp"]["b2"][l]
        queries = layer_norm(queries + mlp_out, p["norm3"], l)

        # (4) cross attention: image -> tokens
        q = queries + q_pe
        k = keys + k_pe
        keys = keys + mha(p["i2t"], l, k, q, queries, slab_k_ref)
        keys = layer_norm(keys, p["norm4"], l)

    # final attention (tokens -> image) + final LayerNorm
    q = queries + q_pe
    k = keys + k_pe
    queries = queries + mha(p["final"], 0, q, k, keys, slab_q_ref)
    queries = layer_norm(queries, p["norm_final"], 0)

    q_out_ref[0] = queries
    k_out_ref[0] = keys


# ------------------------------------------------------------------
# Wrapper: one pallas_call for the whole forward
# ------------------------------------------------------------------

def two_way_transformer(params, image_embedding, image_pe, point_embedding, *,
                        num_heads, depth):
    B, C, H, W = image_embedding.shape
    Nk = H * W
    # B x C x H x W -> B x (H*W) x C  (tokens last-dim = channels on lanes)
    img = image_embedding.reshape(B, C, Nk).transpose(0, 2, 1)
    imgpe = image_pe.reshape(B, C, Nk).transpose(0, 2, 1)
    _, Nq, D = point_embedding.shape

    leaves, treedef = jax.tree_util.tree_flatten(params)
    kernel = partial(_fused_two_way_kernel, treedef=treedef,
                     n_params=len(leaves), depth=depth, num_heads=num_heads)

    def _const_spec(a):
        # Full-array block, constant index_map -> weights stay resident in VMEM.
        return pl.BlockSpec(a.shape, lambda b, _n=a.ndim: (0,) * _n)

    in_specs = ([pl.BlockSpec((1, Nq, D), lambda b: (b, 0, 0)),
                 pl.BlockSpec((1, Nk, D), lambda b: (b, 0, 0)),
                 pl.BlockSpec((1, Nk, D), lambda b: (b, 0, 0))]
                + [_const_spec(x) for x in leaves])
    out_specs = (pl.BlockSpec((1, Nq, D), lambda b: (b, 0, 0)),
                 pl.BlockSpec((1, Nk, D), lambda b: (b, 0, 0)))

    # Explicit scoped-VMEM budget: weights (double-buffered by the pipeline) +
    # double-buffered activation blocks + outputs + scratch, plus headroom.
    param_bytes = sum(int(x.size) * x.dtype.itemsize for x in leaves)
    act_bytes = 4 * D * (Nq + 2 * Nk)        # f32 input blocks per grid step
    out_bytes = 4 * D * (Nq + Nk)            # f32 output blocks
    scratch_bytes = 2 * D * (Nq + Nk)        # bf16 head-output slabs
    vmem_limit = 2 * (param_bytes + act_bytes + out_bytes) + scratch_bytes + (8 << 20)
    vmem_limit = int(min(max(vmem_limit, 32 << 20), 64 << 20))

    queries, keys = pl.pallas_call(
        kernel,
        out_shape=(jax.ShapeDtypeStruct((B, Nq, D), jnp.float32),
                   jax.ShapeDtypeStruct((B, Nk, D), jnp.float32)),
        grid=(B,),
        in_specs=in_specs,
        out_specs=out_specs,
        scratch_shapes=[pltpu.VMEM((Nq, D), jnp.bfloat16),   # head-output slab (token rows)
                        pltpu.VMEM((Nk, D), jnp.bfloat16)],  # head-output slab (image rows)
        compiler_params=pltpu.CompilerParams(
            dimension_semantics=("parallel",),
            vmem_limit_bytes=vmem_limit),
    )(point_embedding, img, imgpe, *leaves)
    return queries, keys


# ------------------------------------------------------------------
# Parameter initialization (deterministic, synthetic), bf16 weight matrices
# ------------------------------------------------------------------

def _init_linear(key, d_in, d_out):
    k1, k2 = jax.random.split(key)
    bound = 1.0 / math.sqrt(d_in)
    w = jax.random.uniform(k1, (d_in, d_out), jnp.float32, -bound, bound)
    b = jax.random.uniform(k2, (1, d_out), jnp.float32, -bound, bound)
    return w, b


def _init_attention(key, embedding_dim, num_heads, downsample_rate=1):
    internal = embedding_dim // downsample_rate
    assert internal % num_heads == 0, "num_heads must divide internal dim"
    ks = jax.random.split(key, 4)
    wq, bq = _init_linear(ks[0], embedding_dim, internal)
    wk, bk = _init_linear(ks[1], embedding_dim, internal)
    wv, bv = _init_linear(ks[2], embedding_dim, internal)
    wo, bo = _init_linear(ks[3], internal, embedding_dim)
    bf = jnp.bfloat16
    return dict(wq=wq.astype(bf), bq=bq, wk=wk.astype(bf), bk=bk,
                wv=wv.astype(bf), bv=bv, wo=wo.astype(bf), bo=bo)


def _init_layernorm(dim):
    return dict(w=jnp.ones((1, dim), jnp.float32), b=jnp.zeros((1, dim), jnp.float32))


def _stack(dicts):
    return jax.tree_util.tree_map(lambda *xs: jnp.stack(xs, axis=0), *dicts)


def init_two_way_transformer(key, depth, embedding_dim, num_heads, mlp_dim,
                             attention_downsample_rate=2):
    keys = jax.random.split(key, depth + 1)
    sa, t2i, i2t, mlp, n1, n2, n3, n4 = [], [], [], [], [], [], [], []
    bf = jnp.bfloat16
    for i in range(depth):
        lk = jax.random.split(keys[i], 5)
        sa.append(_init_attention(lk[0], embedding_dim, num_heads, 1))
        t2i.append(_init_attention(lk[1], embedding_dim, num_heads,
                                   attention_downsample_rate))
        i2t.append(_init_attention(lk[2], embedding_dim, num_heads,
                                   attention_downsample_rate))
        w1, b1 = _init_linear(lk[3], embedding_dim, mlp_dim)
        w2, b2 = _init_linear(lk[4], mlp_dim, embedding_dim)
        mlp.append(dict(w1=w1.astype(bf), b1=b1, w2=w2.astype(bf), b2=b2))
        n1.append(_init_layernorm(embedding_dim))
        n2.append(_init_layernorm(embedding_dim))
        n3.append(_init_layernorm(embedding_dim))
        n4.append(_init_layernorm(embedding_dim))
    final = _stack([_init_attention(keys[depth], embedding_dim, num_heads,
                                    attention_downsample_rate)])
    return dict(
        sa=_stack(sa), t2i=_stack(t2i), i2t=_stack(i2t), mlp=_stack(mlp),
        norm1=_stack(n1), norm2=_stack(n2), norm3=_stack(n3), norm4=_stack(n4),
        final=final, norm_final=_stack([_init_layernorm(embedding_dim)]),
    )


# ------------------------------------------------------------------
# Main
# ------------------------------------------------------------------

if __name__ == "__main__":
    depth = 2
    embedding_dim = 32
    num_heads = 4
    mlp_dim = 64
    attention_downsample_rate = 2

    B, H, W = 2, 8, 8
    n_points = 8

    key = jax.random.PRNGKey(0)
    k_img, k_pe, k_pts, k_params = jax.random.split(key, 4)

    image_embedding = jax.random.normal(k_img, (B, embedding_dim, H, W), jnp.float32)
    image_pe = jax.random.normal(k_pe, (B, embedding_dim, H, W), jnp.float32)
    point_embedding = jax.random.normal(k_pts, (B, n_points, embedding_dim), jnp.float32)

    params = init_two_way_transformer(
        k_params, depth, embedding_dim, num_heads, mlp_dim, attention_downsample_rate)

    fwd = jax.jit(partial(two_way_transformer, num_heads=num_heads, depth=depth))
    queries, keys = fwd(params, image_embedding, image_pe, point_embedding)
    jax.block_until_ready((queries, keys))

    assert queries.shape == (B, n_points, embedding_dim)
    assert keys.shape == (B, H * W, embedding_dim)
    assert bool(jnp.all(jnp.isfinite(queries))) and bool(jnp.all(jnp.isfinite(keys)))
    print("KERNEL_OK")
</pallas_src>

<mosaic_0001>
module attributes {stable_mosaic.version = 11 : i64} {
  func.func @_fused_two_way_kernel(%arg0: i32, %arg1: memref<1x8x32xf32, #tpu.memory_space<vmem>>, %arg2: memref<1x64x32xf32, #tpu.memory_space<vmem>>, %arg3: memref<1x64x32xf32, #tpu.memory_space<vmem>>, %arg4: memref<1x1x16xf32, #tpu.memory_space<vmem>>, %arg5: memref<1x1x32xf32, #tpu.memory_space<vmem>>, %arg6: memref<1x1x16xf32, #tpu.memory_space<vmem>>, %arg7: memref<1x1x16xf32, #tpu.memory_space<vmem>>, %arg8: memref<1x32x16xbf16, #tpu.memory_space<vmem>>, %arg9: memref<1x16x32xbf16, #tpu.memory_space<vmem>>, %arg10: memref<1x32x16xbf16, #tpu.memory_space<vmem>>, %arg11: memref<1x32x16xbf16, #tpu.memory_space<vmem>>, %arg12: memref<2x1x16xf32, #tpu.memory_space<vmem>>, %arg13: memref<2x1x32xf32, #tpu.memory_space<vmem>>, %arg14: memref<2x1x16xf32, #tpu.memory_space<vmem>>, %arg15: memref<2x1x16xf32, #tpu.memory_space<vmem>>, %arg16: memref<2x32x16xbf16, #tpu.memory_space<vmem>>, %arg17: memref<2x16x32xbf16, #tpu.memory_space<vmem>>, %arg18: memref<2x32x16xbf16, #tpu.memory_space<vmem>>, %arg19: memref<2x32x16xbf16, #tpu.memory_space<vmem>>, %arg20: memref<2x1x64xf32, #tpu.memory_space<vmem>>, %arg21: memref<2x1x32xf32, #tpu.memory_space<vmem>>, %arg22: memref<2x32x64xbf16, #tpu.memory_space<vmem>>, %arg23: memref<2x64x32xbf16, #tpu.memory_space<vmem>>, %arg24: memref<2x1x32xf32, #tpu.memory_space<vmem>>, %arg25: memref<2x1x32xf32, #tpu.memory_space<vmem>>, %arg26: memref<2x1x32xf32, #tpu.memory_space<vmem>>, %arg27: memref<2x1x32xf32, #tpu.memory_space<vmem>>, %arg28: memref<2x1x32xf32, #tpu.memory_space<vmem>>, %arg29: memref<2x1x32xf32, #tpu.memory_space<vmem>>, %arg30: memref<2x1x32xf32, #tpu.memory_space<vmem>>, %arg31: memref<2x1x32xf32, #tpu.memory_space<vmem>>, %arg32: memref<1x1x32xf32, #tpu.memory_space<vmem>>, %arg33: memref<1x1x32xf32, #tpu.memory_space<vmem>>, %arg34: memref<2x1x32xf32, #tpu.memory_space<vmem>>, %arg35: memref<2x1x32xf32, #tpu.memory_space<vmem>>, %arg36: memref<2x1x32xf32, #tpu.memory_space<vmem>>, %arg37: memref<2x1x32xf32, #tpu.memory_space<vmem>>, %arg38: memref<2x32x32xbf16, #tpu.memory_space<vmem>>, %arg39: memref<2x32x32xbf16, #tpu.memory_space<vmem>>, %arg40: memref<2x32x32xbf16, #tpu.memory_space<vmem>>, %arg41: memref<2x32x32xbf16, #tpu.memory_space<vmem>>, %arg42: memref<2x1x16xf32, #tpu.memory_space<vmem>>, %arg43: memref<2x1x32xf32, #tpu.memory_space<vmem>>, %arg44: memref<2x1x16xf32, #tpu.memory_space<vmem>>, %arg45: memref<2x1x16xf32, #tpu.memory_space<vmem>>, %arg46: memref<2x32x16xbf16, #tpu.memory_space<vmem>>, %arg47: memref<2x16x32xbf16, #tpu.memory_space<vmem>>, %arg48: memref<2x32x16xbf16, #tpu.memory_space<vmem>>, %arg49: memref<2x32x16xbf16, #tpu.memory_space<vmem>>, %arg50: memref<1x8x32xf32, #tpu.memory_space<vmem>>, %arg51: memref<1x64x32xf32, #tpu.memory_space<vmem>>, %arg52: memref<8x32xbf16, #tpu.memory_space<vmem>>, %arg53: memref<64x32xbf16, #tpu.memory_space<vmem>>) attributes {dimension_semantics = [#tpu.dimension_semantics<parallel>], iteration_bounds = array<i64: 2>, scalar_prefetch = 0 : i64, scratch_operands = 2 : i64, tpu.core_type = #tpu.core_type<tc>, window_params = [{transform_indices = @transform_0, window_bounds = array<i64: 1, 8, 32>}, {transform_indices = @transform_1, window_bounds = array<i64: 1, 64, 32>}, {transform_indices = @transform_2, window_bounds = array<i64: 1, 64, 32>}, {pipeline_mode = #tpu.pipeline_mode<synchronous>, transform_indices = @transform_3, window_bounds = array<i64: 1, 1, 16>}, {pipeline_mode = #tpu.pipeline_mode<synchronous>, transform_indices = @transform_4, window_bounds = array<i64: 1, 1, 32>}, {pipeline_mode = #tpu.pipeline_mode<synchronous>, transform_indices = @transform_5, window_bounds = array<i64: 1, 1, 16>}, {pipeline_mode = #tpu.pipeline_mode<synchronous>, transform_indices = @transform_6, window_bounds = array<i64: 1, 1, 16>}, {pipeline_mode = #tpu.pipeline_mode<synchronous>, transform_indices = @transform_7, window_bounds = array<i64: 1, 32, 16>}, {pipeline_mode = #tpu.pipeline_mode<synchronous>, transform_indices = @transform_8, window_bounds = array<i64: 1, 16, 32>}, {pipeline_mode = #tpu.pipeline_mode<synchronous>, transform_indices = @transform_9, window_bounds = array<i64: 1, 32, 16>}, {pipeline_mode = #tpu.pipeline_mode<synchronous>, transform_indices = @transform_10, window_bounds = array<i64: 1, 32, 16>}, {pipeline_mode = #tpu.pipeline_mode<synchronous>, transform_indices = @transform_11, window_bounds = array<i64: 2, 1, 16>}, {pipeline_mode = #tpu.pipeline_mode<synchronous>, transform_indices = @transform_12, window_bounds = array<i64: 2, 1, 32>}, {pipeline_mode = #tpu.pipeline_mode<synchronous>, transform_indices = @transform_13, window_bounds = array<i64: 2, 1, 16>}, {pipeline_mode = #tpu.pipeline_mode<synchronous>, transform_indices = @transform_14, window_bounds = array<i64: 2, 1, 16>}, {pipeline_mode = #tpu.pipeline_mode<synchronous>, transform_indices = @transform_15, window_bounds = array<i64: 2, 32, 16>}, {pipeline_mode = #tpu.pipeline_mode<synchronous>, transform_indices = @transform_16, window_bounds = array<i64: 2, 16, 32>}, {pipeline_mode = #tpu.pipeline_mode<synchronous>, transform_indices = @transform_17, window_bounds = array<i64: 2, 32, 16>}, {pipeline_mode = #tpu.pipeline_mode<synchronous>, transform_indices = @transform_18, window_bounds = array<i64: 2, 32, 16>}, {pipeline_mode = #tpu.pipeline_mode<synchronous>, transform_indices = @transform_19, window_bounds = array<i64: 2, 1, 64>}, {pipeline_mode = #tpu.pipeline_mode<synchronous>, transform_indices = @transform_20, window_bounds = array<i64: 2, 1, 32>}, {pipeline_mode = #tpu.pipeline_mode<synchronous>, transform_indices = @transform_21, window_bounds = array<i64: 2, 32, 64>}, {pipeline_mode = #tpu.pipeline_mode<synchronous>, transform_indices = @transform_22, window_bounds = array<i64: 2, 64, 32>}, {pipeline_mode = #tpu.pipeline_mode<synchronous>, transform_indices = @transform_23, window_bounds = array<i64: 2, 1, 32>}, {pipeline_mode = #tpu.pipeline_mode<synchronous>, transform_indices = @transform_24, window_bounds = array<i64: 2, 1, 32>}, {pipeline_mode = #tpu.pipeline_mode<synchronous>, transform_indices = @transform_25, window_bounds = array<i64: 2, 1, 32>}, {pipeline_mode = #tpu.pipeline_mode<synchronous>, transform_indices = @transform_26, window_bounds = array<i64: 2, 1, 32>}, {pipeline_mode = #tpu.pipeline_mode<synchronous>, transform_indices = @transform_27, window_bounds = array<i64: 2, 1, 32>}, {pipeline_mode = #tpu.pipeline_mode<synchronous>, transform_indices = @transform_28, window_bounds = array<i64: 2, 1, 32>}, {pipeline_mode = #tpu.pipeline_mode<synchronous>, transform_indices = @transform_29, window_bounds = array<i64: 2, 1, 32>}, {pipeline_mode = #tpu.pipeline_mode<synchronous>, transform_indices = @transform_30, window_bounds = array<i64: 2, 1, 32>}, {pipeline_mode = #tpu.pipeline_mode<synchronous>, transform_indices = @transform_31, window_bounds = array<i64: 1, 1, 32>}, {pipeline_mode = #tpu.pipeline_mode<synchronous>, transform_indices = @transform_32, window_bounds = array<i64: 1, 1, 32>}, {pipeline_mode = #tpu.pipeline_mode<synchronous>, transform_indices = @transform_33, window_bounds = array<i64: 2, 1, 32>}, {pipeline_mode = #tpu.pipeline_mode<synchronous>, transform_indices = @transform_34, window_bounds = array<i64: 2, 1, 32>}, {pipeline_mode = #tpu.pipeline_mode<synchronous>, transform_indices = @transform_35, window_bounds = array<i64: 2, 1, 32>}, {pipeline_mode = #tpu.pipeline_mode<synchronous>, transform_indices = @transform_36, window_bounds = array<i64: 2, 1, 32>}, {pipeline_mode = #tpu.pipeline_mode<synchronous>, transform_indices = @transform_37, window_bounds = array<i64: 2, 32, 32>}, {pipeline_mode = #tpu.pipeline_mode<synchronous>, transform_indices = @transform_38, window_bounds = array<i64: 2, 32, 32>}, {pipeline_mode = #tpu.pipeline_mode<synchronous>, transform_indices = @transform_39, window_bounds = array<i64: 2, 32, 32>}, {pipeline_mode = #tpu.pipeline_mode<synchronous>, transform_indices = @transform_40, window_bounds = array<i64: 2, 32, 32>}, {pipeline_mode = #tpu.pipeline_mode<synchronous>, transform_indices = @transform_41, window_bounds = array<i64: 2, 1, 16>}, {pipeline_mode = #tpu.pipeline_mode<synchronous>, transform_indices = @transform_42, window_bounds = array<i64: 2, 1, 32>}, {pipeline_mode = #tpu.pipeline_mode<synchronous>, transform_indices = @transform_43, window_bounds = array<i64: 2, 1, 16>}, {pipeline_mode = #tpu.pipeline_mode<synchronous>, transform_indices = @transform_44, window_bounds = array<i64: 2, 1, 16>}, {pipeline_mode = #tpu.pipeline_mode<synchronous>, transform_indices = @transform_45, window_bounds = array<i64: 2, 32, 16>}, {pipeline_mode = #tpu.pipeline_mode<synchronous>, transform_indices = @transform_46, window_bounds = array<i64: 2, 16, 32>}, {pipeline_mode = #tpu.pipeline_mode<synchronous>, transform_indices = @transform_47, window_bounds = array<i64: 2, 32, 16>}, {pipeline_mode = #tpu.pipeline_mode<synchronous>, transform_indices = @transform_48, window_bounds = array<i64: 2, 32, 16>}, {transform_indices = @transform_49, window_bounds = array<i64: 1, 8, 32>}, {transform_indices = @transform_50, window_bounds = array<i64: 1, 64, 32>}]} {
    %c0 = arith.constant 0 : index
    %c0_0 = arith.constant 0 : index
    %c0_1 = arith.constant 0 : index
    %0 = vector.load %arg1[%c0, %c0_0, %c0_1] : memref<1x8x32xf32, #tpu.memory_space<vmem>>, vector<1x8x32xf32>
    %1 = vector.shape_cast %0 : vector<1x8x32xf32> to vector<8x32xf32>
    %c0_2 = arith.constant 0 : index
    %c0_3 = arith.constant 0 : index
    %c0_4 = arith.constant 0 : index
    %2 = vector.load %arg3[%c0_2, %c0_3, %c0_4] : memref<1x64x32xf32, #tpu.memory_space<vmem>>, vector<1x64x32xf32>
    %3 = vector.shape_cast %2 : vector<1x64x32xf32> to vector<64x32xf32>
    %c0_5 = arith.constant 0 : index
    %c0_6 = arith.constant 0 : index
    %c0_7 = arith.constant 0 : index
    %4 = vector.load %arg2[%c0_5, %c0_6, %c0_7] : memref<1x64x32xf32, #tpu.memory_space<vmem>>, vector<1x64x32xf32>
    %5 = vector.shape_cast %4 : vector<1x64x32xf32> to vector<64x32xf32>
    %c0_8 = arith.constant 0 : index
    %c0_9 = arith.constant 0 : index
    %c0_10 = arith.constant 0 : index
    %6 = vector.load %arg40[%c0_8, %c0_9, %c0_10] : memref<2x32x32xbf16, #tpu.memory_space<vmem>>, vector<1x32x32xbf16>
    %7 = vector.shape_cast %6 : vector<1x32x32xbf16> to vector<32x32xbf16>
    %c0_11 = arith.constant 0 : index
    %c0_12 = arith.constant 0 : index
    %c0_13 = arith.constant 0 : index
    %8 = vector.load %arg38[%c0_11, %c0_12, %c0_13] : memref<2x32x32xbf16, #tpu.memory_space<vmem>>, vector<1x32x32xbf16>
    %9 = vector.shape_cast %8 : vector<1x32x32xbf16> to vector<32x32xbf16>
    %c0_14 = arith.constant 0 : index
    %c0_15 = arith.constant 0 : index
    %c0_16 = arith.constant 0 : index
    %10 = vector.load %arg41[%c0_14, %c0_15, %c0_16] : memref<2x32x32xbf16, #tpu.memory_space<vmem>>, vector<1x32x32xbf16>
    %11 = vector.shape_cast %10 : vector<1x32x32xbf16> to vector<32x32xbf16>
    %c0_17 = arith.constant 0 : index
    %c0_18 = arith.constant 0 : index
    %c0_19 = arith.constant 0 : index
    %12 = vector.load %arg39[%c0_17, %c0_18, %c0_19] : memref<2x32x32xbf16, #tpu.memory_space<vmem>>, vector<1x32x32xbf16>
    %13 = vector.shape_cast %12 : vector<1x32x32xbf16> to vector<32x32xbf16>
    %14 = arith.truncf %1 : vector<8x32xf32> to vector<8x32xbf16>
    %cst = arith.constant dense<0.000000e+00> : vector<8x32xf32>
    %15 = tpu.matmul %14, %7, %cst {dimension_numbers = #tpu.dot_dimension_numbers<[1], [0], [0], [1], [0, 0, 1, 1], [], []>} : vector<8x32xbf16>, vector<32x32xbf16>, vector<8x32xf32> -> vector<8x32xf32>
    %c0_20 = arith.constant 0 : index
    %c0_21 = arith.constant 0 : index
    %c0_22 = arith.constant 0 : index
    %16 = vector.load %arg36[%c0_20, %c0_21, %c0_22] : memref<2x1x32xf32, #tpu.memory_space<vmem>>, vector<1x1x32xf32>
    %17 = vector.shape_cast %16 : vector<1x1x32xf32> to vector<1x32xf32>
    %18 = vector.broadcast %17 : vector<1x32xf32> to vector<8x32xf32>
    %19 = arith.addf %15, %18 : vector<8x32xf32>
    %20 = arith.truncf %19 : vector<8x32xf32> to vector<8x32xbf16>
    %21 = arith.truncf %1 : vector<8x32xf32> to vector<8x32xbf16>
    %cst_23 = arith.constant dense<0.000000e+00> : vector<8x32xf32>
    %22 = tpu.matmul %21, %9, %cst_23 {dimension_numbers = #tpu.dot_dimension_numbers<[1], [0], [0], [1], [0, 0, 1, 1], [], []>} : vector<8x32xbf16>, vector<32x32xbf16>, vector<8x32xf32> -> vector<8x32xf32>
    %c0_24 = arith.constant 0 : index
    %c0_25 = arith.constant 0 : index
    %c0_26 = arith.constant 0 : index
    %23 = vector.load %arg34[%c0_24, %c0_25, %c0_26] : memref<2x1x32xf32, #tpu.memory_space<vmem>>, vector<1x1x32xf32>
    %24 = vector.shape_cast %23 : vector<1x1x32xf32> to vector<1x32xf32>
    %25 = vector.broadcast %24 : vector<1x32xf32> to vector<8x32xf32>
    %26 = arith.addf %22, %25 : vector<8x32xf32>
    %27 = arith.truncf %26 : vector<8x32xf32> to vector<8x32xbf16>
    %28 = arith.truncf %1 : vector<8x32xf32> to vector<8x32xbf16>
    %cst_27 = arith.constant dense<0.000000e+00> : vector<8x32xf32>
    %29 = tpu.matmul %28, %11, %cst_27 {dimension_numbers = #tpu.dot_dimension_numbers<[1], [0], [0], [1], [0, 0, 1, 1], [], []>} : vector<8x32xbf16>, vector<32x32xbf16>, vector<8x32xf32> -> vector<8x32xf32>
    %c0_28 = arith.constant 0 : index
    %c0_29 = arith.constant 0 : index
    %c0_30 = arith.constant 0 : index
    %30 = vector.load %arg37[%c0_28, %c0_29, %c0_30] : memref<2x1x32xf32, #tpu.memory_space<vmem>>, vector<1x1x32xf32>
    %31 = vector.shape_cast %30 : vector<1x1x32xf32> to vector<1x32xf32>
    %32 = vector.broadcast %31 : vector<1x32xf32> to vector<8x32xf32>
    %33 = arith.addf %29, %32 : vector<8x32xf32>
    %34 = arith.truncf %33 : vector<8x32xf32> to vector<8x32xbf16>
    %35 = vector.extract_strided_slice %20 {offsets = [0, 0], sizes = [8, 8], strides = [1, 1]} : vector<8x32xbf16> to vector<8x8xbf16>
    %36 = vector.extract_strided_slice %27 {offsets = [0, 0], sizes = [8, 8], strides = [1, 1]} : vector<8x32xbf16> to vector<8x8xbf16>
    %37 = vector.extract_strided_slice %34 {offsets = [0, 0], sizes = [8, 8], strides = [1, 1]} : vector<8x32xbf16> to vector<8x8xbf16>
    %cst_31 = arith.constant dense<0.000000e+00> : vector<8x8xf32>
    %38 = tpu.matmul %35, %36, %cst_31 {dimension_numbers = #tpu.dot_dimension_numbers<[1], [1], [0], [0], [0, 0, 1, 0], [], []>} : vector<8x8xbf16>, vector<8x8xbf16>, vector<8x8xf32> -> vector<8x8xf32>
    %cst_32 = arith.constant 0.353553385 : f32
    %39 = vector.broadcast %cst_32 : f32 to vector<8x8xf32>
    %40 = arith.mulf %38, %39 : vector<8x8xf32>
    %cst_33 = arith.constant dense<0xFF800000> : vector<8xf32>
    %41 = vector.multi_reduction <maximumf>, %40, %cst_33 [1] : vector<8x8xf32> to vector<8xf32>
    %42 = vector.shape_cast %41 : vector<8xf32> to vector<8x1xf32>
    %43 = vector.broadcast %42 : vector<8x1xf32> to vector<8x8xf32>
    %44 = arith.subf %40, %43 : vector<8x8xf32>
    %45 = math.exp %44 : vector<8x8xf32>
    %cst_34 = arith.constant dense<0.000000e+00> : vector<8xf32>
    %46 = vector.multi_reduction <add>, %45, %cst_34 [1] : vector<8x8xf32> to vector<8xf32>
    %47 = vector.shape_cast %46 : vector<8xf32> to vector<8x1xf32>
    %48 = tpu.reciprocal %47 {approx = true} : vector<8x1xf32> -> vector<8x1xf32>
    %49 = vector.broadcast %48 : vector<8x1xf32> to vector<8x8xf32>
    %50 = arith.mulf %45, %49 : vector<8x8xf32>
    %51 = arith.truncf %50 : vector<8x8xf32> to vector<8x8xbf16>
    %cst_35 = arith.constant dense<0.000000e+00> : vector<8x8xf32>
    %52 = tpu.matmul %51, %37, %cst_35 {dimension_numbers = #tpu.dot_dimension_numbers<[1], [0], [0], [1], [0, 0, 1, 1], [], []>} : vector<8x8xbf16>, vector<8x8xbf16>, vector<8x8xf32> -> vector<8x8xf32>
    %53 = arith.truncf %52 : vector<8x8xf32> to vector<8x8xbf16>
    %c0_36 = arith.constant 0 : index
    %c0_37 = arith.constant 0 : index
    %54 = vector.load %arg52[%c0_36, %c0_37] : memref<8x32xbf16, #tpu.memory_space<vmem>>, vector<8x8xbf16>
    tpu.vector_store %arg52[%c0_36, %c0_37], %53 {strides = array<i32>} : memref<8x32xbf16, #tpu.memory_space<vmem>>, vector<8x8xbf16>,
    %55 = vector.extract_strided_slice %20 {offsets = [0, 8], sizes = [8, 8], strides = [1, 1]} : vector<8x32xbf16> to vector<8x8xbf16>
    %56 = vector.extract_strided_slice %27 {offsets = [0, 8], sizes = [8, 8], strides = [1, 1]} : vector<8x32xbf16> to vector<8x8xbf16>
    %57 = vector.extract_strided_slice %34 {offsets = [0, 8], sizes = [8, 8], strides = [1, 1]} : vector<8x32xbf16> to vector<8x8xbf16>
    %cst_38 = arith.constant dense<0.000000e+00> : vector<8x8xf32>
    %58 = tpu.matmul %55, %56, %cst_38 {dimension_numbers = #tpu.dot_dimension_numbers<[1], [1], [0], [0], [0, 0, 1, 0], [], []>} : vector<8x8xbf16>, vector<8x8xbf16>, vector<8x8xf32> -> vector<8x8xf32>
    %cst_39 = arith.constant 0.353553385 : f32
    %59 = vector.broadcast %cst_39 : f32 to vector<8x8xf32>
    %60 = arith.mulf %58, %59 : vector<8x8xf32>
    %cst_40 = arith.constant dense<0xFF800000> : vector<8xf32>
    %61 = vector.multi_reduction <maximumf>, %60, %cst_40 [1] : vector<8x8xf32> to vector<8xf32>
    %62 = vector.shape_cast %61 : vector<8xf32> to vector<8x1xf32>
    %63 = vector.broadcast %62 : vector<8x1xf32> to vector<8x8xf32>
    %64 = arith.subf %60, %63 : vector<8x8xf32>
    %65 = math.exp %64 : vector<8x8xf32>
    %cst_41 = arith.constant dense<0.000000e+00> : vector<8xf32>
    %66 = vector.multi_reduction <add>, %65, %cst_41 [1] : vector<8x8xf32> to vector<8xf32>
    %67 = vector.shape_cast %66 : vector<8xf32> to vector<8x1xf32>
    %68 = tpu.reciprocal %67 {approx = true} : vector<8x1xf32> -> vector<8x1xf32>
    %69 = vector.broadcast %68 : vector<8x1xf32> to vector<8x8xf32>
    %70 = arith.mulf %65, %69 : vector<8x8xf32>
    %71 = arith.truncf %70 : vector<8x8xf32> to vector<8x8xbf16>
    %cst_42 = arith.constant dense<0.000000e+00> : vector<8x8xf32>
    %72 = tpu.matmul %71, %57, %cst_42 {dimension_numbers = #tpu.dot_dimension_numbers<[1], [0], [0], [1], [0, 0, 1, 1], [], []>} : vector<8x8xbf16>, vector<8x8xbf16>, vector<8x8xf32> -> vector<8x8xf32>
    %73 = arith.truncf %72 : vector<8x8xf32> to vector<8x8xbf16>
    %c0_43 = arith.constant 0 : index
    %c8 = arith.constant 8 : index
    %74 = vector.load %arg52[%c0_43, %c8] : memref<8x32xbf16, #tpu.memory_space<vmem>>, vector<8x8xbf16>
    tpu.vector_store %arg52[%c0_43, %c8], %73 {strides = array<i32>} : memref<8x32xbf16, #tpu.memory_space<vmem>>, vector<8x8xbf16>,
    %75 = vector.extract_strided_slice %20 {offsets = [0, 16], sizes = [8, 8], strides = [1, 1]} : vector<8x32xbf16> to vector<8x8xbf16>
    %76 = vector.extract_strided_slice %27 {offsets = [0, 16], sizes = [8, 8], strides = [1, 1]} : vector<8x32xbf16> to vector<8x8xbf16>
    %77 = vector.extract_strided_slice %34 {offsets = [0, 16], sizes = [8, 8], strides = [1, 1]} : vector<8x32xbf16> to vector<8x8xbf16>
    %cst_44 = arith.constant dense<0.000000e+00> : vector<8x8xf32>
    %78 = tpu.matmul %75, %76, %cst_44 {dimension_numbers = #tpu.dot_dimension_numbers<[1], [1], [0], [0], [0, 0, 1, 0], [], []>} : vector<8x8xbf16>, vector<8x8xbf16>, vector<8x8xf32> -> vector<8x8xf32>
    %cst_45 = arith.constant 0.353553385 : f32
    %79 = vector.broadcast %cst_45 : f32 to vector<8x8xf32>
    %80 = arith.mulf %78, %79 : vector<8x8xf32>
    %cst_46 = arith.constant dense<0xFF800000> : vector<8xf32>
    %81 = vector.multi_reduction <maximumf>, %80, %cst_46 [1] : vector<8x8xf32> to vector<8xf32>
    %82 = vector.shape_cast %81 : vector<8xf32> to vector<8x1xf32>
    %83 = vector.broadcast %82 : vector<8x1xf32> to vector<8x8xf32>
    %84 = arith.subf %80, %83 : vector<8x8xf32>
    %85 = math.exp %84 : vector<8x8xf32>
    %cst_47 = arith.constant dense<0.000000e+00> : vector<8xf32>
    %86 = vector.multi_reduction <add>, %85, %cst_47 [1] : vector<8x8xf32> to vector<8xf32>
    %87 = vector.shape_cast %86 : vector<8xf32> to vector<8x1xf32>
    %88 = tpu.reciprocal %87 {approx = true} : vector<8x1xf32> -> vector<8x1xf32>
    %89 = vector.broadcast %88 : vector<8x1xf32> to vector<8x8xf32>
    %90 = arith.mulf %85, %89 : vector<8x8xf32>
    %91 = arith.truncf %90 : vector<8x8xf32> to vector<8x8xbf16>
    %cst_48 = arith.constant dense<0.000000e+00> : vector<8x8xf32>
    %92 = tpu.matmul %91, %77, %cst_48 {dimension_numbers = #tpu.dot_dimension_numbers<[1], [0], [0], [1], [0, 0, 1, 1], [], []>} : vector<8x8xbf16>, vector<8x8xbf16>, vector<8x8xf32> -> vector<8x8xf32>
    %93 = arith.truncf %92 : vector<8x8xf32> to vector<8x8xbf16>
    %c0_49 = arith.constant 0 : index
    %c16 = arith.constant 16 : index
    %94 = vector.load %arg52[%c0_49, %c16] : memref<8x32xbf16, #tpu.memory_space<vmem>>, vector<8x8xbf16>
    tpu.vector_store %arg52[%c0_49, %c16], %93 {strides = array<i32>} : memref<8x32xbf16, #tpu.memory_space<vmem>>, vector<8x8xbf16>,
    %95 = vector.extract_strided_slice %20 {offsets = [0, 24], sizes = [8, 8], strides = [1, 1]} : vector<8x32xbf16> to vector<8x8xbf16>
    %96 = vector.extract_strided_slice %27 {offsets = [0, 24], sizes = [8, 8], strides = [1, 1]} : vector<8x32xbf16> to vector<8x8xbf16>
    %97 = vector.extract_strided_slice %34 {offsets = [0, 24], sizes = [8, 8], strides = [1, 1]} : vector<8x32xbf16> to vector<8x8xbf16>
    %cst_50 = arith.constant dense<0.000000e+00> : vector<8x8xf32>
    %98 = tpu.matmul %95, %96, %cst_50 {dimension_numbers = #tpu.dot_dimension_numbers<[1], [1], [0], [0], [0, 0, 1, 0], [], []>} : vector<8x8xbf16>, vector<8x8xbf16>, vector<8x8xf32> -> vector<8x8xf32>
    %cst_51 = arith.constant 0.353553385 : f32
    %99 = vector.broadcast %cst_51 : f32 to vector<8x8xf32>
    %100 = arith.mulf %98, %99 : vector<8x8xf32>
    %cst_52 = arith.constant dense<0xFF800000> : vector<8xf32>
    %101 = vector.multi_reduction <maximumf>, %100, %cst_52 [1] : vector<8x8xf32> to vector<8xf32>
    %102 = vector.shape_cast %101 : vector<8xf32> to vector<8x1xf32>
    %103 = vector.broadcast %102 : vector<8x1xf32> to vector<8x8xf32>
    %104 = arith.subf %100, %103 : vector<8x8xf32>
    %105 = math.exp %104 : vector<8x8xf32>
    %cst_53 = arith.constant dense<0.000000e+00> : vector<8xf32>
    %106 = vector.multi_reduction <add>, %105, %cst_53 [1] : vector<8x8xf32> to vector<8xf32>
    %107 = vector.shape_cast %106 : vector<8xf32> to vector<8x1xf32>
    %108 = tpu.reciprocal %107 {approx = true} : vector<8x1xf32> -> vector<8x1xf32>
    %109 = vector.broadcast %108 : vector<8x1xf32> to vector<8x8xf32>
    %110 = arith.mulf %105, %109 : vector<8x8xf32>
    %111 = arith.truncf %110 : vector<8x8xf32> to vector<8x8xbf16>
    %cst_54 = arith.constant dense<0.000000e+00> : vector<8x8xf32>
    %112 = tpu.matmul %111, %97, %cst_54 {dimension_numbers = #tpu.dot_dimension_numbers<[1], [0], [0], [1], [0, 0, 1, 1], [], []>} : vector<8x8xbf16>, vector<8x8xbf16>, vector<8x8xf32> -> vector<8x8xf32>
    %113 = arith.truncf %112 : vector<8x8xf32> to vector<8x8xbf16>
    %c0_55 = arith.constant 0 : index
    %c24 = arith.constant 24 : index
    %114 = vector.load %arg52[%c0_55, %c24] : memref<8x32xbf16, #tpu.memory_space<vmem>>, vector<8x8xbf16>
    tpu.vector_store %arg52[%c0_55, %c24], %113 {strides = array<i32>} : memref<8x32xbf16, #tpu.memory_space<vmem>>, vector<8x8xbf16>,
    %c0_56 = arith.constant 0 : index
    %c0_57 = arith.constant 0 : index
    %115 = vector.load %arg52[%c0_56, %c0_57] : memref<8x32xbf16, #tpu.memory_space<vmem>>, vector<8x32xbf16>
    %cst_58 = arith.constant dense<0.000000e+00> : vector<8x32xf32>
    %116 = tpu.matmul %115, %13, %cst_58 {dimension_numbers = #tpu.dot_dimension_numbers<[1], [0], [0], [1], [0, 0, 1, 1], [], []>} : vector<8x32xbf16>, vector<32x32xbf16>, vector<8x32xf32> -> vector<8x32xf32>
    %c0_59 = arith.constant 0 : index
    %c0_60 = arith.constant 0 : index
    %c0_61 = arith.constant 0 : index
    %117 = vector.load %arg35[%c0_59, %c0_60, %c0_61] : memref<2x1x32xf32, #tpu.memory_space<vmem>>, vector<1x1x32xf32>
    %118 = vector.shape_cast %117 : vector<1x1x32xf32> to vector<1x32xf32>
    %119 = vector.broadcast %118 : vector<1x32xf32> to vector<8x32xf32>
    %120 = arith.addf %116, %119 : vector<8x32xf32>
    %c0_62 = arith.constant 0 : index
    %c0_63 = arith.constant 0 : index
    %c0_64 = arith.constant 0 : index
    %121 = vector.load %arg25[%c0_62, %c0_63, %c0_64] : memref<2x1x32xf32, #tpu.memory_space<vmem>>, vector<1x1x32xf32>
    %122 = vector.shape_cast %121 : vector<1x1x32xf32> to vector<1x32xf32>
    %c0_65 = arith.constant 0 : index
    %c0_66 = arith.constant 0 : index
    %c0_67 = arith.constant 0 : index
    %123 = vector.load %arg24[%c0_65, %c0_66, %c0_67] : memref<2x1x32xf32, #tpu.memory_space<vmem>>, vector<1x1x32xf32>
    %124 = vector.shape_cast %123 : vector<1x1x32xf32> to vector<1x32xf32>
    %cst_68 = arith.constant dense<0.000000e+00> : vector<8xf32>
    %125 = vector.multi_reduction <add>, %120, %cst_68 [1] : vector<8x32xf32> to vector<8xf32>
    %126 = vector.shape_cast %125 : vector<8xf32> to vector<8x1xf32>
    %cst_69 = arith.constant 3.200000e+01 : f32
    %127 = vector.broadcast %cst_69 : f32 to vector<8x1xf32>
    %128 = arith.divf %126, %127 : vector<8x1xf32>
    %129 = vector.broadcast %128 : vector<8x1xf32> to vector<8x32xf32>
    %130 = arith.subf %120, %129 : vector<8x32xf32>
    %131 = arith.mulf %130, %130 : vector<8x32xf32>
    %cst_70 = arith.constant dense<0.000000e+00> : vector<8xf32>
    %132 = vector.multi_reduction <add>, %131, %cst_70 [1] : vector<8x32xf32> to vector<8xf32>
    %133 = vector.shape_cast %132 : vector<8xf32> to vector<8x1xf32>
    %cst_71 = arith.constant 3.200000e+01 : f32
    %134 = vector.broadcast %cst_71 : f32 to vector<8x1xf32>
    %135 = arith.divf %133, %134 : vector<8x1xf32>
    %136 = vector.broadcast %128 : vector<8x1xf32> to vector<8x32xf32>
    %137 = arith.subf %120, %136 : vector<8x32xf32>
    %cst_72 = arith.constant 9.99999974E-6 : f32
    %138 = vector.broadcast %cst_72 : f32 to vector<8x1xf32>
    %139 = arith.addf %135, %138 : vector<8x1xf32>
    %140 = math.rsqrt %139 : vector<8x1xf32>
    %141 = vector.broadcast %140 : vector<8x1xf32> to vector<8x32xf32>
    %142 = arith.mulf %137, %141 : vector<8x32xf32>
    %143 = vector.broadcast %122 : vector<1x32xf32> to vector<8x32xf32>
    %144 = arith.mulf %142, %143 : vector<8x32xf32>
    %145 = vector.broadcast %124 : vector<1x32xf32> to vector<8x32xf32>
    %146 = arith.addf %144, %145 : vector<8x32xf32>
    %147 = arith.addf %146, %1 : vector<8x32xf32>
    %148 = arith.addf %5, %3 : vector<64x32xf32>
    %c0_73 = arith.constant 0 : index
    %c0_74 = arith.constant 0 : index
    %c0_75 = arith.constant 0 : index
    %149 = vector.load %arg48[%c0_73, %c0_74, %c0_75] : memref<2x32x16xbf16, #tpu.memory_space<vmem>>, vector<1x32x16xbf16>
    %150 = vector.shape_cast %149 : vector<1x32x16xbf16> to vector<32x16xbf16>
    %c0_76 = arith.constant 0 : index
    %c0_77 = arith.constant 0 : index
    %c0_78 = arith.constant 0 : index
    %151 = vector.load %arg46[%c0_76, %c0_77, %c0_78] : memref<2x32x16xbf16, #tpu.memory_space<vmem>>, vector<1x32x16xbf16>
    %152 = vector.shape_cast %151 : vector<1x32x16xbf16> to vector<32x16xbf16>
    %c0_79 = arith.constant 0 : index
    %c0_80 = arith.constant 0 : index
    %c0_81 = arith.constant 0 : index
    %153 = vector.load %arg49[%c0_79, %c0_80, %c0_81] : memref<2x32x16xbf16, #tpu.memory_space<vmem>>, vector<1x32x16xbf16>
    %154 = vector.shape_cast %153 : vector<1x32x16xbf16> to vector<32x16xbf16>
    %c0_82 = arith.constant 0 : index
    %c0_83 = arith.constant 0 : index
    %c0_84 = arith.constant 0 : index
    %155 = vector.load %arg47[%c0_82, %c0_83, %c0_84] : memref<2x16x32xbf16, #tpu.memory_space<vmem>>, vector<1x16x32xbf16>
    %156 = vector.shape_cast %155 : vector<1x16x32xbf16> to vector<16x32xbf16>
    %157 = arith.truncf %147 : vector<8x32xf32> to vector<8x32xbf16>
    %cst_85 = arith.constant dense<0.000000e+00> : vector<8x16xf32>
    %158 = tpu.matmul %157, %150, %cst_85 {dimension_numbers = #tpu.dot_dimension_numbers<[1], [0], [0], [1], [0, 0, 1, 1], [], []>} : vector<8x32xbf16>, vector<32x16xbf16>, vector<8x16xf32> -> vector<8x16xf32>
    %c0_86 = arith.constant 0 : index
    %c0_87 = arith.constant 0 : index
    %c0_88 = arith.constant 0 : index
    %159 = vector.load %arg44[%c0_86, %c0_87, %c0_88] : memref<2x1x16xf32, #tpu.memory_space<vmem>>, vector<1x1x16xf32>
    %160 = vector.shape_cast %159 : vector<1x1x16xf32> to vector<1x16xf32>
    %161 = vector.broadcast %160 : vector<1x16xf32> to vector<8x16xf32>
    %162 = arith.addf %158, %161 : vector<8x16xf32>
    %163 = arith.truncf %162 : vector<8x16xf32> to vector<8x16xbf16>
    %164 = arith.truncf %148 : vector<64x32xf32> to vector<64x32xbf16>
    %cst_89 = arith.constant dense<0.000000e+00> : vector<64x16xf32>
    %165 = tpu.matmul %164, %152, %cst_89 {dimension_numbers = #tpu.dot_dimension_numbers<[1], [0], [0], [1], [0, 0, 1, 1], [], []>} : vector<64x32xbf16>, vector<32x16xbf16>, vector<64x16xf32> -> vector<64x16xf32>
    %c0_90 = arith.constant 0 : index
    %c0_91 = arith.constant 0 : index
    %c0_92 = arith.constant 0 : index
    %166 = vector.load %arg42[%c0_90, %c0_91, %c0_92] : memref<2x1x16xf32, #tpu.memory_space<vmem>>, vector<1x1x16xf32>
    %167 = vector.shape_cast %166 : vector<1x1x16xf32> to vector<1x16xf32>
    %168 = vector.broadcast %167 : vector<1x16xf32> to vector<64x16xf32>
    %169 = arith.addf %165, %168 : vector<64x16xf32>
    %170 = arith.truncf %169 : vector<64x16xf32> to vector<64x16xbf16>
    %171 = arith.truncf %5 : vector<64x32xf32> to vector<64x32xbf16>
    %cst_93 = arith.constant dense<0.000000e+00> : vector<64x16xf32>
    %172 = tpu.matmul %171, %154, %cst_93 {dimension_numbers = #tpu.dot_dimension_numbers<[1], [0], [0], [1], [0, 0, 1, 1], [], []>} : vector<64x32xbf16>, vector<32x16xbf16>, vector<64x16xf32> -> vector<64x16xf32>
    %c0_94 = arith.constant 0 : index
    %c0_95 = arith.constant 0 : index
    %c0_96 = arith.constant 0 : index
    %173 = vector.load %arg45[%c0_94, %c0_95, %c0_96] : memref<2x1x16xf32, #tpu.memory_space<vmem>>, vector<1x1x16xf32>
    %174 = vector.shape_cast %173 : vector<1x1x16xf32> to vector<1x16xf32>
    %175 = vector.broadcast %174 : vector<1x16xf32> to vector<64x16xf32>
    %176 = arith.addf %172, %175 : vector<64x16xf32>
    %177 = arith.truncf %176 : vector<64x16xf32> to vector<64x16xbf16>
    %178 = vector.extract_strided_slice %163 {offsets = [0, 0], sizes = [8, 4], strides = [1, 1]} : vector<8x16xbf16> to vector<8x4xbf16>
    %179 = vector.extract_strided_slice %170 {offsets = [0, 0], sizes = [64, 4], strides = [1, 1]} : vector<64x16xbf16> to vector<64x4xbf16>
    %180 = vector.extract_strided_slice %177 {offsets = [0, 0], sizes = [64, 4], strides = [1, 1]} : vector<64x16xbf16> to vector<64x4xbf16>
    %cst_97 = arith.constant dense<0.000000e+00> : vector<8x64xf32>
    %181 = tpu.matmul %178, %179, %cst_97 {dimension_numbers = #tpu.dot_dimension_numbers<[1], [1], [0], [0], [0, 0, 1, 0], [], []>} : vector<8x4xbf16>, vector<64x4xbf16>, vector<8x64xf32> -> vector<8x64xf32>
    %cst_98 = arith.constant 5.000000e-01 : f32
    %182 = vector.broadcast %cst_98 : f32 to vector<8x64xf32>
    %183 = arith.mulf %181, %182 : vector<8x64xf32>
    %cst_99 = arith.constant dense<0xFF800000> : vector<8xf32>
    %184 = vector.multi_reduction <maximumf>, %183, %cst_99 [1] : vector<8x64xf32> to vector<8xf32>
    %185 = vector.shape_cast %184 : vector<8xf32> to vector<8x1xf32>
    %186 = vector.broadcast %185 : vector<8x1xf32> to vector<8x64xf32>
    %187 = arith.subf %183, %186 : vector<8x64xf32>
    %188 = math.exp %187 : vector<8x64xf32>
    %cst_100 = arith.constant dense<0.000000e+00> : vector<8xf32>
    %189 = vector.multi_reduction <add>, %188, %cst_100 [1] : vector<8x64xf32> to vector<8xf32>
    %190 = vector.shape_cast %189 : vector<8xf32> to vector<8x1xf32>
    %191 = tpu.reciprocal %190 {approx = true} : vector<8x1xf32> -> vector<8x1xf32>
    %192 = vector.broadcast %191 : vector<8x1xf32> to vector<8x64xf32>
    %193 = arith.mulf %188, %192 : vector<8x64xf32>
    %194 = arith.truncf %193 : vector<8x64xf32> to vector<8x64xbf16>
    %cst_101 = arith.constant dense<0.000000e+00> : vector<8x4xf32>
    %195 = tpu.matmul %194, %180, %cst_101 {dimension_numbers = #tpu.dot_dimension_numbers<[1], [0], [0], [1], [0, 0, 1, 1], [], []>} : vector<8x64xbf16>, vector<64x4xbf16>, vector<8x4xf32> -> vector<8x4xf32>
    %196 = arith.truncf %195 : vector<8x4xf32> to vector<8x4xbf16>
    %c0_102 = arith.constant 0 : index
    %c0_103 = arith.constant 0 : index
    %197 = vector.load %arg52[%c0_102, %c0_103] : memref<8x32xbf16, #tpu.memory_space<vmem>>, vector<8x4xbf16>
    tpu.vector_store %arg52[%c0_102, %c0_103], %196 {strides = array<i32>} : memref<8x32xbf16, #tpu.memory_space<vmem>>, vector<8x4xbf16>,
    %198 = vector.extract_strided_slice %163 {offsets = [0, 4], sizes = [8, 4], strides = [1, 1]} : vector<8x16xbf16> to vector<8x4xbf16>
    %199 = vector.extract_strided_slice %170 {offsets = [0, 4], sizes = [64, 4], strides = [1, 1]} : vector<64x16xbf16> to vector<64x4xbf16>
    %200 = vector.extract_strided_slice %177 {offsets = [0, 4], sizes = [64, 4], strides = [1, 1]} : vector<64x16xbf16> to vector<64x4xbf16>
    %cst_104 = arith.constant dense<0.000000e+00> : vector<8x64xf32>
    %201 = tpu.matmul %198, %199, %cst_104 {dimension_numbers = #tpu.dot_dimension_numbers<[1], [1], [0], [0], [0, 0, 1, 0], [], []>} : vector<8x4xbf16>, vector<64x4xbf16>, vector<8x64xf32> -> vector<8x64xf32>
    %cst_105 = arith.constant 5.000000e-01 : f32
    %202 = vector.broadcast %cst_105 : f32 to vector<8x64xf32>
    %203 = arith.mulf %201, %202 : vector<8x64xf32>
    %cst_106 = arith.constant dense<0xFF800000> : vector<8xf32>
    %204 = vector.multi_reduction <maximumf>, %203, %cst_106 [1] : vector<8x64xf32> to vector<8xf32>
    %205 = vector.shape_cast %204 : vector<8xf32> to vector<8x1xf32>
    %206 = vector.broadcast %205 : vector<8x1xf32> to vector<8x64xf32>
    %207 = arith.subf %203, %206 : vector<8x64xf32>
    %208 = math.exp %207 : vector<8x64xf32>
    %cst_107 = arith.constant dense<0.000000e+00> : vector<8xf32>
    %209 = vector.multi_reduction <add>, %208, %cst_107 [1] : vector<8x64xf32> to vector<8xf32>
    %210 = vector.shape_cast %209 : vector<8xf32> to vector<8x1xf32>
    %211 = tpu.reciprocal %210 {approx = true} : vector<8x1xf32> -> vector<8x1xf32>
    %212 = vector.broadcast %211 : vector<8x1xf32> to vector<8x64xf32>
    %213 = arith.mulf %208, %212 : vector<8x64xf32>
    %214 = arith.truncf %213 : vector<8x64xf32> to vector<8x64xbf16>
    %cst_108 = arith.constant dense<0.000000e+00> : vector<8x4xf32>
    %215 = tpu.matmul %214, %200, %cst_108 {dimension_numbers = #tpu.dot_dimension_numbers<[1], [0], [0], [1], [0, 0, 1, 1], [], []>} : vector<8x64xbf16>, vector<64x4xbf16>, vector<8x4xf32> -> vector<8x4xf32>
    %216 = arith.truncf %215 : vector<8x4xf32> to vector<8x4xbf16>
    %c0_109 = arith.constant 0 : index
    %c4 = arith.constant 4 : index
    %217 = vector.load %arg52[%c0_109, %c4] : memref<8x32xbf16, #tpu.memory_space<vmem>>, vector<8x4xbf16>
    tpu.vector_store %arg52[%c0_109, %c4], %216 {strides = array<i32>} : memref<8x32xbf16, #tpu.memory_space<vmem>>, vector<8x4xbf16>,
    %218 = vector.extract_strided_slice %163 {offsets = [0, 8], sizes = [8, 4], strides = [1, 1]} : vector<8x16xbf16> to vector<8x4xbf16>
    %219 = vector.extract_strided_slice %170 {offsets = [0, 8], sizes = [64, 4], strides = [1, 1]} : vector<64x16xbf16> to vector<64x4xbf16>
    %220 = vector.extract_strided_slice %177 {offsets = [0, 8], sizes = [64, 4], strides = [1, 1]} : vector<64x16xbf16> to vector<64x4xbf16>
    %cst_110 = arith.constant dense<0.000000e+00> : vector<8x64xf32>
    %221 = tpu.matmul %218, %219, %cst_110 {dimension_numbers = #tpu.dot_dimension_numbers<[1], [1], [0], [0], [0, 0, 1, 0], [], []>} : vector<8x4xbf16>, vector<64x4xbf16>, vector<8x64xf32> -> vector<8x64xf32>
    %cst_111 = arith.constant 5.000000e-01 : f32
    %222 = vector.broadcast %cst_111 : f32 to vector<8x64xf32>
    %223 = arith.mulf %221, %222 : vector<8x64xf32>
    %cst_112 = arith.constant dense<0xFF800000> : vector<8xf32>
    %224 = vector.multi_reduction <maximumf>, %223, %cst_112 [1] : vector<8x64xf32> to vector<8xf32>
    %225 = vector.shape_cast %224 : vector<8xf32> to vector<8x1xf32>
    %226 = vector.broadcast %225 : vector<8x1xf32> to vector<8x64xf32>
    %227 = arith.subf %223, %226 : vector<8x64xf32>
    %228 = math.exp %227 : vector<8x64xf32>
    %cst_113 = arith.constant dense<0.000000e+00> : vector<8xf32>
    %229 = vector.multi_reduction <add>, %228, %cst_113 [1] : vector<8x64xf32> to vector<8xf32>
    %230 = vector.shape_cast %229 : vector<8xf32> to vector<8x1xf32>
    %231 = tpu.reciprocal %230 {approx = true} : vector<8x1xf32> -> vector<8x1xf32>
    %232 = vector.broadcast %231 : vector<8x1xf32> to vector<8x64xf32>
    %233 = arith.mulf %228, %232 : vector<8x64xf32>
    %234 = arith.truncf %233 : vector<8x64xf32> to vector<8x64xbf16>
    %cst_114 = arith.constant dense<0.000000e+00> : vector<8x4xf32>
    %235 = tpu.matmul %234, %220, %cst_114 {dimension_numbers = #tpu.dot_dimension_numbers<[1], [0], [0], [1], [0, 0, 1, 1], [], []>} : vector<8x64xbf16>, vector<64x4xbf16>, vector<8x4xf32> -> vector<8x4xf32>
    %236 = arith.truncf %235 : vector<8x4xf32> to vector<8x4xbf16>
    %c0_115 = arith.constant 0 : index
    %c8_116 = arith.constant 8 : index
    %237 = vector.load %arg52[%c0_115, %c8_116] : memref<8x32xbf16, #tpu.memory_space<vmem>>, vector<8x4xbf16>
    tpu.vector_store %arg52[%c0_115, %c8_116], %236 {strides = array<i32>} : memref<8x32xbf16, #tpu.memory_space<vmem>>, vector<8x4xbf16>,
    %238 = vector.extract_strided_slice %163 {offsets = [0, 12], sizes = [8, 4], strides = [1, 1]} : vector<8x16xbf16> to vector<8x4xbf16>
    %239 = vector.extract_strided_slice %170 {offsets = [0, 12], sizes = [64, 4], strides = [1, 1]} : vector<64x16xbf16> to vector<64x4xbf16>
    %240 = vector.extract_strided_slice %177 {offsets = [0, 12], sizes = [64, 4], strides = [1, 1]} : vector<64x16xbf16> to vector<64x4xbf16>
    %cst_117 = arith.constant dense<0.000000e+00> : vector<8x64xf32>
    %241 = tpu.matmul %238, %239, %cst_117 {dimension_numbers = #tpu.dot_dimension_numbers<[1], [1], [0], [0], [0, 0, 1, 0], [], []>} : vector<8x4xbf16>, vector<64x4xbf16>, vector<8x64xf32> -> vector<8x64xf32>
    %cst_118 = arith.constant 5.000000e-01 : f32
    %242 = vector.broadcast %cst_118 : f32 to vector<8x64xf32>
    %243 = arith.mulf %241, %242 : vector<8x64xf32>
    %cst_119 = arith.constant dense<0xFF800000> : vector<8xf32>
    %244 = vector.multi_reduction <maximumf>, %243, %cst_119 [1] : vector<8x64xf32> to vector<8xf32>
    %245 = vector.shape_cast %244 : vector<8xf32> to vector<8x1xf32>
    %246 = vector.broadcast %245 : vector<8x1xf32> to vector<8x64xf32>
    %247 = arith.subf %243, %246 : vector<8x64xf32>
    %248 = math.exp %247 : vector<8x64xf32>
    %cst_120 = arith.constant dense<0.000000e+00> : vector<8xf32>
    %249 = vector.multi_reduction <add>, %248, %cst_120 [1] : vector<8x64xf32> to vector<8xf32>
    %250 = vector.shape_cast %249 : vector<8xf32> to vector<8x1xf32>
    %251 = tpu.reciprocal %250 {approx = true} : vector<8x1xf32> -> vector<8x1xf32>
    %252 = vector.broadcast %251 : vector<8x1xf32> to vector<8x64xf32>
    %253 = arith.mulf %248, %252 : vector<8x64xf32>
    %254 = arith.truncf %253 : vector<8x64xf32> to vector<8x64xbf16>
    %cst_121 = arith.constant dense<0.000000e+00> : vector<8x4xf32>
    %255 = tpu.matmul %254, %240, %cst_121 {dimension_numbers = #tpu.dot_dimension_numbers<[1], [0], [0], [1], [0, 0, 1, 1], [], []>} : vector<8x64xbf16>, vector<64x4xbf16>, vector<8x4xf32> -> vector<8x4xf32>
    %256 = arith.truncf %255 : vector<8x4xf32> to vector<8x4xbf16>
    %c0_122 = arith.constant 0 : index
    %c12 = arith.constant 12 : index
    %257 = vector.load %arg52[%c0_122, %c12] : memref<8x32xbf16, #tpu.memory_space<vmem>>, vector<8x4xbf16>
    tpu.vector_store %arg52[%c0_122, %c12], %256 {strides = array<i32>} : memref<8x32xbf16, #tpu.memory_space<vmem>>, vector<8x4xbf16>,
    %c0_123 = arith.constant 0 : index
    %c0_124 = arith.constant 0 : index
    %258 = vector.load %arg52[%c0_123, %c0_124] : memref<8x32xbf16, #tpu.memory_space<vmem>>, vector<8x16xbf16>
    %cst_125 = arith.constant dense<0.000000e+00> : vector<8x32xf32>
    %259 = tpu.matmul %258, %156, %cst_125 {dimension_numbers = #tpu.dot_dimension_numbers<[1], [0], [0], [1], [0, 0, 1, 1], [], []>} : vector<8x16xbf16>, vector<16x32xbf16>, vector<8x32xf32> -> vector<8x32xf32>
    %c0_126 = arith.constant 0 : index
    %c0_127 = arith.constant 0 : index
    %c0_128 = arith.constant 0 : index
    %260 = vector.load %arg43[%c0_126, %c0_127, %c0_128] : memref<2x1x32xf32, #tpu.memory_space<vmem>>, vector<1x1x32xf32>
    %261 = vector.shape_cast %260 : vector<1x1x32xf32> to vector<1x32xf32>
    %262 = vector.broadcast %261 : vector<1x32xf32> to vector<8x32xf32>
    %263 = arith.addf %259, %262 : vector<8x32xf32>
    %264 = arith.addf %146, %263 : vector<8x32xf32>
    %c0_129 = arith.constant 0 : index
    %c0_130 = arith.constant 0 : index
    %c0_131 = arith.constant 0 : index
    %265 = vector.load %arg27[%c0_129, %c0_130, %c0_131] : memref<2x1x32xf32, #tpu.memory_space<vmem>>, vector<1x1x32xf32>
    %266 = vector.shape_cast %265 : vector<1x1x32xf32> to vector<1x32xf32>
    %c0_132 = arith.constant 0 : index
    %c0_133 = arith.constant 0 : index
    %c0_134 = arith.constant 0 : index
    %267 = vector.load %arg26[%c0_132, %c0_133, %c0_134] : memref<2x1x32xf32, #tpu.memory_space<vmem>>, vector<1x1x32xf32>
    %268 = vector.shape_cast %267 : vector<1x1x32xf32> to vector<1x32xf32>
    %cst_135 = arith.constant dense<0.000000e+00> : vector<8xf32>
    %269 = vector.multi_reduction <add>, %264, %cst_135 [1] : vector<8x32xf32> to vector<8xf32>
    %270 = vector.shape_cast %269 : vector<8xf32> to vector<8x1xf32>
    %cst_136 = arith.constant 3.200000e+01 : f32
    %271 = vector.broadcast %cst_136 : f32 to vector<8x1xf32>
    %272 = arith.divf %270, %271 : vector<8x1xf32>
    %273 = vector.broadcast %272 : vector<8x1xf32> to vector<8x32xf32>
    %274 = arith.subf %264, %273 : vector<8x32xf32>
    %275 = arith.mulf %274, %274 : vector<8x32xf32>
    %cst_137 = arith.constant dense<0.000000e+00> : vector<8xf32>
    %276 = vector.multi_reduction <add>, %275, %cst_137 [1] : vector<8x32xf32> to vector<8xf32>
    %277 = vector.shape_cast %276 : vector<8xf32> to vector<8x1xf32>
    %cst_138 = arith.constant 3.200000e+01 : f32
    %278 = vector.broadcast %cst_138 : f32 to vector<8x1xf32>
    %279 = arith.divf %277, %278 : vector<8x1xf32>
    %280 = vector.broadcast %272 : vector<8x1xf32> to vector<8x32xf32>
    %281 = arith.subf %264, %280 : vector<8x32xf32>
    %cst_139 = arith.constant 9.99999974E-6 : f32
    %282 = vector.broadcast %cst_139 : f32 to vector<8x1xf32>
    %283 = arith.addf %279, %282 : vector<8x1xf32>
    %284 = math.rsqrt %283 : vector<8x1xf32>
    %285 = vector.broadcast %284 : vector<8x1xf32> to vector<8x32xf32>
    %286 = arith.mulf %281, %285 : vector<8x32xf32>
    %287 = vector.broadcast %266 : vector<1x32xf32> to vector<8x32xf32>
    %288 = arith.mulf %286, %287 : vector<8x32xf32>
    %289 = vector.broadcast %268 : vector<1x32xf32> to vector<8x32xf32>
    %290 = arith.addf %288, %289 : vector<8x32xf32>
    %291 = arith.truncf %290 : vector<8x32xf32> to vector<8x32xbf16>
    %c0_140 = arith.constant 0 : index
    %c0_141 = arith.constant 0 : index
    %c0_142 = arith.constant 0 : index
    %292 = vector.load %arg22[%c0_140, %c0_141, %c0_142] : memref<2x32x64xbf16, #tpu.memory_space<vmem>>, vector<1x32x64xbf16>
    %293 = vector.shape_cast %292 : vector<1x32x64xbf16> to vector<32x64xbf16>
    %cst_143 = arith.constant dense<0.000000e+00> : vector<8x64xf32>
    %294 = tpu.matmul %291, %293, %cst_143 {dimension_numbers = #tpu.dot_dimension_numbers<[1], [0], [0], [1], [0, 0, 1, 1], [], []>} : vector<8x32xbf16>, vector<32x64xbf16>, vector<8x64xf32> -> vector<8x64xf32>
    %c0_144 = arith.constant 0 : index
    %c0_145 = arith.constant 0 : index
    %c0_146 = arith.constant 0 : index
    %295 = vector.load %arg20[%c0_144, %c0_145, %c0_146] : memref<2x1x64xf32, #tpu.memory_space<vmem>>, vector<1x1x64xf32>
    %296 = vector.shape_cast %295 : vector<1x1x64xf32> to vector<1x64xf32>
    %297 = vector.broadcast %296 : vector<1x64xf32> to vector<8x64xf32>
    %298 = arith.addf %294, %297 : vector<8x64xf32>
    %cst_147 = arith.constant 0.000000e+00 : f32
    %299 = vector.broadcast %cst_147 : f32 to vector<8x64xf32>
    %300 = arith.maximumf %298, %299 : vector<8x64xf32>
    %301 = arith.truncf %300 : vector<8x64xf32> to vector<8x64xbf16>
    %c0_148 = arith.constant 0 : index
    %c0_149 = arith.constant 0 : index
    %c0_150 = arith.constant 0 : index
    %302 = vector.load %arg23[%c0_148, %c0_149, %c0_150] : memref<2x64x32xbf16, #tpu.memory_space<vmem>>, vector<1x64x32xbf16>
    %303 = vector.shape_cast %302 : vector<1x64x32xbf16> to vector<64x32xbf16>
    %cst_151 = arith.constant dense<0.000000e+00> : vector<8x32xf32>
    %304 = tpu.matmul %301, %303, %cst_151 {dimension_numbers = #tpu.dot_dimension_numbers<[1], [0], [0], [1], [0, 0, 1, 1], [], []>} : vector<8x64xbf16>, vector<64x32xbf16>, vector<8x32xf32> -> vector<8x32xf32>
    %c0_152 = arith.constant 0 : index
    %c0_153 = arith.constant 0 : index
    %c0_154 = arith.constant 0 : index
    %305 = vector.load %arg21[%c0_152, %c0_153, %c0_154] : memref<2x1x32xf32, #tpu.memory_space<vmem>>, vector<1x1x32xf32>
    %306 = vector.shape_cast %305 : vector<1x1x32xf32> to vector<1x32xf32>
    %307 = vector.broadcast %306 : vector<1x32xf32> to vector<8x32xf32>
    %308 = arith.addf %304, %307 : vector<8x32xf32>
    %309 = arith.addf %290, %308 : vector<8x32xf32>
    %c0_155 = arith.constant 0 : index
    %c0_156 = arith.constant 0 : index
    %c0_157 = arith.constant 0 : index
    %310 = vector.load %arg29[%c0_155, %c0_156, %c0_157] : memref<2x1x32xf32, #tpu.memory_space<vmem>>, vector<1x1x32xf32>
    %311 = vector.shape_cast %310 : vector<1x1x32xf32> to vector<1x32xf32>
    %c0_158 = arith.constant 0 : index
    %c0_159 = arith.constant 0 : index
    %c0_160 = arith.constant 0 : index
    %312 = vector.load %arg28[%c0_158, %c0_159, %c0_160] : memref<2x1x32xf32, #tpu.memory_space<vmem>>, vector<1x1x32xf32>
    %313 = vector.shape_cast %312 : vector<1x1x32xf32> to vector<1x32xf32>
    %cst_161 = arith.constant dense<0.000000e+00> : vector<8xf32>
    %314 = vector.multi_reduction <add>, %309, %cst_161 [1] : vector<8x32xf32> to vector<8xf32>
    %315 = vector.shape_cast %314 : vector<8xf32> to vector<8x1xf32>
    %cst_162 = arith.constant 3.200000e+01 : f32
    %316 = vector.broadcast %cst_162 : f32 to vector<8x1xf32>
    %317 = arith.divf %315, %316 : vector<8x1xf32>
    %318 = vector.broadcast %317 : vector<8x1xf32> to vector<8x32xf32>
    %319 = arith.subf %309, %318 : vector<8x32xf32>
    %320 = arith.mulf %319, %319 : vector<8x32xf32>
    %cst_163 = arith.constant dense<0.000000e+00> : vector<8xf32>
    %321 = vector.multi_reduction <add>, %320, %cst_163 [1] : vector<8x32xf32> to vector<8xf32>
    %322 = vector.shape_cast %321 : vector<8xf32> to vector<8x1xf32>
    %cst_164 = arith.constant 3.200000e+01 : f32
    %323 = vector.broadcast %cst_164 : f32 to vector<8x1xf32>
    %324 = arith.divf %322, %323 : vector<8x1xf32>
    %325 = vector.broadcast %317 : vector<8x1xf32> to vector<8x32xf32>
    %326 = arith.subf %309, %325 : vector<8x32xf32>
    %cst_165 = arith.constant 9.99999974E-6 : f32
    %327 = vector.broadcast %cst_165 : f32 to vector<8x1xf32>
    %328 = arith.addf %324, %327 : vector<8x1xf32>
    %329 = math.rsqrt %328 : vector<8x1xf32>
    %330 = vector.broadcast %329 : vector<8x1xf32> to vector<8x32xf32>
    %331 = arith.mulf %326, %330 : vector<8x32xf32>
    %332 = vector.broadcast %311 : vector<1x32xf32> to vector<8x32xf32>
    %333 = arith.mulf %331, %332 : vector<8x32xf32>
    %334 = vector.broadcast %313 : vector<1x32xf32> to vector<8x32xf32>
    %335 = arith.addf %333, %334 : vector<8x32xf32>
    %336 = arith.addf %335, %1 : vector<8x32xf32>
    %337 = arith.addf %5, %3 : vector<64x32xf32>
    %c0_166 = arith.constant 0 : index
    %c0_167 = arith.constant 0 : index
    %c0_168 = arith.constant 0 : index
    %338 = vector.load %arg18[%c0_166, %c0_167, %c0_168] : memref<2x32x16xbf16, #tpu.memory_space<vmem>>, vector<1x32x16xbf16>
    %339 = vector.shape_cast %338 : vector<1x32x16xbf16> to vector<32x16xbf16>
    %c0_169 = arith.constant 0 : index
    %c0_170 = arith.constant 0 : index
    %c0_171 = arith.constant 0 : index
    %340 = vector.load %arg16[%c0_169, %c0_170, %c0_171] : memref<2x32x16xbf16, #tpu.memory_space<vmem>>, vector<1x32x16xbf16>
    %341 = vector.shape_cast %340 : vector<1x32x16xbf16> to vector<32x16xbf16>
    %c0_172 = arith.constant 0 : index
    %c0_173 = arith.constant 0 : index
    %c0_174 = arith.constant 0 : index
    %342 = vector.load %arg19[%c0_172, %c0_173, %c0_174] : memref<2x32x16xbf16, #tpu.memory_space<vmem>>, vector<1x32x16xbf16>
    %343 = vector.shape_cast %342 : vector<1x32x16xbf16> to vector<32x16xbf16>
    %c0_175 = arith.constant 0 : index
    %c0_176 = arith.constant 0 : index
    %c0_177 = arith.constant 0 : index
    %344 = vector.load %arg17[%c0_175, %c0_176, %c0_177] : memref<2x16x32xbf16, #tpu.memory_space<vmem>>, vector<1x16x32xbf16>
    %345 = vector.shape_cast %344 : vector<1x16x32xbf16> to vector<16x32xbf16>
    %346 = arith.truncf %337 : vector<64x32xf32> to vector<64x32xbf16>
    %cst_178 = arith.constant dense<0.000000e+00> : vector<64x16xf32>
    %347 = tpu.matmul %346, %339, %cst_178 {dimension_numbers = #tpu.dot_dimension_numbers<[1], [0], [0], [1], [0, 0, 1, 1], [], []>} : vector<64x32xbf16>, vector<32x16xbf16>, vector<64x16xf32> -> vector<64x16xf32>
    %c0_179 = arith.constant 0 : index
    %c0_180 = arith.constant 0 : index
    %c0_181 = arith.constant 0 : index
    %348 = vector.load %arg14[%c0_179, %c0_180, %c0_181] : memref<2x1x16xf32, #tpu.memory_space<vmem>>, vector<1x1x16xf32>
    %349 = vector.shape_cast %348 : vector<1x1x16xf32> to vector<1x16xf32>
    %350 = vector.broadcast %349 : vector<1x16xf32> to vector<64x16xf32>
    %351 = arith.addf %347, %350 : vector<64x16xf32>
    %352 = arith.truncf %351 : vector<64x16xf32> to vector<64x16xbf16>
    %353 = arith.truncf %336 : vector<8x32xf32> to vector<8x32xbf16>
    %cst_182 = arith.constant dense<0.000000e+00> : vector<8x16xf32>
    %354 = tpu.matmul %353, %341, %cst_182 {dimension_numbers = #tpu.dot_dimension_numbers<[1], [0], [0], [1], [0, 0, 1, 1], [], []>} : vector<8x32xbf16>, vector<32x16xbf16>, vector<8x16xf32> -> vector<8x16xf32>
    %c0_183 = arith.constant 0 : index
    %c0_184 = arith.constant 0 : index
    %c0_185 = arith.constant 0 : index
    %355 = vector.load %arg12[%c0_183, %c0_184, %c0_185] : memref<2x1x16xf32, #tpu.memory_space<vmem>>, vector<1x1x16xf32>
    %356 = vector.shape_cast %355 : vector<1x1x16xf32> to vector<1x16xf32>
    %357 = vector.broadcast %356 : vector<1x16xf32> to vector<8x16xf32>
    %358 = arith.addf %354, %357 : vector<8x16xf32>
    %359 = arith.truncf %358 : vector<8x16xf32> to vector<8x16xbf16>
    %360 = arith.truncf %335 : vector<8x32xf32> to vector<8x32xbf16>
    %cst_186 = arith.constant dense<0.000000e+00> : vector<8x16xf32>
    %361 = tpu.matmul %360, %343, %cst_186 {dimension_numbers = #tpu.dot_dimension_numbers<[1], [0], [0], [1], [0, 0, 1, 1], [], []>} : vector<8x32xbf16>, vector<32x16xbf16>, vector<8x16xf32> -> vector<8x16xf32>
    %c0_187 = arith.constant 0 : index
    %c0_188 = arith.constant 0 : index
    %c0_189 = arith.constant 0 : index
    %362 = vector.load %arg15[%c0_187, %c0_188, %c0_189] : memref<2x1x16xf32, #tpu.memory_space<vmem>>, vector<1x1x16xf32>
    %363 = vector.shape_cast %362 : vector<1x1x16xf32> to vector<1x16xf32>
    %364 = vector.broadcast %363 : vector<1x16xf32> to vector<8x16xf32>
    %365 = arith.addf %361, %364 : vector<8x16xf32>
    %366 = arith.truncf %365 : vector<8x16xf32> to vector<8x16xbf16>
    %367 = vector.extract_strided_slice %352 {offsets = [0, 0], sizes = [64, 4], strides = [1, 1]} : vector<64x16xbf16> to vector<64x4xbf16>
    %368 = vector.extract_strided_slice %359 {offsets = [0, 0], sizes = [8, 4], strides = [1, 1]} : vector<8x16xbf16> to vector<8x4xbf16>
    %369 = vector.extract_strided_slice %366 {offsets = [0, 0], sizes = [8, 4], strides = [1, 1]} : vector<8x16xbf16> to vector<8x4xbf16>
    %cst_190 = arith.constant dense<0.000000e+00> : vector<64x8xf32>
    %370 = tpu.matmul %367, %368, %cst_190 {dimension_numbers = #tpu.dot_dimension_numbers<[1], [1], [0], [0], [0, 0, 1, 0], [], []>} : vector<64x4xbf16>, vector<8x4xbf16>, vector<64x8xf32> -> vector<64x8xf32>
    %cst_191 = arith.constant 5.000000e-01 : f32
    %371 = vector.broadcast %cst_191 : f32 to vector<64x8xf32>
    %372 = arith.mulf %370, %371 : vector<64x8xf32>
    %cst_192 = arith.constant dense<0xFF800000> : vector<64xf32>
    %373 = vector.multi_reduction <maximumf>, %372, %cst_192 [1] : vector<64x8xf32> to vector<64xf32>
    %374 = vector.shape_cast %373 : vector<64xf32> to vector<64x1xf32>
    %375 = vector.broadcast %374 : vector<64x1xf32> to vector<64x8xf32>
    %376 = arith.subf %372, %375 : vector<64x8xf32>
    %377 = math.exp %376 : vector<64x8xf32>
    %cst_193 = arith.constant dense<0.000000e+00> : vector<64xf32>
    %378 = vector.multi_reduction <add>, %377, %cst_193 [1] : vector<64x8xf32> to vector<64xf32>
    %379 = vector.shape_cast %378 : vector<64xf32> to vector<64x1xf32>
    %380 = tpu.reciprocal %379 {approx = true} : vector<64x1xf32> -> vector<64x1xf32>
    %381 = vector.broadcast %380 : vector<64x1xf32> to vector<64x8xf32>
    %382 = arith.mulf %377, %381 : vector<64x8xf32>
    %383 = arith.truncf %382 : vector<64x8xf32> to vector<64x8xbf16>
    %cst_194 = arith.constant dense<0.000000e+00> : vector<64x4xf32>
    %384 = tpu.matmul %383, %369, %cst_194 {dimension_numbers = #tpu.dot_dimension_numbers<[1], [0], [0], [1], [0, 0, 1, 1], [], []>} : vector<64x8xbf16>, vector<8x4xbf16>, vector<64x4xf32> -> vector<64x4xf32>
    %385 = arith.truncf %384 : vector<64x4xf32> to vector<64x4xbf16>
    %c0_195 = arith.constant 0 : index
    %c0_196 = arith.constant 0 : index
    %386 = vector.load %arg53[%c0_195, %c0_196] : memref<64x32xbf16, #tpu.memory_space<vmem>>, vector<64x4xbf16>
    tpu.vector_store %arg53[%c0_195, %c0_196], %385 {strides = array<i32>} : memref<64x32xbf16, #tpu.memory_space<vmem>>, vector<64x4xbf16>,
    %387 = vector.extract_strided_slice %352 {offsets = [0, 4], sizes = [64, 4], strides = [1, 1]} : vector<64x16xbf16> to vector<64x4xbf16>
    %388 = vector.extract_strided_slice %359 {offsets = [0, 4], sizes = [8, 4], strides = [1, 1]} : vector<8x16xbf16> to vector<8x4xbf16>
    %389 = vector.extract_strided_slice %366 {offsets = [0, 4], sizes = [8, 4], strides = [1, 1]} : vector<8x16xbf16> to vector<8x4xbf16>
    %cst_197 = arith.constant dense<0.000000e+00> : vector<64x8xf32>
    %390 = tpu.matmul %387, %388, %cst_197 {dimension_numbers = #tpu.dot_dimension_numbers<[1], [1], [0], [0], [0, 0, 1, 0], [], []>} : vector<64x4xbf16>, vector<8x4xbf16>, vector<64x8xf32> -> vector<64x8xf32>
    %cst_198 = arith.constant 5.000000e-01 : f32
    %391 = vector.broadcast %cst_198 : f32 to vector<64x8xf32>
    %392 = arith.mulf %390, %391 : vector<64x8xf32>
    %cst_199 = arith.constant dense<0xFF800000> : vector<64xf32>
    %393 = vector.multi_reduction <maximumf>, %392, %cst_199 [1] : vector<64x8xf32> to vector<64xf32>
    %394 = vector.shape_cast %393 : vector<64xf32> to vector<64x1xf32>
    %395 = vector.broadcast %394 : vector<64x1xf32> to vector<64x8xf32>
    %396 = arith.subf %392, %395 : vector<64x8xf32>
    %397 = math.exp %396 : vector<64x8xf32>
    %cst_200 = arith.constant dense<0.000000e+00> : vector<64xf32>
    %398 = vector.multi_reduction <add>, %397, %cst_200 [1] : vector<64x8xf32> to vector<64xf32>
    %399 = vector.shape_cast %398 : vector<64xf32> to vector<64x1xf32>
    %400 = tpu.reciprocal %399 {approx = true} : vector<64x1xf32> -> vector<64x1xf32>
    %401 = vector.broadcast %400 : vector<64x1xf32> to vector<64x8xf32>
    %402 = arith.mulf %397, %401 : vector<64x8xf32>
    %403 = arith.truncf %402 : vector<64x8xf32> to vector<64x8xbf16>
    %cst_201 = arith.constant dense<0.000000e+00> : vector<64x4xf32>
    %404 = tpu.matmul %403, %389, %cst_201 {dimension_numbers = #tpu.dot_dimension_numbers<[1], [0], [0], [1], [0, 0, 1, 1], [], []>} : vector<64x8xbf16>, vector<8x4xbf16>, vector<64x4xf32> -> vector<64x4xf32>
    %405 = arith.truncf %404 : vector<64x4xf32> to vector<64x4xbf16>
    %c0_202 = arith.constant 0 : index
    %c4_203 = arith.constant 4 : index
    %406 = vector.load %arg53[%c0_202, %c4_203] : memref<64x32xbf16, #tpu.memory_space<vmem>>, vector<64x4xbf16>
    tpu.vector_store %arg53[%c0_202, %c4_203], %405 {strides = array<i32>} : memref<64x32xbf16, #tpu.memory_space<vmem>>, vector<64x4xbf16>,
    %407 = vector.extract_strided_slice %352 {offsets = [0, 8], sizes = [64, 4], strides = [1, 1]} : vector<64x16xbf16> to vector<64x4xbf16>
    %408 = vector.extract_strided_slice %359 {offsets = [0, 8], sizes = [8, 4], strides = [1, 1]} : vector<8x16xbf16> to vector<8x4xbf16>
    %409 = vector.extract_strided_slice %366 {offsets = [0, 8], sizes = [8, 4], strides = [1, 1]} : vector<8x16xbf16> to vector<8x4xbf16>
    %cst_204 = arith.constant dense<0.000000e+00> : vector<64x8xf32>
    %410 = tpu.matmul %407, %408, %cst_204 {dimension_numbers = #tpu.dot_dimension_numbers<[1], [1], [0], [0], [0, 0, 1, 0], [], []>} : vector<64x4xbf16>, vector<8x4xbf16>, vector<64x8xf32> -> vector<64x8xf32>
    %cst_205 = arith.constant 5.000000e-01 : f32
    %411 = vector.broadcast %cst_205 : f32 to vector<64x8xf32>
    %412 = arith.mulf %410, %411 : vector<64x8xf32>
    %cst_206 = arith.constant dense<0xFF800000> : vector<64xf32>
    %413 = vector.multi_reduction <maximumf>, %412, %cst_206 [1] : vector<64x8xf32> to vector<64xf32>
    %414 = vector.shape_cast %413 : vector<64xf32> to vector<64x1xf32>
    %415 = vector.broadcast %414 : vector<64x1xf32> to vector<64x8xf32>
    %416 = arith.subf %412, %415 : vector<64x8xf32>
    %417 = math.exp %416 : vector<64x8xf32>
    %cst_207 = arith.constant dense<0.000000e+00> : vector<64xf32>
    %418 = vector.multi_reduction <add>, %417, %cst_207 [1] : vector<64x8xf32> to vector<64xf32>
    %419 = vector.shape_cast %418 : vector<64xf32> to vector<64x1xf32>
    %420 = tpu.reciprocal %419 {approx = true} : vector<64x1xf32> -> vector<64x1xf32>
    %421 = vector.broadcast %420 : vector<64x1xf32> to vector<64x8xf32>
    %422 = arith.mulf %417, %421 : vector<64x8xf32>
    %423 = arith.truncf %422 : vector<64x8xf32> to vector<64x8xbf16>
    %cst_208 = arith.constant dense<0.000000e+00> : vector<64x4xf32>
    %424 = tpu.matmul %423, %409, %cst_208 {dimension_numbers = #tpu.dot_dimension_numbers<[1], [0], [0], [1], [0, 0, 1, 1], [], []>} : vector<64x8xbf16>, vector<8x4xbf16>, vector<64x4xf32> -> vector<64x4xf32>
    %425 = arith.truncf %424 : vector<64x4xf32> to vector<64x4xbf16>
    %c0_209 = arith.constant 0 : index
    %c8_210 = arith.constant 8 : index
    %426 = vector.load %arg53[%c0_209, %c8_210] : memref<64x32xbf16, #tpu.memory_space<vmem>>, vector<64x4xbf16>
    tpu.vector_store %arg53[%c0_209, %c8_210], %425 {strides = array<i32>} : memref<64x32xbf16, #tpu.memory_space<vmem>>, vector<64x4xbf16>,
    %427 = vector.extract_strided_slice %352 {offsets = [0, 12], sizes = [64, 4], strides = [1, 1]} : vector<64x16xbf16> to vector<64x4xbf16>
    %428 = vector.extract_strided_slice %359 {offsets = [0, 12], sizes = [8, 4], strides = [1, 1]} : vector<8x16xbf16> to vector<8x4xbf16>
    %429 = vector.extract_strided_slice %366 {offsets = [0, 12], sizes = [8, 4], strides = [1, 1]} : vector<8x16xbf16> to vector<8x4xbf16>
    %cst_211 = arith.constant dense<0.000000e+00> : vector<64x8xf32>
    %430 = tpu.matmul %427, %428, %cst_211 {dimension_numbers = #tpu.dot_dimension_numbers<[1], [1], [0], [0], [0, 0, 1, 0], [], []>} : vector<64x4xbf16>, vector<8x4xbf16>, vector<64x8xf32> -> vector<64x8xf32>
    %cst_212 = arith.constant 5.000000e-01 : f32
    %431 = vector.broadcast %cst_212 : f32 to vector<64x8xf32>
    %432 = arith.mulf %430, %431 : vector<64x8xf32>
    %cst_213 = arith.constant dense<0xFF800000> : vector<64xf32>
    %433 = vector.multi_reduction <maximumf>, %432, %cst_213 [1] : vector<64x8xf32> to vector<64xf32>
    %434 = vector.shape_cast %433 : vector<64xf32> to vector<64x1xf32>
    %435 = vector.broadcast %434 : vector<64x1xf32> to vector<64x8xf32>
    %436 = arith.subf %432, %435 : vector<64x8xf32>
    %437 = math.exp %436 : vector<64x8xf32>
    %cst_214 = arith.constant dense<0.000000e+00> : vector<64xf32>
    %438 = vector.multi_reduction <add>, %437, %cst_214 [1] : vector<64x8xf32> to vector<64xf32>
    %439 = vector.shape_cast %438 : vector<64xf32> to vector<64x1xf32>
    %440 = tpu.reciprocal %439 {approx = true} : vector<64x1xf32> -> vector<64x1xf32>
    %441 = vector.broadcast %440 : vector<64x1xf32> to vector<64x8xf32>
    %442 = arith.mulf %437, %441 : vector<64x8xf32>
    %443 = arith.truncf %442 : vector<64x8xf32> to vector<64x8xbf16>
    %cst_215 = arith.constant dense<0.000000e+00> : vector<64x4xf32>
    %444 = tpu.matmul %443, %429, %cst_215 {dimension_numbers = #tpu.dot_dimension_numbers<[1], [0], [0], [1], [0, 0, 1, 1], [], []>} : vector<64x8xbf16>, vector<8x4xbf16>, vector<64x4xf32> -> vector<64x4xf32>
    %445 = arith.truncf %444 : vector<64x4xf32> to vector<64x4xbf16>
    %c0_216 = arith.constant 0 : index
    %c12_217 = arith.constant 12 : index
    %446 = vector.load %arg53[%c0_216, %c12_217] : memref<64x32xbf16, #tpu.memory_space<vmem>>, vector<64x4xbf16>
    tpu.vector_store %arg53[%c0_216, %c12_217], %445 {strides = array<i32>} : memref<64x32xbf16, #tpu.memory_space<vmem>>, vector<64x4xbf16>,
    %c0_218 = arith.constant 0 : index
    %c0_219 = arith.constant 0 : index
    %447 = vector.load %arg53[%c0_218, %c0_219] : memref<64x32xbf16, #tpu.memory_space<vmem>>, vector<64x16xbf16>
    %cst_220 = arith.constant dense<0.000000e+00> : vector<64x32xf32>
    %448 = tpu.matmul %447, %345, %cst_220 {dimension_numbers = #tpu.dot_dimension_numbers<[1], [0], [0], [1], [0, 0, 1, 1], [], []>} : vector<64x16xbf16>, vector<16x32xbf16>, vector<64x32xf32> -> vector<64x32xf32>
    %c0_221 = arith.constant 0 : index
    %c0_222 = arith.constant 0 : index
    %c0_223 = arith.constant 0 : index
    %449 = vector.load %arg13[%c0_221, %c0_222, %c0_223] : memref<2x1x32xf32, #tpu.memory_space<vmem>>, vector<1x1x32xf32>
    %450 = vector.shape_cast %449 : vector<1x1x32xf32> to vector<1x32xf32>
    %451 = vector.broadcast %450 : vector<1x32xf32> to vector<64x32xf32>
    %452 = arith.addf %448, %451 : vector<64x32xf32>
    %453 = arith.addf %5, %452 : vector<64x32xf32>
    %c0_224 = arith.constant 0 : index
    %c0_225 = arith.constant 0 : index
    %c0_226 = arith.constant 0 : index
    %454 = vector.load %arg31[%c0_224, %c0_225, %c0_226] : memref<2x1x32xf32, #tpu.memory_space<vmem>>, vector<1x1x32xf32>
    %455 = vector.shape_cast %454 : vector<1x1x32xf32> to vector<1x32xf32>
    %c0_227 = arith.constant 0 : index
    %c0_228 = arith.constant 0 : index
    %c0_229 = arith.constant 0 : index
    %456 = vector.load %arg30[%c0_227, %c0_228, %c0_229] : memref<2x1x32xf32, #tpu.memory_space<vmem>>, vector<1x1x32xf32>
    %457 = vector.shape_cast %456 : vector<1x1x32xf32> to vector<1x32xf32>
    %cst_230 = arith.constant dense<0.000000e+00> : vector<64xf32>
    %458 = vector.multi_reduction <add>, %453, %cst_230 [1] : vector<64x32xf32> to vector<64xf32>
    %459 = vector.shape_cast %458 : vector<64xf32> to vector<64x1xf32>
    %cst_231 = arith.constant 3.200000e+01 : f32
    %460 = vector.broadcast %cst_231 : f32 to vector<64x1xf32>
    %461 = arith.divf %459, %460 : vector<64x1xf32>
    %462 = vector.broadcast %461 : vector<64x1xf32> to vector<64x32xf32>
    %463 = arith.subf %453, %462 : vector<64x32xf32>
    %464 = arith.mulf %463, %463 : vector<64x32xf32>
    %cst_232 = arith.constant dense<0.000000e+00> : vector<64xf32>
    %465 = vector.multi_reduction <add>, %464, %cst_232 [1] : vector<64x32xf32> to vector<64xf32>
    %466 = vector.shape_cast %465 : vector<64xf32> to vector<64x1xf32>
    %cst_233 = arith.constant 3.200000e+01 : f32
    %467 = vector.broadcast %cst_233 : f32 to vector<64x1xf32>
    %468 = arith.divf %466, %467 : vector<64x1xf32>
    %469 = vector.broadcast %461 : vector<64x1xf32> to vector<64x32xf32>
    %470 = arith.subf %453, %469 : vector<64x32xf32>
    %cst_234 = arith.constant 9.99999974E-6 : f32
    %471 = vector.broadcast %cst_234 : f32 to vector<64x1xf32>
    %472 = arith.addf %468, %471 : vector<64x1xf32>
    %473 = math.rsqrt %472 : vector<64x1xf32>
    %474 = vector.broadcast %473 : vector<64x1xf32> to vector<64x32xf32>
    %475 = arith.mulf %470, %474 : vector<64x32xf32>
    %476 = vector.broadcast %455 : vector<1x32xf32> to vector<64x32xf32>
    %477 = arith.mulf %475, %476 : vector<64x32xf32>
    %478 = vector.broadcast %457 : vector<1x32xf32> to vector<64x32xf32>
    %479 = arith.addf %477, %478 : vector<64x32xf32>
    %480 = arith.addf %335, %1 : vector<8x32xf32>
    %c1 = arith.constant 1 : index
    %c0_235 = arith.constant 0 : index
    %c0_236 = arith.constant 0 : index
    %481 = vector.load %arg40[%c1, %c0_235, %c0_236] : memref<2x32x32xbf16, #tpu.memory_space<vmem>>, vector<1x32x32xbf16>
    %482 = vector.shape_cast %481 : vector<1x32x32xbf16> to vector<32x32xbf16>
    %c1_237 = arith.constant 1 : index
    %c0_238 = arith.constant 0 : index
    %c0_239 = arith.constant 0 : index
    %483 = vector.load %arg38[%c1_237, %c0_238, %c0_239] : memref<2x32x32xbf16, #tpu.memory_space<vmem>>, vector<1x32x32xbf16>
    %484 = vector.shape_cast %483 : vector<1x32x32xbf16> to vector<32x32xbf16>
    %c1_240 = arith.constant 1 : index
    %c0_241 = arith.constant 0 : index
    %c0_242 = arith.constant 0 : index
    %485 = vector.load %arg41[%c1_240, %c0_241, %c0_242] : memref<2x32x32xbf16, #tpu.memory_space<vmem>>, vector<1x32x32xbf16>
    %486 = vector.shape_cast %485 : vector<1x32x32xbf16> to vector<32x32xbf16>
    %c1_243 = arith.constant 1 : index
    %c0_244 = arith.constant 0 : index
    %c0_245 = arith.constant 0 : index
    %487 = vector.load %arg39[%c1_243, %c0_244, %c0_245] : memref<2x32x32xbf16, #tpu.memory_space<vmem>>, vector<1x32x32xbf16>
    %488 = vector.shape_cast %487 : vector<1x32x32xbf16> to vector<32x32xbf16>
    %489 = arith.truncf %480 : vector<8x32xf32> to vector<8x32xbf16>
    %cst_246 = arith.constant dense<0.000000e+00> : vector<8x32xf32>
    %490 = tpu.matmul %489, %482, %cst_246 {dimension_numbers = #tpu.dot_dimension_numbers<[1], [0], [0], [1], [0, 0, 1, 1], [], []>} : vector<8x32xbf16>, vector<32x32xbf16>, vector<8x32xf32> -> vector<8x32xf32>
    %c1_247 = arith.constant 1 : index
    %c0_248 = arith.constant 0 : index
    %c0_249 = arith.constant 0 : index
    %491 = vector.load %arg36[%c1_247, %c0_248, %c0_249] : memref<2x1x32xf32, #tpu.memory_space<vmem>>, vector<1x1x32xf32>
    %492 = vector.shape_cast %491 : vector<1x1x32xf32> to vector<1x32xf32>
    %493 = vector.broadcast %492 : vector<1x32xf32> to vector<8x32xf32>
    %494 = arith.addf %490, %493 : vector<8x32xf32>
    %495 = arith.truncf %494 : vector<8x32xf32> to vector<8x32xbf16>
    %496 = arith.truncf %480 : vector<8x32xf32> to vector<8x32xbf16>
    %cst_250 = arith.constant dense<0.000000e+00> : vector<8x32xf32>
    %497 = tpu.matmul %496, %484, %cst_250 {dimension_numbers = #tpu.dot_dimension_numbers<[1], [0], [0], [1], [0, 0, 1, 1], [], []>} : vector<8x32xbf16>, vector<32x32xbf16>, vector<8x32xf32> -> vector<8x32xf32>
    %c1_251 = arith.constant 1 : index
    %c0_252 = arith.constant 0 : index
    %c0_253 = arith.constant 0 : index
    %498 = vector.load %arg34[%c1_251, %c0_252, %c0_253] : memref<2x1x32xf32, #tpu.memory_space<vmem>>, vector<1x1x32xf32>
    %499 = vector.shape_cast %498 : vector<1x1x32xf32> to vector<1x32xf32>
    %500 = vector.broadcast %499 : vector<1x32xf32> to vector<8x32xf32>
    %501 = arith.addf %497, %500 : vector<8x32xf32>
    %502 = arith.truncf %501 : vector<8x32xf32> to vector<8x32xbf16>
    %503 = arith.truncf %335 : vector<8x32xf32> to vector<8x32xbf16>
    %cst_254 = arith.constant dense<0.000000e+00> : vector<8x32xf32>
    %504 = tpu.matmul %503, %486, %cst_254 {dimension_numbers = #tpu.dot_dimension_numbers<[1], [0], [0], [1], [0, 0, 1, 1], [], []>} : vector<8x32xbf16>, vector<32x32xbf16>, vector<8x32xf32> -> vector<8x32xf32>
    %c1_255 = arith.constant 1 : index
    %c0_256 = arith.constant 0 : index
    %c0_257 = arith.constant 0 : index
    %505 = vector.load %arg37[%c1_255, %c0_256, %c0_257] : memref<2x1x32xf32, #tpu.memory_space<vmem>>, vector<1x1x32xf32>
    %506 = vector.shape_cast %505 : vector<1x1x32xf32> to vector<1x32xf32>
    %507 = vector.broadcast %506 : vector<1x32xf32> to vector<8x32xf32>
    %508 = arith.addf %504, %507 : vector<8x32xf32>
    %509 = arith.truncf %508 : vector<8x32xf32> to vector<8x32xbf16>
    %510 = vector.extract_strided_slice %495 {offsets = [0, 0], sizes = [8, 8], strides = [1, 1]} : vector<8x32xbf16> to vector<8x8xbf16>
    %511 = vector.extract_strided_slice %502 {offsets = [0, 0], sizes = [8, 8], strides = [1, 1]} : vector<8x32xbf16> to vector<8x8xbf16>
    %512 = vector.extract_strided_slice %509 {offsets = [0, 0], sizes = [8, 8], strides = [1, 1]} : vector<8x32xbf16> to vector<8x8xbf16>
    %cst_258 = arith.constant dense<0.000000e+00> : vector<8x8xf32>
    %513 = tpu.matmul %510, %511, %cst_258 {dimension_numbers = #tpu.dot_dimension_numbers<[1], [1], [0], [0], [0, 0, 1, 0], [], []>} : vector<8x8xbf16>, vector<8x8xbf16>, vector<8x8xf32> -> vector<8x8xf32>
    %cst_259 = arith.constant 0.353553385 : f32
    %514 = vector.broadcast %cst_259 : f32 to vector<8x8xf32>
    %515 = arith.mulf %513, %514 : vector<8x8xf32>
    %cst_260 = arith.constant dense<0xFF800000> : vector<8xf32>
    %516 = vector.multi_reduction <maximumf>, %515, %cst_260 [1] : vector<8x8xf32> to vector<8xf32>
    %517 = vector.shape_cast %516 : vector<8xf32> to vector<8x1xf32>
    %518 = vector.broadcast %517 : vector<8x1xf32> to vector<8x8xf32>
    %519 = arith.subf %515, %518 : vector<8x8xf32>
    %520 = math.exp %519 : vector<8x8xf32>
    %cst_261 = arith.constant dense<0.000000e+00> : vector<8xf32>
    %521 = vector.multi_reduction <add>, %520, %cst_261 [1] : vector<8x8xf32> to vector<8xf32>
    %522 = vector.shape_cast %521 : vector<8xf32> to vector<8x1xf32>
    %523 = tpu.reciprocal %522 {approx = true} : vector<8x1xf32> -> vector<8x1xf32>
    %524 = vector.broadcast %523 : vector<8x1xf32> to vector<8x8xf32>
    %525 = arith.mulf %520, %524 : vector<8x8xf32>
    %526 = arith.truncf %525 : vector<8x8xf32> to vector<8x8xbf16>
    %cst_262 = arith.constant dense<0.000000e+00> : vector<8x8xf32>
    %527 = tpu.matmul %526, %512, %cst_262 {dimension_numbers = #tpu.dot_dimension_numbers<[1], [0], [0], [1], [0, 0, 1, 1], [], []>} : vector<8x8xbf16>, vector<8x8xbf16>, vector<8x8xf32> -> vector<8x8xf32>
    %528 = arith.truncf %527 : vector<8x8xf32> to vector<8x8xbf16>
    %c0_263 = arith.constant 0 : index
    %c0_264 = arith.constant 0 : index
    %529 = vector.load %arg52[%c0_263, %c0_264] : memref<8x32xbf16, #tpu.memory_space<vmem>>, vector<8x8xbf16>
    tpu.vector_store %arg52[%c0_263, %c0_264], %528 {strides = array<i32>} : memref<8x32xbf16, #tpu.memory_space<vmem>>, vector<8x8xbf16>,
    %530 = vector.extract_strided_slice %495 {offsets = [0, 8], sizes = [8, 8], strides = [1, 1]} : vector<8x32xbf16> to vector<8x8xbf16>
    %531 = vector.extract_strided_slice %502 {offsets = [0, 8], sizes = [8, 8], strides = [1, 1]} : vector<8x32xbf16> to vector<8x8xbf16>
    %532 = vector.extract_strided_slice %509 {offsets = [0, 8], sizes = [8, 8], strides = [1, 1]} : vector<8x32xbf16> to vector<8x8xbf16>
    %cst_265 = arith.constant dense<0.000000e+00> : vector<8x8xf32>
    %533 = tpu.matmul %530, %531, %cst_265 {dimension_numbers = #tpu.dot_dimension_numbers<[1], [1], [0], [0], [0, 0, 1, 0], [], []>} : vector<8x8xbf16>, vector<8x8xbf16>, vector<8x8xf32> -> vector<8x8xf32>
    %cst_266 = arith.constant 0.353553385 : f32
    %534 = vector.broadcast %cst_266 : f32 to vector<8x8xf32>
    %535 = arith.mulf %533, %534 : vector<8x8xf32>
    %cst_267 = arith.constant dense<0xFF800000> : vector<8xf32>
    %536 = vector.multi_reduction <maximumf>, %535, %cst_267 [1] : vector<8x8xf32> to vector<8xf32>
    %537 = vector.shape_cast %536 : vector<8xf32> to vector<8x1xf32>
    %538 = vector.broadcast %537 : vector<8x1xf32> to vector<8x8xf32>
    %539 = arith.subf %535, %538 : vector<8x8xf32>
    %540 = math.exp %539 : vector<8x8xf32>
    %cst_268 = arith.constant dense<0.000000e+00> : vector<8xf32>
    %541 = vector.multi_reduction <add>, %540, %cst_268 [1] : vector<8x8xf32> to vector<8xf32>
    %542 = vector.shape_cast %541 : vector<8xf32> to vector<8x1xf32>
    %543 = tpu.reciprocal %542 {approx = true} : vector<8x1xf32> -> vector<8x1xf32>
    %544 = vector.broadcast %543 : vector<8x1xf32> to vector<8x8xf32>
    %545 = arith.mulf %540, %544 : vector<8x8xf32>
    %546 = arith.truncf %545 : vector<8x8xf32> to vector<8x8xbf16>
    %cst_269 = arith.constant dense<0.000000e+00> : vector<8x8xf32>
    %547 = tpu.matmul %546, %532, %cst_269 {dimension_numbers = #tpu.dot_dimension_numbers<[1], [0], [0], [1], [0, 0, 1, 1], [], []>} : vector<8x8xbf16>, vector<8x8xbf16>, vector<8x8xf32> -> vector<8x8xf32>
    %548 = arith.truncf %547 : vector<8x8xf32> to vector<8x8xbf16>
    %c0_270 = arith.constant 0 : index
    %c8_271 = arith.constant 8 : index
    %549 = vector.load %arg52[%c0_270, %c8_271] : memref<8x32xbf16, #tpu.memory_space<vmem>>, vector<8x8xbf16>
    tpu.vector_store %arg52[%c0_270, %c8_271], %548 {strides = array<i32>} : memref<8x32xbf16, #tpu.memory_space<vmem>>, vector<8x8xbf16>,
    %550 = vector.extract_strided_slice %495 {offsets = [0, 16], sizes = [8, 8], strides = [1, 1]} : vector<8x32xbf16> to vector<8x8xbf16>
    %551 = vector.extract_strided_slice %502 {offsets = [0, 16], sizes = [8, 8], strides = [1, 1]} : vector<8x32xbf16> to vector<8x8xbf16>
    %552 = vector.extract_strided_slice %509 {offsets = [0, 16], sizes = [8, 8], strides = [1, 1]} : vector<8x32xbf16> to vector<8x8xbf16>
    %cst_272 = arith.constant dense<0.000000e+00> : vector<8x8xf32>
    %553 = tpu.matmul %550, %551, %cst_272 {dimension_numbers = #tpu.dot_dimension_numbers<[1], [1], [0], [0], [0, 0, 1, 0], [], []>} : vector<8x8xbf16>, vector<8x8xbf16>, vector<8x8xf32> -> vector<8x8xf32>
    %cst_273 = arith.constant 0.353553385 : f32
    %554 = vector.broadcast %cst_273 : f32 to vector<8x8xf32>
    %555 = arith.mulf %553, %554 : vector<8x8xf32>
    %cst_274 = arith.constant dense<0xFF800000> : vector<8xf32>
    %556 = vector.multi_reduction <maximumf>, %555, %cst_274 [1] : vector<8x8xf32> to vector<8xf32>
    %557 = vector.shape_cast %556 : vector<8xf32> to vector<8x1xf32>
    %558 = vector.broadcast %557 : vector<8x1xf32> to vector<8x8xf32>
    %559 = arith.subf %555, %558 : vector<8x8xf32>
    %560 = math.exp %559 : vector<8x8xf32>
    %cst_275 = arith.constant dense<0.000000e+00> : vector<8xf32>
    %561 = vector.multi_reduction <add>, %560, %cst_275 [1] : vector<8x8xf32> to vector<8xf32>
    %562 = vector.shape_cast %561 : vector<8xf32> to vector<8x1xf32>
    %563 = tpu.reciprocal %562 {approx = true} : vector<8x1xf32> -> vector<8x1xf32>
    %564 = vector.broadcast %563 : vector<8x1xf32> to vector<8x8xf32>
    %565 = arith.mulf %560, %564 : vector<8x8xf32>
    %566 = arith.truncf %565 : vector<8x8xf32> to vector<8x8xbf16>
    %cst_276 = arith.constant dense<0.000000e+00> : vector<8x8xf32>
    %567 = tpu.matmul %566, %552, %cst_276 {dimension_numbers = #tpu.dot_dimension_numbers<[1], [0], [0], [1], [0, 0, 1, 1], [], []>} : vector<8x8xbf16>, vector<8x8xbf16>, vector<8x8xf32> -> vector<8x8xf32>
    %568 = arith.truncf %567 : vector<8x8xf32> to vector<8x8xbf16>
    %c0_277 = arith.constant 0 : index
    %c16_278 = arith.constant 16 : index
    %569 = vector.load %arg52[%c0_277, %c16_278] : memref<8x32xbf16, #tpu.memory_space<vmem>>, vector<8x8xbf16>
    tpu.vector_store %arg52[%c0_277, %c16_278], %568 {strides = array<i32>} : memref<8x32xbf16, #tpu.memory_space<vmem>>, vector<8x8xbf16>,
    %570 = vector.extract_strided_slice %495 {offsets = [0, 24], sizes = [8, 8], strides = [1, 1]} : vector<8x32xbf16> to vector<8x8xbf16>
    %571 = vector.extract_strided_slice %502 {offsets = [0, 24], sizes = [8, 8], strides = [1, 1]} : vector<8x32xbf16> to vector<8x8xbf16>
    %572 = vector.extract_strided_slice %509 {offsets = [0, 24], sizes = [8, 8], strides = [1, 1]} : vector<8x32xbf16> to vector<8x8xbf16>
    %cst_279 = arith.constant dense<0.000000e+00> : vector<8x8xf32>
    %573 = tpu.matmul %570, %571, %cst_279 {dimension_numbers = #tpu.dot_dimension_numbers<[1], [1], [0], [0], [0, 0, 1, 0], [], []>} : vector<8x8xbf16>, vector<8x8xbf16>, vector<8x8xf32> -> vector<8x8xf32>
    %cst_280 = arith.constant 0.353553385 : f32
    %574 = vector.broadcast %cst_280 : f32 to vector<8x8xf32>
    %575 = arith.mulf %573, %574 : vector<8x8xf32>
    %cst_281 = arith.constant dense<0xFF800000> : vector<8xf32>
    %576 = vector.multi_reduction <maximumf>, %575, %cst_281 [1] : vector<8x8xf32> to vector<8xf32>
    %577 = vector.shape_cast %576 : vector<8xf32> to vector<8x1xf32>
    %578 = vector.broadcast %577 : vector<8x1xf32> to vector<8x8xf32>
    %579 = arith.subf %575, %578 : vector<8x8xf32>
    %580 = math.exp %579 : vector<8x8xf32>
    %cst_282 = arith.constant dense<0.000000e+00> : vector<8xf32>
    %581 = vector.multi_reduction <add>, %580, %cst_282 [1] : vector<8x8xf32> to vector<8xf32>
    %582 = vector.shape_cast %581 : vector<8xf32> to vector<8x1xf32>
    %583 = tpu.reciprocal %582 {approx = true} : vector<8x1xf32> -> vector<8x1xf32>
    %584 = vector.broadcast %583 : vector<8x1xf32> to vector<8x8xf32>
    %585 = arith.mulf %580, %584 : vector<8x8xf32>
    %586 = arith.truncf %585 : vector<8x8xf32> to vector<8x8xbf16>
    %cst_283 = arith.constant dense<0.000000e+00> : vector<8x8xf32>
    %587 = tpu.matmul %586, %572, %cst_283 {dimension_numbers = #tpu.dot_dimension_numbers<[1], [0], [0], [1], [0, 0, 1, 1], [], []>} : vector<8x8xbf16>, vector<8x8xbf16>, vector<8x8xf32> -> vector<8x8xf32>
    %588 = arith.truncf %587 : vector<8x8xf32> to vector<8x8xbf16>
    %c0_284 = arith.constant 0 : index
    %c24_285 = arith.constant 24 : index
    %589 = vector.load %arg52[%c0_284, %c24_285] : memref<8x32xbf16, #tpu.memory_space<vmem>>, vector<8x8xbf16>
    tpu.vector_store %arg52[%c0_284, %c24_285], %588 {strides = array<i32>} : memref<8x32xbf16, #tpu.memory_space<vmem>>, vector<8x8xbf16>,
    %c0_286 = arith.constant 0 : index
    %c0_287 = arith.constant 0 : index
    %590 = vector.load %arg52[%c0_286, %c0_287] : memref<8x32xbf16, #tpu.memory_space<vmem>>, vector<8x32xbf16>
    %cst_288 = arith.constant dense<0.000000e+00> : vector<8x32xf32>
    %591 = tpu.matmul %590, %488, %cst_288 {dimension_numbers = #tpu.dot_dimension_numbers<[1], [0], [0], [1], [0, 0, 1, 1], [], []>} : vector<8x32xbf16>, vector<32x32xbf16>, vector<8x32xf32> -> vector<8x32xf32>
    %c1_289 = arith.constant 1 : index
    %c0_290 = arith.constant 0 : index
    %c0_291 = arith.constant 0 : index
    %592 = vector.load %arg35[%c1_289, %c0_290, %c0_291] : memref<2x1x32xf32, #tpu.memory_space<vmem>>, vector<1x1x32xf32>
    %593 = vector.shape_cast %592 : vector<1x1x32xf32> to vector<1x32xf32>
    %594 = vector.broadcast %593 : vector<1x32xf32> to vector<8x32xf32>
    %595 = arith.addf %591, %594 : vector<8x32xf32>
    %596 = arith.addf %335, %595 : vector<8x32xf32>
    %c1_292 = arith.constant 1 : index
    %c0_293 = arith.constant 0 : index
    %c0_294 = arith.constant 0 : index
    %597 = vector.load %arg25[%c1_292, %c0_293, %c0_294] : memref<2x1x32xf32, #tpu.memory_space<vmem>>, vector<1x1x32xf32>
    %598 = vector.shape_cast %597 : vector<1x1x32xf32> to vector<1x32xf32>
    %c1_295 = arith.constant 1 : index
    %c0_296 = arith.constant 0 : index
    %c0_297 = arith.constant 0 : index
    %599 = vector.load %arg24[%c1_295, %c0_296, %c0_297] : memref<2x1x32xf32, #tpu.memory_space<vmem>>, vector<1x1x32xf32>
    %600 = vector.shape_cast %599 : vector<1x1x32xf32> to vector<1x32xf32>
    %cst_298 = arith.constant dense<0.000000e+00> : vector<8xf32>
    %601 = vector.multi_reduction <add>, %596, %cst_298 [1] : vector<8x32xf32> to vector<8xf32>
    %602 = vector.shape_cast %601 : vector<8xf32> to vector<8x1xf32>
    %cst_299 = arith.constant 3.200000e+01 : f32
    %603 = vector.broadcast %cst_299 : f32 to vector<8x1xf32>
    %604 = arith.divf %602, %603 : vector<8x1xf32>
    %605 = vector.broadcast %604 : vector<8x1xf32> to vector<8x32xf32>
    %606 = arith.subf %596, %605 : vector<8x32xf32>
    %607 = arith.mulf %606, %606 : vector<8x32xf32>
    %cst_300 = arith.constant dense<0.000000e+00> : vector<8xf32>
    %608 = vector.multi_reduction <add>, %607, %cst_300 [1] : vector<8x32xf32> to vector<8xf32>
    %609 = vector.shape_cast %608 : vector<8xf32> to vector<8x1xf32>
    %cst_301 = arith.constant 3.200000e+01 : f32
    %610 = vector.broadcast %cst_301 : f32 to vector<8x1xf32>
    %611 = arith.divf %609, %610 : vector<8x1xf32>
    %612 = vector.broadcast %604 : vector<8x1xf32> to vector<8x32xf32>
    %613 = arith.subf %596, %612 : vector<8x32xf32>
    %cst_302 = arith.constant 9.99999974E-6 : f32
    %614 = vector.broadcast %cst_302 : f32 to vector<8x1xf32>
    %615 = arith.addf %611, %614 : vector<8x1xf32>
    %616 = math.rsqrt %615 : vector<8x1xf32>
    %617 = vector.broadcast %616 : vector<8x1xf32> to vector<8x32xf32>
    %618 = arith.mulf %613, %617 : vector<8x32xf32>
    %619 = vector.broadcast %598 : vector<1x32xf32> to vector<8x32xf32>
    %620 = arith.mulf %618, %619 : vector<8x32xf32>
    %621 = vector.broadcast %600 : vector<1x32xf32> to vector<8x32xf32>
    %622 = arith.addf %620, %621 : vector<8x32xf32>
    %623 = arith.addf %622, %1 : vector<8x32xf32>
    %624 = arith.addf %479, %3 : vector<64x32xf32>
    %c1_303 = arith.constant 1 : index
    %c0_304 = arith.constant 0 : index
    %c0_305 = arith.constant 0 : index
    %625 = vector.load %arg48[%c1_303, %c0_304, %c0_305] : memref<2x32x16xbf16, #tpu.memory_space<vmem>>, vector<1x32x16xbf16>
    %626 = vector.shape_cast %625 : vector<1x32x16xbf16> to vector<32x16xbf16>
    %c1_306 = arith.constant 1 : index
    %c0_307 = arith.constant 0 : index
    %c0_308 = arith.constant 0 : index
    %627 = vector.load %arg46[%c1_306, %c0_307, %c0_308] : memref<2x32x16xbf16, #tpu.memory_space<vmem>>, vector<1x32x16xbf16>
    %628 = vector.shape_cast %627 : vector<1x32x16xbf16> to vector<32x16xbf16>
    %c1_309 = arith.constant 1 : index
    %c0_310 = arith.constant 0 : index
    %c0_311 = arith.constant 0 : index
    %629 = vector.load %arg49[%c1_309, %c0_310, %c0_311] : memref<2x32x16xbf16, #tpu.memory_space<vmem>>, vector<1x32x16xbf16>
    %630 = vector.shape_cast %629 : vector<1x32x16xbf16> to vector<32x16xbf16>
    %c1_312 = arith.constant 1 : index
    %c0_313 = arith.constant 0 : index
    %c0_314 = arith.constant 0 : index
    %631 = vector.load %arg47[%c1_312, %c0_313, %c0_314] : memref<2x16x32xbf16, #tpu.memory_space<vmem>>, vector<1x16x32xbf16>
    %632 = vector.shape_cast %631 : vector<1x16x32xbf16> to vector<16x32xbf16>
    %633 = arith.truncf %623 : vector<8x32xf32> to vector<8x32xbf16>
    %cst_315 = arith.constant dense<0.000000e+00> : vector<8x16xf32>
    %634 = tpu.matmul %633, %626, %cst_315 {dimension_numbers = #tpu.dot_dimension_numbers<[1], [0], [0], [1], [0, 0, 1, 1], [], []>} : vector<8x32xbf16>, vector<32x16xbf16>, vector<8x16xf32> -> vector<8x16xf32>
    %c1_316 = arith.constant 1 : index
    %c0_317 = arith.constant 0 : index
    %c0_318 = arith.constant 0 : index
    %635 = vector.load %arg44[%c1_316, %c0_317, %c0_318] : memref<2x1x16xf32, #tpu.memory_space<vmem>>, vector<1x1x16xf32>
    %636 = vector.shape_cast %635 : vector<1x1x16xf32> to vector<1x16xf32>
    %637 = vector.broadcast %636 : vector<1x16xf32> to vector<8x16xf32>
    %638 = arith.addf %634, %637 : vector<8x16xf32>
    %639 = arith.truncf %638 : vector<8x16xf32> to vector<8x16xbf16>
    %640 = arith.truncf %624 : vector<64x32xf32> to vector<64x32xbf16>
    %cst_319 = arith.constant dense<0.000000e+00> : vector<64x16xf32>
    %641 = tpu.matmul %640, %628, %cst_319 {dimension_numbers = #tpu.dot_dimension_numbers<[1], [0], [0], [1], [0, 0, 1, 1], [], []>} : vector<64x32xbf16>, vector<32x16xbf16>, vector<64x16xf32> -> vector<64x16xf32>
    %c1_320 = arith.constant 1 : index
    %c0_321 = arith.constant 0 : index
    %c0_322 = arith.constant 0 : index
    %642 = vector.load %arg42[%c1_320, %c0_321, %c0_322] : memref<2x1x16xf32, #tpu.memory_space<vmem>>, vector<1x1x16xf32>
    %643 = vector.shape_cast %642 : vector<1x1x16xf32> to vector<1x16xf32>
    %644 = vector.broadcast %643 : vector<1x16xf32> to vector<64x16xf32>
    %645 = arith.addf %641, %644 : vector<64x16xf32>
    %646 = arith.truncf %645 : vector<64x16xf32> to vector<64x16xbf16>
    %647 = arith.truncf %479 : vector<64x32xf32> to vector<64x32xbf16>
    %cst_323 = arith.constant dense<0.000000e+00> : vector<64x16xf32>
    %648 = tpu.matmul %647, %630, %cst_323 {dimension_numbers = #tpu.dot_dimension_numbers<[1], [0], [0], [1], [0, 0, 1, 1], [], []>} : vector<64x32xbf16>, vector<32x16xbf16>, vector<64x16xf32> -> vector<64x16xf32>
    %c1_324 = arith.constant 1 : index
    %c0_325 = arith.constant 0 : index
    %c0_326 = arith.constant 0 : index
    %649 = vector.load %arg45[%c1_324, %c0_325, %c0_326] : memref<2x1x16xf32, #tpu.memory_space<vmem>>, vector<1x1x16xf32>
    %650 = vector.shape_cast %649 : vector<1x1x16xf32> to vector<1x16xf32>
    %651 = vector.broadcast %650 : vector<1x16xf32> to vector<64x16xf32>
    %652 = arith.addf %648, %651 : vector<64x16xf32>
    %653 = arith.truncf %652 : vector<64x16xf32> to vector<64x16xbf16>
    %654 = vector.extract_strided_slice %639 {offsets = [0, 0], sizes = [8, 4], strides = [1, 1]} : vector<8x16xbf16> to vector<8x4xbf16>
    %655 = vector.extract_strided_slice %646 {offsets = [0, 0], sizes = [64, 4], strides = [1, 1]} : vector<64x16xbf16> to vector<64x4xbf16>
    %656 = vector.extract_strided_slice %653 {offsets = [0, 0], sizes = [64, 4], strides = [1, 1]} : vector<64x16xbf16> to vector<64x4xbf16>
    %cst_327 = arith.constant dense<0.000000e+00> : vector<8x64xf32>
    %657 = tpu.matmul %654, %655, %cst_327 {dimension_numbers = #tpu.dot_dimension_numbers<[1], [1], [0], [0], [0, 0, 1, 0], [], []>} : vector<8x4xbf16>, vector<64x4xbf16>, vector<8x64xf32> -> vector<8x64xf32>
    %cst_328 = arith.constant 5.000000e-01 : f32
    %658 = vector.broadcast %cst_328 : f32 to vector<8x64xf32>
    %659 = arith.mulf %657, %658 : vector<8x64xf32>
    %cst_329 = arith.constant dense<0xFF800000> : vector<8xf32>
    %660 = vector.multi_reduction <maximumf>, %659, %cst_329 [1] : vector<8x64xf32> to vector<8xf32>
    %661 = vector.shape_cast %660 : vector<8xf32> to vector<8x1xf32>
    %662 = vector.broadcast %661 : vector<8x1xf32> to vector<8x64xf32>
    %663 = arith.subf %659, %662 : vector<8x64xf32>
    %664 = math.exp %663 : vector<8x64xf32>
    %cst_330 = arith.constant dense<0.000000e+00> : vector<8xf32>
    %665 = vector.multi_reduction <add>, %664, %cst_330 [1] : vector<8x64xf32> to vector<8xf32>
    %666 = vector.shape_cast %665 : vector<8xf32> to vector<8x1xf32>
    %667 = tpu.reciprocal %666 {approx = true} : vector<8x1xf32> -> vector<8x1xf32>
    %668 = vector.broadcast %667 : vector<8x1xf32> to vector<8x64xf32>
    %669 = arith.mulf %664, %668 : vector<8x64xf32>
    %670 = arith.truncf %669 : vector<8x64xf32> to vector<8x64xbf16>
    %cst_331 = arith.constant dense<0.000000e+00> : vector<8x4xf32>
    %671 = tpu.matmul %670, %656, %cst_331 {dimension_numbers = #tpu.dot_dimension_numbers<[1], [0], [0], [1], [0, 0, 1, 1], [], []>} : vector<8x64xbf16>, vector<64x4xbf16>, vector<8x4xf32> -> vector<8x4xf32>
    %672 = arith.truncf %671 : vector<8x4xf32> to vector<8x4xbf16>
    %c0_332 = arith.constant 0 : index
    %c0_333 = arith.constant 0 : index
    %673 = vector.load %arg52[%c0_332, %c0_333] : memref<8x32xbf16, #tpu.memory_space<vmem>>, vector<8x4xbf16>
    tpu.vector_store %arg52[%c0_332, %c0_333], %672 {strides = array<i32>} : memref<8x32xbf16, #tpu.memory_space<vmem>>, vector<8x4xbf16>,
    %674 = vector.extract_strided_slice %639 {offsets = [0, 4], sizes = [8, 4], strides = [1, 1]} : vector<8x16xbf16> to vector<8x4xbf16>
    %675 = vector.extract_strided_slice %646 {offsets = [0, 4], sizes = [64, 4], strides = [1, 1]} : vector<64x16xbf16> to vector<64x4xbf16>
    %676 = vector.extract_strided_slice %653 {offsets = [0, 4], sizes = [64, 4], strides = [1, 1]} : vector<64x16xbf16> to vector<64x4xbf16>
    %cst_334 = arith.constant dense<0.000000e+00> : vector<8x64xf32>
    %677 = tpu.matmul %674, %675, %cst_334 {dimension_numbers = #tpu.dot_dimension_numbers<[1], [1], [0], [0], [0, 0, 1, 0], [], []>} : vector<8x4xbf16>, vector<64x4xbf16>, vector<8x64xf32> -> vector<8x64xf32>
    %cst_335 = arith.constant 5.000000e-01 : f32
    %678 = vector.broadcast %cst_335 : f32 to vector<8x64xf32>
    %679 = arith.mulf %677, %678 : vector<8x64xf32>
    %cst_336 = arith.constant dense<0xFF800000> : vector<8xf32>
    %680 = vector.multi_reduction <maximumf>, %679, %cst_336 [1] : vector<8x64xf32> to vector<8xf32>
    %681 = vector.shape_cast %680 : vector<8xf32> to vector<8x1xf32>
    %682 = vector.broadcast %681 : vector<8x1xf32> to vector<8x64xf32>
    %683 = arith.subf %679, %682 : vector<8x64xf32>
    %684 = math.exp %683 : vector<8x64xf32>
    %cst_337 = arith.constant dense<0.000000e+00> : vector<8xf32>
    %685 = vector.multi_reduction <add>, %684, %cst_337 [1] : vector<8x64xf32> to vector<8xf32>
    %686 = vector.shape_cast %685 : vector<8xf32> to vector<8x1xf32>
    %687 = tpu.reciprocal %686 {approx = true} : vector<8x1xf32> -> vector<8x1xf32>
    %688 = vector.broadcast %687 : vector<8x1xf32> to vector<8x64xf32>
    %689 = arith.mulf %684, %688 : vector<8x64xf32>
    %690 = arith.truncf %689 : vector<8x64xf32> to vector<8x64xbf16>
    %cst_338 = arith.constant dense<0.000000e+00> : vector<8x4xf32>
    %691 = tpu.matmul %690, %676, %cst_338 {dimension_numbers = #tpu.dot_dimension_numbers<[1], [0], [0], [1], [0, 0, 1, 1], [], []>} : vector<8x64xbf16>, vector<64x4xbf16>, vector<8x4xf32> -> vector<8x4xf32>
    %692 = arith.truncf %691 : vector<8x4xf32> to vector<8x4xbf16>
    %c0_339 = arith.constant 0 : index
    %c4_340 = arith.constant 4 : index
    %693 = vector.load %arg52[%c0_339, %c4_340] : memref<8x32xbf16, #tpu.memory_space<vmem>>, vector<8x4xbf16>
    tpu.vector_store %arg52[%c0_339, %c4_340], %692 {strides = array<i32>} : memref<8x32xbf16, #tpu.memory_space<vmem>>, vector<8x4xbf16>,
    %694 = vector.extract_strided_slice %639 {offsets = [0, 8], sizes = [8, 4], strides = [1, 1]} : vector<8x16xbf16> to vector<8x4xbf16>
    %695 = vector.extract_strided_slice %646 {offsets = [0, 8], sizes = [64, 4], strides = [1, 1]} : vector<64x16xbf16> to vector<64x4xbf16>
    %696 = vector.extract_strided_slice %653 {offsets = [0, 8], sizes = [64, 4], strides = [1, 1]} : vector<64x16xbf16> to vector<64x4xbf16>
    %cst_341 = arith.constant dense<0.000000e+00> : vector<8x64xf32>
    %697 = tpu.matmul %694, %695, %cst_341 {dimension_numbers = #tpu.dot_dimension_numbers<[1], [1], [0], [0], [0, 0, 1, 0], [], []>} : vector<8x4xbf16>, vector<64x4xbf16>, vector<8x64xf32> -> vector<8x64xf32>
    %cst_342 = arith.constant 5.000000e-01 : f32
    %698 = vector.broadcast %cst_342 : f32 to vector<8x64xf32>
    %699 = arith.mulf %697, %698 : vector<8x64xf32>
    %cst_343 = arith.constant dense<0xFF800000> : vector<8xf32>
    %700 = vector.multi_reduction <maximumf>, %699, %cst_343 [1] : vector<8x64xf32> to vector<8xf32>
    %701 = vector.shape_cast %700 : vector<8xf32> to vector<8x1xf32>
    %702 = vector.broadcast %701 : vector<8x1xf32> to vector<8x64xf32>
    %703 = arith.subf %699, %702 : vector<8x64xf32>
    %704 = math.exp %703 : vector<8x64xf32>
    %cst_344 = arith.constant dense<0.000000e+00> : vector<8xf32>
    %705 = vector.multi_reduction <add>, %704, %cst_344 [1] : vector<8x64xf32> to vector<8xf32>
    %706 = vector.shape_cast %705 : vector<8xf32> to vector<8x1xf32>
    %707 = tpu.reciprocal %706 {approx = true} : vector<8x1xf32> -> vector<8x1xf32>
    %708 = vector.broadcast %707 : vector<8x1xf32> to vector<8x64xf32>
    %709 = arith.mulf %704, %708 : vector<8x64xf32>
    %710 = arith.truncf %709 : vector<8x64xf32> to vector<8x64xbf16>
    %cst_345 = arith.constant dense<0.000000e+00> : vector<8x4xf32>
    %711 = tpu.matmul %710, %696, %cst_345 {dimension_numbers = #tpu.dot_dimension_numbers<[1], [0], [0], [1], [0, 0, 1, 1], [], []>} : vector<8x64xbf16>, vector<64x4xbf16>, vector<8x4xf32> -> vector<8x4xf32>
    %712 = arith.truncf %711 : vector<8x4xf32> to vector<8x4xbf16>
    %c0_346 = arith.constant 0 : index
    %c8_347 = arith.constant 8 : index
    %713 = vector.load %arg52[%c0_346, %c8_347] : memref<8x32xbf16, #tpu.memory_space<vmem>>, vector<8x4xbf16>
    tpu.vector_store %arg52[%c0_346, %c8_347], %712 {strides = array<i32>} : memref<8x32xbf16, #tpu.memory_space<vmem>>, vector<8x4xbf16>,
    %714 = vector.extract_strided_slice %639 {offsets = [0, 12], sizes = [8, 4], strides = [1, 1]} : vector<8x16xbf16> to vector<8x4xbf16>
    %715 = vector.extract_strided_slice %646 {offsets = [0, 12], sizes = [64, 4], strides = [1, 1]} : vector<64x16xbf16> to vector<64x4xbf16>
    %716 = vector.extract_strided_slice %653 {offsets = [0, 12], sizes = [64, 4], strides = [1, 1]} : vector<64x16xbf16> to vector<64x4xbf16>
    %cst_348 = arith.constant dense<0.000000e+00> : vector<8x64xf32>
    %717 = tpu.matmul %714, %715, %cst_348 {dimension_numbers = #tpu.dot_dimension_numbers<[1], [1], [0], [0], [0, 0, 1, 0], [], []>} : vector<8x4xbf16>, vector<64x4xbf16>, vector<8x64xf32> -> vector<8x64xf32>
    %cst_349 = arith.constant 5.000000e-01 : f32
    %718 = vector.broadcast %cst_349 : f32 to vector<8x64xf32>
    %719 = arith.mulf %717, %718 : vector<8x64xf32>
    %cst_350 = arith.constant dense<0xFF800000> : vector<8xf32>
    %720 = vector.multi_reduction <maximumf>, %719, %cst_350 [1] : vector<8x64xf32> to vector<8xf32>
    %721 = vector.shape_cast %720 : vector<8xf32> to vector<8x1xf32>
    %722 = vector.broadcast %721 : vector<8x1xf32> to vector<8x64xf32>
    %723 = arith.subf %719, %722 : vector<8x64xf32>
    %724 = math.exp %723 : vector<8x64xf32>
    %cst_351 = arith.constant dense<0.000000e+00> : vector<8xf32>
    %725 = vector.multi_reduction <add>, %724, %cst_351 [1] : vector<8x64xf32> to vector<8xf32>
    %726 = vector.shape_cast %725 : vector<8xf32> to vector<8x1xf32>
    %727 = tpu.reciprocal %726 {approx = true} : vector<8x1xf32> -> vector<8x1xf32>
    %728 = vector.broadcast %727 : vector<8x1xf32> to vector<8x64xf32>
    %729 = arith.mulf %724, %728 : vector<8x64xf32>
    %730 = arith.truncf %729 : vector<8x64xf32> to vector<8x64xbf16>
    %cst_352 = arith.constant dense<0.000000e+00> : vector<8x4xf32>
    %731 = tpu.matmul %730, %716, %cst_352 {dimension_numbers = #tpu.dot_dimension_numbers<[1], [0], [0], [1], [0, 0, 1, 1], [], []>} : vector<8x64xbf16>, vector<64x4xbf16>, vector<8x4xf32> -> vector<8x4xf32>
    %732 = arith.truncf %731 : vector<8x4xf32> to vector<8x4xbf16>
    %c0_353 = arith.constant 0 : index
    %c12_354 = arith.constant 12 : index
    %733 = vector.load %arg52[%c0_353, %c12_354] : memref<8x32xbf16, #tpu.memory_space<vmem>>, vector<8x4xbf16>
    tpu.vector_store %arg52[%c0_353, %c12_354], %732 {strides = array<i32>} : memref<8x32xbf16, #tpu.memory_space<vmem>>, vector<8x4xbf16>,
    %c0_355 = arith.constant 0 : index
    %c0_356 = arith.constant 0 : index
    %734 = vector.load %arg52[%c0_355, %c0_356] : memref<8x32xbf16, #tpu.memory_space<vmem>>, vector<8x16xbf16>
    %cst_357 = arith.constant dense<0.000000e+00> : vector<8x32xf32>
    %735 = tpu.matmul %734, %632, %cst_357 {dimension_numbers = #tpu.dot_dimension_numbers<[1], [0], [0], [1], [0, 0, 1, 1], [], []>} : vector<8x16xbf16>, vector<16x32xbf16>, vector<8x32xf32> -> vector<8x32xf32>
    %c1_358 = arith.constant 1 : index
    %c0_359 = arith.constant 0 : index
    %c0_360 = arith.constant 0 : index
    %736 = vector.load %arg43[%c1_358, %c0_359, %c0_360] : memref<2x1x32xf32, #tpu.memory_space<vmem>>, vector<1x1x32xf32>
    %737 = vector.shape_cast %736 : vector<1x1x32xf32> to vector<1x32xf32>
    %738 = vector.broadcast %737 : vector<1x32xf32> to vector<8x32xf32>
    %739 = arith.addf %735, %738 : vector<8x32xf32>
    %740 = arith.addf %622, %739 : vector<8x32xf32>
    %c1_361 = arith.constant 1 : index
    %c0_362 = arith.constant 0 : index
    %c0_363 = arith.constant 0 : index
    %741 = vector.load %arg27[%c1_361, %c0_362, %c0_363] : memref<2x1x32xf32, #tpu.memory_space<vmem>>, vector<1x1x32xf32>
    %742 = vector.shape_cast %741 : vector<1x1x32xf32> to vector<1x32xf32>
    %c1_364 = arith.constant 1 : index
    %c0_365 = arith.constant 0 : index
    %c0_366 = arith.constant 0 : index
    %743 = vector.load %arg26[%c1_364, %c0_365, %c0_366] : memref<2x1x32xf32, #tpu.memory_space<vmem>>, vector<1x1x32xf32>
    %744 = vector.shape_cast %743 : vector<1x1x32xf32> to vector<1x32xf32>
    %cst_367 = arith.constant dense<0.000000e+00> : vector<8xf32>
    %745 = vector.multi_reduction <add>, %740, %cst_367 [1] : vector<8x32xf32> to vector<8xf32>
    %746 = vector.shape_cast %745 : vector<8xf32> to vector<8x1xf32>
    %cst_368 = arith.constant 3.200000e+01 : f32
    %747 = vector.broadcast %cst_368 : f32 to vector<8x1xf32>
    %748 = arith.divf %746, %747 : vector<8x1xf32>
    %749 = vector.broadcast %748 : vector<8x1xf32> to vector<8x32xf32>
    %750 = arith.subf %740, %749 : vector<8x32xf32>
    %751 = arith.mulf %750, %750 : vector<8x32xf32>
    %cst_369 = arith.constant dense<0.000000e+00> : vector<8xf32>
    %752 = vector.multi_reduction <add>, %751, %cst_369 [1] : vector<8x32xf32> to vector<8xf32>
    %753 = vector.shape_cast %752 : vector<8xf32> to vector<8x1xf32>
    %cst_370 = arith.constant 3.200000e+01 : f32
    %754 = vector.broadcast %cst_370 : f32 to vector<8x1xf32>
    %755 = arith.divf %753, %754 : vector<8x1xf32>
    %756 = vector.broadcast %748 : vector<8x1xf32> to vector<8x32xf32>
    %757 = arith.subf %740, %756 : vector<8x32xf32>
    %cst_371 = arith.constant 9.99999974E-6 : f32
    %758 = vector.broadcast %cst_371 : f32 to vector<8x1xf32>
    %759 = arith.addf %755, %758 : vector<8x1xf32>
    %760 = math.rsqrt %759 : vector<8x1xf32>
    %761 = vector.broadcast %760 : vector<8x1xf32> to vector<8x32xf32>
    %762 = arith.mulf %757, %761 : vector<8x32xf32>
    %763 = vector.broadcast %742 : vector<1x32xf32> to vector<8x32xf32>
    %764 = arith.mulf %762, %763 : vector<8x32xf32>
    %765 = vector.broadcast %744 : vector<1x32xf32> to vector<8x32xf32>
    %766 = arith.addf %764, %765 : vector<8x32xf32>
    %767 = arith.truncf %766 : vector<8x32xf32> to vector<8x32xbf16>
    %c1_372 = arith.constant 1 : index
    %c0_373 = arith.constant 0 : index
    %c0_374 = arith.constant 0 : index
    %768 = vector.load %arg22[%c1_372, %c0_373, %c0_374] : memref<2x32x64xbf16, #tpu.memory_space<vmem>>, vector<1x32x64xbf16>
    %769 = vector.shape_cast %768 : vector<1x32x64xbf16> to vector<32x64xbf16>
    %cst_375 = arith.constant dense<0.000000e+00> : vector<8x64xf32>
    %770 = tpu.matmul %767, %769, %cst_375 {dimension_numbers = #tpu.dot_dimension_numbers<[1], [0], [0], [1], [0, 0, 1, 1], [], []>} : vector<8x32xbf16>, vector<32x64xbf16>, vector<8x64xf32> -> vector<8x64xf32>
    %c1_376 = arith.constant 1 : index
    %c0_377 = arith.constant 0 : index
    %c0_378 = arith.constant 0 : index
    %771 = vector.load %arg20[%c1_376, %c0_377, %c0_378] : memref<2x1x64xf32, #tpu.memory_space<vmem>>, vector<1x1x64xf32>
    %772 = vector.shape_cast %771 : vector<1x1x64xf32> to vector<1x64xf32>
    %773 = vector.broadcast %772 : vector<1x64xf32> to vector<8x64xf32>
    %774 = arith.addf %770, %773 : vector<8x64xf32>
    %cst_379 = arith.constant 0.000000e+00 : f32
    %775 = vector.broadcast %cst_379 : f32 to vector<8x64xf32>
    %776 = arith.maximumf %774, %775 : vector<8x64xf32>
    %777 = arith.truncf %776 : vector<8x64xf32> to vector<8x64xbf16>
    %c1_380 = arith.constant 1 : index
    %c0_381 = arith.constant 0 : index
    %c0_382 = arith.constant 0 : index
    %778 = vector.load %arg23[%c1_380, %c0_381, %c0_382] : memref<2x64x32xbf16, #tpu.memory_space<vmem>>, vector<1x64x32xbf16>
    %779 = vector.shape_cast %778 : vector<1x64x32xbf16> to vector<64x32xbf16>
    %cst_383 = arith.constant dense<0.000000e+00> : vector<8x32xf32>
    %780 = tpu.matmul %777, %779, %cst_383 {dimension_numbers = #tpu.dot_dimension_numbers<[1], [0], [0], [1], [0, 0, 1, 1], [], []>} : vector<8x64xbf16>, vector<64x32xbf16>, vector<8x32xf32> -> vector<8x32xf32>
    %c1_384 = arith.constant 1 : index
    %c0_385 = arith.constant 0 : index
    %c0_386 = arith.constant 0 : index
    %781 = vector.load %arg21[%c1_384, %c0_385, %c0_386] : memref<2x1x32xf32, #tpu.memory_space<vmem>>, vector<1x1x32xf32>
    %782 = vector.shape_cast %781 : vector<1x1x32xf32> to vector<1x32xf32>
    %783 = vector.broadcast %782 : vector<1x32xf32> to vector<8x32xf32>
    %784 = arith.addf %780, %783 : vector<8x32xf32>
    %785 = arith.addf %766, %784 : vector<8x32xf32>
    %c1_387 = arith.constant 1 : index
    %c0_388 = arith.constant 0 : index
    %c0_389 = arith.constant 0 : index
    %786 = vector.load %arg29[%c1_387, %c0_388, %c0_389] : memref<2x1x32xf32, #tpu.memory_space<vmem>>, vector<1x1x32xf32>
    %787 = vector.shape_cast %786 : vector<1x1x32xf32> to vector<1x32xf32>
    %c1_390 = arith.constant 1 : index
    %c0_391 = arith.constant 0 : index
    %c0_392 = arith.constant 0 : index
    %788 = vector.load %arg28[%c1_390, %c0_391, %c0_392] : memref<2x1x32xf32, #tpu.memory_space<vmem>>, vector<1x1x32xf32>
    %789 = vector.shape_cast %788 : vector<1x1x32xf32> to vector<1x32xf32>
    %cst_393 = arith.constant dense<0.000000e+00> : vector<8xf32>
    %790 = vector.multi_reduction <add>, %785, %cst_393 [1] : vector<8x32xf32> to vector<8xf32>
    %791 = vector.shape_cast %790 : vector<8xf32> to vector<8x1xf32>
    %cst_394 = arith.constant 3.200000e+01 : f32
    %792 = vector.broadcast %cst_394 : f32 to vector<8x1xf32>
    %793 = arith.divf %791, %792 : vector<8x1xf32>
    %794 = vector.broadcast %793 : vector<8x1xf32> to vector<8x32xf32>
    %795 = arith.subf %785, %794 : vector<8x32xf32>
    %796 = arith.mulf %795, %795 : vector<8x32xf32>
    %cst_395 = arith.constant dense<0.000000e+00> : vector<8xf32>
    %797 = vector.multi_reduction <add>, %796, %cst_395 [1] : vector<8x32xf32> to vector<8xf32>
    %798 = vector.shape_cast %797 : vector<8xf32> to vector<8x1xf32>
    %cst_396 = arith.constant 3.200000e+01 : f32
    %799 = vector.broadcast %cst_396 : f32 to vector<8x1xf32>
    %800 = arith.divf %798, %799 : vector<8x1xf32>
    %801 = vector.broadcast %793 : vector<8x1xf32> to vector<8x32xf32>
    %802 = arith.subf %785, %801 : vector<8x32xf32>
    %cst_397 = arith.constant 9.99999974E-6 : f32
    %803 = vector.broadcast %cst_397 : f32 to vector<8x1xf32>
    %804 = arith.addf %800, %803 : vector<8x1xf32>
    %805 = math.rsqrt %804 : vector<8x1xf32>
    %806 = vector.broadcast %805 : vector<8x1xf32> to vector<8x32xf32>
    %807 = arith.mulf %802, %806 : vector<8x32xf32>
    %808 = vector.broadcast %787 : vector<1x32xf32> to vector<8x32xf32>
    %809 = arith.mulf %807, %808 : vector<8x32xf32>
    %810 = vector.broadcast %789 : vector<1x32xf32> to vector<8x32xf32>
    %811 = arith.addf %809, %810 : vector<8x32xf32>
    %812 = arith.addf %811, %1 : vector<8x32xf32>
    %813 = arith.addf %479, %3 : vector<64x32xf32>
    %c1_398 = arith.constant 1 : index
    %c0_399 = arith.constant 0 : index
    %c0_400 = arith.constant 0 : index
    %814 = vector.load %arg18[%c1_398, %c0_399, %c0_400] : memref<2x32x16xbf16, #tpu.memory_space<vmem>>, vector<1x32x16xbf16>
    %815 = vector.shape_cast %814 : vector<1x32x16xbf16> to vector<32x16xbf16>
    %c1_401 = arith.constant 1 : index
    %c0_402 = arith.constant 0 : index
    %c0_403 = arith.constant 0 : index
    %816 = vector.load %arg16[%c1_401, %c0_402, %c0_403] : memref<2x32x16xbf16, #tpu.memory_space<vmem>>, vector<1x32x16xbf16>
    %817 = vector.shape_cast %816 : vector<1x32x16xbf16> to vector<32x16xbf16>
    %c1_404 = arith.constant 1 : index
    %c0_405 = arith.constant 0 : index
    %c0_406 = arith.constant 0 : index
    %818 = vector.load %arg19[%c1_404, %c0_405, %c0_406] : memref<2x32x16xbf16, #tpu.memory_space<vmem>>, vector<1x32x16xbf16>
    %819 = vector.shape_cast %818 : vector<1x32x16xbf16> to vector<32x16xbf16>
    %c1_407 = arith.constant 1 : index
    %c0_408 = arith.constant 0 : index
    %c0_409 = arith.constant 0 : index
    %820 = vector.load %arg17[%c1_407, %c0_408, %c0_409] : memref<2x16x32xbf16, #tpu.memory_space<vmem>>, vector<1x16x32xbf16>
    %821 = vector.shape_cast %820 : vector<1x16x32xbf16> to vector<16x32xbf16>
    %822 = arith.truncf %813 : vector<64x32xf32> to vector<64x32xbf16>
    %cst_410 = arith.constant dense<0.000000e+00> : vector<64x16xf32>
    %823 = tpu.matmul %822, %815, %cst_410 {dimension_numbers = #tpu.dot_dimension_numbers<[1], [0], [0], [1], [0, 0, 1, 1], [], []>} : vector<64x32xbf16>, vector<32x16xbf16>, vector<64x16xf32> -> vector<64x16xf32>
    %c1_411 = arith.constant 1 : index
    %c0_412 = arith.constant 0 : index
    %c0_413 = arith.constant 0 : index
    %824 = vector.load %arg14[%c1_411, %c0_412, %c0_413] : memref<2x1x16xf32, #tpu.memory_space<vmem>>, vector<1x1x16xf32>
    %825 = vector.shape_cast %824 : vector<1x1x16xf32> to vector<1x16xf32>
    %826 = vector.broadcast %825 : vector<1x16xf32> to vector<64x16xf32>
    %827 = arith.addf %823, %826 : vector<64x16xf32>
    %828 = arith.truncf %827 : vector<64x16xf32> to vector<64x16xbf16>
    %829 = arith.truncf %812 : vector<8x32xf32> to vector<8x32xbf16>
    %cst_414 = arith.constant dense<0.000000e+00> : vector<8x16xf32>
    %830 = tpu.matmul %829, %817, %cst_414 {dimension_numbers = #tpu.dot_dimension_numbers<[1], [0], [0], [1], [0, 0, 1, 1], [], []>} : vector<8x32xbf16>, vector<32x16xbf16>, vector<8x16xf32> -> vector<8x16xf32>
    %c1_415 = arith.constant 1 : index
    %c0_416 = arith.constant 0 : index
    %c0_417 = arith.constant 0 : index
    %831 = vector.load %arg12[%c1_415, %c0_416, %c0_417] : memref<2x1x16xf32, #tpu.memory_space<vmem>>, vector<1x1x16xf32>
    %832 = vector.shape_cast %831 : vector<1x1x16xf32> to vector<1x16xf32>
    %833 = vector.broadcast %832 : vector<1x16xf32> to vector<8x16xf32>
    %834 = arith.addf %830, %833 : vector<8x16xf32>
    %835 = arith.truncf %834 : vector<8x16xf32> to vector<8x16xbf16>
    %836 = arith.truncf %811 : vector<8x32xf32> to vector<8x32xbf16>
    %cst_418 = arith.constant dense<0.000000e+00> : vector<8x16xf32>
    %837 = tpu.matmul %836, %819, %cst_418 {dimension_numbers = #tpu.dot_dimension_numbers<[1], [0], [0], [1], [0, 0, 1, 1], [], []>} : vector<8x32xbf16>, vector<32x16xbf16>, vector<8x16xf32> -> vector<8x16xf32>
    %c1_419 = arith.constant 1 : index
    %c0_420 = arith.constant 0 : index
    %c0_421 = arith.constant 0 : index
    %838 = vector.load %arg15[%c1_419, %c0_420, %c0_421] : memref<2x1x16xf32, #tpu.memory_space<vmem>>, vector<1x1x16xf32>
    %839 = vector.shape_cast %838 : vector<1x1x16xf32> to vector<1x16xf32>
    %840 = vector.broadcast %839 : vector<1x16xf32> to vector<8x16xf32>
    %841 = arith.addf %837, %840 : vector<8x16xf32>
    %842 = arith.truncf %841 : vector<8x16xf32> to vector<8x16xbf16>
    %843 = vector.extract_strided_slice %828 {offsets = [0, 0], sizes = [64, 4], strides = [1, 1]} : vector<64x16xbf16> to vector<64x4xbf16>
    %844 = vector.extract_strided_slice %835 {offsets = [0, 0], sizes = [8, 4], strides = [1, 1]} : vector<8x16xbf16> to vector<8x4xbf16>
    %845 = vector.extract_strided_slice %842 {offsets = [0, 0], sizes = [8, 4], strides = [1, 1]} : vector<8x16xbf16> to vector<8x4xbf16>
    %cst_422 = arith.constant dense<0.000000e+00> : vector<64x8xf32>
    %846 = tpu.matmul %843, %844, %cst_422 {dimension_numbers = #tpu.dot_dimension_numbers<[1], [1], [0], [0], [0, 0, 1, 0], [], []>} : vector<64x4xbf16>, vector<8x4xbf16>, vector<64x8xf32> -> vector<64x8xf32>
    %cst_423 = arith.constant 5.000000e-01 : f32
    %847 = vector.broadcast %cst_423 : f32 to vector<64x8xf32>
    %848 = arith.mulf %846, %847 : vector<64x8xf32>
    %cst_424 = arith.constant dense<0xFF800000> : vector<64xf32>
    %849 = vector.multi_reduction <maximumf>, %848, %cst_424 [1] : vector<64x8xf32> to vector<64xf32>
    %850 = vector.shape_cast %849 : vector<64xf32> to vector<64x1xf32>
    %851 = vector.broadcast %850 : vector<64x1xf32> to vector<64x8xf32>
    %852 = arith.subf %848, %851 : vector<64x8xf32>
    %853 = math.exp %852 : vector<64x8xf32>
    %cst_425 = arith.constant dense<0.000000e+00> : vector<64xf32>
    %854 = vector.multi_reduction <add>, %853, %cst_425 [1] : vector<64x8xf32> to vector<64xf32>
    %855 = vector.shape_cast %854 : vector<64xf32> to vector<64x1xf32>
    %856 = tpu.reciprocal %855 {approx = true} : vector<64x1xf32> -> vector<64x1xf32>
    %857 = vector.broadcast %856 : vector<64x1xf32> to vector<64x8xf32>
    %858 = arith.mulf %853, %857 : vector<64x8xf32>
    %859 = arith.truncf %858 : vector<64x8xf32> to vector<64x8xbf16>
    %cst_426 = arith.constant dense<0.000000e+00> : vector<64x4xf32>
    %860 = tpu.matmul %859, %845, %cst_426 {dimension_numbers = #tpu.dot_dimension_numbers<[1], [0], [0], [1], [0, 0, 1, 1], [], []>} : vector<64x8xbf16>, vector<8x4xbf16>, vector<64x4xf32> -> vector<64x4xf32>
    %861 = arith.truncf %860 : vector<64x4xf32> to vector<64x4xbf16>
    %c0_427 = arith.constant 0 : index
    %c0_428 = arith.constant 0 : index
    %862 = vector.load %arg53[%c0_427, %c0_428] : memref<64x32xbf16, #tpu.memory_space<vmem>>, vector<64x4xbf16>
    tpu.vector_store %arg53[%c0_427, %c0_428], %861 {strides = array<i32>} : memref<64x32xbf16, #tpu.memory_space<vmem>>, vector<64x4xbf16>,
    %863 = vector.extract_strided_slice %828 {offsets = [0, 4], sizes = [64, 4], strides = [1, 1]} : vector<64x16xbf16> to vector<64x4xbf16>
    %864 = vector.extract_strided_slice %835 {offsets = [0, 4], sizes = [8, 4], strides = [1, 1]} : vector<8x16xbf16> to vector<8x4xbf16>
    %865 = vector.extract_strided_slice %842 {offsets = [0, 4], sizes = [8, 4], strides = [1, 1]} : vector<8x16xbf16> to vector<8x4xbf16>
    %cst_429 = arith.constant dense<0.000000e+00> : vector<64x8xf32>
    %866 = tpu.matmul %863, %864, %cst_429 {dimension_numbers = #tpu.dot_dimension_numbers<[1], [1], [0], [0], [0, 0, 1, 0], [], []>} : vector<64x4xbf16>, vector<8x4xbf16>, vector<64x8xf32> -> vector<64x8xf32>
    %cst_430 = arith.constant 5.000000e-01 : f32
    %867 = vector.broadcast %cst_430 : f32 to vector<64x8xf32>
    %868 = arith.mulf %866, %867 : vector<64x8xf32>
    %cst_431 = arith.constant dense<0xFF800000> : vector<64xf32>
    %869 = vector.multi_reduction <maximumf>, %868, %cst_431 [1] : vector<64x8xf32> to vector<64xf32>
    %870 = vector.shape_cast %869 : vector<64xf32> to vector<64x1xf32>
    %871 = vector.broadcast %870 : vector<64x1xf32> to vector<64x8xf32>
    %872 = arith.subf %868, %871 : vector<64x8xf32>
    %873 = math.exp %872 : vector<64x8xf32>
    %cst_432 = arith.constant dense<0.000000e+00> : vector<64xf32>
    %874 = vector.multi_reduction <add>, %873, %cst_432 [1] : vector<64x8xf32> to vector<64xf32>
    %875 = vector.shape_cast %874 : vector<64xf32> to vector<64x1xf32>
    %876 = tpu.reciprocal %875 {approx = true} : vector<64x1xf32> -> vector<64x1xf32>
    %877 = vector.broadcast %876 : vector<64x1xf32> to vector<64x8xf32>
    %878 = arith.mulf %873, %877 : vector<64x8xf32>
    %879 = arith.truncf %878 : vector<64x8xf32> to vector<64x8xbf16>
    %cst_433 = arith.constant dense<0.000000e+00> : vector<64x4xf32>
    %880 = tpu.matmul %879, %865, %cst_433 {dimension_numbers = #tpu.dot_dimension_numbers<[1], [0], [0], [1], [0, 0, 1, 1], [], []>} : vector<64x8xbf16>, vector<8x4xbf16>, vector<64x4xf32> -> vector<64x4xf32>
    %881 = arith.truncf %880 : vector<64x4xf32> to vector<64x4xbf16>
    %c0_434 = arith.constant 0 : index
    %c4_435 = arith.constant 4 : index
    %882 = vector.load %arg53[%c0_434, %c4_435] : memref<64x32xbf16, #tpu.memory_space<vmem>>, vector<64x4xbf16>
    tpu.vector_store %arg53[%c0_434, %c4_435], %881 {strides = array<i32>} : memref<64x32xbf16, #tpu.memory_space<vmem>>, vector<64x4xbf16>,
    %883 = vector.extract_strided_slice %828 {offsets = [0, 8], sizes = [64, 4], strides = [1, 1]} : vector<64x16xbf16> to vector<64x4xbf16>
    %884 = vector.extract_strided_slice %835 {offsets = [0, 8], sizes = [8, 4], strides = [1, 1]} : vector<8x16xbf16> to vector<8x4xbf16>
    %885 = vector.extract_strided_slice %842 {offsets = [0, 8], sizes = [8, 4], strides = [1, 1]} : vector<8x16xbf16> to vector<8x4xbf16>
    %cst_436 = arith.constant dense<0.000000e+00> : vector<64x8xf32>
    %886 = tpu.matmul %883, %884, %cst_436 {dimension_numbers = #tpu.dot_dimension_numbers<[1], [1], [0], [0], [0, 0, 1, 0], [], []>} : vector<64x4xbf16>, vector<8x4xbf16>, vector<64x8xf32> -> vector<64x8xf32>
    %cst_437 = arith.constant 5.000000e-01 : f32
    %887 = vector.broadcast %cst_437 : f32 to vector<64x8xf32>
    %888 = arith.mulf %886, %887 : vector<64x8xf32>
    %cst_438 = arith.constant dense<0xFF800000> : vector<64xf32>
    %889 = vector.multi_reduction <maximumf>, %888, %cst_438 [1] : vector<64x8xf32> to vector<64xf32>
    %890 = vector.shape_cast %889 : vector<64xf32> to vector<64x1xf32>
    %891 = vector.broadcast %890 : vector<64x1xf32> to vector<64x8xf32>
    %892 = arith.subf %888, %891 : vector<64x8xf32>
    %893 = math.exp %892 : vector<64x8xf32>
    %cst_439 = arith.constant dense<0.000000e+00> : vector<64xf32>
    %894 = vector.multi_reduction <add>, %893, %cst_439 [1] : vector<64x8xf32> to vector<64xf32>
    %895 = vector.shape_cast %894 : vector<64xf32> to vector<64x1xf32>
    %896 = tpu.reciprocal %895 {approx = true} : vector<64x1xf32> -> vector<64x1xf32>
    %897 = vector.broadcast %896 : vector<64x1xf32> to vector<64x8xf32>
    %898 = arith.mulf %893, %897 : vector<64x8xf32>
    %899 = arith.truncf %898 : vector<64x8xf32> to vector<64x8xbf16>
    %cst_440 = arith.constant dense<0.000000e+00> : vector<64x4xf32>
    %900 = tpu.matmul %899, %885, %cst_440 {dimension_numbers = #tpu.dot_dimension_numbers<[1], [0], [0], [1], [0, 0, 1, 1], [], []>} : vector<64x8xbf16>, vector<8x4xbf16>, vector<64x4xf32> -> vector<64x4xf32>
    %901 = arith.truncf %900 : vector<64x4xf32> to vector<64x4xbf16>
    %c0_441 = arith.constant 0 : index
    %c8_442 = arith.constant 8 : index
    %902 = vector.load %arg53[%c0_441, %c8_442] : memref<64x32xbf16, #tpu.memory_space<vmem>>, vector<64x4xbf16>
    tpu.vector_store %arg53[%c0_441, %c8_442], %901 {strides = array<i32>} : memref<64x32xbf16, #tpu.memory_space<vmem>>, vector<64x4xbf16>,
    %903 = vector.extract_strided_slice %828 {offsets = [0, 12], sizes = [64, 4], strides = [1, 1]} : vector<64x16xbf16> to vector<64x4xbf16>
    %904 = vector.extract_strided_slice %835 {offsets = [0, 12], sizes = [8, 4], strides = [1, 1]} : vector<8x16xbf16> to vector<8x4xbf16>
    %905 = vector.extract_strided_slice %842 {offsets = [0, 12], sizes = [8, 4], strides = [1, 1]} : vector<8x16xbf16> to vector<8x4xbf16>
    %cst_443 = arith.constant dense<0.000000e+00> : vector<64x8xf32>
    %906 = tpu.matmul %903, %904, %cst_443 {dimension_numbers = #tpu.dot_dimension_numbers<[1], [1], [0], [0], [0, 0, 1, 0], [], []>} : vector<64x4xbf16>, vector<8x4xbf16>, vector<64x8xf32> -> vector<64x8xf32>
    %cst_444 = arith.constant 5.000000e-01 : f32
    %907 = vector.broadcast %cst_444 : f32 to vector<64x8xf32>
    %908 = arith.mulf %906, %907 : vector<64x8xf32>
    %cst_445 = arith.constant dense<0xFF800000> : vector<64xf32>
    %909 = vector.multi_reduction <maximumf>, %908, %cst_445 [1] : vector<64x8xf32> to vector<64xf32>
    %910 = vector.shape_cast %909 : vector<64xf32> to vector<64x1xf32>
    %911 = vector.broadcast %910 : vector<64x1xf32> to vector<64x8xf32>
    %912 = arith.subf %908, %911 : vector<64x8xf32>
    %913 = math.exp %912 : vector<64x8xf32>
    %cst_446 = arith.constant dense<0.000000e+00> : vector<64xf32>
    %914 = vector.multi_reduction <add>, %913, %cst_446 [1] : vector<64x8xf32> to vector<64xf32>
    %915 = vector.shape_cast %914 : vector<64xf32> to vector<64x1xf32>
    %916 = tpu.reciprocal %915 {approx = true} : vector<64x1xf32> -> vector<64x1xf32>
    %917 = vector.broadcast %916 : vector<64x1xf32> to vector<64x8xf32>
    %918 = arith.mulf %913, %917 : vector<64x8xf32>
    %919 = arith.truncf %918 : vector<64x8xf32> to vector<64x8xbf16>
    %cst_447 = arith.constant dense<0.000000e+00> : vector<64x4xf32>
    %920 = tpu.matmul %919, %905, %cst_447 {dimension_numbers = #tpu.dot_dimension_numbers<[1], [0], [0], [1], [0, 0, 1, 1], [], []>} : vector<64x8xbf16>, vector<8x4xbf16>, vector<64x4xf32> -> vector<64x4xf32>
    %921 = arith.truncf %920 : vector<64x4xf32> to vector<64x4xbf16>
    %c0_448 = arith.constant 0 : index
    %c12_449 = arith.constant 12 : index
    %922 = vector.load %arg53[%c0_448, %c12_449] : memref<64x32xbf16, #tpu.memory_space<vmem>>, vector<64x4xbf16>
    tpu.vector_store %arg53[%c0_448, %c12_449], %921 {strides = array<i32>} : memref<64x32xbf16, #tpu.memory_space<vmem>>, vector<64x4xbf16>,
    %c0_450 = arith.constant 0 : index
    %c0_451 = arith.constant 0 : index
    %923 = vector.load %arg53[%c0_450, %c0_451] : memref<64x32xbf16, #tpu.memory_space<vmem>>, vector<64x16xbf16>
    %cst_452 = arith.constant dense<0.000000e+00> : vector<64x32xf32>
    %924 = tpu.matmul %923, %821, %cst_452 {dimension_numbers = #tpu.dot_dimension_numbers<[1], [0], [0], [1], [0, 0, 1, 1], [], []>} : vector<64x16xbf16>, vector<16x32xbf16>, vector<64x32xf32> -> vector<64x32xf32>
    %c1_453 = arith.constant 1 : index
    %c0_454 = arith.constant 0 : index
    %c0_455 = arith.constant 0 : index
    %925 = vector.load %arg13[%c1_453, %c0_454, %c0_455] : memref<2x1x32xf32, #tpu.memory_space<vmem>>, vector<1x1x32xf32>
    %926 = vector.shape_cast %925 : vector<1x1x32xf32> to vector<1x32xf32>
    %927 = vector.broadcast %926 : vector<1x32xf32> to vector<64x32xf32>
    %928 = arith.addf %924, %927 : vector<64x32xf32>
    %929 = arith.addf %479, %928 : vector<64x32xf32>
    %c1_456 = arith.constant 1 : index
    %c0_457 = arith.constant 0 : index
    %c0_458 = arith.constant 0 : index
    %930 = vector.load %arg31[%c1_456, %c0_457, %c0_458] : memref<2x1x32xf32, #tpu.memory_space<vmem>>, vector<1x1x32xf32>
    %931 = vector.shape_cast %930 : vector<1x1x32xf32> to vector<1x32xf32>
    %c1_459 = arith.constant 1 : index
    %c0_460 = arith.constant 0 : index
    %c0_461 = arith.constant 0 : index
    %932 = vector.load %arg30[%c1_459, %c0_460, %c0_461] : memref<2x1x32xf32, #tpu.memory_space<vmem>>, vector<1x1x32xf32>
    %933 = vector.shape_cast %932 : vector<1x1x32xf32> to vector<1x32xf32>
    %cst_462 = arith.constant dense<0.000000e+00> : vector<64xf32>
    %934 = vector.multi_reduction <add>, %929, %cst_462 [1] : vector<64x32xf32> to vector<64xf32>
    %935 = vector.shape_cast %934 : vector<64xf32> to vector<64x1xf32>
    %cst_463 = arith.constant 3.200000e+01 : f32
    %936 = vector.broadcast %cst_463 : f32 to vector<64x1xf32>
    %937 = arith.divf %935, %936 : vector<64x1xf32>
    %938 = vector.broadcast %937 : vector<64x1xf32> to vector<64x32xf32>
    %939 = arith.subf %929, %938 : vector<64x32xf32>
    %940 = arith.mulf %939, %939 : vector<64x32xf32>
    %cst_464 = arith.constant dense<0.000000e+00> : vector<64xf32>
    %941 = vector.multi_reduction <add>, %940, %cst_464 [1] : vector<64x32xf32> to vector<64xf32>
    %942 = vector.shape_cast %941 : vector<64xf32> to vector<64x1xf32>
    %cst_465 = arith.constant 3.200000e+01 : f32
    %943 = vector.broadcast %cst_465 : f32 to vector<64x1xf32>
    %944 = arith.divf %942, %943 : vector<64x1xf32>
    %945 = vector.broadcast %937 : vector<64x1xf32> to vector<64x32xf32>
    %946 = arith.subf %929, %945 : vector<64x32xf32>
    %cst_466 = arith.constant 9.99999974E-6 : f32
    %947 = vector.broadcast %cst_466 : f32 to vector<64x1xf32>
    %948 = arith.addf %944, %947 : vector<64x1xf32>
    %949 = math.rsqrt %948 : vector<64x1xf32>
    %950 = vector.broadcast %949 : vector<64x1xf32> to vector<64x32xf32>
    %951 = arith.mulf %946, %950 : vector<64x32xf32>
    %952 = vector.broadcast %931 : vector<1x32xf32> to vector<64x32xf32>
    %953 = arith.mulf %951, %952 : vector<64x32xf32>
    %954 = vector.broadcast %933 : vector<1x32xf32> to vector<64x32xf32>
    %955 = arith.addf %953, %954 : vector<64x32xf32>
    %956 = arith.addf %811, %1 : vector<8x32xf32>
    %957 = arith.addf %955, %3 : vector<64x32xf32>
    %c0_467 = arith.constant 0 : index
    %c0_468 = arith.constant 0 : index
    %c0_469 = arith.constant 0 : index
    %958 = vector.load %arg10[%c0_467, %c0_468, %c0_469] : memref<1x32x16xbf16, #tpu.memory_space<vmem>>, vector<1x32x16xbf16>
    %959 = vector.shape_cast %958 : vector<1x32x16xbf16> to vector<32x16xbf16>
    %c0_470 = arith.constant 0 : index
    %c0_471 = arith.constant 0 : index
    %c0_472 = arith.constant 0 : index
    %960 = vector.load %arg8[%c0_470, %c0_471, %c0_472] : memref<1x32x16xbf16, #tpu.memory_space<vmem>>, vector<1x32x16xbf16>
    %961 = vector.shape_cast %960 : vector<1x32x16xbf16> to vector<32x16xbf16>
    %c0_473 = arith.constant 0 : index
    %c0_474 = arith.constant 0 : index
    %c0_475 = arith.constant 0 : index
    %962 = vector.load %arg11[%c0_473, %c0_474, %c0_475] : memref<1x32x16xbf16, #tpu.memory_space<vmem>>, vector<1x32x16xbf16>
    %963 = vector.shape_cast %962 : vector<1x32x16xbf16> to vector<32x16xbf16>
    %c0_476 = arith.constant 0 : index
    %c0_477 = arith.constant 0 : index
    %c0_478 = arith.constant 0 : index
    %964 = vector.load %arg9[%c0_476, %c0_477, %c0_478] : memref<1x16x32xbf16, #tpu.memory_space<vmem>>, vector<1x16x32xbf16>
    %965 = vector.shape_cast %964 : vector<1x16x32xbf16> to vector<16x32xbf16>
    %966 = arith.truncf %956 : vector<8x32xf32> to vector<8x32xbf16>
    %cst_479 = arith.constant dense<0.000000e+00> : vector<8x16xf32>
    %967 = tpu.matmul %966, %959, %cst_479 {dimension_numbers = #tpu.dot_dimension_numbers<[1], [0], [0], [1], [0, 0, 1, 1], [], []>} : vector<8x32xbf16>, vector<32x16xbf16>, vector<8x16xf32> -> vector<8x16xf32>
    %c0_480 = arith.constant 0 : index
    %c0_481 = arith.constant 0 : index
    %c0_482 = arith.constant 0 : index
    %968 = vector.load %arg6[%c0_480, %c0_481, %c0_482] : memref<1x1x16xf32, #tpu.memory_space<vmem>>, vector<1x1x16xf32>
    %969 = vector.shape_cast %968 : vector<1x1x16xf32> to vector<1x16xf32>
    %970 = vector.broadcast %969 : vector<1x16xf32> to vector<8x16xf32>
    %971 = arith.addf %967, %970 : vector<8x16xf32>
    %972 = arith.truncf %971 : vector<8x16xf32> to vector<8x16xbf16>
    %973 = arith.truncf %957 : vector<64x32xf32> to vector<64x32xbf16>
    %cst_483 = arith.constant dense<0.000000e+00> : vector<64x16xf32>
    %974 = tpu.matmul %973, %961, %cst_483 {dimension_numbers = #tpu.dot_dimension_numbers<[1], [0], [0], [1], [0, 0, 1, 1], [], []>} : vector<64x32xbf16>, vector<32x16xbf16>, vector<64x16xf32> -> vector<64x16xf32>
    %c0_484 = arith.constant 0 : index
    %c0_485 = arith.constant 0 : index
    %c0_486 = arith.constant 0 : index
    %975 = vector.load %arg4[%c0_484, %c0_485, %c0_486] : memref<1x1x16xf32, #tpu.memory_space<vmem>>, vector<1x1x16xf32>
    %976 = vector.shape_cast %975 : vector<1x1x16xf32> to vector<1x16xf32>
    %977 = vector.broadcast %976 : vector<1x16xf32> to vector<64x16xf32>
    %978 = arith.addf %974, %977 : vector<64x16xf32>
    %979 = arith.truncf %978 : vector<64x16xf32> to vector<64x16xbf16>
    %980 = arith.truncf %955 : vector<64x32xf32> to vector<64x32xbf16>
    %cst_487 = arith.constant dense<0.000000e+00> : vector<64x16xf32>
    %981 = tpu.matmul %980, %963, %cst_487 {dimension_numbers = #tpu.dot_dimension_numbers<[1], [0], [0], [1], [0, 0, 1, 1], [], []>} : vector<64x32xbf16>, vector<32x16xbf16>, vector<64x16xf32> -> vector<64x16xf32>
    %c0_488 = arith.constant 0 : index
    %c0_489 = arith.constant 0 : index
    %c0_490 = arith.constant 0 : index
    %982 = vector.load %arg7[%c0_488, %c0_489, %c0_490] : memref<1x1x16xf32, #tpu.memory_space<vmem>>, vector<1x1x16xf32>
    %983 = vector.shape_cast %982 : vector<1x1x16xf32> to vector<1x16xf32>
    %984 = vector.broadcast %983 : vector<1x16xf32> to vector<64x16xf32>
    %985 = arith.addf %981, %984 : vector<64x16xf32>
    %986 = arith.truncf %985 : vector<64x16xf32> to vector<64x16xbf16>
    %987 = vector.extract_strided_slice %972 {offsets = [0, 0], sizes = [8, 4], strides = [1, 1]} : vector<8x16xbf16> to vector<8x4xbf16>
    %988 = vector.extract_strided_slice %979 {offsets = [0, 0], sizes = [64, 4], strides = [1, 1]} : vector<64x16xbf16> to vector<64x4xbf16>
    %989 = vector.extract_strided_slice %986 {offsets = [0, 0], sizes = [64, 4], strides = [1, 1]} : vector<64x16xbf16> to vector<64x4xbf16>
    %cst_491 = arith.constant dense<0.000000e+00> : vector<8x64xf32>
    %990 = tpu.matmul %987, %988, %cst_491 {dimension_numbers = #tpu.dot_dimension_numbers<[1], [1], [0], [0], [0, 0, 1, 0], [], []>} : vector<8x4xbf16>, vector<64x4xbf16>, vector<8x64xf32> -> vector<8x64xf32>
    %cst_492 = arith.constant 5.000000e-01 : f32
    %991 = vector.broadcast %cst_492 : f32 to vector<8x64xf32>
    %992 = arith.mulf %990, %991 : vector<8x64xf32>
    %cst_493 = arith.constant dense<0xFF800000> : vector<8xf32>
    %993 = vector.multi_reduction <maximumf>, %992, %cst_493 [1] : vector<8x64xf32> to vector<8xf32>
    %994 = vector.shape_cast %993 : vector<8xf32> to vector<8x1xf32>
    %995 = vector.broadcast %994 : vector<8x1xf32> to vector<8x64xf32>
    %996 = arith.subf %992, %995 : vector<8x64xf32>
    %997 = math.exp %996 : vector<8x64xf32>
    %cst_494 = arith.constant dense<0.000000e+00> : vector<8xf32>
    %998 = vector.multi_reduction <add>, %997, %cst_494 [1] : vector<8x64xf32> to vector<8xf32>
    %999 = vector.shape_cast %998 : vector<8xf32> to vector<8x1xf32>
    %1000 = tpu.reciprocal %999 {approx = true} : vector<8x1xf32> -> vector<8x1xf32>
    %1001 = vector.broadcast %1000 : vector<8x1xf32> to vector<8x64xf32>
    %1002 = arith.mulf %997, %1001 : vector<8x64xf32>
    %1003 = arith.truncf %1002 : vector<8x64xf32> to vector<8x64xbf16>
    %cst_495 = arith.constant dense<0.000000e+00> : vector<8x4xf32>
    %1004 = tpu.matmul %1003, %989, %cst_495 {dimension_numbers = #tpu.dot_dimension_numbers<[1], [0], [0], [1], [0, 0, 1, 1], [], []>} : vector<8x64xbf16>, vector<64x4xbf16>, vector<8x4xf32> -> vector<8x4xf32>
    %1005 = arith.truncf %1004 : vector<8x4xf32> to vector<8x4xbf16>
    %c0_496 = arith.constant 0 : index
    %c0_497 = arith.constant 0 : index
    %1006 = vector.load %arg52[%c0_496, %c0_497] : memref<8x32xbf16, #tpu.memory_space<vmem>>, vector<8x4xbf16>
    tpu.vector_store %arg52[%c0_496, %c0_497], %1005 {strides = array<i32>} : memref<8x32xbf16, #tpu.memory_space<vmem>>, vector<8x4xbf16>,
    %1007 = vector.extract_strided_slice %972 {offsets = [0, 4], sizes = [8, 4], strides = [1, 1]} : vector<8x16xbf16> to vector<8x4xbf16>
    %1008 = vector.extract_strided_slice %979 {offsets = [0, 4], sizes = [64, 4], strides = [1, 1]} : vector<64x16xbf16> to vector<64x4xbf16>
    %1009 = vector.extract_strided_slice %986 {offsets = [0, 4], sizes = [64, 4], strides = [1, 1]} : vector<64x16xbf16> to vector<64x4xbf16>
    %cst_498 = arith.constant dense<0.000000e+00> : vector<8x64xf32>
    %1010 = tpu.matmul %1007, %1008, %cst_498 {dimension_numbers = #tpu.dot_dimension_numbers<[1], [1], [0], [0], [0, 0, 1, 0], [], []>} : vector<8x4xbf16>, vector<64x4xbf16>, vector<8x64xf32> -> vector<8x64xf32>
    %cst_499 = arith.constant 5.000000e-01 : f32
    %1011 = vector.broadcast %cst_499 : f32 to vector<8x64xf32>
    %1012 = arith.mulf %1010, %1011 : vector<8x64xf32>
    %cst_500 = arith.constant dense<0xFF800000> : vector<8xf32>
    %1013 = vector.multi_reduction <maximumf>, %1012, %cst_500 [1] : vector<8x64xf32> to vector<8xf32>
    %1014 = vector.shape_cast %1013 : vector<8xf32> to vector<8x1xf32>
    %1015 = vector.broadcast %1014 : vector<8x1xf32> to vector<8x64xf32>
    %1016 = arith.subf %1012, %1015 : vector<8x64xf32>
    %1017 = math.exp %1016 : vector<8x64xf32>
    %cst_501 = arith.constant dense<0.000000e+00> : vector<8xf32>
    %1018 = vector.multi_reduction <add>, %1017, %cst_501 [1] : vector<8x64xf32> to vector<8xf32>
    %1019 = vector.shape_cast %1018 : vector<8xf32> to vector<8x1xf32>
    %1020 = tpu.reciprocal %1019 {approx = true} : vector<8x1xf32> -> vector<8x1xf32>
    %1021 = vector.broadcast %1020 : vector<8x1xf32> to vector<8x64xf32>
    %1022 = arith.mulf %1017, %1021 : vector<8x64xf32>
    %1023 = arith.truncf %1022 : vector<8x64xf32> to vector<8x64xbf16>
    %cst_502 = arith.constant dense<0.000000e+00> : vector<8x4xf32>
    %1024 = tpu.matmul %1023, %1009, %cst_502 {dimension_numbers = #tpu.dot_dimension_numbers<[1], [0], [0], [1], [0, 0, 1, 1], [], []>} : vector<8x64xbf16>, vector<64x4xbf16>, vector<8x4xf32> -> vector<8x4xf32>
    %1025 = arith.truncf %1024 : vector<8x4xf32> to vector<8x4xbf16>
    %c0_503 = arith.constant 0 : index
    %c4_504 = arith.constant 4 : index
    %1026 = vector.load %arg52[%c0_503, %c4_504] : memref<8x32xbf16, #tpu.memory_space<vmem>>, vector<8x4xbf16>
    tpu.vector_store %arg52[%c0_503, %c4_504], %1025 {strides = array<i32>} : memref<8x32xbf16, #tpu.memory_space<vmem>>, vector<8x4xbf16>,
    %1027 = vector.extract_strided_slice %972 {offsets = [0, 8], sizes = [8, 4], strides = [1, 1]} : vector<8x16xbf16> to vector<8x4xbf16>
    %1028 = vector.extract_strided_slice %979 {offsets = [0, 8], sizes = [64, 4], strides = [1, 1]} : vector<64x16xbf16> to vector<64x4xbf16>
    %1029 = vector.extract_strided_slice %986 {offsets = [0, 8], sizes = [64, 4], strides = [1, 1]} : vector<64x16xbf16> to vector<64x4xbf16>
    %cst_505 = arith.constant dense<0.000000e+00> : vector<8x64xf32>
    %1030 = tpu.matmul %1027, %1028, %cst_505 {dimension_numbers = #tpu.dot_dimension_numbers<[1], [1], [0], [0], [0, 0, 1, 0], [], []>} : vector<8x4xbf16>, vector<64x4xbf16>, vector<8x64xf32> -> vector<8x64xf32>
    %cst_506 = arith.constant 5.000000e-01 : f32
    %1031 = vector.broadcast %cst_506 : f32 to vector<8x64xf32>
    %1032 = arith.mulf %1030, %1031 : vector<8x64xf32>
    %cst_507 = arith.constant dense<0xFF800000> : vector<8xf32>
    %1033 = vector.multi_reduction <maximumf>, %1032, %cst_507 [1] : vector<8x64xf32> to vector<8xf32>
    %1034 = vector.shape_cast %1033 : vector<8xf32> to vector<8x1xf32>
    %1035 = vector.broadcast %1034 : vector<8x1xf32> to vector<8x64xf32>
    %1036 = arith.subf %1032, %1035 : vector<8x64xf32>
    %1037 = math.exp %1036 : vector<8x64xf32>
    %cst_508 = arith.constant dense<0.000000e+00> : vector<8xf32>
    %1038 = vector.multi_reduction <add>, %1037, %cst_508 [1] : vector<8x64xf32> to vector<8xf32>
    %1039 = vector.shape_cast %1038 : vector<8xf32> to vector<8x1xf32>
    %1040 = tpu.reciprocal %1039 {approx = true} : vector<8x1xf32> -> vector<8x1xf32>
    %1041 = vector.broadcast %1040 : vector<8x1xf32> to vector<8x64xf32>
    %1042 = arith.mulf %1037, %1041 : vector<8x64xf32>
    %1043 = arith.truncf %1042 : vector<8x64xf32> to vector<8x64xbf16>
    %cst_509 = arith.constant dense<0.000000e+00> : vector<8x4xf32>
    %1044 = tpu.matmul %1043, %1029, %cst_509 {dimension_numbers = #tpu.dot_dimension_numbers<[1], [0], [0], [1], [0, 0, 1, 1], [], []>} : vector<8x64xbf16>, vector<64x4xbf16>, vector<8x4xf32> -> vector<8x4xf32>
    %1045 = arith.truncf %1044 : vector<8x4xf32> to vector<8x4xbf16>
    %c0_510 = arith.constant 0 : index
    %c8_511 = arith.constant 8 : index
    %1046 = vector.load %arg52[%c0_510, %c8_511] : memref<8x32xbf16, #tpu.memory_space<vmem>>, vector<8x4xbf16>
    tpu.vector_store %arg52[%c0_510, %c8_511], %1045 {strides = array<i32>} : memref<8x32xbf16, #tpu.memory_space<vmem>>, vector<8x4xbf16>,
    %1047 = vector.extract_strided_slice %972 {offsets = [0, 12], sizes = [8, 4], strides = [1, 1]} : vector<8x16xbf16> to vector<8x4xbf16>
    %1048 = vector.extract_strided_slice %979 {offsets = [0, 12], sizes = [64, 4], strides = [1, 1]} : vector<64x16xbf16> to vector<64x4xbf16>
    %1049 = vector.extract_strided_slice %986 {offsets = [0, 12], sizes = [64, 4], strides = [1, 1]} : vector<64x16xbf16> to vector<64x4xbf16>
    %cst_512 = arith.constant dense<0.000000e+00> : vector<8x64xf32>
    %1050 = tpu.matmul %1047, %1048, %cst_512 {dimension_numbers = #tpu.dot_dimension_numbers<[1], [1], [0], [0], [0, 0, 1, 0], [], []>} : vector<8x4xbf16>, vector<64x4xbf16>, vector<8x64xf32> -> vector<8x64xf32>
    %cst_513 = arith.constant 5.000000e-01 : f32
    %1051 = vector.broadcast %cst_513 : f32 to vector<8x64xf32>
    %1052 = arith.mulf %1050, %1051 : vector<8x64xf32>
    %cst_514 = arith.constant dense<0xFF800000> : vector<8xf32>
    %1053 = vector.multi_reduction <maximumf>, %1052, %cst_514 [1] : vector<8x64xf32> to vector<8xf32>
    %1054 = vector.shape_cast %1053 : vector<8xf32> to vector<8x1xf32>
    %1055 = vector.broadcast %1054 : vector<8x1xf32> to vector<8x64xf32>
    %1056 = arith.subf %1052, %1055 : vector<8x64xf32>
    %1057 = math.exp %1056 : vector<8x64xf32>
    %cst_515 = arith.constant dense<0.000000e+00> : vector<8xf32>
    %1058 = vector.multi_reduction <add>, %1057, %cst_515 [1] : vector<8x64xf32> to vector<8xf32>
    %1059 = vector.shape_cast %1058 : vector<8xf32> to vector<8x1xf32>
    %1060 = tpu.reciprocal %1059 {approx = true} : vector<8x1xf32> -> vector<8x1xf32>
    %1061 = vector.broadcast %1060 : vector<8x1xf32> to vector<8x64xf32>
    %1062 = arith.mulf %1057, %1061 : vector<8x64xf32>
    %1063 = arith.truncf %1062 : vector<8x64xf32> to vector<8x64xbf16>
    %cst_516 = arith.constant dense<0.000000e+00> : vector<8x4xf32>
    %1064 = tpu.matmul %1063, %1049, %cst_516 {dimension_numbers = #tpu.dot_dimension_numbers<[1], [0], [0], [1], [0, 0, 1, 1], [], []>} : vector<8x64xbf16>, vector<64x4xbf16>, vector<8x4xf32> -> vector<8x4xf32>
    %1065 = arith.truncf %1064 : vector<8x4xf32> to vector<8x4xbf16>
    %c0_517 = arith.constant 0 : index
    %c12_518 = arith.constant 12 : index
    %1066 = vector.load %arg52[%c0_517, %c12_518] : memref<8x32xbf16, #tpu.memory_space<vmem>>, vector<8x4xbf16>
    tpu.vector_store %arg52[%c0_517, %c12_518], %1065 {strides = array<i32>} : memref<8x32xbf16, #tpu.memory_space<vmem>>, vector<8x4xbf16>,
    %c0_519 = arith.constant 0 : index
    %c0_520 = arith.constant 0 : index
    %1067 = vector.load %arg52[%c0_519, %c0_520] : memref<8x32xbf16, #tpu.memory_space<vmem>>, vector<8x16xbf16>
    %cst_521 = arith.constant dense<0.000000e+00> : vector<8x32xf32>
    %1068 = tpu.matmul %1067, %965, %cst_521 {dimension_numbers = #tpu.dot_dimension_numbers<[1], [0], [0], [1], [0, 0, 1, 1], [], []>} : vector<8x16xbf16>, vector<16x32xbf16>, vector<8x32xf32> -> vector<8x32xf32>
    %c0_522 = arith.constant 0 : index
    %c0_523 = arith.constant 0 : index
    %c0_524 = arith.constant 0 : index
    %1069 = vector.load %arg5[%c0_522, %c0_523, %c0_524] : memref<1x1x32xf32, #tpu.memory_space<vmem>>, vector<1x1x32xf32>
    %1070 = vector.shape_cast %1069 : vector<1x1x32xf32> to vector<1x32xf32>
    %1071 = vector.broadcast %1070 : vector<1x32xf32> to vector<8x32xf32>
    %1072 = arith.addf %1068, %1071 : vector<8x32xf32>
    %1073 = arith.addf %811, %1072 : vector<8x32xf32>
    %c0_525 = arith.constant 0 : index
    %c0_526 = arith.constant 0 : index
    %c0_527 = arith.constant 0 : index
    %1074 = vector.load %arg33[%c0_525, %c0_526, %c0_527] : memref<1x1x32xf32, #tpu.memory_space<vmem>>, vector<1x1x32xf32>
    %1075 = vector.shape_cast %1074 : vector<1x1x32xf32> to vector<1x32xf32>
    %c0_528 = arith.constant 0 : index
    %c0_529 = arith.constant 0 : index
    %c0_530 = arith.constant 0 : index
    %1076 = vector.load %arg32[%c0_528, %c0_529, %c0_530] : memref<1x1x32xf32, #tpu.memory_space<vmem>>, vector<1x1x32xf32>
    %1077 = vector.shape_cast %1076 : vector<1x1x32xf32> to vector<1x32xf32>
    %cst_531 = arith.constant dense<0.000000e+00> : vector<8xf32>
    %1078 = vector.multi_reduction <add>, %1073, %cst_531 [1] : vector<8x32xf32> to vector<8xf32>
    %1079 = vector.shape_cast %1078 : vector<8xf32> to vector<8x1xf32>
    %cst_532 = arith.constant 3.200000e+01 : f32
    %1080 = vector.broadcast %cst_532 : f32 to vector<8x1xf32>
    %1081 = arith.divf %1079, %1080 : vector<8x1xf32>
    %1082 = vector.broadcast %1081 : vector<8x1xf32> to vector<8x32xf32>
    %1083 = arith.subf %1073, %1082 : vector<8x32xf32>
    %1084 = arith.mulf %1083, %1083 : vector<8x32xf32>
    %cst_533 = arith.constant dense<0.000000e+00> : vector<8xf32>
    %1085 = vector.multi_reduction <add>, %1084, %cst_533 [1] : vector<8x32xf32> to vector<8xf32>
    %1086 = vector.shape_cast %1085 : vector<8xf32> to vector<8x1xf32>
    %cst_534 = arith.constant 3.200000e+01 : f32
    %1087 = vector.broadcast %cst_534 : f32 to vector<8x1xf32>
    %1088 = arith.divf %1086, %1087 : vector<8x1xf32>
    %1089 = vector.broadcast %1081 : vector<8x1xf32> to vector<8x32xf32>
    %1090 = arith.subf %1073, %1089 : vector<8x32xf32>
    %cst_535 = arith.constant 9.99999974E-6 : f32
    %1091 = vector.broadcast %cst_535 : f32 to vector<8x1xf32>
    %1092 = arith.addf %1088, %1091 : vector<8x1xf32>
    %1093 = math.rsqrt %1092 : vector<8x1xf32>
    %1094 = vector.broadcast %1093 : vector<8x1xf32> to vector<8x32xf32>
    %1095 = arith.mulf %1090, %1094 : vector<8x32xf32>
    %1096 = vector.broadcast %1075 : vector<1x32xf32> to vector<8x32xf32>
    %1097 = arith.mulf %1095, %1096 : vector<8x32xf32>
    %1098 = vector.broadcast %1077 : vector<1x32xf32> to vector<8x32xf32>
    %1099 = arith.addf %1097, %1098 : vector<8x32xf32>
    %c0_536 = arith.constant 0 : index
    %c0_537 = arith.constant 0 : index
    %c0_538 = arith.constant 0 : index
    %1100 = vector.load %arg50[%c0_536, %c0_537, %c0_538] : memref<1x8x32xf32, #tpu.memory_space<vmem>>, vector<1x8x32xf32>
    %1101 = vector.shape_cast %1100 : vector<1x8x32xf32> to vector<8x32xf32>
    %1102 = vector.shape_cast %1099 : vector<8x32xf32> to vector<1x8x32xf32>
    tpu.vector_store %arg50[%c0_536, %c0_537, %c0_538], %1102 {strides = array<i32>} : memref<1x8x32xf32, #tpu.memory_space<vmem>>, vector<1x8x32xf32>,
    %c0_539 = arith.constant 0 : index
    %c0_540 = arith.constant 0 : index
    %c0_541 = arith.constant 0 : index
    %1103 = vector.load %arg51[%c0_539, %c0_540, %c0_541] : memref<1x64x32xf32, #tpu.memory_space<vmem>>, vector<1x64x32xf32>
    %1104 = vector.shape_cast %1103 : vector<1x64x32xf32> to vector<64x32xf32>
    %1105 = vector.shape_cast %955 : vector<64x32xf32> to vector<1x64x32xf32>
    tpu.vector_store %arg51[%c0_539, %c0_540, %c0_541], %1105 {strides = array<i32>} : memref<1x64x32xf32, #tpu.memory_space<vmem>>, vector<1x64x32xf32>,
    return
  }
  func.func @transform_0(%arg0: i32) -> (i32, i32, i32) {
    %c0_i32 = arith.constant 0 : i32
    %c0_i32_0 = arith.constant 0 : i32
    %c0_i32_1 = arith.constant 0 : i32
    return %arg0, %c0_i32, %c0_i32_0 : i32, i32, i32
  }
  func.func @transform_1(%arg0: i32) -> (i32, i32, i32) {
    %c0_i32 = arith.constant 0 : i32
    %c0_i32_0 = arith.constant 0 : i32
    %c0_i32_1 = arith.constant 0 : i32
    return %arg0, %c0_i32, %c0_i32_0 : i32, i32, i32
  }
  func.func @transform_2(%arg0: i32) -> (i32, i32, i32) {
    %c0_i32 = arith.constant 0 : i32
    %c0_i32_0 = arith.constant 0 : i32
    %c0_i32_1 = arith.constant 0 : i32
    return %arg0, %c0_i32, %c0_i32_0 : i32, i32, i32
  }
  func.func @transform_3(%arg0: i32) -> (i32, i32, i32) {
    %c0_i32 = arith.constant 0 : i32
    %c0_i32_0 = arith.constant 0 : i32
    %c0_i32_1 = arith.constant 0 : i32
    %c0_i32_2 = arith.constant 0 : i32
    return %c0_i32, %c0_i32_0, %c0_i32_1 : i32, i32, i32
  }
  func.func @transform_4(%arg0: i32) -> (i32, i32, i32) {
    %c0_i32 = arith.constant 0 : i32
    %c0_i32_0 = arith.constant 0 : i32
    %c0_i32_1 = arith.constant 0 : i32
    %c0_i32_2 = arith.constant 0 : i32
    return %c0_i32, %c0_i32_0, %c0_i32_1 : i32, i32, i32
  }
  func.func @transform_5(%arg0: i32) -> (i32, i32, i32) {
    %c0_i32 = arith.constant 0 : i32
    %c0_i32_0 = arith.constant 0 : i32
    %c0_i32_1 = arith.constant 0 : i32
    %c0_i32_2 = arith.constant 0 : i32
    return %c0_i32, %c0_i32_0, %c0_i32_1 : i32, i32, i32
  }
  func.func @transform_6(%arg0: i32) -> (i32, i32, i32) {
    %c0_i32 = arith.constant 0 : i32
    %c0_i32_0 = arith.constant 0 : i32
    %c0_i32_1 = arith.constant 0 : i32
    %c0_i32_2 = arith.constant 0 : i32
    return %c0_i32, %c0_i32_0, %c0_i32_1 : i32, i32, i32
  }
  func.func @transform_7(%arg0: i32) -> (i32, i32, i32) {
    %c0_i32 = arith.constant 0 : i32
    %c0_i32_0 = arith.constant 0 : i32
    %c0_i32_1 = arith.constant 0 : i32
    %c0_i32_2 = arith.constant 0 : i32
    return %c0_i32, %c0_i32_0, %c0_i32_1 : i32, i32, i32
  }
  func.func @transform_8(%arg0: i32) -> (i32, i32, i32) {
    %c0_i32 = arith.constant 0 : i32
    %c0_i32_0 = arith.constant 0 : i32
    %c0_i32_1 = arith.constant 0 : i32
    %c0_i32_2 = arith.constant 0 : i32
    return %c0_i32, %c0_i32_0, %c0_i32_1 : i32, i32, i32
  }
  func.func @transform_9(%arg0: i32) -> (i32, i32, i32) {
    %c0_i32 = arith.constant 0 : i32
    %c0_i32_0 = arith.constant 0 : i32
    %c0_i32_1 = arith.constant 0 : i32
    %c0_i32_2 = arith.constant 0 : i32
    return %c0_i32, %c0_i32_0, %c0_i32_1 : i32, i32, i32
  }
  func.func @transform_10(%arg0: i32) -> (i32, i32, i32) {
    %c0_i32 = arith.constant 0 : i32
    %c0_i32_0 = arith.constant 0 : i32
    %c0_i32_1 = arith.constant 0 : i32
    %c0_i32_2 = arith.constant 0 : i32
    return %c0_i32, %c0_i32_0, %c0_i32_1 : i32, i32, i32
  }
  func.func @transform_11(%arg0: i32) -> (i32, i32, i32) {
    %c0_i32 = arith.constant 0 : i32
    %c0_i32_0 = arith.constant 0 : i32
    %c0_i32_1 = arith.constant 0 : i32
    %c0_i32_2 = arith.constant 0 : i32
    return %c0_i32, %c0_i32_0, %c0_i32_1 : i32, i32, i32
  }
  func.func @transform_12(%arg0: i32) -> (i32, i32, i32) {
    %c0_i32 = arith.constant 0 : i32
    %c0_i32_0 = arith.constant 0 : i32
    %c0_i32_1 = arith.constant 0 : i32
    %c0_i32_2 = arith.constant 0 : i32
    return %c0_i32, %c0_i32_0, %c0_i32_1 : i32, i32, i32
  }
  func.func @transform_13(%arg0: i32) -> (i32, i32, i32) {
    %c0_i32 = arith.constant 0 : i32
    %c0_i32_0 = arith.constant 0 : i32
    %c0_i32_1 = arith.constant 0 : i32
    %c0_i32_2 = arith.constant 0 : i32
    return %c0_i32, %c0_i32_0, %c0_i32_1 : i32, i32, i32
  }
  func.func @transform_14(%arg0: i32) -> (i32, i32, i32) {
    %c0_i32 = arith.constant 0 : i32
    %c0_i32_0 = arith.constant 0 : i32
    %c0_i32_1 = arith.constant 0 : i32
    %c0_i32_2 = arith.constant 0 : i32
    return %c0_i32, %c0_i32_0, %c0_i32_1 : i32, i32, i32
  }
  func.func @transform_15(%arg0: i32) -> (i32, i32, i32) {
    %c0_i32 = arith.constant 0 : i32
    %c0_i32_0 = arith.constant 0 : i32
    %c0_i32_1 = arith.constant 0 : i32
    %c0_i32_2 = arith.constant 0 : i32
    return %c0_i32, %c0_i32_0, %c0_i32_1 : i32, i32, i32
  }
  func.func @transform_16(%arg0: i32) -> (i32, i32, i32) {
    %c0_i32 = arith.constant 0 : i32
    %c0_i32_0 = arith.constant 0 : i32
    %c0_i32_1 = arith.constant 0 : i32
    %c0_i32_2 = arith.constant 0 : i32
    return %c0_i32, %c0_i32_0, %c0_i32_1 : i32, i32, i32
  }
  func.func @transform_17(%arg0: i32) -> (i32, i32, i32) {
    %c0_i32 = arith.constant 0 : i32
    %c0_i32_0 = arith.constant 0 : i32
    %c0_i32_1 = arith.constant 0 : i32
    %c0_i32_2 = arith.constant 0 : i32
    return %c0_i32, %c0_i32_0, %c0_i32_1 : i32, i32, i32
  }
  func.func @transform_18(%arg0: i32) -> (i32, i32, i32) {
    %c0_i32 = arith.constant 0 : i32
    %c0_i32_0 = arith.constant 0 : i32
    %c0_i32_1 = arith.constant 0 : i32
    %c0_i32_2 = arith.constant 0 : i32
    return %c0_i32, %c0_i32_0, %c0_i32_1 : i32, i32, i32
  }
  func.func @transform_19(%arg0: i32) -> (i32, i32, i32) {
    %c0_i32 = arith.constant 0 : i32
    %c0_i32_0 = arith.constant 0 : i32
    %c0_i32_1 = arith.constant 0 : i32
    %c0_i32_2 = arith.constant 0 : i32
    return %c0_i32, %c0_i32_0, %c0_i32_1 : i32, i32, i32
  }
  func.func @transform_20(%arg0: i32) -> (i32, i32, i32) {
    %c0_i32 = arith.constant 0 : i32
    %c0_i32_0 = arith.constant 0 : i32
    %c0_i32_1 = arith.constant 0 : i32
    %c0_i32_2 = arith.constant 0 : i32
    return %c0_i32, %c0_i32_0, %c0_i32_1 : i32, i32, i32
  }
  func.func @transform_21(%arg0: i32) -> (i32, i32, i32) {
    %c0_i32 = arith.constant 0 : i32
    %c0_i32_0 = arith.constant 0 : i32
    %c0_i32_1 = arith.constant 0 : i32
    %c0_i32_2 = arith.constant 0 : i32
    return %c0_i32, %c0_i32_0, %c0_i32_1 : i32, i32, i32
  }
  func.func @transform_22(%arg0: i32) -> (i32, i32, i32) {
    %c0_i32 = arith.constant 0 : i32
    %c0_i32_0 = arith.constant 0 : i32
    %c0_i32_1 = arith.constant 0 : i32
    %c0_i32_2 = arith.constant 0 : i32
    return %c0_i32, %c0_i32_0, %c0_i32_1 : i32, i32, i32
  }
  func.func @transform_23(%arg0: i32) -> (i32, i32, i32) {
    %c0_i32 = arith.constant 0 : i32
    %c0_i32_0 = arith.constant 0 : i32
    %c0_i32_1 = arith.constant 0 : i32
    %c0_i32_2 = arith.constant 0 : i32
    return %c0_i32, %c0_i32_0, %c0_i32_1 : i32, i32, i32
  }
  func.func @transform_24(%arg0: i32) -> (i32, i32, i32) {
    %c0_i32 = arith.constant 0 : i32
    %c0_i32_0 = arith.constant 0 : i32
    %c0_i32_1 = arith.constant 0 : i32
    %c0_i32_2 = arith.constant 0 : i32
    return %c0_i32, %c0_i32_0, %c0_i32_1 : i32, i32, i32
  }
  func.func @transform_25(%arg0: i32) -> (i32, i32, i32) {
    %c0_i32 = arith.constant 0 : i32
    %c0_i32_0 = arith.constant 0 : i32
    %c0_i32_1 = arith.constant 0 : i32
    %c0_i32_2 = arith.constant 0 : i32
    return %c0_i32, %c0_i32_0, %c0_i32_1 : i32, i32, i32
  }
  func.func @transform_26(%arg0: i32) -> (i32, i32, i32) {
    %c0_i32 = arith.constant 0 : i32
    %c0_i32_0 = arith.constant 0 : i32
    %c0_i32_1 = arith.constant 0 : i32
    %c0_i32_2 = arith.constant 0 : i32
    return %c0_i32, %c0_i32_0, %c0_i32_1 : i32, i32, i32
  }
  func.func @transform_27(%arg0: i32) -> (i32, i32, i32) {
    %c0_i32 = arith.constant 0 : i32
    %c0_i32_0 = arith.constant 0 : i32
    %c0_i32_1 = arith.constant 0 : i32
    %c0_i32_2 = arith.constant 0 : i32
    return %c0_i32, %c0_i32_0, %c0_i32_1 : i32, i32, i32
  }
  func.func @transform_28(%arg0: i32) -> (i32, i32, i32) {
    %c0_i32 = arith.constant 0 : i32
    %c0_i32_0 = arith.constant 0 : i32
    %c0_i32_1 = arith.constant 0 : i32
    %c0_i32_2 = arith.constant 0 : i32
    return %c0_i32, %c0_i32_0, %c0_i32_1 : i32, i32, i32
  }
  func.func @transform_29(%arg0: i32) -> (i32, i32, i32) {
    %c0_i32 = arith.constant 0 : i32
    %c0_i32_0 = arith.constant 0 : i32
    %c0_i32_1 = arith.constant 0 : i32
    %c0_i32_2 = arith.constant 0 : i32
    return %c0_i32, %c0_i32_0, %c0_i32_1 : i32, i32, i32
  }
  func.func @transform_30(%arg0: i32) -> (i32, i32, i32) {
    %c0_i32 = arith.constant 0 : i32
    %c0_i32_0 = arith.constant 0 : i32
    %c0_i32_1 = arith.constant 0 : i32
    %c0_i32_2 = arith.constant 0 : i32
    return %c0_i32, %c0_i32_0, %c0_i32_1 : i32, i32, i32
  }
  func.func @transform_31(%arg0: i32) -> (i32, i32, i32) {
    %c0_i32 = arith.constant 0 : i32
    %c0_i32_0 = arith.constant 0 : i32
    %c0_i32_1 = arith.constant 0 : i32
    %c0_i32_2 = arith.constant 0 : i32
    return %c0_i32, %c0_i32_0, %c0_i32_1 : i32, i32, i32
  }
  func.func @transform_32(%arg0: i32) -> (i32, i32, i32) {
    %c0_i32 = arith.constant 0 : i32
    %c0_i32_0 = arith.constant 0 : i32
    %c0_i32_1 = arith.constant 0 : i32
    %c0_i32_2 = arith.constant 0 : i32
    return %c0_i32, %c0_i32_0, %c0_i32_1 : i32, i32, i32
  }
  func.func @transform_33(%arg0: i32) -> (i32, i32, i32) {
    %c0_i32 = arith.constant 0 : i32
    %c0_i32_0 = arith.constant 0 : i32
    %c0_i32_1 = arith.constant 0 : i32
    %c0_i32_2 = arith.constant 0 : i32
    return %c0_i32, %c0_i32_0, %c0_i32_1 : i32, i32, i32
  }
  func.func @transform_34(%arg0: i32) -> (i32, i32, i32) {
    %c0_i32 = arith.constant 0 : i32
    %c0_i32_0 = arith.constant 0 : i32
    %c0_i32_1 = arith.constant 0 : i32
    %c0_i32_2 = arith.constant 0 : i32
    return %c0_i32, %c0_i32_0, %c0_i32_1 : i32, i32, i32
  }
  func.func @transform_35(%arg0: i32) -> (i32, i32, i32) {
    %c0_i32 = arith.constant 0 : i32
    %c0_i32_0 = arith.constant 0 : i32
    %c0_i32_1 = arith.constant 0 : i32
    %c0_i32_2 = arith.constant 0 : i32
    return %c0_i32, %c0_i32_0, %c0_i32_1 : i32, i32, i32
  }
  func.func @transform_36(%arg0: i32) -> (i32, i32, i32) {
    %c0_i32 = arith.constant 0 : i32
    %c0_i32_0 = arith.constant 0 : i32
    %c0_i32_1 = arith.constant 0 : i32
    %c0_i32_2 = arith.constant 0 : i32
    return %c0_i32, %c0_i32_0, %c0_i32_1 : i32, i32, i32
  }
  func.func @transform_37(%arg0: i32) -> (i32, i32, i32) {
    %c0_i32 = arith.constant 0 : i32
    %c0_i32_0 = arith.constant 0 : i32
    %c0_i32_1 = arith.constant 0 : i32
    %c0_i32_2 = arith.constant 0 : i32
    return %c0_i32, %c0_i32_0, %c0_i32_1 : i32, i32, i32
  }
  func.func @transform_38(%arg0: i32) -> (i32, i32, i32) {
    %c0_i32 = arith.constant 0 : i32
    %c0_i32_0 = arith.constant 0 : i32
    %c0_i32_1 = arith.constant 0 : i32
    %c0_i32_2 = arith.constant 0 : i32
    return %c0_i32, %c0_i32_0, %c0_i32_1 : i32, i32, i32
  }
  func.func @transform_39(%arg0: i32) -> (i32, i32, i32) {
    %c0_i32 = arith.constant 0 : i32
    %c0_i32_0 = arith.constant 0 : i32
    %c0_i32_1 = arith.constant 0 : i32
    %c0_i32_2 = arith.constant 0 : i32
    return %c0_i32, %c0_i32_0, %c0_i32_1 : i32, i32, i32
  }
  func.func @transform_40(%arg0: i32) -> (i32, i32, i32) {
    %c0_i32 = arith.constant 0 : i32
    %c0_i32_0 = arith.constant 0 : i32
    %c0_i32_1 = arith.constant 0 : i32
    %c0_i32_2 = arith.constant 0 : i32
    return %c0_i32, %c0_i32_0, %c0_i32_1 : i32, i32, i32
  }
  func.func @transform_41(%arg0: i32) -> (i32, i32, i32) {
    %c0_i32 = arith.constant 0 : i32
    %c0_i32_0 = arith.constant 0 : i32
    %c0_i32_1 = arith.constant 0 : i32
    %c0_i32_2 = arith.constant 0 : i32
    return %c0_i32, %c0_i32_0, %c0_i32_1 : i32, i32, i32
  }
  func.func @transform_42(%arg0: i32) -> (i32, i32, i32) {
    %c0_i32 = arith.constant 0 : i32
    %c0_i32_0 = arith.constant 0 : i32
    %c0_i32_1 = arith.constant 0 : i32
    %c0_i32_2 = arith.constant 0 : i32
    return %c0_i32, %c0_i32_0, %c0_i32_1 : i32, i32, i32
  }
  func.func @transform_43(%arg0: i32) -> (i32, i32, i32) {
    %c0_i32 = arith.constant 0 : i32
    %c0_i32_0 = arith.constant 0 : i32
    %c0_i32_1 = arith.constant 0 : i32
    %c0_i32_2 = arith.constant 0 : i32
    return %c0_i32, %c0_i32_0, %c0_i32_1 : i32, i32, i32
  }
  func.func @transform_44(%arg0: i32) -> (i32, i32, i32) {
    %c0_i32 = arith.constant 0 : i32
    %c0_i32_0 = arith.constant 0 : i32
    %c0_i32_1 = arith.constant 0 : i32
    %c0_i32_2 = arith.constant 0 : i32
    return %c0_i32, %c0_i32_0, %c0_i32_1 : i32, i32, i32
  }
  func.func @transform_45(%arg0: i32) -> (i32, i32, i32) {
    %c0_i32 = arith.constant 0 : i32
    %c0_i32_0 = arith.constant 0 : i32
    %c0_i32_1 = arith.constant 0 : i32
    %c0_i32_2 = arith.constant 0 : i32
    return %c0_i32, %c0_i32_0, %c0_i32_1 : i32, i32, i32
  }
  func.func @transform_46(%arg0: i32) -> (i32, i32, i32) {
    %c0_i32 = arith.constant 0 : i32
    %c0_i32_0 = arith.constant 0 : i32
    %c0_i32_1 = arith.constant 0 : i32
    %c0_i32_2 = arith.constant 0 : i32
    return %c0_i32, %c0_i32_0, %c0_i32_1 : i32, i32, i32
  }
  func.func @transform_47(%arg0: i32) -> (i32, i32, i32) {
    %c0_i32 = arith.constant 0 : i32
    %c0_i32_0 = arith.constant 0 : i32
    %c0_i32_1 = arith.constant 0 : i32
    %c0_i32_2 = arith.constant 0 : i32
    return %c0_i32, %c0_i32_0, %c0_i32_1 : i32, i32, i32
  }
  func.func @transform_48(%arg0: i32) -> (i32, i32, i32) {
    %c0_i32 = arith.constant 0 : i32
    %c0_i32_0 = arith.constant 0 : i32
    %c0_i32_1 = arith.constant 0 : i32
    %c0_i32_2 = arith.constant 0 : i32
    return %c0_i32, %c0_i32_0, %c0_i32_1 : i32, i32, i32
  }
  func.func @transform_49(%arg0: i32) -> (i32, i32, i32) {
    %c0_i32 = arith.constant 0 : i32
    %c0_i32_0 = arith.constant 0 : i32
    %c0_i32_1 = arith.constant 0 : i32
    return %arg0, %c0_i32, %c0_i32_0 : i32, i32, i32
  }
  func.func @transform_50(%arg0: i32) -> (i32, i32, i32) {
    %c0_i32 = arith.constant 0 : i32
    %c0_i32_0 = arith.constant 0 : i32
    %c0_i32_1 = arith.constant 0 : i32
    return %arg0, %c0_i32, %c0_i32_0 : i32, i32, i32
  }
}

</mosaic_0001>

<bundles_post_ra>
// kernel: two_way_transformer.1
= control target key start
LH: loop header
LB: loop body
LE: loop exit
PB: predicated region body
PF: predicated region fallthrough
CT: control target
= control target key end

     0   :  { %s14307_s6 = smov 1   ;;  %s14308_s10 = smov 2   ;;  %s17330_s0 = inlined_call_operand.smem [shape: u32[51], index: -1, kind: input, shape index: {}] }
   0x1   :  { %s14412_s5 = sld [smem:[%s17330_s0]]   ;;  %s14309_s14 = smov 3  }
   0x2   :  { %s14417_s9 = sld [smem:[%s17330_s0 + %s14307_s6]]   ;;  %s14310_s18 = smov 4  }
   0x3   :  { %s14422_s13 = sld [smem:[%s17330_s0 + %s14308_s10]]   ;;  %s14311_s22 = smov 5  }
   0x4   :  { %s14427_s17 = sld [smem:[%s17330_s0 + %s14309_s14]]   ;;  %s14312_s26 = smov 6  }
   0x5   :  { %s14432_s21 = sld [smem:[%s17330_s0 + %s14310_s18]]   ;;  %s14313_s30 = smov 7  }
   0x6   :  { %s14437_s25 = sld [smem:[%s17330_s0 + %s14311_s22]]   ;;  %s14314_s4 = smov 8  }
   0x7   :  { %17387 = sst [smem:[#allocation69_spill]] %s14412_s5  ;;  %s14315_s10 = smov 9  }
   0x8   :  { %17388 = sst [smem:[#allocation70_spill]] %s14417_s9  ;;  %s14316_s15 = smov 10  }
   0x9   :  { %17389 = sst [smem:[#allocation71_spill]] %s14422_s13  ;;  %s14317_s20 = smov 11  }
   0xa   :  { %17390 = sst [smem:[#allocation72_spill]] %s14427_s17  ;;  %s14319_s1 = smov 13  }
   0xb   :  { %17391 = sst [smem:[#allocation73_spill]] %s14432_s21  ;;  %s14320_s7 = smov 14  }
   0xc   :  { %17392 = sst [smem:[#allocation74_spill]] %s14437_s25  ;;  %s14322_s22 = smov 16  }
   0xd   :  { %s14442_s29 = sld [smem:[%s17330_s0 + %s14312_s26]]   ;;  %s14318_s26 = smov 12  }
   0xe   :  { %s14447_s3 = sld [smem:[%s17330_s0 + %s14313_s30]]   ;;  %s14323_s28 = smov 17  }
   0xf   :  { %s14452_s8 = sld [smem:[%s17330_s0 + %s14314_s4]]  }
  0x10   :  { %s14457_s14 = sld [smem:[%s17330_s0 + %s14315_s10]]  }
  0x11   :  { %s14462_s19 = sld [smem:[%s17330_s0 + %s14316_s15]]   ;;  %s14321_s15 = smov 15  }
  0x12   :  { %s14467_s24 = sld [smem:[%s17330_s0 + %s14317_s20]]  }
  0x13   :  { %17393 = sst [smem:[#allocation75_spill]] %s14442_s29 }
  0x14   :  { %17394 = sst [smem:[#allocation76_spill]] %s14447_s3 }
  0x15   :  { %17395 = sst [smem:[#allocation77_spill]] %s14452_s8 }
  0x16   :  { %17396 = sst [smem:[#allocation78_spill]] %s14457_s14 }
  0x17   :  { %17397 = sst [smem:[#allocation79_spill]] %s14462_s19 }
  0x18   :  { %17398 = sst [smem:[#allocation80_spill]] %s14467_s24 }
  0x19   :  { %s14472_s30 = sld [smem:[%s17330_s0 + %s14318_s26]]  }
  0x1a   :  { %s14477_s6 = sld [smem:[%s17330_s0 + %s14319_s1]]  }
  0x1b   :  { %s14482_s12 = sld [smem:[%s17330_s0 + %s14320_s7]]   ;;  %s14324_s7 = smov 18  }
  0x1c   :  { %s14487_s20 = sld [smem:[%s17330_s0 + %s14321_s15]]   ;;  %s14325_s15 = smov 19  }
  0x1d   :  { %s14492_s27 = sld [smem:[%s17330_s0 + %s14322_s22]]   ;;  %s14326_s22 = smov 20  }
  0x1e   :  { %s14497_s4 = sld [smem:[%s17330_s0 + %s14323_s28]]   ;;  %s14327_s28 = smov 21  }
  0x1f   :  { %17399 = sst [smem:[#allocation81_spill]] %s14472_s30 }
  0x20   :  { %17400 = sst [smem:[#allocation82_spill]] %s14477_s6 }
  0x21   :  { %17401 = sst [smem:[#allocation83_spill]] %s14482_s12 }
  0x22   :  { %17402 = sst [smem:[#allocation84_spill]] %s14487_s20 }
  0x23   :  { %17403 = sst [smem:[#allocation85_spill]] %s14492_s27 }
  0x24   :  { %17404 = sst [smem:[#allocation86_spill]] %s14497_s4 }
  0x25   :  { %s14502_s3 = sld [smem:[%s17330_s0 + %s14324_s7]]   ;;  %s14328_s7 = smov 22  }
  0x26   :  { %s14507_s19 = sld [smem:[%s17330_s0 + %s14325_s15]]   ;;  %s14329_s15 = smov 23  }
  0x27   :  { %s14512_s14 = sld [smem:[%s17330_s0 + %s14326_s22]]   ;;  %s14330_s22 = smov 24  }
  0x28   :  { %s14517_s20 = sld [smem:[%s17330_s0 + %s14327_s28]]   ;;  %s14331_s28 = smov 25  }
  0x29   :  { %s14527_s4 = sld [smem:[%s17330_s0 + %s14329_s15]]   ;;  %s14333_s15 = smov 27  }
  0x2a   :  { %s14532_s13 = sld [smem:[%s17330_s0 + %s14330_s22]]   ;;  %s14334_s22 = smov 28  }
  0x2b   :  { %17405 = sst [smem:[#allocation87_spill]] %s14502_s3 }
  0x2c   :  { %17406 = sst [smem:[#allocation88_spill]] %s14507_s19 }
  0x2d   :  { %17407 = sst [smem:[#allocation89_spill]] %s14512_s14 }
  0x2e   :  { %17408 = sst [smem:[#allocation90_spill]] %s14517_s20 }
  0x2f   :  { %s14522_s3 = sld [smem:[%s17330_s0 + %s14328_s7]]   ;;  %s14332_s7 = smov 26  }
  0x30   :  { %17410 = sst [smem:[#allocation92_spill]] %s14527_s4 }
  0x31   :  { %17411 = sst [smem:[#allocation93_spill]] %s14532_s13 }
  0x32   :  { %s14537_s20 = sld [smem:[%s17330_s0 + %s14331_s28]]   ;;  %s14335_s28 = smov 29  }
  0x33   :  { %s14547_s9 = sld [smem:[%s17330_s0 + %s14333_s15]]   ;;  %s14337_s15 = smov 31  }
  0x34   :  { %s14552_s5 = sld [smem:[%s17330_s0 + %s14334_s22]]   ;;  %s14338_s22 = smov 32  }
  0x35   :  { %17409 = sst [smem:[#allocation91_spill]] %s14522_s3 }
  0x36   :  { %s14542_s3 = sld [smem:[%s17330_s0 + %s14332_s7]]   ;;  %s14336_s7 = smov 30  }
  0x37   :  { %s14562_s13 = sld [smem:[%s17330_s0 + %s14336_s7]]   ;;  %s14340_s7 = smov 34  }
  0x38   :  { %17412 = sst [smem:[#allocation94_spill]] %s14537_s20 }
  0x39   :  { %17414 = sst [smem:[#allocation96_spill]] %s14547_s9 }
  0x3a   :  { %17415 = sst [smem:[#allocation97_spill]] %s14552_s5 }
  0x3b   :  { %s14557_s20 = sld [smem:[%s17330_s0 + %s14335_s28]]   ;;  %s14339_s28 = smov 33  }
  0x3c   :  { %17413 = sst [smem:[#allocation95_spill]] %s14542_s3 }
  0x3d   :  { %17417 = sst [smem:[#allocation99_spill]] %s14562_s13 }
  0x3e   :  { %s14567_s9 = sld [smem:[%s17330_s0 + %s14337_s15]]   ;;  %s14341_s15 = smov 35  }
  0x3f   :  { %s14572_s14 = sld [smem:[%s17330_s0 + %s14338_s22]]   ;;  %s14342_s22 = smov 36  }
  0x40   :  { %s14582_s27 = sld [smem:[%s17330_s0 + %s14340_s7]]   ;;  %s14344_s7 = smov 38  }
  0x41   :  { %17416 = sst [smem:[#allocation98_spill]] %s14557_s20 }
  0x42   :  { %s14577_s20 = sld [smem:[%s17330_s0 + %s14339_s28]]   ;;  %s14343_s28 = smov 37  }
  0x43   :  { %s14592_s6 = sld [smem:[%s17330_s0 + %s14342_s22]]   ;;  %s14346_s22 = smov 40  }
  0x44   :  { %17418 = sst [smem:[#allocation100_spill]] %s14567_s9 }
  0x45   :  { %17419 = sst [smem:[#allocation101_spill]] %s14572_s14 }
  0x46   :  { %17421 = sst [smem:[#allocation103_spill]] %s14582_s27 }
  0x47   :  { %s14587_s9 = sld [smem:[%s17330_s0 + %s14341_s15]]   ;;  %s14345_s15 = smov 39  }
  0x48   :  { %17420 = sst [smem:[#allocation102_spill]] %s14577_s20 }
  0x49   :  { %17423 = sst [smem:[#allocation105_spill]] %s14592_s6 }
  0x4a   :  { %s14597_s20 = sld [smem:[%s17330_s0 + %s14343_s28]]   ;;  %s14347_s28 = smov 41  }
  0x4b   :  { %s14602_s27 = sld [smem:[%s17330_s0 + %s14344_s7]]   ;;  %s14348_s7 = smov 42  }
  0x4c   :  { %s14607_s24 = sld [smem:[%s17330_s0 + %s14345_s15]]   ;;  %s14349_s15 = smov 43  }
  0x4d   :  { %17422 = sst [smem:[#allocation104_spill]] %s14587_s9 }
  0x4e   :  { %s14612_s6 = sld [smem:[%s17330_s0 + %s14346_s22]]   ;;  %s14350_s22 = smov 44  }
  0x50   :  { %17424 = sst [smem:[#allocation106_spill]] %s14597_s20 }
  0x51   :  { %17425 = sst [smem:[#allocation107_spill]] %s14602_s27 }
  0x52   :  { %17426 = sst [smem:[#allocation108_spill]] %s14607_s24 }
  0x53   :  { %s14617_s20 = sld [smem:[%s17330_s0 + %s14347_s28]]   ;;  %s14351_s28 = smov 45  }
  0x54   :  { %17427 = sst [smem:[#allocation109_spill]] %s14612_s6 }
  0x55   :  { %s14622_s27 = sld [smem:[%s17330_s0 + %s14348_s7]]   ;;  %s14352_s7 = smov 46  }
  0x56   :  { %s14627_s24 = sld [smem:[%s17330_s0 + %s14349_s15]]   ;;  %s14353_s15 = smov 47  }
  0x57   :  { %s14632_s6 = sld [smem:[%s17330_s0 + %s14350_s22]]   ;;  %s14354_s22 = smov 48  }
  0x58   :  { %s14637_s29 = sld [smem:[%s17330_s0 + %s14351_s28]]   ;;  %s14355_s28 = smov 49  }
  0x59   :  { %17428 = sst [smem:[#allocation110_spill]] %s14617_s20 }
  0x5a   :  { %s14647_s21 = sld [smem:[%s17330_s0 + %s14353_s15]]  }
  0x5b   :  { %17429 = sst [smem:[#allocation111_spill]] %s14622_s27 }
  0x5c   :  { %17430 = sst [smem:[#allocation112_spill]] %s14627_s24 }
  0x5d   :  { %17431 = sst [smem:[#allocation113_spill]] %s14632_s6 }
  0x5e   :  { %17432 = sst [smem:[#allocation114_spill]] %s14637_s29 }
  0x5f   :  { %s14642_s27 = sld [smem:[%s17330_s0 + %s14352_s7]]   ;;  %s14356_s7 = smov 50  }
  0x60   :  { %s14652_s6 = sld [smem:[%s17330_s0 + %s14354_s22]]  }
  0x61   :  { %s14657_s29 = sld [smem:[%s17330_s0 + %s14355_s28]]  }
  0x65   :  { %17433 = sst [smem:[#allocation115_spill]] %s14642_s27 }
  0x66   :  { %17434 = sst [smem:[#allocation116_spill]] %s14652_s6 }
  0x67   :  { %17435 = sst [smem:[#allocation117_spill]] %s14657_s29 }
  0x68   :  { %s14662_s27 = sld [smem:[%s17330_s0 + %s14356_s7]]  }
  0x6e   :  { %17436 = sst [smem:[#allocation118_spill]] %s14662_s27 }
  0x6f   :  { %107 = vsyncpa [#allocation5], 0 }
  0x70   :  { %109 = vsyncpa [#allocation5 + $0x1], 0 }
  0x71   :  { %110 = vsyncpa [#allocation8], 0 }
  0x72   :  { %111 = vsyncpa [#allocation11], 0 }
  0x73   :  { %112 = vsyncpa [#allocation14], 0 }
  0x74   :  { %113 = vsyncpa [#allocation17], 0 }
  0x75   :  { %114 = vsyncpa [#allocation20], 0 }
  0x76   :  { %115 = vsyncpa [#allocation23], 0 }
  0x77   :  { %116 = vsyncpa [#allocation26], 0 }
  0x78   :  { %117 = vsyncpa [#allocation29], 0 }
  0x79   :  { %118 = vsyncpa [#allocation32], 0 }
  0x7a   :  { %119 = vsyncpa [#allocation35], 0 }
  0x7b   :  { %120 = vsyncpa [#allocation38], 0 }
  0x7c   :  { %121 = vsyncpa [#allocation41], 0 }
  0x7d   :  { %122 = vsyncpa [#allocation44], 0 }
  0x7e   :  { %123 = vsyncpa [#allocation47], 0 }
  0x7f   :  { %124 = vsyncpa [#allocation50], 0 }
  0x80   :  { %125 = vsyncpa [#allocation6], 0 }
  0x81   :  { %127 = vsyncpa [#allocation6 + $0x1], 0  ;;  %s14664_s0 = smov 0   ;;  %s14666_s15 = smov 0  }
  0x82   :  { %s14668_s16 = smov 0   ;;  %s14670_s18 = smov 0  }
  0x83 LB: > { %s17437_s6 = sld [smem:[#allocation116_spill]]  ;;  %s14357_s22 = smov [#allocation7]   ;;  %s14293_s0 = sphi %s14664_s0, %s17549_s0   ;;  %s14305_s18 = sphi %s14670_s18, %s17552_s18   ;;  %s14301_s16 = sphi %s14668_s16, %s17551_s16   ;;  %s14297_s15 = sphi %s14666_s15, %s17550_s15  }
  0x84   : > { %17438 = sst [smem:[#allocation119_spill]] %s14297_s15  ;;  %s1247_s23 = sshll.u32 %s14357_s22, 4  ;;  %s1248_s23 = int_to_ptr.vmem [resolvable:$true] %s1247_s23 }
  0x85   : > { %17439 = sst [smem:[#allocation120_spill]] %s14301_s16  ;;  %s14685_s26 = sadd.s32 4294967295, %s14305_s18  }
  0x86   : > { %p10729_p0 = scmp.ge.s32.totalorder %s14305_s18, 1  ;;  %p17348_p1 = scmp.eq.s32.totalorder %s14685_s26, 0 }
  0x87   : > { %p1234_p2 = scmp.lt.s32.totalorder %s14305_s18, 3  ;;  %s14358_s1 = smov [#allocation10]  }
  0x88   : > { %s1269_s2 = sshll.u32 %s14358_s1, 4  ;;  %s14359_s7 = smov [#allocation13]   ;;  %s1270_s2 = int_to_ptr.vmem [resolvable:$true] %s1269_s2 }
  0x89   : > { %p14690_p3 = pnand %p10729_p0, %p1234_p2  ;;  %s1293_s10 = sshll.u32 %s14359_s7, 4  ;;  %s14703_s10 = int_to_ptr.vmem [resolvable:$true] %s1293_s10 }
  0x8a   : > { %s13410_s29 = scalar_lea.vmem %s1248_s23, 16  ;;  %s13417_s1 = scalar_lea.vmem %s1248_s23, 32 }
  0x8b   : > { %s17440_s28 = scalar_select %p14690_p3, 1, 0 }
  0x8c   : > { %p12637_p5 = pneg %p14690_p3  ;;  %p13411_p8 = scmp.ne.s32.totalorder %s1248_s23, %s13410_s29 }
  0x8d   : > { %p13418_p11 = scmp.lt.s32.totalorder %s1248_s23, %s1248_s23  ;;  %p13419_p12 = scmp.lt.s32.totalorder %s13417_s1, %s13410_s29 }
  0x8e   : > { %p14699_p6 = pnand %p12637_p5, %p17348_p1 }
  0x8f   : > { %p13420_p13 = por %p13419_p12, %p13418_p11 }
  0x90   : > { %p14707_p7 = pneg %p14699_p6 }
  0x92   : > { %p13413_p9 = pnand %p13411_p8, %p14707_p7 }
  0x94   : > { %p13414_p10 = pneg %p13413_p9 }
  0x96   : > { %p13421_p0 = pnand %p13420_p13, %p13414_p10 }
  0x98   : > { %13424 = shalt.err (!%p13421_p0)
}
  0x99   : > { %s17443_s17 = sld [smem:[#allocation72_spill]]  ;;  %s13436_s7 = scalar_lea.vmem %s1270_s2, 16 }
  0x9a   : > { %p13437_p2 = scmp.ne.s32.totalorder %s1270_s2, %s13436_s7  ;;  %s13443_s27 = scalar_lea.vmem %s1270_s2, 32 }
  0x9b   : > { %p13444_p1 = scmp.lt.s32.totalorder %s1270_s2, %s1270_s2  ;;  %p13445_p8 = scmp.lt.s32.totalorder %s13443_s27, %s13436_s7 }
  0x9c   : > { %p13439_p5 = pnand %p13437_p2, %p14707_p7 }
  0x9d   : > { %p13446_p9 = por %p13445_p8, %p13444_p1 }
  0x9e   : > { %p13440_p4 = pneg %p13439_p5 }
  0x9f   : > { %12640 = dma.hbm_to_vmem [thread:$0]  (!%p14699_p6), %s17443_s17, 16, %s1248_s23, [#allocation8]  }
  0xa0   : > { %p13447_p3 = pnand %p13446_p9, %p13440_p4 }
  0xa2   : > { %13450 = shalt.err (!%p13447_p3)
}
  0xa3   : > { %s17444_s25 = sld [smem:[#allocation74_spill]]  ;;  %s13462_s29 = scalar_lea.vmem %s14703_s10, 128 }
  0xa4   : > { %p13463_p10 = scmp.ne.s32.totalorder %s14703_s10, %s13462_s29  ;;  %p13470_p13 = scmp.lt.s32.totalorder %s14703_s10, %s14703_s10 }
  0xa5   : > { %p13471_p0 = scmp.lt.s32.totalorder %s13462_s29, %s13462_s29 }
  0xa6   : > { %p13465_p11 = pnand %p13463_p10, %p14707_p7 }
  0xa7   : > { %p13472_p2 = por %p13471_p0, %p13470_p13 }
  0xa8   : > { %p13466_p12 = pneg %p13465_p11 }
  0xa9   : > { %12646 = dma.hbm_to_vmem [thread:$0]  (!%p14699_p6), %s17444_s25, 16, %s1270_s2, [#allocation11]  }
  0xaa   : > { %p13473_p1 = pnand %p13472_p2, %p13466_p12 }
  0xac   : > { %13476 = shalt.err (!%p13473_p1)
}
  0xad   : > { %s17350_s27 = smov 64   ;;  %s17445_s8 = sld [smem:[#allocation77_spill]] }
  0xae   : > { %s17352_s23 = smov 4   ;;  %s14362_s2 = smov [#allocation16]  }
  0xaf   : > { %s1325_s1 = sshll.u32 %s14362_s2, 4  ;;  %s14363_s7 = smov [#allocation19]   ;;  %s1326_s1 = int_to_ptr.vmem [resolvable:$true] %s1325_s1 }
  0xb0   : > { %s1351_s17 = sshll.u32 %s14363_s7, 4  ;;  %s13488_s29 = scalar_lea.vmem %s1326_s1, 32  ;;  %s1352_s17 = int_to_ptr.vmem [resolvable:$true] %s1351_s17 }
  0xb1   : > { %p13489_p3 = scmp.ne.s32.totalorder %s1326_s1, %s13488_s29  ;;  %p13496_p8 = scmp.lt.s32.totalorder %s1326_s1, %s1326_s1 }
  0xb2   : > { %p13497_p9 = scmp.lt.s32.totalorder %s13488_s29, %s13488_s29 }
  0xb3   : > { %12652 = dma.hbm_to_vmem [thread:$0]  (!%p14699_p6), %s17445_s8, 128, %s14703_s10, [#allocation14], %s17350_s27, %s17350_s27, %s17352_s23  }
  0xb4   : > { %p13491_p4 = pnand %p13489_p3, %p14707_p7  ;;  %p13498_p10 = por %p13497_p9, %p13496_p8 }
  0xb6   : > { %p13492_p5 = pneg %p13491_p4 }
  0xb8   : > { %p13499_p11 = pnand %p13498_p10, %p13492_p5 }
  0xba   : > { %13502 = shalt.err (!%p13499_p11)
}
  0xbb   : > { %s17354_s25 = smov 16   ;;  %s17446_s30 = sld [smem:[#allocation81_spill]] }
  0xbc   : > { %s17356_s10 = smov 1   ;;  %s13514_s2 = scalar_lea.vmem %s1352_s17, 32 }
  0xbd   : > { %p13515_p12 = scmp.ne.s32.totalorder %s1352_s17, %s13514_s2  ;;  %p13522_p2 = scmp.lt.s32.totalorder %s1352_s17, %s1352_s17 }
  0xbe   : > { %p13523_p1 = scmp.lt.s32.totalorder %s13514_s2, %s13514_s2 }
  0xbf   : > { %p13517_p13 = pnand %p13515_p12, %p14707_p7 }
  0xc0   : > { %p13524_p3 = por %p13523_p1, %p13522_p2 }
  0xc1   : > { %12658 = dma.hbm_to_vmem [thread:$0]  (!%p14699_p6), %s17446_s30, 32, %s1326_s1, [#allocation17], %s17354_s25, %s17354_s25, %s17356_s10  }
  0xc2   : > { %p13518_p0 = pneg %p13517_p13 }
  0xc4   : > { %p13525_p4 = pnand %p13524_p3, %p13518_p0 }
  0xc6   : > { %13528 = shalt.err (!%p13525_p4)
}
  0xc7   : > { %s17447_s12 = sld [smem:[#allocation83_spill]]  ;;  %s14366_s1 = smov [#allocation22]  }
  0xc8   : > { %s1386_s7 = sshll.u32 %s14366_s1, 4  ;;  %s14367_s29 = smov [#allocation25]   ;;  %s1387_s7 = int_to_ptr.vmem [resolvable:$true] %s1386_s7 }
  0xc9   : > { %s1418_s27 = sshll.u32 %s14367_s29, 4  ;;  %s13540_s23 = scalar_lea.vmem %s1387_s7, 32  ;;  %s1419_s27 = int_to_ptr.vmem [resolvable:$true] %s1418_s27 }
  0xca   : > { %p13541_p5 = scmp.ne.s32.totalorder %s1387_s7, %s13540_s23  ;;  %p13548_p10 = scmp.lt.s32.totalorder %s1387_s7, %s1387_s7 }
  0xcb   : > { %p13549_p11 = scmp.lt.s32.totalorder %s13540_s23, %s13540_s23 }
  0xcc   : > { %p13543_p8 = pnand %p13541_p5, %p14707_p7 }
  0xcd   : > { %12664 = dma.hbm_to_vmem [thread:$0]  (!%p14699_p6), %s17447_s12, 32, %s1352_s17, [#allocation20], %s17354_s25, %s17354_s25, %s17356_s10  }
  0xce   : > { %p13544_p9 = pneg %p13543_p8  ;;  %p13550_p12 = por %p13549_p11, %p13548_p10 }
  0xd0   : > { %p13551_p13 = pnand %p13550_p12, %p13544_p9 }
  0xd2   : > { %13554 = shalt.err (!%p13551_p13)
}
  0xd3   : > { %s17448_s19 = sld [smem:[#allocation88_spill]]  ;;  %s13566_s17 = scalar_lea.vmem %s1419_s27, 32 }
  0xd4   : > { %p13567_p0 = scmp.ne.s32.totalorder %s1419_s27, %s13566_s17  ;;  %p13574_p3 = scmp.lt.s32.totalorder %s1419_s27, %s1419_s27 }
  0xd5   : > { %p13575_p4 = scmp.lt.s32.totalorder %s13566_s17, %s13566_s17 }
  0xd6   : > { %p13569_p2 = pnand %p13567_p0, %p14707_p7 }
  0xd7   : > { %p13576_p5 = por %p13575_p4, %p13574_p3 }
  0xd8   : > { %p13570_p1 = pneg %p13569_p2 }
  0xd9   : > { %12670 = dma.hbm_to_vmem [thread:$0]  (!%p14699_p6), %s17448_s19, 32, %s1387_s7, [#allocation23], %s17354_s25, %s17354_s25, %s17356_s10  }
  0xda   : > { %p13577_p8 = pnand %p13576_p5, %p13570_p1 }
  0xdc   : > { %13580 = shalt.err (!%p13577_p8)
}
  0xdd   : > { %s17449_s4 = sld [smem:[#allocation92_spill]]  ;;  %s14368_s23 = smov [#allocation28]  }
  0xde   : > { %s1447_s2 = sshll.u32 %s14368_s23, 4  ;;  %s14369_s1 = smov [#allocation31]   ;;  %s1448_s2 = int_to_ptr.vmem [resolvable:$true] %s1447_s2 }
  0xdf   : > { %s1473_s7 = sshll.u32 %s14369_s1, 4  ;;  %s13592_s29 = scalar_lea.vmem %s1448_s2, 32  ;;  %s1474_s7 = int_to_ptr.vmem [resolvable:$true] %s1473_s7 }
  0xe0   : > { %p13593_p9 = scmp.ne.s32.totalorder %s1448_s2, %s13592_s29  ;;  %p13600_p12 = scmp.lt.s32.totalorder %s1448_s2, %s1448_s2 }
  0xe1   : > { %p13601_p13 = scmp.lt.s32.totalorder %s13592_s29, %s13592_s29 }
  0xe2   : > { %p13595_p10 = pnand %p13593_p9, %p14707_p7 }
  0xe3   : > { %12676 = dma.hbm_to_vmem [thread:$0]  (!%p14699_p6), %s17449_s4, 32, %s1419_s27, [#allocation26], %s17354_s25, %s17354_s25, %s17356_s10  }
  0xe4   : > { %p13596_p11 = pneg %p13595_p10  ;;  %p13602_p0 = por %p13601_p13, %p13600_p12 }
  0xe6   : > { %p13603_p2 = pnand %p13602_p0, %p13596_p11 }
  0xe8   : > { %13606 = shalt.err (!%p13603_p2)
}
  0xe9   : > { %s17450_s3 = sld [smem:[#allocation95_spill]]  ;;  %s13618_s27 = scalar_lea.vmem %s1474_s7, 32 }
  0xea   : > { %p13619_p1 = scmp.ne.s32.totalorder %s1474_s7, %s13618_s27  ;;  %p13626_p5 = scmp.lt.s32.totalorder %s1474_s7, %s1474_s7 }
  0xeb   : > { %p13627_p8 = scmp.lt.s32.totalorder %s13618_s27, %s13618_s27 }
  0xec   : > { %p13621_p3 = pnand %p13619_p1, %p14707_p7 }
  0xed   : > { %p13628_p9 = por %p13627_p8, %p13626_p5 }
  0xee   : > { %p13622_p4 = pneg %p13621_p3 }
  0xef   : > { %12682 = dma.hbm_to_vmem [thread:$0]  (!%p14699_p6), %s17450_s3, 32, %s1448_s2, [#allocation29], %s17354_s25, %s17354_s25, %s17356_s10  }
  0xf0   : > { %p13629_p10 = pnand %p13628_p9, %p13622_p4 }
  0xf2   : > { %13632 = shalt.err (!%p13629_p10)
}
  0xf3   : > { %s17451_s5 = sld [smem:[#allocation97_spill]]  ;;  %s14370_s17 = smov [#allocation34]  }
  0xf4   : > { %s1499_s23 = sshll.u32 %s14370_s17, 4  ;;  %s14371_s2 = smov [#allocation37]   ;;  %s1500_s23 = int_to_ptr.vmem [resolvable:$true] %s1499_s23 }
  0xf5   : > { %s1524_s1 = sshll.u32 %s14371_s2, 4  ;;  %s13644_s29 = scalar_lea.vmem %s1500_s23, 32  ;;  %s1525_s1 = int_to_ptr.vmem [resolvable:$true] %s1524_s1 }
  0xf6   : > { %p13645_p11 = scmp.ne.s32.totalorder %s1500_s23, %s13644_s29  ;;  %p13652_p0 = scmp.lt.s32.totalorder %s1500_s23, %s1500_s23 }
  0xf7   : > { %p13653_p2 = scmp.lt.s32.totalorder %s13644_s29, %s13644_s29 }
  0xf8   : > { %p13647_p12 = pnand %p13645_p11, %p14707_p7 }
  0xf9   : > { %12688 = dma.hbm_to_vmem [thread:$0]  (!%p14699_p6), %s17451_s5, 32, %s1474_s7, [#allocation32], %s17354_s25, %s17354_s25, %s17356_s10  }
  0xfa   : > { %p13648_p13 = pneg %p13647_p12  ;;  %p13654_p1 = por %p13653_p2, %p13652_p0 }
  0xfc   : > { %p13655_p3 = pnand %p13654_p1, %p13648_p13 }
  0xfe   : > { %13658 = shalt.err (!%p13655_p3)
}
  0xff   : > { %s17452_s13 = sld [smem:[#allocation99_spill]]  ;;  %s13670_s7 = scalar_lea.vmem %s1525_s1, 16 }
 0x100   : > { %p13671_p4 = scmp.ne.s32.totalorder %s1525_s1, %s13670_s7  ;;  %s13677_s27 = scalar_lea.vmem %s1525_s1, 32 }
 0x101   : > { %p13678_p9 = scmp.lt.s32.totalorder %s1525_s1, %s1525_s1  ;;  %p13679_p10 = scmp.lt.s32.totalorder %s13677_s27, %s13670_s7 }
 0x102   : > { %p13673_p5 = pnand %p13671_p4, %p14707_p7 }
 0x103   : > { %p13680_p11 = por %p13679_p10, %p13678_p9 }
 0x104   : > { %p13674_p8 = pneg %p13673_p5 }
 0x105   : > { %12694 = dma.hbm_to_vmem [thread:$0]  (!%p14699_p6), %s17452_s13, 32, %s1500_s23, [#allocation35], %s17354_s25, %s17354_s25, %s17356_s10  }
 0x106   : > { %p13681_p12 = pnand %p13680_p11, %p13674_p8 }
 0x108   : > { %13684 = shalt.err (!%p13681_p12)
}
 0x109   : > { %s17453_s14 = sld [smem:[#allocation101_spill]]  ;;  %s14372_s17 = smov [#allocation40]  }
 0x10a   : > { %s1550_s2 = sshll.u32 %s14372_s17, 4  ;;  %s14373_s23 = smov [#allocation43]   ;;  %s1551_s2 = int_to_ptr.vmem [resolvable:$true] %s1550_s2 }
 0x10b   : > { %s1588_s29 = sshll.u32 %s14373_s23, 4  ;;  %s13696_s25 = scalar_lea.vmem %s1551_s2, 32  ;;  %s1589_s29 = int_to_ptr.vmem [resolvable:$true] %s1588_s29 }
 0x10c   : > { %p13697_p13 = scmp.ne.s32.totalorder %s1551_s2, %s13696_s25  ;;  %p13704_p1 = scmp.lt.s32.totalorder %s1551_s2, %s1551_s2 }
 0x10d   : > { %p13705_p3 = scmp.lt.s32.totalorder %s13696_s25, %s13696_s25 }
 0x10e   : > { %p13699_p0 = pnand %p13697_p13, %p14707_p7 }
 0x10f   : > { %12700 = dma.hbm_to_vmem [thread:$0]  (!%p14699_p6), %s17453_s14, 16, %s1525_s1, [#allocation38]  }
 0x110   : > { %p13700_p2 = pneg %p13699_p0  ;;  %p13706_p4 = por %p13705_p3, %p13704_p1 }
 0x112   : > { %p13707_p5 = pnand %p13706_p4, %p13700_p2 }
 0x114   : > { %13710 = shalt.err (!%p13707_p5)
}
 0x115   : > { %s17454_s7 = smov 16   ;;  %s17455_s9 = sld [smem:[#allocation104_spill]] }
 0x116   : > { %s13722_s1 = scalar_lea.vmem %s1589_s29, 32  ;;  %p13730_p11 = scmp.lt.s32.totalorder %s1589_s29, %s1589_s29 }
 0x117   : > { %p13723_p8 = scmp.ne.s32.totalorder %s1589_s29, %s13722_s1  ;;  %p13731_p12 = scmp.lt.s32.totalorder %s13722_s1, %s13722_s1 }
 0x119   : > { %p13725_p9 = pnand %p13723_p8, %p14707_p7  ;;  %p13732_p13 = por %p13731_p12, %p13730_p11 }
 0x11b   : > { %12706 = dma.hbm_to_vmem [thread:$0]  (!%p14699_p6), %s17455_s9, 32, %s1551_s2, [#allocation41], %s17454_s7, %s17454_s7, %s17356_s10  }
 0x11c   : > { %p13726_p10 = pneg %p13725_p9 }
 0x11e   : > { %p13733_p0 = pnand %p13732_p13, %p13726_p10 }
 0x120   : > { %13736 = shalt.err (!%p13733_p0)
}
 0x121   : > { %s17456_s20 = sld [smem:[#allocation110_spill]]  ;;  %s14374_s25 = smov [#allocation46]  }
 0x122   : > { %s1614_s27 = sshll.u32 %s14374_s25, 4  ;;  %s14375_s17 = smov [#allocation9]   ;;  %s1615_s27 = int_to_ptr.vmem [resolvable:$true] %s1614_s27 }
 0x123   : > { %s1258_s2 = sshll.u32 %s14375_s17, 4  ;;  %s13748_s23 = scalar_lea.vmem %s1615_s27, 32  ;;  %s1259_s2 = int_to_ptr.vmem [resolvable:$true] %s1258_s2 }
 0x124   : > { %p13749_p2 = scmp.ne.s32.totalorder %s1615_s27, %s13748_s23  ;;  %p13756_p4 = scmp.lt.s32.totalorder %s1615_s27, %s1615_s27 }
 0x125   : > { %p13757_p5 = scmp.lt.s32.totalorder %s13748_s23, %s13748_s23 }
 0x126   : > { %p13751_p1 = pnand %p13749_p2, %p14707_p7 }
 0x127   : > { %12712 = dma.hbm_to_vmem [thread:$0]  (!%p14699_p6), %s17456_s20, 32, %s1589_s29, [#allocation44], %s17454_s7, %s17454_s7, %s17356_s10  }
 0x128   : > { %p13752_p3 = pneg %p13751_p1  ;;  %p13758_p8 = por %p13757_p5, %p13756_p4 }
 0x12a   : > { %p13759_p9 = pnand %p13758_p8, %p13752_p3 }
 0x12c   : > { %13762 = shalt.err (!%p13759_p9)
}
 0x12d   : > { %s17457_s24 = sld [smem:[#allocation112_spill]]  ;;  %s13774_s29 = scalar_lea.vmem %s1259_s2, 16 }
 0x12e   : > { %p13775_p10 = scmp.ne.s32.totalorder %s1259_s2, %s13774_s29  ;;  %s13781_s1 = scalar_lea.vmem %s1259_s2, 32 }
 0x12f   : > { %p13782_p13 = scmp.lt.s32.totalorder %s1259_s2, %s1259_s2  ;;  %p13783_p0 = scmp.lt.s32.totalorder %s13781_s1, %s13774_s29 }
 0x130   : > { %p13777_p11 = pnand %p13775_p10, %p14707_p7 }
 0x131   : > { %p13784_p2 = por %p13783_p0, %p13782_p13 }
 0x132   : > { %p13778_p12 = pneg %p13777_p11 }
 0x133   : > { %12718 = dma.hbm_to_vmem [thread:$0]  (!%p14699_p6), %s17457_s24, 32, %s1615_s27, [#allocation47], %s17454_s7, %s17454_s7, %s17356_s10  }
 0x134   : > { %p13785_p1 = pnand %p13784_p2, %p13778_p12 }
 0x136   : > { %13788 = shalt.err (!%p13785_p1)
}
 0x137   : > { %s17458_s25 = sld [smem:[#allocation73_spill]]  ;;  %s14376_s17 = smov [#allocation12]  }
 0x138   : > { %s1280_s23 = sshll.u32 %s14376_s17, 4  ;;  %s14377_s27 = smov [#allocation15]   ;;  %s1281_s23 = int_to_ptr.vmem [resolvable:$true] %s1280_s23 }
 0x139   : > { %s1312_s10 = sshll.u32 %s14377_s27, 4  ;;  %s13800_s3 = scalar_lea.vmem %s1281_s23, 16  ;;  %s1313_s10 = int_to_ptr.vmem [resolvable:$true] %s1312_s10 }
 0x13a   : > { %p13801_p3 = scmp.ne.s32.totalorder %s1281_s23, %s13800_s3  ;;  %s13807_s4 = scalar_lea.vmem %s1281_s23, 32 }
 0x13b   : > { %p13808_p8 = scmp.lt.s32.totalorder %s1281_s23, %s1281_s23  ;;  %p13809_p9 = scmp.lt.s32.totalorder %s13807_s4, %s13800_s3 }
 0x13c   : > { %p13803_p4 = pnand %p13801_p3, %p14707_p7 }
 0x13d   : > { %12643 = dma.hbm_to_vmem [thread:$0]  (!%p14699_p6), %s17458_s25, 16, %s1259_s2, [#allocation8]  }
 0x13e   : > { %p13804_p5 = pneg %p13803_p4  ;;  %p13810_p10 = por %p13809_p9, %p13808_p8 }
 0x140   : > { %p13811_p11 = pnand %p13810_p10, %p13804_p5 }
 0x142   : > { %13814 = shalt.err (!%p13811_p11)
}
 0x143   : > { %s17459_s29 = sld [smem:[#allocation75_spill]]  ;;  %s13826_s2 = scalar_lea.vmem %s1313_s10, 32 }
 0x144   : > { %p13827_p12 = scmp.ne.s32.totalorder %s1313_s10, %s13826_s2  ;;  %p13834_p2 = scmp.lt.s32.totalorder %s1313_s10, %s1313_s10 }
 0x145   : > { %p13835_p1 = scmp.lt.s32.totalorder %s13826_s2, %s13826_s2 }
 0x146   : > { %p13829_p13 = pnand %p13827_p12, %p14707_p7 }
 0x147   : > { %p13836_p3 = por %p13835_p1, %p13834_p2 }
 0x148   : > { %p13830_p0 = pneg %p13829_p13 }
 0x149   : > { %12649 = dma.hbm_to_vmem [thread:$0]  (!%p14699_p6), %s17459_s29, 16, %s1281_s23, [#allocation11]  }
 0x14a   : > { %p13837_p4 = pnand %p13836_p3, %p13830_p0 }
 0x14c   : > { %13840 = shalt.err (!%p13837_p4)
}
 0x14d   : > { %s17460_s3 = smov 1   ;;  %s17461_s4 = sld [smem:[#allocation80_spill]] }
 0x14e   : > { %s14378_s1 = smov [#allocation18]   ;;  %s14379_s17 = smov [#allocation21]  }
 0x14f   : > { %s1338_s25 = sshll.u32 %s14378_s1, 4  ;;  %s1367_s23 = sshll.u32 %s14379_s17, 4  ;;  %s1339_s25 = int_to_ptr.vmem [resolvable:$true] %s1338_s25  ;;  %s1368_s23 = int_to_ptr.vmem [resolvable:$true] %s1367_s23 }
 0x150   : > { %s13852_s27 = scalar_lea.vmem %s1339_s25, 32  ;;  %p13860_p10 = scmp.lt.s32.totalorder %s1339_s25, %s1339_s25 }
 0x151   : > { %p13853_p5 = scmp.ne.s32.totalorder %s1339_s25, %s13852_s27  ;;  %p13861_p11 = scmp.lt.s32.totalorder %s13852_s27, %s13852_s27 }
 0x153   : > { %12655 = dma.hbm_to_vmem [thread:$0]  (!%p14699_p6), %s17461_s4, 32, %s1313_s10, [#allocation14], %s17454_s7, %s17454_s7, %s17460_s3  }
 0x154   : > { %p13855_p8 = pnand %p13853_p5, %p14707_p7  ;;  %p13862_p12 = por %p13861_p11, %p13860_p10 }
 0x156   : > { %p13856_p9 = pneg %p13855_p8 }
 0x158   : > { %p13863_p13 = pnand %p13862_p12, %p13856_p9 }
 0x15a   : > { %13866 = shalt.err (!%p13863_p13)
}
 0x15b   : > { %s17462_s10 = sld [smem:[#allocation82_spill]]  ;;  %s13878_s29 = scalar_lea.vmem %s1368_s23, 256 }
 0x15c   : > { %p13879_p0 = scmp.ne.s32.totalorder %s1368_s23, %s13878_s29  ;;  %p13886_p3 = scmp.lt.s32.totalorder %s1368_s23, %s1368_s23 }
 0x15d   : > { %p13887_p4 = scmp.lt.s32.totalorder %s13878_s29, %s13878_s29 }
 0x15e   : > { %p13881_p2 = pnand %p13879_p0, %p14707_p7 }
 0x15f   : > { %p13888_p5 = por %p13887_p4, %p13886_p3 }
 0x160   : > { %p13882_p1 = pneg %p13881_p2 }
 0x161   : > { %12661 = dma.hbm_to_vmem [thread:$0]  (!%p14699_p6), %s17462_s10, 32, %s1339_s25, [#allocation17], %s17454_s7, %s17454_s7, %s17460_s3  }
 0x162   : > { %p13889_p8 = pnand %p13888_p5, %p13882_p1 }
 0x164   : > { %13892 = shalt.err (!%p13889_p8)
}
 0x165   : > { %s17463_s2 = smov 4   ;;  %s17464_s4 = smov 64  }
 0x166   : > { %s17465_s1 = sld [smem:[#allocation85_spill]]  ;;  %s14380_s25 = smov [#allocation24]  }
 0x167   : > { %s1399_s17 = sshll.u32 %s14380_s25, 4  ;;  %s14381_s27 = smov [#allocation27]   ;;  %s1400_s17 = int_to_ptr.vmem [resolvable:$true] %s1399_s17 }
 0x168   : > { %s1431_s10 = sshll.u32 %s14381_s27, 4  ;;  %s13904_s5 = scalar_lea.vmem %s1400_s17, 32  ;;  %s1432_s10 = int_to_ptr.vmem [resolvable:$true] %s1431_s10 }
 0x169   : > { %p13905_p9 = scmp.ne.s32.totalorder %s1400_s17, %s13904_s5  ;;  %p13912_p12 = scmp.lt.s32.totalorder %s1400_s17, %s1400_s17 }
 0x16a   : > { %p13913_p13 = scmp.lt.s32.totalorder %s13904_s5, %s13904_s5 }
 0x16b   : > { %p13907_p10 = pnand %p13905_p9, %p14707_p7 }
 0x16c   : > { %12667 = dma.hbm_to_vmem [thread:$0]  (!%p14699_p6), %s17465_s1, 256, %s1368_s23, [#allocation20], %s17464_s4, %s17464_s4, %s17463_s2  }
 0x16d   : > { %p13908_p11 = pneg %p13907_p10  ;;  %p13914_p0 = por %p13913_p13, %p13912_p12 }
 0x16f   : > { %p13915_p2 = pnand %p13914_p0, %p13908_p11 }
 0x171   : > { %13918 = shalt.err (!%p13915_p2)
}
 0x172   : > { %s17466_s23 = sld [smem:[#allocation89_spill]]  ;;  %s13930_s29 = scalar_lea.vmem %s1432_s10, 32 }
 0x173   : > { %p13931_p1 = scmp.ne.s32.totalorder %s1432_s10, %s13930_s29  ;;  %p13938_p5 = scmp.lt.s32.totalorder %s1432_s10, %s1432_s10 }
 0x174   : > { %p13939_p8 = scmp.lt.s32.totalorder %s13930_s29, %s13930_s29 }
 0x175   : > { %p13933_p3 = pnand %p13931_p1, %p14707_p7 }
 0x176   : > { %p13940_p9 = por %p13939_p8, %p13938_p5 }
 0x177   : > { %p13934_p4 = pneg %p13933_p3 }
 0x178   : > { %12673 = dma.hbm_to_vmem [thread:$0]  (!%p14699_p6), %s17466_s23, 32, %s1400_s17, [#allocation23], %s17454_s7, %s17454_s7, %s17460_s3  }
 0x179   : > { %p13941_p10 = pnand %p13940_p9, %p13934_p4 }
 0x17b   : > { %13944 = shalt.err (!%p13941_p10)
}
 0x17c   : > { %s17467_s5 = sld [smem:[#allocation93_spill]]  ;;  %s14382_s1 = smov [#allocation30]  }
 0x17d   : > { %s1460_s25 = sshll.u32 %s14382_s1, 4  ;;  %s14383_s17 = smov [#allocation33]   ;;  %s1461_s25 = int_to_ptr.vmem [resolvable:$true] %s1460_s25 }
 0x17e   : > { %s1486_s27 = sshll.u32 %s14383_s17, 4  ;;  %s13956_s23 = scalar_lea.vmem %s1461_s25, 32  ;;  %s1487_s27 = int_to_ptr.vmem [resolvable:$true] %s1486_s27 }
 0x17f   : > { %p13957_p11 = scmp.ne.s32.totalorder %s1461_s25, %s13956_s23  ;;  %p13964_p0 = scmp.lt.s32.totalorder %s1461_s25, %s1461_s25 }
 0x180   : > { %p13965_p2 = scmp.lt.s32.totalorder %s13956_s23, %s13956_s23 }
 0x181   : > { %p13959_p12 = pnand %p13957_p11, %p14707_p7 }
 0x182   : > { %12679 = dma.hbm_to_vmem [thread:$0]  (!%p14699_p6), %s17467_s5, 32, %s1432_s10, [#allocation26], %s17454_s7, %s17454_s7, %s17460_s3  }
 0x183   : > { %p13960_p13 = pneg %p13959_p12  ;;  %p13966_p1 = por %p13965_p2, %p13964_p0 }
 0x185   : > { %p13967_p3 = pnand %p13966_p1, %p13960_p13 }
 0x187   : > { %13970 = shalt.err (!%p13967_p3)
}
 0x188   : > { %s17468_s10 = sld [smem:[#allocation96_spill]]  ;;  %s13982_s29 = scalar_lea.vmem %s1487_s27, 32 }
 0x189   : > { %p13983_p4 = scmp.ne.s32.totalorder %s1487_s27, %s13982_s29  ;;  %p13990_p9 = scmp.lt.s32.totalorder %s1487_s27, %s1487_s27 }
 0x18a   : > { %p13991_p10 = scmp.lt.s32.totalorder %s13982_s29, %s13982_s29 }
 0x18b   : > { %p13985_p5 = pnand %p13983_p4, %p14707_p7 }
 0x18c   : > { %p13992_p11 = por %p13991_p10, %p13990_p9 }
 0x18d   : > { %p13986_p8 = pneg %p13985_p5 }
 0x18e   : > { %12685 = dma.hbm_to_vmem [thread:$0]  (!%p14699_p6), %s17468_s10, 32, %s1461_s25, [#allocation29], %s17454_s7, %s17454_s7, %s17460_s3  }
 0x18f   : > { %p13993_p12 = pnand %p13992_p11, %p13986_p8 }
 0x191   : > { %13996 = shalt.err (!%p13993_p12)
}
 0x192   : > { %s17469_s5 = sld [smem:[#allocation98_spill]]  ;;  %s14384_s1 = smov [#allocation36]  }
 0x193   : > { %s1513_s25 = sshll.u32 %s14384_s1, 4  ;;  %s14385_s17 = smov [#allocation39]   ;;  %s1514_s25 = int_to_ptr.vmem [resolvable:$true] %s1513_s25 }
 0x194   : > { %s1534_s23 = sshll.u32 %s14385_s17, 4  ;;  %s14008_s10 = scalar_lea.vmem %s1514_s25, 16  ;;  %s1535_s23 = int_to_ptr.vmem [resolvable:$true] %s1534_s23 }
 0x195   : > { %p14009_p13 = scmp.ne.s32.totalorder %s1514_s25, %s14008_s10  ;;  %s14015_s29 = scalar_lea.vmem %s1514_s25, 32 }
 0x196   : > { %p14016_p1 = scmp.lt.s32.totalorder %s1514_s25, %s1514_s25  ;;  %p14017_p3 = scmp.lt.s32.totalorder %s14015_s29, %s14008_s10 }
 0x197   : > { %p14011_p0 = pnand %p14009_p13, %p14707_p7 }
 0x198   : > { %12691 = dma.hbm_to_vmem [thread:$0]  (!%p14699_p6), %s17469_s5, 32, %s1487_s27, [#allocation32], %s17454_s7, %s17454_s7, %s17460_s3  }
 0x199   : > { %p14012_p2 = pneg %p14011_p0  ;;  %p14018_p4 = por %p14017_p3, %p14016_p1 }
 0x19b   : > { %p14019_p5 = pnand %p14018_p4, %p14012_p2 }
 0x19d   : > { %14022 = shalt.err (!%p14019_p5)
}
 0x19e   : > { %s17470_s8 = sld [smem:[#allocation100_spill]]  ;;  %s14034_s27 = scalar_lea.vmem %s1535_s23, 32 }
 0x19f   : > { %p14035_p8 = scmp.ne.s32.totalorder %s1535_s23, %s14034_s27  ;;  %p14042_p11 = scmp.lt.s32.totalorder %s1535_s23, %s1535_s23 }
 0x1a0   : > { %p14043_p12 = scmp.lt.s32.totalorder %s14034_s27, %s14034_s27 }
 0x1a1   : > { %p14037_p9 = pnand %p14035_p8, %p14707_p7 }
 0x1a2   : > { %p14044_p13 = por %p14043_p12, %p14042_p11 }
 0x1a3   : > { %p14038_p10 = pneg %p14037_p9 }
 0x1a4   : > { %12697 = dma.hbm_to_vmem [thread:$0]  (!%p14699_p6), %s17470_s8, 16, %s1514_s25, [#allocation35]  }
 0x1a5   : > { %p14045_p0 = pnand %p14044_p13, %p14038_p10 }
 0x1a7   : > { %14048 = shalt.err (!%p14045_p0)
}
 0x1a8   : > { %s17471_s5 = sld [smem:[#allocation102_spill]]  ;;  %s14386_s8 = smov [#allocation42]  }
 0x1a9   : > { %s1563_s1 = sshll.u32 %s14386_s8, 4  ;;  %s14387_s25 = smov [#allocation45]   ;;  %s1564_s1 = int_to_ptr.vmem [resolvable:$true] %s1563_s1 }
 0x1aa   : > { %s1601_s17 = sshll.u32 %s14387_s25, 4  ;;  %s14060_s10 = scalar_lea.vmem %s1564_s1, 32  ;;  %s1602_s17 = int_to_ptr.vmem [resolvable:$true] %s1601_s17 }
 0x1ab   : > { %p14061_p2 = scmp.ne.s32.totalorder %s1564_s1, %s14060_s10  ;;  %p14068_p4 = scmp.lt.s32.totalorder %s1564_s1, %s1564_s1 }
 0x1ac   : > { %p14069_p5 = scmp.lt.s32.totalorder %s14060_s10, %s14060_s10 }
 0x1ad   : > { %p14063_p1 = pnand %p14061_p2, %p14707_p7 }
 0x1ae   : > { %12703 = dma.hbm_to_vmem [thread:$0]  (!%p14699_p6), %s17471_s5, 32, %s1535_s23, [#allocation38], %s17454_s7, %s17454_s7, %s17460_s3  }
 0x1af   : > { %p14064_p3 = pneg %p14063_p1  ;;  %p14070_p8 = por %p14069_p5, %p14068_p4 }
 0x1b1   : > { %p14071_p9 = pnand %p14070_p8, %p14064_p3 }
 0x1b3   : > { %14074 = shalt.err (!%p14071_p9)
}
 0x1b4   : > { %s17472_s23 = sld [smem:[#allocation105_spill]]  ;;  %s14086_s29 = scalar_lea.vmem %s1602_s17, 32 }
 0x1b5   : > { %p14087_p10 = scmp.ne.s32.totalorder %s1602_s17, %s14086_s29  ;;  %p14094_p13 = scmp.lt.s32.totalorder %s1602_s17, %s1602_s17 }
 0x1b6   : > { %p14095_p0 = scmp.lt.s32.totalorder %s14086_s29, %s14086_s29 }
 0x1b7   : > { %p14089_p11 = pnand %p14087_p10, %p14707_p7 }
 0x1b8   : > { %p14096_p2 = por %p14095_p0, %p14094_p13 }
 0x1b9   : > { %p14090_p12 = pneg %p14089_p11 }
 0x1ba   : > { %12709 = dma.hbm_to_vmem [thread:$0]  (!%p14699_p6), %s17472_s23, 32, %s1564_s1, [#allocation41], %s17454_s7, %s17454_s7, %s17460_s3  }
 0x1bb   : > { %p14097_p1 = pnand %p14096_p2, %p14090_p12 }
 0x1bd   : > { %14100 = shalt.err (!%p14097_p1)
}
 0x1be   : > { %s17473_s27 = sld [smem:[#allocation111_spill]]  ;;  %s14388_s5 = smov [#allocation48]  }
 0x1bf   : > { %s1627_s8 = sshll.u32 %s14388_s5, 4  ;;  %s14389_s1 = smov [#allocation49]   ;;  %s1628_s8 = int_to_ptr.vmem [resolvable:$true] %s1627_s8 }
 0x1c0   : > { %s1643_s25 = sshll.u32 %s14389_s1, 4  ;;  %s14112_s10 = scalar_lea.vmem %s1628_s8, 32  ;;  %s1644_s25 = int_to_ptr.vmem [resolvable:$true] %s1643_s25 }
 0x1c1   : > { %p14113_p3 = scmp.ne.s32.totalorder %s1628_s8, %s14112_s10  ;;  %p14120_p8 = scmp.lt.s32.totalorder %s1628_s8, %s1628_s8 }
 0x1c2   : > { %p14121_p9 = scmp.lt.s32.totalorder %s14112_s10, %s14112_s10 }
 0x1c3   : > { %p14115_p4 = pnand %p14113_p3, %p14707_p7 }
 0x1c4   : > { %12715 = dma.hbm_to_vmem [thread:$0]  (!%p14699_p6), %s17473_s27, 32, %s1602_s17, [#allocation44], %s17454_s7, %s17454_s7, %s17460_s3  }
 0x1c5   : > { %p14116_p5 = pneg %p14115_p4  ;;  %p14122_p10 = por %p14121_p9, %p14120_p8 }
 0x1c7   : > { %p14123_p11 = pnand %p14122_p10, %p14116_p5 }
 0x1c9   : > { %14126 = shalt.err (!%p14123_p11)
}
 0x1ca   : > { %s17474_s17 = sld [smem:[#allocation113_spill]]  ;;  %s14138_s23 = scalar_lea.vmem %s1644_s25, 256 }
 0x1cb   : > { %p14139_p12 = scmp.ne.s32.totalorder %s1644_s25, %s14138_s23  ;;  %p14146_p2 = scmp.lt.s32.totalorder %s1644_s25, %s1644_s25 }
 0x1cc   : > { %p14147_p1 = scmp.lt.s32.totalorder %s14138_s23, %s14138_s23 }
 0x1cd   : > { %p14141_p13 = pnand %p14139_p12, %p14707_p7 }
 0x1ce   : > { %p14148_p3 = por %p14147_p1, %p14146_p2 }
 0x1cf   : > { %p14142_p0 = pneg %p14141_p13 }
 0x1d0   : > { %12721 = dma.hbm_to_vmem [thread:$0]  (!%p14699_p6), %s17474_s17, 32, %s1628_s8, [#allocation47], %s17454_s7, %s17454_s7, %s17460_s3  }
 0x1d1   : > { %p14149_p4 = pnand %p14148_p3, %p14142_p0 }
 0x1d3   : > { %14152 = shalt.err (!%p14149_p4)
}
 0x1d4   : > { %s17475_s29 = sld [smem:[#allocation115_spill]]  ;;  %s10728_s11 = sadd.s32 4294967294, %s14305_s18  }
 0x1d5   : > { %s14932_s22 = sadd.s32 1, %s14305_s18   ;;  %s140_s7 = sadd.s32 1, %s14301_s16 }
 0x1d6   : > { %s137_s3 = ssub.s32 %s14305_s18, %s14932_s22  ;;  %s17476_s27 = sld [smem:[#allocation69_spill]] }
 0x1d7   : > { %p147_p7 = scmp.ne.s32.totalorder %s14301_s16, %s14297_s15  ;;  %p138_p5 = scmp.eq.s32.totalorder %s137_s3, 0 }
 0x1d8   : > { %p148_p8 = scmp.eq.s32.totalorder %s14305_s18, 0  ;;  %p153_p9 = scmp.ne.s32.totalorder %s14297_s15, %s14293_s0 }
 0x1d9   : > { %p1195_p10 = scmp.eq.s32.totalorder %s14685_s26, 1  ;;  %p17478_p12 = scmp.eq.s32.totalorder %s14685_s26, 0 }
 0x1da   : > { %12724 = dma.hbm_to_vmem [thread:$0]  (!%p14699_p6), %s17475_s29, 256, %s1644_s25, [#allocation50], %s17464_s4, %s17464_s4, %s17463_s2  }
 0x1db   : > { %s14944_s5 = scalar_select %p138_p5, %s14301_s16, %s140_s7  }
 0x1dc   : > { %p149_p11 = por %p148_p8, %p147_p7  ;;  %p14948_p13 = por %p17478_p12, %p153_p9 }
 0x1dd   : > { %17477 = sst [smem:[#allocation121_spill]] %s14944_s5  ;;  %p14952_p6 = por %p1195_p10, %p147_p7 }
 0x1de   : > { %s17479_s2 = scalar_select %p14948_p13, 1, 0 }
 0x1df   : > { %s17480_s4 = scalar_select %p14952_p6, 1, 0 }
 0x1e0   : > { %p1201_p0 = scmp.eq.s32.totalorder %s10728_s11, 1  ;;  %p12762_p2 = scmp.lt.s32.totalorder %s14305_s18, 2 }
 0x1e1   : > { %s1663_s8 = sand.u32 1, %s14301_s16   ;;  %s10761_s10 = sshll.u32 %s14305_s18, 7 }
 0x1e2   : > { %p14958_p1 = por %p1201_p0, %p153_p9  ;;  %s10760_s25 = sshll.u32 %s1663_s8, 3 }
 0x1e3   : > { %s14964_s17 = scalar_lea.hbm %s17476_s27, %s10761_s10  ;;  %s1667_s23 = scalar_lea.vmem [#allocation4], %s10760_s25 }
 0x1e4   : > { %s17481_s1 = scalar_select %p14958_p1, 1, 0 }
 0x1e5   : > { %s1674_s29 = sshll.u32 %s1667_s23, 4  ;;  %p14966_p3 = pnand %p12762_p2, %p149_p11  ;;  %s1675_s29 = int_to_ptr.vmem [resolvable:$true] %s1674_s29 }
 0x1e6   : > { %s1664_s11 = scalar_lea.sflag [#allocation5], %s1663_s8  ;;  %s14153_s3 = scalar_lea.hbm %s14964_s17, 128 }
 0x1e7   : > { %s17482_s7 = scalar_select %p14966_p3, 1, 0 }
 0x1e8   : > { %p14154_p4 = scmp.ne.s32.totalorder %s14964_s17, %s14153_s3  ;;  %p14155_p7 = pneg %p14966_p3 }
 0x1e9   : > { %s14158_s10 = scalar_lea.hbm %s17476_s27, 256  ;;  %p14159_p9 = scmp.lt.s32.totalorder %s14964_s17, %s17476_s27 }
 0x1ea   : > { %p14156_p5 = pnand %p14155_p7, %p14154_p4  ;;  %p14160_p10 = scmp.lt.s32.totalorder %s14158_s10, %s14153_s3 }
 0x1ec   : > { %p14157_p8 = pneg %p14156_p5  ;;  %p14161_p12 = por %p14160_p10, %p14159_p9 }
 0x1ee   : > { %p14162_p0 = pnand %p14161_p12, %p14157_p8 }
 0x1f0   : > { %14165 = shalt.err (!%p14162_p0)
}
 0x1f1   : > { %s14166_s25 = scalar_lea.vmem %s1675_s29, 128  ;;  %s14390_s23 = smov [#allocation4]  }
 0x1f2   : > { %p14167_p11 = scmp.ne.s32.totalorder %s1675_s29, %s14166_s25  ;;  %s14171_s9 = sshll.u32 %s14390_s23, 4  ;;  %s14172_s9 = int_to_ptr.vmem [resolvable:$false] %s14171_s9 }
 0x1f3   : > { %s14173_s8 = scalar_lea.vmem %s14172_s9, 256  ;;  %p14174_p6 = scmp.lt.s32.totalorder %s1675_s29, %s14172_s9 }
 0x1f4   : > { %p14169_p2 = pnand %p14167_p11, %p14155_p7  ;;  %p14175_p13 = scmp.lt.s32.totalorder %s14173_s8, %s14166_s25 }
 0x1f6   : > { %p14170_p1 = pneg %p14169_p2  ;;  %p14176_p3 = por %p14175_p13, %p14174_p6 }
 0x1f8   : > { %p14177_p4 = pnand %p14176_p3, %p14170_p1 }
 0x1fa   : > { %14180 = shalt.err (!%p14177_p4)
}
 0x1fb   : > { %p17483_p5 = scmp.ne.s32.totalorder %s17482_s7, 0  ;;  %p17484_p8 = scmp.ne.s32.totalorder %s17440_s28, 0 }
 0x1fc   : > { %s14983_s3 = sand.u32 (!%p17484_p8), 1, %s14297_s15   ;;  %p17485_p13 = scmp.ne.s32.totalorder (!%p17484_p8), %s17479_s2, 0 }
 0x1fd   : > { %12728 = dma.hbm_to_vmem [thread:$0]  (!%p17483_p5), %s14964_s17, 128, %s1675_s29, %s1664_s11  }
 0x1fe   : > { %1699 = sbr.rel (%p17484_p8) target bundleno = 17589 (0x44b5), region = 216  ;;  %s17361_s10 = sshll.u32 (!%p17484_p8), %s14983_s3, 3 }
 0x1ff   : > { %s1702_s9 = scalar_lea.sflag (!%p17484_p8), [#allocation5], %s14983_s3  ;;  %s14989_s25 = scalar_lea.vmem (!%p17484_p8), [#allocation4], %s17361_s10 }
 0x203   : > { %14224 = dma.done.wait (%p17485_p13), %s1702_s9, 128  }
 0x204   : > { %14226 = vsyncadd (%p17485_p13), %s1702_s9, 4294967168  ;;  %p17486_p6 = scmp.eq.s32.totalorder %s14685_s26, 0 }
 0x206   : > { %14228 = dma.done.wait (%p17486_p6), [#allocation8], 32   ;;  %p17487_p1 = pmov %p17486_p6 }
 0x208   : > { %14230 = vsyncadd (%p17487_p1), [#allocation8], 4294967264  ;;  %p17488_p3 = pmov %p17487_p1 }
 0x209   : > { %p17489_p7 = pmov %p17487_p1 }
 0x20a   : > { %14232 = dma.done.wait (%p17488_p3), [#allocation11], 32  }
 0x20b   : > { %14234 = vsyncadd (%p17489_p7), [#allocation11], 4294967264  ;;  %p17490_p9 = pmov %p17487_p1 }
 0x20c   : > { %p17491_p10 = pmov %p17487_p1 }
 0x20d   : > { %14236 = dma.done.wait (%p17490_p9), [#allocation14], 160  }
 0x20e   : > { %14238 = vsyncadd (%p17491_p10), [#allocation14], 4294967136  ;;  %p17492_p12 = pmov %p17487_p1 }
 0x20f   : > { %p17493_p0 = pmov %p17487_p1 }
 0x210   : > { %14240 = dma.done.wait (%p17492_p12), [#allocation17], 64  }
 0x211   : > { %14242 = vsyncadd (%p17493_p0), [#allocation17], 4294967232  ;;  %p17494_p11 = pmov %p17493_p0 }
 0x212   : > { %p17495_p2 = pmov %p17493_p0 }
 0x213   : > { %14244 = dma.done.wait (%p17494_p11), [#allocation20], 288  }
 0x214   : > { %14246 = vsyncadd (%p17495_p2), [#allocation20], 4294967008  ;;  %p17496_p4 = pmov %p17493_p0 }
 0x215   : > { %p17497_p5 = pmov %p17493_p0 }
 0x216   : > { %14248 = dma.done.wait (%p17496_p4), [#allocation23], 64  }
 0x217   : > { %14250 = vsyncadd (%p17497_p5), [#allocation23], 4294967232  ;;  %p17498_p8 = pmov %p17493_p0 }
 0x218   : > { %p17499_p13 = pmov %p17493_p0 }
 0x219   : > { %14252 = dma.done.wait (%p17498_p8), [#allocation26], 64  }
 0x21a   : > { %14254 = vsyncadd (%p17499_p13), [#allocation26], 4294967232  ;;  %p17500_p6 = pmov %p17493_p0 }
 0x21b   : > { %p17501_p1 = pmov %p17493_p0 }
 0x21c   : > { %14256 = dma.done.wait (%p17500_p6), [#allocation29], 64  }
 0x21d   : > { %14258 = vsyncadd (%p17501_p1), [#allocation29], 4294967232  ;;  %p17502_p3 = pmov %p17493_p0 }
 0x21e   : > { %p17503_p7 = pmov %p17493_p0 }
 0x21f   : > { %14260 = dma.done.wait (%p17502_p3), [#allocation32], 64  }
 0x220   : > { %14262 = vsyncadd (%p17503_p7), [#allocation32], 4294967232  ;;  %p17504_p9 = pmov %p17493_p0 }
 0x221   : > { %p17505_p10 = pmov %p17493_p0 }
 0x222   : > { %14264 = dma.done.wait (%p17504_p9), [#allocation35], 48  }
 0x223   : > { %14266 = vsyncadd (%p17505_p10), [#allocation35], 4294967248  ;;  %p17506_p12 = pmov %p17493_p0 }
 0x225   : > { %14268 = dma.done.wait (%p17506_p12), [#allocation38], 48  }
 0x226   : > { %14270 = vsyncadd (%p17493_p0), [#allocation38], 4294967248  ;;  %p17507_p11 = pmov %p17493_p0 }
 0x227   : > { %p17508_p2 = pmov %p17493_p0 }
 0x228   : > { %14272 = dma.done.wait (%p17507_p11), [#allocation41], 64  }
 0x229   : > { %14274 = vsyncadd (%p17508_p2), [#allocation41], 4294967232  ;;  %p17509_p4 = pmov %p17493_p0 }
 0x22a   : > { %p17510_p5 = pmov %p17493_p0 }
 0x22b   : > { %14276 = dma.done.wait (%p17509_p4), [#allocation44], 64  }
 0x22c   : > { %14278 = vsyncadd (%p17510_p5), [#allocation44], 4294967232  ;;  %p17511_p8 = pmov %p17493_p0 }
 0x22d   : > { %p17512_p13 = pmov %p17493_p0 }
 0x22e   : > { %14280 = dma.done.wait (%p17511_p8), [#allocation47], 64  }
 0x22f   : > { %14282 = vsyncadd (%p17512_p13), [#allocation47], 4294967232  ;;  %p17513_p6 = pmov %p17493_p0 }
 0x230   : > { %p17514_p1 = pmov %p17493_p0 }
 0x231   : > { %14284 = dma.done.wait (%p17513_p6), [#allocation50], 256  }
 0x232   : > { %14286 = vsyncadd (%p17514_p1), [#allocation50], 4294967040  ;;  %s17515_s28 = sld [smem:[#allocation106_spill]]  ;;  %v14391_v0 = vmov 0.0   ;;  %vm14392_vm0 = vmmov 0   ;;  %v15068_v5 = vld [vmem:[%s14989_s25] sm:$0xff] }
 0x233   : > { %s17516_s2 = sld [smem:[#allocation108_spill]]  ;;  %11671 = vmatprep.subr.bf16.mxu1 %v14391_v0  ;;  %11663 = vmatprep.subr.bf16.mxu0 %v14391_v0  ;;  %vm2022_vm1 = vcmask 261120   ;;  %v2002_v6 = vpack.c.bf16 %v15068_v5, %v15068_v5  ;;  %v10804_v7 = vld [vmem:[#allocation39] ss:$0 sm:$0xff]  ;;  %v10800_v8 = vld [vmem:[#allocation40] ss:$0 sm:$0xff] }
 0x234   : > { %11675 = vmatprep.mubr.msk.bf16.mxu1 %vm14392_vm0, %v14391_v0  ;;  %11667 = vmatprep.mubr.msk.bf16.mxu0 %vm14392_vm0, %v14391_v0  ;;  %vm2187_vm2 = vcmask 64512   ;;  %s17364_s17 = smov 112   ;;  %s17517_s29 = sld [smem:[#allocation109_spill]]  ;;  %v10808_v39 = vld [vmem:[#allocation42] ss:$0 sm:$0xff]  ;;  %vm2250_vm3 = vcmask 1043456  }
 0x235   : > { %s17370_s7 = smov 120   ;;  %s17362_s11 = smov 104   ;;  %vm2295_vm4 = vcmask 60416   ;;  %vm2418_vm5 = vcmask 126016   ;;  %vm2538_vm6 = vcmask 191616   ;;  %vm2658_vm7 = vcmask 257216  }
 0x236   : > { %s17518_s23 = sld [smem:[#allocation107_spill]]  ;;  %s17368_s8 = smov 8   ;;  %vm3048_vm8 = vcmask 31744   ;;  %vm3105_vm9 = vcmask 523264   ;;  %vm3162_vm10 = vcmask 27648   ;;  %vm3313_vm11 = vcmask 60448  }
 0x237   : > { %s17367_s9 = smov 16   ;;  %s17519_s10 = sld [smem:[#allocation103_spill]]  ;;  %vm3455_vm12 = vcmask 93248   ;;  %vm3597_vm13 = vcmask 126048   ;;  %vm3613_vm14 = vcmask 130048  }
 0x238   : > { %v12920_v1 = vld [vmem:[%s17515_s28 + $0x8] sm:$0xff]   ;;  %v12922_v3 = vld [vmem:[%s17515_s28] sm:$0xff]   ;;  %p1953_p3 = scmp.lt.s32.totalorder %s14685_s26, 1  ;;  %s17525_s14 = sld [smem:[#allocation90_spill]] }
 0x239   : > { %v12921_v2 = vld [vmem:[%s17516_s2 + $0x8] sm:$0xff]   ;;  %11672 = vmatpush3.bf16.msra.mxu1 %v12920_v1  ;;  %v12923_v4 = vld [vmem:[%s17516_s2] sm:$0xff]   ;;  %s17527_s19 = sld [smem:[#allocation94_spill]]  ;;  %s17531_s30 = smov 124  }
 0x23a   : > { %11664 = vmatpush3.bf16.msra.mxu0 %v12921_v2  ;;  %11673 = vmatprep.subr.bf16.mxu1 %v14391_v0  ;;  %v12924_v22 = vld [vmem:[%s17517_s29 + $0x8] sm:$0xff]   ;;  %v12925_v23 = vld [vmem:[%s17517_s29] sm:$0xff]   ;;  %s17528_s20 = sld [smem:[#allocation86_spill]]  ;;  %s17532_s5 = smov 116  }
 0x23b   : > { %11665 = vmatprep.subr.bf16.mxu0 %v14391_v0  ;;  %s17529_s24 = sld [smem:[#allocation87_spill]]  ;;  %s17535_s16 = smov 12  }
 0x23c   : > { %s17530_s27 = sld [smem:[#allocation84_spill]]  ;;  %s17536_s15 = smov 104  }
 0x23d   : > { %11674 = vmatpush3.bf16.msra.mxu1 %v12922_v3  ;;  %p17546_p9 = scmp.ne.s32.totalorder %s17480_s4, 0 }
 0x23e   : > { %11666 = vmatpush3.bf16.msra.mxu0 %v12923_v4  ;;  %11687 = vmatprep.subr.bf16.mxu1 %v14391_v0 }
 0x23f   : > { %11679 = vmatprep.subr.bf16.mxu0 %v14391_v0 }
 0x240   : > { %11676 = vmatmul.mubr.msk.bf16.vlgmr.msra.gmra.mxu1 %vm2022_vm1, %v2002_v6 }
 0x241   : > { %11668 = vmatmul.mubr.msk.bf16.vlgmr.msra.gmra.mxu0 %vm2022_vm1, %v2002_v6  ;;  %11689 = vmatprep.mubr.msk.bf16.mxu1 %vm14392_vm0, %v14391_v0 }
 0x242   : > { %11683 = vmatprep.mubr.msk.bf16.mxu0 %vm14392_vm0, %v14391_v0  ;;  %11680 = vmatpush3.bf16.msra.mxu0 %v12924_v22 }
 0x243   : > { %11681 = vmatprep.subr.bf16.mxu0 %v14391_v0 }
 0x246   : > { %11682 = vmatpush3.bf16.msra.mxu0 %v12925_v23 }
 0x247   : > { %11693 = vmatprep.subr.bf16.mxu0 %v14391_v0 }
 0x249   : > { %11684 = vmatmul.mubr.msk.bf16.vlgmr.msra.gmra.mxu0 %vm2022_vm1, %v2002_v6 }
 0x24a   : > { %11695 = vmatprep.mubr.msk.bf16.mxu0 %vm14392_vm0, %v14391_v0 }
 0x300   : > { %v2120_v9 = vpop.f32.mrf.mxu1 }
 0x301   : > { %v2121_v10 = vadd.f32 %v10804_v7, %v2120_v9  ;;  %v2060_v11 = vpop.f32.mrf.mxu0 }
 0x302   : > { %v2061_v12 = vadd.f32 %v10800_v8, %v2060_v11  ;;  %v11677_v13 = vpop.f32.mrf.mxu1 }
 0x303   : > { %v2126_v14 = vpack.c.bf16 %v2121_v10, %v2121_v10  ;;  %v11669_v15 = vpop.f32.mrf.mxu0 }
 0x304   : > { %v2123_v16 = vpop.f32.mrf.mxu1  ;;  %v2066_v17 = vpack.c.bf16 %v2061_v12, %v2061_v12 }
 0x305   : > { %2422 = vrot.lane.b32.xlu1 %v2126_v14, %s17364_s17  ;;  %2301 = vrot.lane.b32.xlu0 %v2126_v14, %s17370_s7  ;;  %v2063_v18 = vpop.f32.mrf.mxu0  ;;  %v2192_v19 = vsel %vm2187_vm2, %v2126_v14, 0 }
 0x306   : > { %v11678_v20 = vpop.f32.mrf.mxu1  ;;  %11688 = vmatpush3.bf16.xpose.msra.mxu1 %v2192_v19 }
 0x307   : > { %v11670_v21 = vpop.f32.mrf.mxu0  ;;  %11699 = vmatprep.subr.bf16.mxu1 %v14391_v0 }
 0x309   : > { %2420 = vrot.lane.b32.xlu1 %v2066_v17, %s17364_s17  ;;  %2298 = vrot.lane.b32.xlu0 %v2066_v17, %s17370_s7  ;;  %v2180_v40 = vpop.f32.mrf.mxu0 }
 0x30a   : > { %v2181_v41 = vadd.f32 %v10808_v39, %v2180_v40 }
 0x30b   : > { %v11685_v42 = vpop.f32.mrf.mxu0 }
 0x30c   : > { %v2186_v43 = vpack.c.bf16 %v2181_v41, %v2181_v41 }
 0x30d   : > { %2540 = vrot.lane.b32.xlu1 %v2066_v17, %s17362_s11  ;;  %2542 = vrot.lane.b32.xlu0 %v2126_v14, %s17362_s11  ;;  %v2183_v44 = vpop.f32.mrf.mxu0 }
 0x30e   : > { %11690 = vmatmul.mubr.msk.bf16.vlgmr.msra.gmra.mxu1 %vm2187_vm2, %v2066_v17  ;;  %v2252_v45 = vsel %vm2250_vm3, %v2186_v43, 0 }
 0x30f   : > { %11701 = vmatprep.mubr.msk.bf16.mxu1 %vm14392_vm0, %v14391_v0  ;;  %v11686_v46 = vpop.f32.mrf.mxu0  ;;  %11694 = vmatpush3.bf16.msra.mxu0 %v2252_v45 }
 0x310   : > { %11705 = vmatprep.subr.bf16.mxu0 %v14391_v0 }
 0x377   : > { %v2302_v24 = vpop.permute.xlu0 %2301  ;;  %v2423_v26 = vpop.permute.xlu1 %2422 }
 0x378   : > { %v2307_v25 = vsel %vm2187_vm2, %v2302_v24, 0  ;;  %v2428_v28 = vsel %vm2187_vm2, %v2423_v26, 0 }
 0x379   : > { %11700 = vmatpush3.bf16.xpose.msra.mxu1 %v2307_v25 }
 0x37a   : > { %11711 = vmatprep.subr.bf16.mxu1 %v14391_v0 }
 0x37b   : > { %v2299_v27 = vpop.permute.xlu0 %2298  ;;  %v2421_v30 = vpop.permute.xlu1 %2420 }
 0x37f   : > { %v2543_v29 = vpop.permute.xlu0 %2542  ;;  %v2541_v32 = vpop.permute.xlu1 %2540 }
 0x380   : > { %11702 = vmatmul.mubr.msk.bf16.vlgmr.msra.gmra.mxu1 %vm2187_vm2, %v2299_v27  ;;  %v2548_v31 = vsel %vm2187_vm2, %v2543_v29, 0 }
 0x381   : > { %11712 = vmatpush3.bf16.xpose.msra.mxu1 %v2428_v28  ;;  %11713 = vmatprep.mubr.msk.bf16.mxu1 %vm14392_vm0, %v14391_v0 }
 0x382   : > { %11723 = vmatprep.subr.bf16.mxu1 %v14391_v0 }
 0x388   : > { %11714 = vmatmul.mubr.msk.bf16.vlgmr.msra.gmra.mxu1 %vm2187_vm2, %v2421_v30 }
 0x389   : > { %11724 = vmatpush3.bf16.xpose.msra.mxu1 %v2548_v31  ;;  %11725 = vmatprep.mubr.msk.bf16.mxu1 %vm14392_vm0, %v14391_v0 }
 0x38a   : > { %11735 = vmatprep.subr.bf16.mxu1 %v14391_v0 }
 0x390   : > { %11726 = vmatmul.mubr.msk.bf16.vlgmr.msra.gmra.mxu1 %vm2187_vm2, %v2541_v32 }
 0x391   : > { %11739 = vmatprep.mubr.msk.bf16.mxu1 %vm14392_vm0, %v14391_v0 }
 0x3ce   : > { %v2228_v33 = vpop.f32.mrf.mxu1 }
 0x3cf   : > { %v2234_v34 = vmul.f32 0.35355338, %v2228_v33 }
 0x3d0   : > { %v11691_v35 = vpop.f32.mrf.mxu1 }
 0x3d1   : > { %v2235_v36 = vsel %vm2187_vm2, %v2234_v34, -inf }
 0x3d2   : > { %2236 = vmax.xlane.f32.xlu0 %v2235_v36  ;;  %v2231_v37 = vpop.f32.mrf.mxu1 }
 0x3d4   : > { %v11692_v38 = vpop.f32.mrf.mxu1 }
 0x440   : > { %v2343_v47 = vpop.f32.mrf.mxu1 }
 0x441   : > { %v2349_v48 = vmul.f32 0.35355338, %v2343_v47 }
 0x442   : > { %v11703_v49 = vpop.f32.mrf.mxu1 }
 0x443   : > { %v2350_v50 = vsel %vm2187_vm2, %v2349_v48, -inf }
 0x444   : > { %2351 = vmax.xlane.f32.xlu1 %v2350_v50  ;;  %v2346_v51 = vpop.f32.mrf.mxu1 }
 0x446   : > { %v11704_v52 = vpop.f32.mrf.mxu1 }
 0x448   : > { %v2464_v53 = vpop.f32.mrf.mxu1 }
 0x449   : > { %v2470_v54 = vmul.f32 0.35355338, %v2464_v53 }
 0x44a   : > { %v11715_v55 = vpop.f32.mrf.mxu1 }
 0x44b   : > { %v2471_v56 = vsel %vm2187_vm2, %v2470_v54, -inf  ;;  %v12926_v55 = vld [vmem:[%s17518_s23 + $0x8] sm:$0xff]  }
 0x44c   : > { %2472 = vmax.xlane.f32.xlu0 %v2471_v56  ;;  %v2467_v57 = vpop.f32.mrf.mxu1  ;;  %11736 = vmatpush3.bf16.msra.mxu1 %v12926_v55 }
 0x44d   : > { %11737 = vmatprep.subr.bf16.mxu1 %v14391_v0 }
 0x44e   : > { %v11716_v58 = vpop.f32.mrf.mxu1 }
 0x450   : > { %v2584_v59 = vpop.f32.mrf.mxu1 }
 0x451   : > { %v2590_v60 = vmul.f32 0.35355338, %v2584_v59  ;;  %v12927_v59 = vld [vmem:[%s17518_s23] sm:$0xff]  }
 0x452   : > { %v11727_v61 = vpop.f32.mrf.mxu1  ;;  %11738 = vmatpush3.bf16.msra.mxu1 %v12927_v59 }
 0x453   : > { %v2591_v62 = vsel %vm2187_vm2, %v2590_v60, -inf }
 0x454   : > { %2592 = vmax.xlane.f32.xlu0 %v2591_v62  ;;  %v2587_v63 = vpop.f32.mrf.mxu1 }
 0x456   : > { %v11728_v1 = vpop.f32.mrf.mxu1 }
 0x45b   : > { %v2237_v2 = vpop.xlane.xlu0 %2236 }
 0x45c   : > { %v2238_v3 = vsub.f32 %v2234_v34, %v2237_v2 }
 0x45e   : > { %v2239_v4 = vmul.f32 1.442695, %v2238_v3 }
 0x460   : > { %12991 = vpow2.f32 %v2239_v4 }
 0x46d   : > { %v12992_v6 = vpop.eup %12991 }
 0x46e   : > { %v2241_v7 = vsel %vm2187_vm2, %v12992_v6, 0.0 }
 0x46f   : > { %2242 = vadd.xlane.f32.xlu1 %v2241_v7 }
 0x480   : > { %2363 = vrot.lane.b32.xlu1 %v2186_v43, %s17370_s7 }
 0x4cd   : > { %v2352_v8 = vpop.xlane.xlu1 %2351 }
 0x4ce   : > { %v2353_v9 = vsub.f32 %v2349_v48, %v2352_v8 }
 0x4d0   : > { %v2354_v10 = vmul.f32 1.442695, %v2353_v9  ;;  %v10823_v9 = vld [vmem:[%s17519_s10] ss:$0 sm:$0xff] }
 0x4d2   : > { %12993 = vpow2.f32 %v2354_v10 }
 0x4d5   : > { %v2473_v11 = vpop.xlane.xlu0 %2472 }
 0x4d6   : > { %v2474_v12 = vsub.f32 %v2470_v54, %v2473_v11 }
 0x4d8   : > { %v2475_v13 = vmul.f32 1.442695, %v2474_v12 }
 0x4da   : > { %12995 = vpow2.f32 %v2475_v13 }
 0x4dd   : > { %v2593_v14 = vpop.xlane.xlu0 %2592 }
 0x4de   : > { %v2594_v15 = vsub.f32 %v2590_v60, %v2593_v14 }
 0x4df   : > { %v12994_v16 = vpop.eup %12993 }
 0x4e0   : > { %v2595_v17 = vmul.f32 1.442695, %v2594_v15  ;;  %v2356_v18 = vsel %vm2187_vm2, %v12994_v16, 0.0 }
 0x4e1   : > { %2357 = vadd.xlane.f32.xlu0 %v2356_v18 }
 0x4e2   : > { %12997 = vpow2.f32 %v2595_v17 }
 0x4e7   : > { %v12996_v19 = vpop.eup %12995 }
 0x4e8   : > { %v2477_v20 = vsel %vm2187_vm2, %v12996_v19, 0.0 }
 0x4e9   : > { %2478 = vadd.xlane.f32.xlu1 %v2477_v20 }
 0x4ef   : > { %v12998_v21 = vpop.eup %12997 }
 0x4f0   : > { %v2597_v22 = vsel %vm2187_vm2, %v12998_v21, 0.0 }
 0x4f1   : > { %2598 = vadd.xlane.f32.xlu0 %v2597_v22 }
 0x4f8   : > { %v2243_v23 = vpop.xlane.xlu1 %2242 }
 0x4f9   : > { %12999 = vrcp.f32 %v2243_v23 }
 0x4fa   : > { %2603 = vrot.lane.b32.xlu1 %v2186_v43, %s17362_s11  ;;  %s17366_s11 = smov 24  }
 0x4fc   : > { %v2364_v25 = vpop.permute.xlu1 %2363 }
 0x4fd   : > { %v2369_v28 = vsel %vm2250_vm3, %v2364_v25, 0 }
 0x506   : > { %v13000_v24 = vpop.eup %12999 }
 0x507   : > { %2483 = vrot.lane.b32.xlu0 %v2186_v43, %s17364_s17  ;;  %v2245_v26 = vmul.f32 %v13000_v24, %v12992_v6  ;;  %s17520_s17 = sld [smem:[#allocation114_spill]] }
 0x509   : > { %v2246_v27 = vpack.c.bf16 %v2245_v26, %v2245_v26 }
 0x50b   : > { %11696 = vmatmul.mubr.msk.bf16.vlgmr.msra.gmra.mxu0 %vm2187_vm2, %v2246_v27 }
 0x50c   : > { %11706 = vmatpush3.bf16.msra.mxu0 %v2369_v28  ;;  %11707 = vmatprep.mubr.msk.bf16.mxu0 %vm14392_vm0, %v14391_v0 }
 0x50d   : > { %11717 = vmatprep.subr.bf16.mxu0 %v14391_v0  ;;  %v12929_v17 = vld [vmem:[%s17520_s17] sm:$0xff]  }
 0x56a   : > { %v2358_v29 = vpop.xlane.xlu0 %2357 }
 0x56b   : > { %13001 = vrcp.f32 %v2358_v29 }
 0x572   : > { %v2479_v30 = vpop.xlane.xlu1 %2478 }
 0x573   : > { %13003 = vrcp.f32 %v2479_v30 }
 0x576   : > { %v2604_v39 = vpop.permute.xlu1 %2603 }
 0x577   : > { %v2609_v41 = vsel %vm2250_vm3, %v2604_v39, 0 }
 0x578   : > { %v13002_v31 = vpop.eup %13001 }
 0x579   : > { %v2360_v32 = vmul.f32 %v13002_v31, %v12994_v16  ;;  %v12928_v16 = vld [vmem:[%s17520_s17 + $0x8] sm:$0xff]  }
 0x57a   : > { %v2599_v33 = vpop.xlane.xlu0 %2598  ;;  %11751 = vmatprep.subr.bf16.mxu1 %v12928_v16 }
 0x57b   : > { %13005 = vrcp.f32 %v2599_v33  ;;  %v2361_v34 = vpack.c.bf16 %v2360_v32, %v2360_v32 }
 0x57d   : > { %11708 = vmatmul.mubr.msk.bf16.vlgmr.msra.gmra.mxu0 %vm2187_vm2, %v2361_v34 }
 0x57e   : > { %v2484_v35 = vpop.permute.xlu0 %2483  ;;  %11719 = vmatprep.mubr.msk.bf16.mxu0 %vm14392_vm0, %v14391_v0 }
 0x57f   : > { %v2489_v36 = vsel %vm2250_vm3, %v2484_v35, 0 }
 0x580   : > { %v13004_v37 = vpop.eup %13003  ;;  %11718 = vmatpush3.bf16.msra.mxu0 %v2489_v36 }
 0x581   : > { %11729 = vmatprep.subr.bf16.mxu0 %v14391_v0  ;;  %v2481_v38 = vmul.f32 %v13004_v37, %v12996_v19 }
 0x583   : > { %v2482_v40 = vpack.c.bf16 %v2481_v38, %v2481_v38 }
 0x585   : > { %11720 = vmatmul.mubr.msk.bf16.vlgmr.msra.gmra.mxu0 %vm2187_vm2, %v2482_v40 }
 0x586   : > { %11730 = vmatpush3.bf16.msra.mxu0 %v2609_v41  ;;  %11731 = vmatprep.mubr.msk.bf16.mxu0 %vm14392_vm0, %v14391_v0 }
 0x587   : > { %11743 = vmatprep.subr.bf16.mxu0 %v14391_v0 }
 0x588   : > { %v13006_v42 = vpop.eup %13005 }
 0x589   : > { %v2601_v43 = vmul.f32 %v13006_v42, %v12998_v21 }
 0x58b   : > { %v2602_v44 = vpack.c.bf16 %v2601_v43, %v2601_v43 }
 0x58d   : > { %11732 = vmatmul.mubr.msk.bf16.vlgmr.msra.gmra.mxu0 %vm2187_vm2, %v2602_v44 }
 0x58e   : > { %11747 = vmatprep.mubr.msk.bf16.mxu0 %vm14392_vm0, %v14391_v0 }
 0x5cb   : > { %v2288_v45 = vpop.f32.mrf.mxu0 }
 0x5cc   : > { %v2294_v46 = vpack.c.bf16 %v2288_v45, %v2288_v45 }
 0x5cd   : > { %v11697_v47 = vpop.f32.mrf.mxu0 }
 0x5ce   : > { %2296 = vst.msk [vmem:[#allocation2] sm:$0xf] %vm2295_vm4, %v2294_v46 }
 0x5cf   : > { %v2291_v48 = vpop.f32.mrf.mxu0 }
 0x5d1   : > { %v11698_v49 = vpop.f32.mrf.mxu0 }
 0x63d   : > { %v2405_v50 = vpop.f32.mrf.mxu0 }
 0x63e   : > { %v11227_v51 = vpack.c.bf16 %v2405_v50, %v2405_v50 }
 0x63f   : > { %v11709_v52 = vpop.f32.mrf.mxu0 }
 0x640   : > { %2415 = vrot.lane.b32.xlu1 %v11227_v51, %s17368_s8  ;;  %s1954_s8 = scalar_select %p1953_p3, %s14685_s26, 1  ;;  %v12930_v51 = vld [vmem:[%s14647_s21 + $0x8] sm:$0xff]   ;;  %v12931_v52 = vld [vmem:[%s14647_s21] sm:$0xff]  }
 0x641   : > { %v2408_v53 = vpop.f32.mrf.mxu0  ;;  %11744 = vmatpush3.bf16.msra.mxu0 %v12930_v51 }
 0x642   : > { %s15161_s7 = sshll.u32 %s1954_s8, 6  ;;  %11745 = vmatprep.subr.bf16.mxu0 %v14391_v0  ;;  %s17523_s8 = smov 120  }
 0x643   : > { %v11710_v54 = vpop.f32.mrf.mxu0 }
 0x645   : > { %v2525_v56 = vpop.f32.mrf.mxu0  ;;  %11746 = vmatpush3.bf16.msra.mxu0 %v12931_v52 }
 0x646   : > { %v11228_v57 = vpack.c.bf16 %v2525_v56, %v2525_v56 }
 0x647   : > { %v11721_v58 = vpop.f32.mrf.mxu0 }
 0x648   : > { %2535 = vrot.lane.b32.xlu0 %v11228_v57, %s17367_s9  ;;  %s17522_s9 = sld [smem:[#allocation71_spill]]  ;;  %v10833_v57 = vld [vmem:[#allocation43] ss:$0 sm:$0xff] }
 0x649   : > { %v2528_v60 = vpop.f32.mrf.mxu0 }
 0x64b   : > { %v11722_v61 = vpop.f32.mrf.mxu0 }
 0x64d   : > { %v2645_v62 = vpop.f32.mrf.mxu0 }
 0x64e   : > { %v11229_v63 = vpack.c.bf16 %v2645_v62, %v2645_v62  ;;  %s15169_s13 = scalar_lea.vmem %s17522_s9, %s15161_s7  ;;  %s17376_s9 = smov 116  }
 0x64f   : > { %v11733_v1 = vpop.f32.mrf.mxu0  ;;  %v1970_v18 = vld [vmem:[%s15169_s13] sm:$0xff]  ;;  %v1971_v19 = vld [vmem:[%s15169_s13 + $0x8] sm:$0xff]  ;;  %v1972_v23 = vld [vmem:[%s15169_s13 + $0x10] sm:$0xff] }
 0x650   : > { %2655 = vrot.lane.b32.xlu1 %v11229_v63, %s17366_s11  ;;  %s17521_s11 = sld [smem:[#allocation70_spill]]  ;;  %v1973_v24 = vld [vmem:[%s15169_s13 + $0x18] sm:$0xff]  ;;  %v1974_v28 = vld [vmem:[%s15169_s13 + $0x20] sm:$0xff]  ;;  %v1975_v31 = vld [vmem:[%s15169_s13 + $0x28] sm:$0xff] }
 0x651   : > { %v2648_v2 = vpop.f32.mrf.mxu0  ;;  %v1976_v37 = vld [vmem:[%s15169_s13 + $0x30] sm:$0xff]  ;;  %v1977_v38 = vld [vmem:[%s15169_s13 + $0x38] sm:$0xff] }
 0x653   : > { %v11734_v3 = vpop.f32.mrf.mxu0 }
 0x656   : > { %s15165_s12 = scalar_lea.vmem %s17521_s11, %s15161_s7  ;;  %s17372_s11 = smov 124  }
 0x657   : > { %v15174_v20 = vld [vmem:[%s15165_s12] sm:$0xff]  ;;  %v15177_v21 = vld [vmem:[%s15165_s12 + $0x8] sm:$0xff]  ;;  %v15184_v26 = vld [vmem:[%s15165_s12 + $0x10] sm:$0xff] }
 0x658   : > { %v2754_v22 = vadd.f32 %v15174_v20, %v1970_v18  ;;  %v2755_v25 = vadd.f32 %v15177_v21, %v1971_v19  ;;  %v15187_v27 = vld [vmem:[%s15165_s12 + $0x18] sm:$0xff]  ;;  %v2756_v29 = vadd.f32 %v15184_v26, %v1972_v23  ;;  %v15195_v32 = vld [vmem:[%s15165_s12 + $0x20] sm:$0xff]  ;;  %v15198_v33 = vld [vmem:[%s15165_s12 + $0x28] sm:$0xff] }
 0x659   : > { %v2757_v30 = vadd.f32 %v15187_v27, %v1973_v24  ;;  %v2758_v35 = vadd.f32 %v15195_v32, %v1974_v28  ;;  %v2759_v36 = vadd.f32 %v15198_v33, %v1975_v31  ;;  %v15207_v39 = vld [vmem:[%s15165_s12 + $0x30] sm:$0xff]  ;;  %v15212_v41 = vld [vmem:[%s15165_s12 + $0x38] sm:$0xff]  ;;  %v10828_v24 = vld [vmem:[#allocation25] ss:$0 sm:$0xff] }
 0x65a   : > { %v15200_v34 = vpack.c.bf16 %v2755_v25, %v2754_v22  ;;  %v2760_v43 = vadd.f32 %v15207_v39, %v1976_v37  ;;  %v2761_v44 = vadd.f32 %v15212_v41, %v1977_v38  ;;  %v10827_v22 = vld [vmem:[#allocation27] ss:$0 sm:$0xff]  ;;  %v10829_v31 = vld [vmem:[#allocation46] ss:$0 sm:$0xff] }
 0x65b   : > { %v15209_v40 = vpack.c.bf16 %v2757_v30, %v2756_v29  ;;  %v15216_v42 = vpack.c.bf16 %v2759_v36, %v2758_v35 }
 0x65c   : > { %v15224_v45 = vpack.c.bf16 %v2761_v44, %v2760_v43 }
 0x6b2   : > { %v2416_v4 = vpop.permute.xlu1 %2415 }
 0x6b3   : > { %2419 = vst.msk [vmem:[#allocation2] sm:$0xf] %vm2418_vm5, %v2416_v4 }
 0x6ba   : > { %v2536_v6 = vpop.permute.xlu0 %2535 }
 0x6bb   : > { %2539 = vst.msk [vmem:[#allocation2] sm:$0xf] %vm2538_vm6, %v2536_v6 }
 0x6c2   : > { %v2656_v7 = vpop.permute.xlu1 %2655 }
 0x6c3   : > { %2659 = vst.msk [vmem:[#allocation2] sm:$0xf] %vm2658_vm7, %v2656_v7 }
 0x6ca   : > { %v2660_v8 = vld [vmem:[#allocation2] sm:$0xf] }
 0x6cb   : > { %11740 = vmatmul.mubr.msk.bf16.vlgmr.msra.gmra.mxu1 %vm2022_vm1, %v2660_v8 }
 0x6cc   : > { %11752 = vmatpush3.bf16.msra.mxu1 %v12928_v16  ;;  %11755 = vmatprep.mubr.msk.bf16.mxu1 %vm2022_vm1, %v15200_v34 }
 0x6cd   : > { %11753 = vmatprep.subr.bf16.mxu1 %v12929_v17 }
 0x6d0   : > { %11754 = vmatpush3.bf16.msra.mxu1 %v12929_v17 }
 0x6d1   : > { %11775 = vmatprep.subr.bf16.mxu1 %v14391_v0 }
 0x6d3   : > { %11756 = vmatmul.mubr.msk.bf16.vlgmr.msra.gmra.mxu1 %vm2022_vm1, %v15209_v40 }
 0x6d4   : > { %11759 = vmatprep.mubr.msk.bf16.mxu1 %vm2022_vm1, %v15216_v42 }
 0x6db   : > { %11760 = vmatmul.mubr.msk.bf16.gmra.mxu1 %vm2022_vm1, %v15224_v45 }
 0x6dc   : > { %11783 = vmatprep.mubr.msk.bf16.mxu1 %vm14392_vm0, %v14391_v0 }
 0x78b   : > { %v2717_v10 = vpop.f32.mrf.mxu1 }
 0x78c   : > { %v2718_v11 = vadd.f32 %v10823_v9, %v2717_v10 }
 0x78d   : > { %v11741_v12 = vpop.f32.mrf.mxu1 }
 0x78e   : > { %v2725_v13 = vsel %vm2022_vm1, %v2718_v11, 0.0 }
 0x78f   : > { %2726 = vadd.xlane.f32.xlu0 %v2725_v13  ;;  %v2720_v14 = vpop.f32.mrf.mxu1 }
 0x791   : > { %v11742_v15 = vpop.f32.mrf.mxu1 }
 0x793   : > { %v11757_v53 = vpop.f32.mrf.mxu1 }
 0x794   : > { %v2918_v63 = vadd.f32 %v11757_v53, %v10833_v57 }
 0x795   : > { %v2909_v54 = vpop.f32.mrf.mxu1 }
 0x796   : > { %v2910_v7 = vadd.f32 %v10833_v57, %v2909_v54 }
 0x797   : > { %v11758_v55 = vpop.f32.mrf.mxu1 }
 0x798   : > { %v2921_v2 = vadd.f32 %v11758_v55, %v10833_v57  ;;  %v10840_v55 = vld [vmem:[#allocation48] ss:$0 sm:$0xff] }
 0x799   : > { %v2912_v56 = vpop.f32.mrf.mxu1 }
 0x79a   : > { %v2913_v8 = vadd.f32 %v10833_v57, %v2912_v56  ;;  %v15240_v10 = vpack.c.bf16 %v2921_v2, %v2918_v63 }
 0x79b   : > { %v11761_v58 = vpop.f32.mrf.mxu1 }
 0x79c   : > { %v2934_v60 = vadd.f32 %v11761_v58, %v10833_v57  ;;  %v15245_v12 = vpack.c.bf16 %v2913_v8, %v2910_v7  ;;  %v3056_v14 = vsel %vm3048_vm8, %v15240_v10, 0 }
 0x79d   : > { %v2925_v59 = vpop.f32.mrf.mxu1 }
 0x79e   : > { %v2926_v3 = vadd.f32 %v10833_v57, %v2925_v59  ;;  %v3053_v15 = vsel %vm3048_vm8, %v15245_v12, 0 }
 0x79f   : > { %v11762_v61 = vpop.f32.mrf.mxu1 }
 0x7a0   : > { %v2937_v62 = vadd.f32 %v11762_v61, %v10833_v57 }
 0x7a1   : > { %v2928_v1 = vpop.f32.mrf.mxu1 }
 0x7a2   : > { %v15234_v4 = vpack.c.bf16 %v2937_v62, %v2934_v60  ;;  %v2929_v6 = vadd.f32 %v10833_v57, %v2928_v1 }
 0x7a4   : > { %v3062_v9 = vsel %vm3048_vm8, %v15234_v4, 0 }
 0x7a5   : > { %11776 = vmatpush3.bf16.xpose.msra.mxu1 %v3062_v9 }
 0x7a6   : > { %11777 = vmatprep.subr.bf16.mxu1 %v14391_v0 }
 0x818   : > { %v2727_v46 = vpop.xlane.xlu0 %2726 }
 0x819   : > { %v2729_v47 = vmul.f32 0.03125, %v2727_v46  ;;  %v12932_v46 = vld [vmem:[%s17437_s6 + $0x8] sm:$0xff]  }
 0x81a   : > { %11763 = vmatprep.subr.bf16.mxu0 %v12932_v46 }
 0x81b   : > { %v2730_v48 = vsub.f32 %v2718_v11, %v2729_v47  ;;  %v15242_v11 = vpack.c.bf16 %v2929_v6, %v2926_v3  ;;  %v12933_v47 = vld [vmem:[%s17437_s6] sm:$0xff]  }
 0x81d   : > { %v2731_v49 = vmul.f32 %v2730_v48, %v2730_v48  ;;  %v3059_v13 = vsel %vm3048_vm8, %v15242_v11, 0 }
 0x81e   : > { %11778 = vmatpush3.bf16.xpose.msra.mxu1 %v3059_v13 }
 0x81f   : > { %v2732_v50 = vsel %vm2022_vm1, %v2731_v49, 0.0  ;;  %11779 = vmatprep.subr.bf16.mxu1 %v14391_v0  ;;  %v2946_v49 = vpack.c.bf16 %v15198_v33, %v15195_v32 }
 0x820   : > { %2733 = vadd.xlane.f32.xlu1 %v2732_v50 }
 0x826   : > { %11780 = vmatpush3.bf16.xpose.msra.mxu1 %v3056_v14 }
 0x827   : > { %11781 = vmatprep.subr.bf16.mxu1 %v14391_v0 }
 0x82e   : > { %11782 = vmatpush3.bf16.xpose.msra.mxu1 %v3053_v15 }
 0x82f   : > { %11811 = vmatprep.subr.bf16.mxu1 %v14391_v0 }
 0x831   : > { %3177 = vrot.lane.b32.xlu1 %v15234_v4, %s17372_s11 }
 0x835   : > { %3173 = vrot.lane.b32.xlu1 %v15240_v10, %s17372_s11 }
 0x839   : > { %3171 = vrot.lane.b32.xlu1 %v15245_v12, %s17372_s11 }
 0x8a9   : > { %v2734_v16 = vpop.xlane.xlu1 %2733 }
 0x8aa   : > { %v2735_v17 = vmul.f32 0.03125, %v2734_v16 }
 0x8ac   : > { %v2736_v18 = vadd.f32 1e-05, %v2735_v17 }
 0x8ae   : > { %13007 = vrsqrt.f32 %v2736_v18 }
 0x8bb   : > { %v13008_v19 = vpop.eup %13007 }
 0x8bc   : > { %v2738_v23 = vmul.f32 %v13008_v19, %v2730_v48  ;;  %v2945_v48 = vpack.c.bf16 %v15187_v27, %v15184_v26 }
 0x8be   : > { %v2745_v25 = vmul.f32 %v10827_v22, %v2738_v23 }
 0x8c0   : > { %v15260_v28 = vadd.f32 %v10828_v24, %v2745_v25 }
 0x8c2   : > { %v2753_v29 = vadd.f32 %v15260_v28, %v15068_v5  ;;  %v2944_v5 = vpack.c.bf16 %v15177_v21, %v15174_v20  ;;  %v2947_v20 = vpack.c.bf16 %v15212_v41, %v15207_v39 }
 0x8c4   : > { %v2776_v30 = vpack.c.bf16 %v2753_v29, %v2753_v29  ;;  %v3178_v29 = vpop.permute.xlu1 %3177 }
 0x8c6   : > { %11748 = vmatmul.mubr.msk.bf16.vlgmr.msra.gmra.mxu0 %vm2022_vm1, %v2776_v30  ;;  %v3192_v30 = vsel %vm3048_vm8, %v3178_v29, 0 }
 0x8c7   : > { %11767 = vmatprep.mubr.msk.bf16.mxu0 %vm2022_vm1, %v2944_v5  ;;  %11764 = vmatpush3.bf16.msra.mxu0 %v12932_v46 }
 0x8c8   : > { %11765 = vmatprep.subr.bf16.mxu0 %v12933_v47 }
 0x8cb   : > { %11766 = vmatpush3.bf16.msra.mxu0 %v12933_v47 }
 0x8cc   : > { %11787 = vmatprep.subr.bf16.mxu0 %v14391_v0 }
 0x8ce   : > { %11768 = vmatmul.mubr.msk.bf16.vlgmr.msra.gmra.mxu0 %vm2022_vm1, %v2945_v48 }
 0x8cf   : > { %11771 = vmatprep.mubr.msk.bf16.mxu0 %vm2022_vm1, %v2946_v49 }
 0x8d6   : > { %11772 = vmatmul.mubr.msk.bf16.gmra.mxu0 %vm2022_vm1, %v2947_v20 }
 0x8d7   : > { %11795 = vmatprep.mubr.msk.bf16.mxu0 %vm14392_vm0, %v14391_v0 }
 0x986   : > { %v2833_v35 = vpop.f32.mrf.mxu0 }
 0x987   : > { %v2834_v36 = vadd.f32 %v10829_v31, %v2833_v35  ;;  %v3174_v35 = vpop.permute.xlu1 %3173 }
 0x988   : > { %v11749_v37 = vpop.f32.mrf.mxu0 }
 0x989   : > { %v15265_v38 = vpack.c.bf16 %v2834_v36, %v2834_v36  ;;  %v3186_v36 = vsel %vm3048_vm8, %v3174_v35, 0 }
 0x98a   : > { %v2836_v43 = vpop.f32.mrf.mxu0 }
 0x98b   : > { %11784 = vmatmul.mubr.msk.bf16.vlgmr.msra.gmra.mxu1 %vm3048_vm8, %v15265_v38  ;;  %v3172_v37 = vpop.permute.xlu1 %3171 }
 0x98c   : > { %v11750_v44 = vpop.f32.mrf.mxu0  ;;  %11819 = vmatprep.mubr.msk.bf16.mxu1 %vm14392_vm0, %v14391_v0  ;;  %v3183_v43 = vsel %vm3048_vm8, %v3172_v37, 0 }
 0x98e   : > { %v11769_v51 = vpop.f32.mrf.mxu0 }
 0x98f   : > { %v3022_v63 = vadd.f32 %v11769_v51, %v10840_v55 }
 0x990   : > { %v3013_v52 = vpop.f32.mrf.mxu0 }
 0x991   : > { %v3014_v3 = vadd.f32 %v10840_v55, %v3013_v52 }
 0x992   : > { %v11770_v53 = vpop.f32.mrf.mxu0 }
 0x993   : > { %v3025_v1 = vadd.f32 %v11770_v53, %v10840_v55 }
 0x994   : > { %v3016_v54 = vpop.f32.mrf.mxu0 }
 0x995   : > { %v15295_v6 = vpack.c.bf16 %v3025_v1, %v3022_v63  ;;  %v3017_v7 = vadd.f32 %v10840_v55, %v3016_v54 }
 0x996   : > { %v11773_v39 = vpop.f32.mrf.mxu0 }
 0x997   : > { %v3038_v56 = vadd.f32 %v11773_v39, %v10840_v55  ;;  %v15299_v8 = vpack.c.bf16 %v3017_v7, %v3014_v3 }
 0x998   : > { %v3029_v41 = vpop.f32.mrf.mxu0 }
 0x999   : > { %v3030_v58 = vadd.f32 %v10840_v55, %v3029_v41 }
 0x99a   : > { %v11774_v57 = vpop.f32.mrf.mxu0 }
 0x99b   : > { %v3041_v59 = vadd.f32 %v11774_v57, %v10840_v55 }
 0x99c   : > { %v3032_v60 = vpop.f32.mrf.mxu0 }
 0x99d   : > { %v15289_v61 = vpack.c.bf16 %v3041_v59, %v3038_v56  ;;  %v3033_v62 = vadd.f32 %v10840_v55, %v3032_v60 }
 0x99f   : > { %v15291_v2 = vpack.c.bf16 %v3033_v62, %v3030_v58  ;;  %11788 = vmatpush3.bf16.msra.mxu0 %v15289_v61 }
 0x9a0   : > { %11789 = vmatprep.subr.bf16.mxu0 %v14391_v0 }
 0x9a3   : > { %11790 = vmatpush3.bf16.msra.mxu0 %v15291_v2 }
 0x9a4   : > { %11791 = vmatprep.subr.bf16.mxu0 %v14391_v0 }
 0x9a7   : > { %11792 = vmatpush3.bf16.msra.mxu0 %v15295_v6 }
 0x9a8   : > { %11793 = vmatprep.subr.bf16.mxu0 %v14391_v0 }
 0x9ab   : > { %11794 = vmatpush3.bf16.msra.mxu0 %v15299_v8 }
 0x9ac   : > { %11799 = vmatprep.subr.bf16.mxu0 %v14391_v0 }
 0xa4b   : > { %v3098_v21 = vpop.f32.mrf.mxu1 }
 0xa4c   : > { %v3104_v26 = vmul.f32 0.5, %v3098_v21 }
 0xa4d   : > { %v11785_v27 = vpop.f32.mrf.mxu1 }
 0xa4e   : > { %v3106_v32 = vsel %vm3105_vm9, %v3104_v26, -inf }
 0xa4f   : > { %3107 = vmax.xlane.f32.xlu0 %v3106_v32  ;;  %v3101_v33 = vpop.f32.mrf.mxu1 }
 0xa51   : > { %v11786_v50 = vpop.f32.mrf.mxu1 }
 0xad8   : > { %v3108_v9 = vpop.xlane.xlu0 %3107 }
 0xad9   : > { %v3109_v13 = vsub.f32 %v3104_v26, %v3108_v9 }
 0xadb   : > { %v3110_v14 = vmul.f32 1.442695, %v3109_v13 }
 0xadd   : > { %13009 = vpow2.f32 %v3110_v14 }
 0xaea   : > { %v13010_v15 = vpop.eup %13009 }
 0xaeb   : > { %v3112_v16 = vsel %vm3105_vm9, %v13010_v15, 0.0 }
 0xaec   : > { %3113 = vadd.xlane.f32.xlu0 %v3112_v16 }
 0xb02   : > { %3175 = vrot.lane.b32.xlu0 %v15242_v11, %s17372_s11 }
 0xb06   : > { %3165 = vrot.lane.b32.xlu0 %v15265_v38, %s17372_s11 }
 0xb0a   : > { %3257 = vrot.lane.b32.xlu0 %v15289_v61, %s17372_s11 }
 0xb75   : > { %v3114_v17 = vpop.xlane.xlu0 %3113 }
 0xb76   : > { %13011 = vrcp.f32 %v3114_v17 }
 0xb79   : > { %v3176_v18 = vpop.permute.xlu0 %3175 }
 0xb7a   : > { %v3189_v31 = vsel %vm3048_vm8, %v3176_v18, 0 }
 0xb7d   : > { %v3166_v19 = vpop.permute.xlu0 %3165 }
 0xb81   : > { %v3258_v22 = vpop.permute.xlu0 %3257 }
 0xb82   : > { %11812 = vmatpush3.bf16.msra.mxu1 %v3258_v22 }
 0xb83   : > { %v13012_v23 = vpop.eup %13011  ;;  %11813 = vmatprep.subr.bf16.mxu1 %v14391_v0 }
 0xb84   : > { %v3116_v24 = vmul.f32 %v13012_v23, %v13010_v15 }
 0xb86   : > { %v3117_v25 = vpack.c.bf16 %v3116_v24, %v3116_v24 }
 0xb88   : > { %11796 = vmatmul.mubr.msk.bf16.vlgmr.msra.gmra.mxu0 %vm3105_vm9, %v3117_v25 }
 0xb89   : > { %11800 = vmatpush3.bf16.xpose.msra.mxu0 %v3192_v30  ;;  %11807 = vmatprep.mubr.msk.bf16.mxu0 %vm14392_vm0, %v14391_v0 }
 0xb8a   : > { %11801 = vmatprep.subr.bf16.mxu0 %v14391_v0 }
 0xb91   : > { %11802 = vmatpush3.bf16.xpose.msra.mxu0 %v3189_v31 }
 0xb92   : > { %11803 = vmatprep.subr.bf16.mxu0 %v14391_v0 }
 0xb99   : > { %11804 = vmatpush3.bf16.xpose.msra.mxu0 %v3186_v36 }
 0xb9a   : > { %11805 = vmatprep.subr.bf16.mxu0 %v14391_v0 }
 0xba1   : > { %11806 = vmatpush3.bf16.xpose.msra.mxu0 %v3183_v43 }
 0xba2   : > { %11835 = vmatprep.subr.bf16.mxu0 %v14391_v0 }
 0xba8   : > { %11808 = vmatmul.mubr.msk.bf16.vlgmr.msra.gmra.mxu0 %vm3048_vm8, %v3166_v19 }
 0xba9   : > { %11843 = vmatprep.mubr.msk.bf16.mxu0 %vm14392_vm0, %v14391_v0 }
 0xc48   : > { %v3155_v44 = vpop.f32.mrf.mxu0 }
 0xc49   : > { %v3161_v46 = vpack.c.bf16 %v3155_v44, %v3155_v44 }
 0xc4a   : > { %v11797_v47 = vpop.f32.mrf.mxu0 }
 0xc4b   : > { %3163 = vst.msk [vmem:[#allocation2] sm:$0xf] %vm3162_vm10, %v3161_v46 }
 0xc4c   : > { %v3158_v5 = vpop.f32.mrf.mxu0 }
 0xc4e   : > { %v11798_v48 = vpop.f32.mrf.mxu0 }
 0xc68   : > { %v3228_v49 = vpop.f32.mrf.mxu0 }
 0xc69   : > { %v3234_v20 = vmul.f32 0.5, %v3228_v49 }
 0xc6a   : > { %v11809_v21 = vpop.f32.mrf.mxu0 }
 0xc6b   : > { %v3235_v26 = vsel %vm3105_vm9, %v3234_v20, -inf }
 0xc6c   : > { %3236 = vmax.xlane.f32.xlu1 %v3235_v26  ;;  %v3231_v27 = vpop.f32.mrf.mxu0 }
 0xc6e   : > { %v11810_v32 = vpop.f32.mrf.mxu0 }
 0xc7d   : > { %3255 = vrot.lane.b32.xlu1 %v15291_v2, %s17372_s11 }
 0xc81   : > { %3253 = vrot.lane.b32.xlu1 %v15295_v6, %s17372_s11 }
 0xc85   : > { %3323 = vrot.lane.b32.xlu1 %v15234_v4, %s17523_s8 }
 0xc89   : > { %3319 = vrot.lane.b32.xlu1 %v15240_v10, %s17523_s8 }
 0xc8d   : > { %3315 = vrot.lane.b32.xlu1 %v15265_v38, %s17523_s8 }
 0xc91   : > { %3397 = vrot.lane.b32.xlu1 %v15291_v2, %s17523_s8 }
 0xcf5   : > { %v3237_v33 = vpop.xlane.xlu1 %3236 }
 0xcf6   : > { %v3238_v50 = vsub.f32 %v3234_v20, %v3237_v33 }
 0xcf8   : > { %v3239_v51 = vmul.f32 1.442695, %v3238_v50 }
 0xcf9   : > { %v3256_v52 = vpop.permute.xlu1 %3255 }
 0xcfa   : > { %13013 = vpow2.f32 %v3239_v51  ;;  %11814 = vmatpush3.bf16.msra.mxu1 %v3256_v52 }
 0xcfb   : > { %11815 = vmatprep.subr.bf16.mxu1 %v14391_v0 }
 0xcfd   : > { %v3254_v53 = vpop.permute.xlu1 %3253 }
 0xcfe   : > { %11816 = vmatpush3.bf16.msra.mxu1 %v3254_v53 }
 0xcff   : > { %11817 = vmatprep.subr.bf16.mxu1 %v14391_v0 }
 0xd01   : > { %v3324_v58 = vpop.permute.xlu1 %3323 }
 0xd02   : > { %v3338_v60 = vsel %vm3048_vm8, %v3324_v58, 0 }
 0xd05   : > { %v3320_v1 = vpop.permute.xlu1 %3319 }
 0xd06   : > { %v3332_v3 = vsel %vm3048_vm8, %v3320_v1, 0 }
 0xd07   : > { %v13014_v54 = vpop.eup %13013 }
 0xd08   : > { %v3241_v55 = vsel %vm3105_vm9, %v13014_v54, 0.0 }
 0xd09   : > { %3242 = vadd.xlane.f32.xlu0 %v3241_v55  ;;  %v3316_v13 = vpop.permute.xlu1 %3315 }
 0xd0d   : > { %v3398_v36 = vpop.permute.xlu1 %3397 }
 0xd1f   : > { %3251 = vrot.lane.b32.xlu0 %v15299_v8, %s17372_s11  ;;  %s17374_s11 = smov 4  }
 0xd23   : > { %3321 = vrot.lane.b32.xlu0 %v15242_v11, %s17523_s8 }
 0xd27   : > { %3317 = vrot.lane.b32.xlu0 %v15245_v12, %s17523_s8 }
 0xd92   : > { %v3243_v39 = vpop.xlane.xlu0 %3242 }
 0xd93   : > { %13015 = vrcp.f32 %v3243_v39 }
 0xd96   : > { %v3252_v41 = vpop.permute.xlu0 %3251 }
 0xd97   : > { %11818 = vmatpush3.bf16.msra.mxu1 %v3252_v41 }
 0xd98   : > { %11823 = vmatprep.subr.bf16.mxu1 %v14391_v0 }
 0xd9a   : > { %v3322_v62 = vpop.permute.xlu0 %3321 }
 0xd9b   : > { %v3335_v63 = vsel %vm3048_vm8, %v3322_v62, 0 }
 0xd9e   : > { %v3318_v7 = vpop.permute.xlu0 %3317 }
 0xd9f   : > { %v3329_v9 = vsel %vm3048_vm8, %v3318_v7, 0 }
 0xda0   : > { %v13016_v56 = vpop.eup %13015 }
 0xda1   : > { %v3245_v57 = vmul.f32 %v13016_v56, %v13014_v54 }
 0xda3   : > { %v3246_v59 = vpack.c.bf16 %v3245_v57, %v3245_v57 }
 0xda5   : > { %11820 = vmatmul.mubr.msk.bf16.vlgmr.msra.gmra.mxu1 %vm3105_vm9, %v3246_v59 }
 0xda6   : > { %11824 = vmatpush3.bf16.xpose.msra.mxu1 %v3338_v60  ;;  %11831 = vmatprep.mubr.msk.bf16.mxu1 %vm14392_vm0, %v14391_v0 }
 0xda7   : > { %11825 = vmatprep.subr.bf16.mxu1 %v14391_v0 }
 0xdae   : > { %11826 = vmatpush3.bf16.xpose.msra.mxu1 %v3335_v63 }
 0xdaf   : > { %11827 = vmatprep.subr.bf16.mxu1 %v14391_v0 }
 0xdb6   : > { %11828 = vmatpush3.bf16.xpose.msra.mxu1 %v3332_v3 }
 0xdb7   : > { %11829 = vmatprep.subr.bf16.mxu1 %v14391_v0 }
 0xdbe   : > { %11830 = vmatpush3.bf16.xpose.msra.mxu1 %v3329_v9 }
 0xdbf   : > { %11859 = vmatprep.subr.bf16.mxu1 %v14391_v0 }
 0xdc5   : > { %11832 = vmatmul.mubr.msk.bf16.vlgmr.msra.gmra.mxu1 %vm3048_vm8, %v3316_v13 }
 0xdc6   : > { %11867 = vmatprep.mubr.msk.bf16.mxu1 %vm14392_vm0, %v14391_v0 }
 0xe65   : > { %v15365_v14 = vpop.f32.mrf.mxu1 }
 0xe66   : > { %v11230_v56 = vpack.c.bf16 %v15365_v14, %v15365_v14 }
 0xe67   : > { %v11821_v15 = vpop.f32.mrf.mxu1 }
 0xe69   : > { %v3303_v16 = vpop.f32.mrf.mxu1 }
 0xe6b   : > { %v11822_v17 = vpop.f32.mrf.mxu1 }
 0xe85   : > { %v3374_v18 = vpop.f32.mrf.mxu1 }
 0xe86   : > { %v3380_v19 = vmul.f32 0.5, %v3374_v18 }
 0xe87   : > { %v11833_v22 = vpop.f32.mrf.mxu1 }
 0xe88   : > { %v3381_v23 = vsel %vm3105_vm9, %v3380_v19, -inf }
 0xe89   : > { %3382 = vmax.xlane.f32.xlu0 %v3381_v23  ;;  %v3377_v24 = vpop.f32.mrf.mxu1 }
 0xe8b   : > { %v11834_v25 = vpop.f32.mrf.mxu1 }
 0xe8c   : > { %v10858_v25 = vld [vmem:[#allocation45] ss:$0 sm:$0xff] }
 0xe9f   : > { %3399 = vrot.lane.b32.xlu0 %v15289_v61, %s17523_s8 }
 0xea3   : > { %3395 = vrot.lane.b32.xlu0 %v15295_v6, %s17523_s8 }
 0xea7   : > { %3465 = vrot.lane.b32.xlu0 %v15234_v4, %s17376_s9 }
 0xeab   : > { %3461 = vrot.lane.b32.xlu0 %v15240_v10, %s17376_s9 }
 0xeaf   : > { %3457 = vrot.lane.b32.xlu0 %v15265_v38, %s17376_s9 }
 0xeb3   : > { %3541 = vrot.lane.b32.xlu0 %v15289_v61, %s17376_s9 }
 0xf12   : > { %v3383_v29 = vpop.xlane.xlu0 %3382 }
 0xf13   : > { %v3384_v30 = vsub.f32 %v3380_v19, %v3383_v29 }
 0xf15   : > { %v3385_v31 = vmul.f32 1.442695, %v3384_v30 }
 0xf16   : > { %v3400_v35 = vpop.permute.xlu0 %3399 }
 0xf17   : > { %13017 = vpow2.f32 %v3385_v31  ;;  %11836 = vmatpush3.bf16.msra.mxu0 %v3400_v35 }
 0xf18   : > { %11837 = vmatprep.subr.bf16.mxu0 %v14391_v0 }
 0xf1a   : > { %v3396_v37 = vpop.permute.xlu0 %3395 }
 0xf1b   : > { %11838 = vmatpush3.bf16.msra.mxu0 %v3398_v36 }
 0xf1c   : > { %11839 = vmatprep.subr.bf16.mxu0 %v14391_v0 }
 0xf1e   : > { %v3466_v4 = vpop.permute.xlu0 %3465 }
 0xf1f   : > { %11840 = vmatpush3.bf16.msra.mxu0 %v3396_v37  ;;  %v3480_v20 = vsel %vm3048_vm8, %v3466_v4, 0 }
 0xf20   : > { %11841 = vmatprep.subr.bf16.mxu0 %v14391_v0 }
 0xf22   : > { %v3462_v10 = vpop.permute.xlu0 %3461 }
 0xf23   : > { %v3474_v21 = vsel %vm3048_vm8, %v3462_v10, 0 }
 0xf24   : > { %v13018_v38 = vpop.eup %13017 }
 0xf25   : > { %v3387_v61 = vsel %vm3105_vm9, %v13018_v38, 0.0 }
 0xf26   : > { %3388 = vadd.xlane.f32.xlu1 %v3387_v61  ;;  %v3458_v43 = vpop.permute.xlu0 %3457 }
 0xf2a   : > { %v3542_v44 = vpop.permute.xlu0 %3541 }
 0xf2b   : > { %11860 = vmatpush3.bf16.msra.mxu1 %v3542_v44 }
 0xf2c   : > { %11861 = vmatprep.subr.bf16.mxu1 %v14391_v0 }
 0xf37   : > { %3393 = vrot.lane.b32.xlu1 %v15299_v8, %s17523_s8 }
 0xf3b   : > { %3463 = vrot.lane.b32.xlu1 %v15242_v11, %s17376_s9 }
 0xf3f   : > { %3459 = vrot.lane.b32.xlu1 %v15245_v12, %s17376_s9 }
 0xfaf   : > { %v3389_v46 = vpop.xlane.xlu1 %3388 }
 0xfb0   : > { %13019 = vrcp.f32 %v3389_v46  ;;  %v12935_v46 = vld [vmem:[%s17525_s14 + $0x8] sm:$0xff]  }
 0xfb3   : > { %v3394_v47 = vpop.permute.xlu1 %3393 }
 0xfb4   : > { %11842 = vmatpush3.bf16.msra.mxu0 %v3394_v47  ;;  %v12936_v47 = vld [vmem:[%s17525_s14] sm:$0xff]  }
 0xfb5   : > { %11847 = vmatprep.subr.bf16.mxu0 %v14391_v0 }
 0xfb7   : > { %v3464_v11 = vpop.permute.xlu1 %3463 }
 0xfb8   : > { %v3477_v12 = vsel %vm3048_vm8, %v3464_v11, 0 }
 0xfbb   : > { %v3460_v26 = vpop.permute.xlu1 %3459 }
 0xfbc   : > { %v3471_v27 = vsel %vm3048_vm8, %v3460_v26, 0  ;;  %v10862_v26 = vld [vmem:[%s17527_s19] ss:$0 sm:$0xff] }
 0xfbd   : > { %v13020_v5 = vpop.eup %13019 }
 0xfbe   : > { %v3391_v48 = vmul.f32 %v13020_v5, %v13018_v38 }
 0xfc0   : > { %v3392_v49 = vpack.c.bf16 %v3391_v48, %v3391_v48 }
 0xfc2   : > { %11844 = vmatmul.mubr.msk.bf16.vlgmr.msra.gmra.mxu0 %vm3105_vm9, %v3392_v49 }
 0xfc3   : > { %11848 = vmatpush3.bf16.xpose.msra.mxu0 %v3480_v20  ;;  %11855 = vmatprep.mubr.msk.bf16.mxu0 %vm14392_vm0, %v14391_v0 }
 0xfc4   : > { %11849 = vmatprep.subr.bf16.mxu0 %v14391_v0 }
 0xfcb   : > { %11850 = vmatpush3.bf16.xpose.msra.mxu0 %v3477_v12  ;;  %v10861_v12 = vld [vmem:[#allocation28] ss:$0 sm:$0xff] }
 0xfcc   : > { %11851 = vmatprep.subr.bf16.mxu0 %v14391_v0 }
 0xfd3   : > { %11852 = vmatpush3.bf16.xpose.msra.mxu0 %v3474_v21 }
 0xfd4   : > { %11853 = vmatprep.subr.bf16.mxu0 %v14391_v0 }
 0xfdb   : > { %11854 = vmatpush3.bf16.xpose.msra.mxu0 %v3471_v27 }
 0xfdc   : > { %11877 = vmatprep.subr.bf16.mxu0 %v14391_v0 }
 0xfe2   : > { %11856 = vmatmul.mubr.msk.bf16.vlgmr.msra.gmra.mxu0 %vm3048_vm8, %v3458_v43 }
 0xfe3   : > { %11881 = vmatprep.mubr.msk.bf16.mxu0 %vm14392_vm0, %v14391_v0  ;;  %11878 = vmatpush3.bf16.msra.mxu0 %v12935_v46 }
 0xfe4   : > { %11879 = vmatprep.subr.bf16.mxu0 %v14391_v0 }
 0xfe7   : > { %11880 = vmatpush3.bf16.msra.mxu0 %v12936_v47 }
0x1082   : > { %v3442_v32 = vpop.f32.mrf.mxu0 }
0x1083   : > { %v11231_v1 = vpack.c.bf16 %v3442_v32, %v3442_v32 }
0x1084   : > { %v11845_v33 = vpop.f32.mrf.mxu0 }
0x1086   : > { %v3445_v50 = vpop.f32.mrf.mxu0 }
0x1088   : > { %v11846_v51 = vpop.f32.mrf.mxu0 }
0x10a2   : > { %v3516_v52 = vpop.f32.mrf.mxu0 }
0x10a3   : > { %v3522_v53 = vmul.f32 0.5, %v3516_v52  ;;  %v10863_v52 = vld [vmem:[#allocation22] ss:$0 sm:$0xff] }
0x10a4   : > { %v11857_v54 = vpop.f32.mrf.mxu0 }
0x10a5   : > { %v3523_v55 = vsel %vm3105_vm9, %v3522_v53, -inf }
0x10a6   : > { %3524 = vmax.xlane.f32.xlu1 %v3523_v55  ;;  %v3519_v39 = vpop.f32.mrf.mxu0 }
0x10a8   : > { %v11858_v41 = vpop.f32.mrf.mxu0 }
0x10b7   : > { %3539 = vrot.lane.b32.xlu1 %v15291_v2, %s17376_s9 }
0x10bb   : > { %3537 = vrot.lane.b32.xlu1 %v15295_v6, %s17376_s9 }
0x10bf   : > { %3310 = vrot.lane.b32.xlu1 %v11230_v56, %s17374_s11  ;;  %s17524_s11 = smov 8  }
0x112f   : > { %v3525_v57 = vpop.xlane.xlu1 %3524 }
0x1130   : > { %v3526_v58 = vsub.f32 %v3522_v53, %v3525_v57 }
0x1132   : > { %v3527_v59 = vmul.f32 1.442695, %v3526_v58 }
0x1133   : > { %v3540_v60 = vpop.permute.xlu1 %3539 }
0x1134   : > { %13021 = vpow2.f32 %v3527_v59  ;;  %11862 = vmatpush3.bf16.msra.mxu1 %v3540_v60 }
0x1135   : > { %11863 = vmatprep.subr.bf16.mxu1 %v14391_v0 }
0x1137   : > { %v3538_v62 = vpop.permute.xlu1 %3537 }
0x1138   : > { %11864 = vmatpush3.bf16.msra.mxu1 %v3538_v62 }
0x1139   : > { %11865 = vmatprep.subr.bf16.mxu1 %v14391_v0 }
0x113b   : > { %v3311_v2 = vpop.permute.xlu1 %3310 }
0x113c   : > { %3314 = vst.msk [vmem:[#allocation2] sm:$0xf] %vm3313_vm11, %v3311_v2 }
0x1141   : > { %v13022_v6 = vpop.eup %13021 }
0x1142   : > { %v3529_v63 = vsel %vm3105_vm9, %v13022_v6, 0.0 }
0x1143   : > { %3530 = vadd.xlane.f32.xlu0 %v3529_v63 }
0x1159   : > { %3535 = vrot.lane.b32.xlu0 %v15299_v8, %s17376_s9  ;;  %v12934_v8 = vld [vmem:[#allocation49] sm:$0xff]   ;;  %s17378_s9 = smov 12  }
0x115d   : > { %3452 = vrot.lane.b32.xlu0 %v11231_v1, %s17524_s11  ;;  %v12941_v1 = vld [vmem:[%s17528_s20 + $0x8] sm:$0xff]  }
0x115e   : > { %11897 = vmatprep.subr.bf16.mxu0 %v12941_v1 }
0x11cc   : > { %v3531_v3 = vpop.xlane.xlu0 %3530 }
0x11cd   : > { %13023 = vrcp.f32 %v3531_v3 }
0x11d0   : > { %v3536_v7 = vpop.permute.xlu0 %3535 }
0x11d1   : > { %11866 = vmatpush3.bf16.msra.mxu1 %v3536_v7 }
0x11d2   : > { %11871 = vmatprep.subr.bf16.mxu1 %v14391_v0 }
0x11d4   : > { %v3453_v9 = vpop.permute.xlu0 %3452 }
0x11d5   : > { %3456 = vst.msk [vmem:[#allocation2] sm:$0xf] %vm3455_vm12, %v3453_v9 }
0x11da   : > { %v13024_v13 = vpop.eup %13023 }
0x11db   : > { %v3533_v14 = vmul.f32 %v13024_v13, %v13022_v6 }
0x11dd   : > { %v3534_v15 = vpack.c.bf16 %v3533_v14, %v3533_v14 }
0x11df   : > { %11868 = vmatmul.mubr.msk.bf16.vlgmr.msra.gmra.mxu1 %vm3105_vm9, %v3534_v15  ;;  %v12942_v15 = vld [vmem:[%s17528_s20] sm:$0xff]  }
0x11e0   : > { %11873 = vmatprep.mubr.msk.bf16.mxu1 %vm14392_vm0, %v14391_v0  ;;  %11872 = vmatpush3.bf16.msra.mxu1 %v12934_v8  ;;  %v12943_v8 = vld [vmem:[%s17529_s24 + $0x8] sm:$0xff]  }
0x11e1   : > { %11885 = vmatprep.subr.bf16.mxu1 %v14391_v0 }
0x129f   : > { %v3584_v16 = vpop.f32.mrf.mxu1 }
0x12a0   : > { %v11232_v17 = vpack.c.bf16 %v3584_v16, %v3584_v16  ;;  %v12944_v16 = vld [vmem:[%s17530_s27 + $0x8] sm:$0xff]  }
0x12a1   : > { %v11869_v18 = vpop.f32.mrf.mxu1 }
0x12a2   : > { %3594 = vrot.lane.b32.xlu1 %v11232_v17, %s17378_s9  ;;  %s17526_s9 = sld [smem:[#allocation91_spill]]  ;;  %v12945_v17 = vld [vmem:[%s17529_s24] sm:$0xff]  }
0x12a3   : > { %v3587_v19 = vpop.f32.mrf.mxu1 }
0x12a5   : > { %v11870_v22 = vpop.f32.mrf.mxu1 }
0x12a6   : > { %v10873_v22 = vld [vmem:[#allocation31] ss:$0 sm:$0xff] }
0x12a8   : > { %v12938_v5 = vld [vmem:[%s17526_s9 + $0x10] sm:$0xff]   ;;  %v12939_v50 = vld [vmem:[%s17526_s9 + $0x8] sm:$0xff]   ;;  %v12940_v51 = vld [vmem:[%s17526_s9] sm:$0xff]  }
0x1314   : > { %v3595_v23 = vpop.permute.xlu1 %3594 }
0x1315   : > { %3598 = vst.msk [vmem:[#allocation2] sm:$0xf] %vm3597_vm13, %v3595_v23 }
0x131c   : > { %v3599_v24 = vld [vmem:[#allocation2] sm:$0xf] }
0x131d   : > { %11874 = vmatmul.mubr.msk.bf16.vlgmr.msra.gmra.mxu1 %vm3613_vm14, %v3599_v24  ;;  %v10874_v24 = vld [vmem:[#allocation30] ss:$0 sm:$0xff] }
0x131e   : > { %11893 = vmatprep.mubr.msk.bf16.mxu1 %vm14392_vm0, %v14391_v0 }
0x13dd   : > { %v3651_v29 = vpop.f32.mrf.mxu1 }
0x13de   : > { %v3652_v30 = vadd.f32 %v10858_v25, %v3651_v29 }
0x13df   : > { %v11875_v31 = vpop.f32.mrf.mxu1 }
0x13e0   : > { %v3657_v35 = vadd.f32 %v3652_v30, %v15260_v28  ;;  %v12937_v28 = vld [vmem:[%s17526_s9 + $0x18] sm:$0xff]   ;;  %v13373_v31 = vld [vmem:[%s14989_s25] sm:$0xff] }
0x13e1   : > { %v3654_v36 = vpop.f32.mrf.mxu1  ;;  %11886 = vmatpush3.bf16.msra.mxu1 %v12937_v28 }
0x13e2   : > { %v3660_v37 = vsel %vm2022_vm1, %v3657_v35, 0.0  ;;  %11887 = vmatprep.subr.bf16.mxu1 %v14391_v0 }
0x13e3   : > { %3661 = vadd.xlane.f32.xlu0 %v3660_v37  ;;  %v11876_v4 = vpop.f32.mrf.mxu1 }
0x13e4   : > { %v10875_v4 = vld [vmem:[#allocation18] ss:$0 sm:$0xff] }
0x13e5   : > { %11888 = vmatpush3.bf16.msra.mxu1 %v12938_v5 }
0x13e6   : > { %11889 = vmatprep.subr.bf16.mxu1 %v14391_v0 }
0x13e9   : > { %11890 = vmatpush3.bf16.msra.mxu1 %v12939_v50  ;;  %v10886_v50 = vld [vmem:[#allocation19] ss:$0 sm:$0xff] }
0x13ea   : > { %11891 = vmatprep.subr.bf16.mxu1 %v14391_v0 }
0x13ed   : > { %11892 = vmatpush3.bf16.msra.mxu1 %v12940_v51 }
0x13ee   : > { %11909 = vmatprep.subr.bf16.mxu1 %v14391_v0 }
0x146c   : > { %v3662_v10 = vpop.xlane.xlu0 %3661 }
0x146d   : > { %v3663_v38 = vmul.f32 0.03125, %v3662_v10 }
0x146f   : > { %v3664_v61 = vsub.f32 %v3657_v35, %v3663_v38 }
0x1471   : > { %v3665_v43 = vmul.f32 %v3664_v61, %v3664_v61 }
0x1473   : > { %v3666_v44 = vsel %vm2022_vm1, %v3665_v43, 0.0 }
0x1474   : > { %3667 = vadd.xlane.f32.xlu1 %v3666_v44 }
0x14fd   : > { %v3668_v48 = vpop.xlane.xlu1 %3667 }
0x14fe   : > { %v3669_v49 = vmul.f32 0.03125, %v3668_v48 }
0x1500   : > { %v3670_v20 = vadd.f32 1e-05, %v3669_v49 }
0x1502   : > { %13025 = vrsqrt.f32 %v3670_v20 }
0x150f   : > { %v13026_v11 = vpop.eup %13025 }
0x1510   : > { %v3672_v21 = vmul.f32 %v13026_v11, %v3664_v61 }
0x1512   : > { %v3679_v27 = vmul.f32 %v10861_v12, %v3672_v21 }
0x1514   : > { %v3686_v32 = vadd.f32 %v10862_v26, %v3679_v27 }
0x1516   : > { %v3687_v33 = vpack.c.bf16 %v3686_v32, %v3686_v32 }
0x1518   : > { %11882 = vmatmul.mubr.msk.bf16.vlgmr.msra.gmra.mxu0 %vm2022_vm1, %v3687_v33 }
0x1519   : > { %11901 = vmatprep.mubr.msk.bf16.mxu0 %vm2022_vm1, %v15200_v34  ;;  %v10867_v34 = vld [vmem:[#allocation24] ss:$0 sm:$0xff]  ;;  %11898 = vmatpush3.bf16.msra.mxu0 %v12941_v1 }
0x151a   : > { %11899 = vmatprep.subr.bf16.mxu0 %v12942_v15 }
0x151d   : > { %11900 = vmatpush3.bf16.msra.mxu0 %v12942_v15 }
0x151e   : > { %11917 = vmatprep.subr.bf16.mxu0 %v14391_v0 }
0x1520   : > { %11902 = vmatmul.mubr.msk.bf16.vlgmr.msra.gmra.mxu0 %vm2022_vm1, %v15209_v40  ;;  %v12946_v40 = vld [vmem:[%s17530_s27] sm:$0xff]  }
0x1521   : > { %11905 = vmatprep.mubr.msk.bf16.mxu0 %vm2022_vm1, %v15216_v42  ;;  %11918 = vmatpush3.bf16.msra.mxu0 %v12943_v8 }
0x1522   : > { %11919 = vmatprep.subr.bf16.mxu0 %v14391_v0 }
0x1525   : > { %11920 = vmatpush3.bf16.msra.mxu0 %v12945_v17 }
0x1528   : > { %11906 = vmatmul.mubr.msk.bf16.gmra.mxu0 %vm2022_vm1, %v15224_v45 }
0x1529   : > { %11921 = vmatprep.mubr.msk.bf16.mxu0 %vm14392_vm0, %v14391_v0 }
0x15d8   : > { %v3748_v53 = vpop.f32.mrf.mxu0 }
0x15d9   : > { %v3749_v54 = vadd.f32 %v10863_v52, %v3748_v53  ;;  %v10882_v52 = vld [vmem:[#allocation15] ss:$0 sm:$0xff] }
0x15da   : > { %v11883_v55 = vpop.f32.mrf.mxu0 }
0x15db   : > { %v3754_v39 = vmax.f32 %v3749_v54, 0.0 }
0x15dc   : > { %v3751_v41 = vpop.f32.mrf.mxu0 }
0x15dd   : > { %v3755_v56 = vpack.c.bf16 %v3754_v39, %v3754_v39 }
0x15de   : > { %v11884_v57 = vpop.f32.mrf.mxu0 }
0x15df   : > { %11894 = vmatmul.mubr.msk.bf16.vlgmr.msra.gmra.mxu1 %vm3105_vm9, %v3755_v56 }
0x15e0   : > { %11913 = vmatprep.mubr.msk.bf16.mxu1 %vm14392_vm0, %v14391_v0  ;;  %11910 = vmatpush3.bf16.msra.mxu1 %v12944_v16  ;;  %v11903_v37 = vpop.f32.mrf.mxu0 }
0x15e1   : > { %11911 = vmatprep.subr.bf16.mxu1 %v14391_v0  ;;  %v3945_v10 = vadd.f32 %v11903_v37, %v10875_v4 }
0x15e2   : > { %v3936_v38 = vpop.f32.mrf.mxu0 }
0x15e3   : > { %v3937_v43 = vadd.f32 %v10875_v4, %v3936_v38 }
0x15e4   : > { %11912 = vmatpush3.bf16.msra.mxu1 %v12946_v40  ;;  %v11904_v61 = vpop.f32.mrf.mxu0 }
0x15e5   : > { %v3948_v44 = vadd.f32 %v11904_v61, %v10875_v4 }
0x15e6   : > { %v3939_v46 = vpop.f32.mrf.mxu0 }
0x15e7   : > { %v3968_v47 = vpack.c.bf16 %v3948_v44, %v3945_v10  ;;  %v3940_v28 = vadd.f32 %v10875_v4, %v3939_v46 }
0x15e8   : > { %v11907_v5 = vpop.f32.mrf.mxu0 }
0x15e9   : > { %v3967_v48 = vpack.c.bf16 %v3940_v28, %v3937_v43  ;;  %v3961_v20 = vadd.f32 %v11907_v5, %v10875_v4 }
0x15ea   : > { %v3952_v49 = vpop.f32.mrf.mxu0 }
0x15eb   : > { %v3953_v27 = vadd.f32 %v10875_v4, %v3952_v49 }
0x15ec   : > { %v11908_v11 = vpop.f32.mrf.mxu0 }
0x15ed   : > { %v3964_v12 = vadd.f32 %v11908_v11, %v10875_v4 }
0x15ee   : > { %v3955_v21 = vpop.f32.mrf.mxu0 }
0x15ef   : > { %v3970_v26 = vpack.c.bf16 %v3964_v12, %v3961_v20 }
0x169f   : > { %v3832_v58 = vpop.f32.mrf.mxu1 }
0x16a0   : > { %v3833_v59 = vadd.f32 %v10867_v34, %v3832_v58 }
0x16a1   : > { %v11895_v60 = vpop.f32.mrf.mxu1 }
0x16a2   : > { %v3838_v62 = vadd.f32 %v3833_v59, %v3686_v32  ;;  %v3956_v32 = vadd.f32 %v10875_v4, %v3955_v21 }
0x16a3   : > { %v3835_v2 = vpop.f32.mrf.mxu1 }
0x16a4   : > { %v3841_v6 = vsel %vm2022_vm1, %v3838_v62, 0.0  ;;  %v3969_v33 = vpack.c.bf16 %v3956_v32, %v3953_v27 }
0x16a5   : > { %3842 = vadd.xlane.f32.xlu0 %v3841_v6  ;;  %v11896_v63 = vpop.f32.mrf.mxu1 }
0x172e   : > { %v3843_v3 = vpop.xlane.xlu0 %3842 }
0x172f   : > { %v3844_v7 = vmul.f32 0.03125, %v3843_v3 }
0x1731   : > { %v3845_v9 = vsub.f32 %v3838_v62, %v3844_v7 }
0x1733   : > { %v3846_v13 = vmul.f32 %v3845_v9, %v3845_v9 }
0x1735   : > { %v3847_v14 = vsel %vm2022_vm1, %v3846_v13, 0.0 }
0x1736   : > { %3848 = vadd.xlane.f32.xlu0 %v3847_v14 }
0x174c   : > { %4403 = vrot.lane.b32.xlu0 %v3967_v48, %s17531_s30 }
0x1750   : > { %4409 = vrot.lane.b32.xlu0 %v3970_v26, %s17531_s30 }
0x1754   : > { %4733 = vrot.lane.b32.xlu0 %v3967_v48, %s17523_s8 }
0x1758   : > { %4737 = vrot.lane.b32.xlu0 %v3969_v33, %s17523_s8 }
0x17bf   : > { %v3849_v42 = vpop.xlane.xlu0 %3848 }
0x17c0   : > { %v3850_v18 = vmul.f32 0.03125, %v3849_v42 }
0x17c2   : > { %v3851_v19 = vadd.f32 1e-05, %v3850_v18 }
0x17c3   : > { %v4404_v6 = vpop.permute.xlu0 %4403 }
0x17c4   : > { %13027 = vrsqrt.f32 %v3851_v19 }
0x17c7   : > { %v4410_v63 = vpop.permute.xlu0 %4409 }
0x17cb   : > { %v4734_v7 = vpop.permute.xlu0 %4733 }
0x17cf   : > { %v4738_v13 = vpop.permute.xlu0 %4737 }
0x17d1   : > { %v13028_v45 = vpop.eup %13027 }
0x17d2   : > { %v3853_v23 = vmul.f32 %v13028_v45, %v3845_v9 }
0x17d4   : > { %v3860_v25 = vmul.f32 %v10873_v22, %v3853_v23 }
0x17d6   : > { %v15472_v29 = vadd.f32 %v10874_v24, %v3860_v25 }
0x17d8   : > { %v15476_v30 = vpack.c.bf16 %v15472_v29, %v15472_v29  ;;  %v3868_v35 = vadd.f32 %v13373_v31, %v15472_v29 }
0x17da   : > { %11922 = vmatmul.mubr.msk.bf16.vlgmr.msra.gmra.mxu0 %vm2022_vm1, %v15476_v30  ;;  %v15482_v36 = vpack.c.bf16 %v3868_v35, %v3868_v35 }
0x17dc   : > { %11914 = vmatmul.mubr.msk.bf16.vlgmr.msra.gmra.mxu1 %vm2022_vm1, %v15482_v36 }
0x17dd   : > { %11927 = vmatprep.mubr.msk.bf16.mxu1 %vm3048_vm8, %v3967_v48 }
0x189a   : > { %v4092_v51 = vpop.f32.mrf.mxu0 }
0x189b   : > { %v4093_v53 = vadd.f32 %v10886_v50, %v4092_v51 }
0x189c   : > { %v4028_v54 = vpop.f32.mrf.mxu1  ;;  %v11923_v55 = vpop.f32.mrf.mxu0 }
0x189d   : > { %v15491_v39 = vpack.c.bf16 %v4093_v53, %v4093_v53  ;;  %v4029_v41 = vadd.f32 %v10882_v52, %v4028_v54 }
0x189e   : > { %v11915_v56 = vpop.f32.mrf.mxu1  ;;  %v4095_v57 = vpop.f32.mrf.mxu0 }
0x189f   : > { %v4034_v34 = vpack.c.bf16 %v4029_v41, %v4029_v41  ;;  %12502 = vmatprep.subr.msk.bf16.mxu0 %vm2250_vm3, %v15491_v39  ;;  %v4292_v58 = vsel %vm2250_vm3, %v15491_v39, 0 }
0x18a0   : > { %v4031_v59 = vpop.f32.mrf.mxu1  ;;  %v11924_v60 = vpop.f32.mrf.mxu0  ;;  %11936 = vmatpush3.bf16.msra.mxu0 %v4292_v58 }
0x18a1   : > { %4412 = vrot.lane.b32.xlu1 %v4034_v34, %s17531_s30  ;;  %12501 = vmatprep.subr.msk.bf16.mxu1 %vm3048_vm8, %v4034_v34  ;;  %v4112_v62 = vsel %vm3048_vm8, %v4034_v34, 0 }
0x18a2   : > { %5069 = vrot.lane.b32.xlu0 %v4034_v34, %s17532_s5  ;;  %v11916_v2 = vpop.f32.mrf.mxu1  ;;  %11926 = vmatpush3.bf16.xpose.msra.mxu1 %v4112_v62 }
0x18a5   : > { %4405 = vrot.lane.b32.xlu1 %v3968_v47, %s17531_s30 }
0x18a6   : > { %5063 = vrot.lane.b32.xlu0 %v3968_v47, %s17532_s5 }
0x18a9   : > { %4407 = vrot.lane.b32.xlu1 %v3969_v33, %s17531_s30  ;;  %11928 = vmatmul.mubr.msk.bf16.vlgmr.msra.gmra.mxu1 %vm3048_vm8, %v3968_v47 }
0x18aa   : > { %5067 = vrot.lane.b32.xlu0 %v3970_v26, %s17532_s5  ;;  %11931 = vmatprep.mubr.msk.bf16.mxu1 %vm3048_vm8, %v3969_v33 }
0x18ad   : > { %4741 = vrot.lane.b32.xlu1 %v4034_v34, %s17523_s8 }
0x18b1   : > { %4735 = vrot.lane.b32.xlu1 %v3968_v47, %s17523_s8  ;;  %11932 = vmatmul.mubr.msk.bf16.gmra.mxu1 %vm3048_vm8, %v3970_v26 }
0x18b2   : > { %11947 = vmatprep.mubr.msk.bf16.mxu1 %vm3048_vm8, %v4404_v6 }
0x18b5   : > { %4739 = vrot.lane.b32.xlu1 %v3970_v26, %s17523_s8 }
0x18b9   : > { %5061 = vrot.lane.b32.xlu1 %v3967_v48, %s17532_s5 }
0x18bd   : > { %5065 = vrot.lane.b32.xlu1 %v3969_v33, %s17532_s5 }
0x1913   : > { %v4413_v1 = vpop.permute.xlu1 %4412 }
0x1914   : > { %12503 = vmatprep.subr.msk.bf16.mxu1 %vm3048_vm8, %v4413_v1  ;;  %v4427_v3 = vsel %vm3048_vm8, %v4413_v1, 0  ;;  %v5070_v16 = vpop.permute.xlu0 %5069 }
0x1915   : > { %11946 = vmatpush3.bf16.xpose.msra.mxu1 %v4427_v3  ;;  %v5084_v40 = vsel %vm3048_vm8, %v5070_v16, 0 }
0x1917   : > { %v4406_v9 = vpop.permute.xlu1 %4405 }
0x1918   : > { %v5064_v19 = vpop.permute.xlu0 %5063 }
0x191b   : > { %v4408_v14 = vpop.permute.xlu1 %4407 }
0x191c   : > { %11948 = vmatmul.mubr.msk.bf16.vlgmr.msra.gmra.mxu1 %vm3048_vm8, %v4406_v9  ;;  %v5068_v22 = vpop.permute.xlu0 %5067 }
0x191d   : > { %11951 = vmatprep.mubr.msk.bf16.mxu1 %vm3048_vm8, %v4408_v14 }
0x191f   : > { %v4742_v15 = vpop.permute.xlu1 %4741 }
0x1920   : > { %12505 = vmatprep.subr.msk.bf16.mxu1 %vm3048_vm8, %v4742_v15  ;;  %v4756_v8 = vsel %vm3048_vm8, %v4742_v15, 0 }
0x1921   : > { %11966 = vmatpush3.bf16.xpose.msra.mxu1 %v4756_v8 }
0x1922   : > { %12507 = vmatprep.subr.msk.bf16.mxu1 %vm3048_vm8, %v5070_v16 }
0x1923   : > { %v4736_v17 = vpop.permute.xlu1 %4735 }
0x1924   : > { %11952 = vmatmul.mubr.msk.bf16.gmra.mxu1 %vm3048_vm8, %v4410_v63 }
0x1925   : > { %11967 = vmatprep.mubr.msk.bf16.mxu1 %vm3048_vm8, %v4734_v7 }
0x1927   : > { %v4740_v42 = vpop.permute.xlu1 %4739 }
0x192b   : > { %v5062_v18 = vpop.permute.xlu1 %5061 }
0x192c   : > { %11968 = vmatmul.mubr.msk.bf16.vlgmr.msra.gmra.mxu1 %vm3048_vm8, %v4736_v17 }
0x192d   : > { %11986 = vmatpush3.bf16.xpose.msra.mxu1 %v5084_v40  ;;  %11971 = vmatprep.mubr.msk.bf16.mxu1 %vm3048_vm8, %v4738_v13 }
0x192f   : > { %v5066_v45 = vpop.permute.xlu1 %5065 }
0x1934   : > { %11972 = vmatmul.mubr.msk.bf16.gmra.mxu1 %vm3048_vm8, %v4740_v42 }
0x1935   : > { %11987 = vmatprep.mubr.msk.bf16.mxu1 %vm3048_vm8, %v5062_v18 }
0x193c   : > { %11988 = vmatmul.mubr.msk.bf16.vlgmr.msra.gmra.mxu1 %vm3048_vm8, %v5064_v19 }
0x193d   : > { %11991 = vmatprep.mubr.msk.bf16.mxu1 %vm3048_vm8, %v5066_v45 }
0x1944   : > { %11992 = vmatmul.mubr.msk.bf16.gmra.mxu1 %vm3048_vm8, %v5068_v22 }
0x1969   : > { %v11929_v23 = vpop.f32.mrf.mxu1 }
0x196a   : > { %v15531_v24 = vmul.f32 0.5, %v11929_v23 }
0x196b   : > { %v4148_v25 = vpop.f32.mrf.mxu1 }
0x196c   : > { %v15533_v31 = vmul.f32 0.5, %v4148_v25  ;;  %v4193_v35 = vsel %vm2187_vm2, %v15531_v24, -inf }
0x196d   : > { %4194 = vmax.xlane.f32.xlu0 %v4193_v35  ;;  %v11930_v37 = vpop.f32.mrf.mxu1 }
0x196e   : > { %v15537_v4 = vmul.f32 0.5, %v11930_v37  ;;  %v4187_v10 = vsel %vm2187_vm2, %v15533_v31, -inf }
0x196f   : > { %4188 = vmax.xlane.f32.xlu1 %v4187_v10  ;;  %v4151_v38 = vpop.f32.mrf.mxu1 }
0x1970   : > { %v15541_v61 = vmul.f32 0.5, %v4151_v38  ;;  %v4196_v46 = vsel %vm2187_vm2, %v15537_v4, -inf }
0x1971   : > { %v11933_v43 = vpop.f32.mrf.mxu1 }
0x1972   : > { %v15543_v44 = vmul.f32 0.5, %v11933_v43  ;;  %v4190_v47 = vsel %vm2187_vm2, %v15541_v61, -inf }
0x1973   : > { %4197 = vmax.xlane.f32.xlu1 %v4196_v46  ;;  %4191 = vmax.xlane.f32.xlu0 %v4190_v47  ;;  %v4164_v28 = vpop.f32.mrf.mxu1 }
0x1974   : > { %v15549_v48 = vmul.f32 0.5, %v4164_v28  ;;  %v4205_v20 = vsel %vm2187_vm2, %v15543_v44, -inf }
0x1975   : > { %v11934_v5 = vpop.f32.mrf.mxu1 }
0x1976   : > { %v15551_v49 = vmul.f32 0.5, %v11934_v5  ;;  %v4199_v26 = vsel %vm2187_vm2, %v15549_v48, -inf }
0x1977   : > { %4206 = vmax.xlane.f32.xlu0 %v4205_v20  ;;  %v4167_v11 = vpop.f32.mrf.mxu1 }
0x1978   : > { %v15555_v12 = vmul.f32 0.5, %v4167_v11  ;;  %v4208_v21 = vsel %vm2187_vm2, %v15551_v49, -inf }
0x1979   : > { %4209 = vmax.xlane.f32.xlu1 %v4208_v21 }
0x197a   : > { %v4202_v27 = vsel %vm2187_vm2, %v15555_v12, -inf }
0x197b   : > { %4200 = vmax.xlane.f32.xlu0 %v4199_v26 }
0x197d   : > { %4203 = vmax.xlane.f32.xlu1 %v4202_v27 }
0x19dc   : > { %v11949_v32 = vpop.f32.mrf.mxu1 }
0x19dd   : > { %v15563_v33 = vmul.f32 0.5, %v11949_v32 }
0x19de   : > { %v4463_v50 = vpop.f32.mrf.mxu1 }
0x19df   : > { %v15565_v51 = vmul.f32 0.5, %v4463_v50  ;;  %v4508_v52 = vsel %vm2187_vm2, %v15563_v33, -inf }
0x19e0   : > { %4509 = vmax.xlane.f32.xlu0 %v4508_v52  ;;  %v11950_v53 = vpop.f32.mrf.mxu1 }
0x19e1   : > { %v15569_v54 = vmul.f32 0.5, %v11950_v53  ;;  %v4502_v56 = vsel %vm2187_vm2, %v15565_v51, -inf }
0x19e2   : > { %v4466_v55 = vpop.f32.mrf.mxu1 }
0x19e3   : > { %v15571_v41 = vmul.f32 0.5, %v4466_v55  ;;  %v4511_v57 = vsel %vm2187_vm2, %v15569_v54, -inf }
0x19e4   : > { %4503 = vmax.xlane.f32.xlu0 %v4502_v56  ;;  %v11953_v34 = vpop.f32.mrf.mxu1  ;;  %4512 = vmax.xlane.f32.xlu1 %v4511_v57 }
0x19e5   : > { %v15577_v58 = vmul.f32 0.5, %v11953_v34  ;;  %v4505_v2 = vsel %vm2187_vm2, %v15571_v41, -inf }
0x19e6   : > { %v4479_v59 = vpop.f32.mrf.mxu1 }
0x19e7   : > { %v15579_v60 = vmul.f32 0.5, %v4479_v59  ;;  %v4520_v62 = vsel %vm2187_vm2, %v15577_v58, -inf }
0x19e8   : > { %4521 = vmax.xlane.f32.xlu0 %v4520_v62  ;;  %v11954_v6 = vpop.f32.mrf.mxu1  ;;  %4506 = vmax.xlane.f32.xlu1 %v4505_v2 }
0x19e9   : > { %v15585_v63 = vmul.f32 0.5, %v11954_v6  ;;  %v4514_v7 = vsel %vm2187_vm2, %v15579_v60, -inf }
0x19ea   : > { %v4482_v1 = vpop.f32.mrf.mxu1 }
0x19eb   : > { %v15587_v3 = vmul.f32 0.5, %v4482_v1  ;;  %v4523_v9 = vsel %vm2187_vm2, %v15585_v63, -inf }
0x19ec   : > { %4515 = vmax.xlane.f32.xlu0 %v4514_v7  ;;  %v11969_v13 = vpop.f32.mrf.mxu1  ;;  %4524 = vmax.xlane.f32.xlu1 %v4523_v9 }
0x19ed   : > { %v15593_v14 = vmul.f32 0.5, %v11969_v13  ;;  %v4517_v17 = vsel %vm2187_vm2, %v15587_v3, -inf }
0x19ee   : > { %v4792_v15 = vpop.f32.mrf.mxu1 }
0x19ef   : > { %v15595_v8 = vmul.f32 0.5, %v4792_v15  ;;  %v4837_v16 = vsel %vm2187_vm2, %v15593_v14, -inf }
0x19f0   : > { %4838 = vmax.xlane.f32.xlu0 %v4837_v16  ;;  %v11970_v40 = vpop.f32.mrf.mxu1  ;;  %4518 = vmax.xlane.f32.xlu1 %v4517_v17 }
0x19f1   : > { %v15601_v42 = vmul.f32 0.5, %v11970_v40  ;;  %v4831_v45 = vsel %vm2187_vm2, %v15595_v8, -inf }
0x19f2   : > { %v4795_v18 = vpop.f32.mrf.mxu1 }
0x19f3   : > { %v15603_v19 = vmul.f32 0.5, %v4795_v18  ;;  %v4840_v22 = vsel %vm2187_vm2, %v15601_v42, -inf }
0x19f4   : > { %4832 = vmax.xlane.f32.xlu0 %v4831_v45  ;;  %v11973_v23 = vpop.f32.mrf.mxu1  ;;  %4841 = vmax.xlane.f32.xlu1 %v4840_v22 }
0x19f5   : > { %v15609_v25 = vmul.f32 0.5, %v11973_v23  ;;  %v4834_v43 = vsel %vm2187_vm2, %v15603_v19, -inf }
0x19f6   : > { %v4195_v35 = vpop.xlane.xlu0 %4194  ;;  %v4808_v37 = vpop.f32.mrf.mxu1 }
0x19f7   : > { %v15611_v10 = vmul.f32 0.5, %v4808_v37  ;;  %v4849_v38 = vsel %vm2187_vm2, %v15609_v25, -inf  ;;  %v4213_v46 = vsub.f32 %v15531_v24, %v4195_v35 }
0x19f8   : > { %v4189_v47 = vpop.xlane.xlu1 %4188  ;;  %4850 = vmax.xlane.f32.xlu0 %v4849_v38  ;;  %v11974_v28 = vpop.f32.mrf.mxu1  ;;  %4835 = vmax.xlane.f32.xlu1 %v4834_v43 }
0x19f9   : > { %v15618_v5 = vmul.f32 0.5, %v11974_v28  ;;  %v4211_v11 = vsub.f32 %v15533_v31, %v4189_v47  ;;  %v4843_v26 = vsel %vm2187_vm2, %v15611_v10, -inf  ;;  %v4223_v32 = vmul.f32 1.442695, %v4213_v46 }
0x19fa   : > { %v4811_v20 = vpop.f32.mrf.mxu1 }
0x19fb   : > { %v15621_v21 = vmul.f32 0.5, %v4811_v20  ;;  %v4852_v27 = vsel %vm2187_vm2, %v15618_v5, -inf  ;;  %v4219_v31 = vmul.f32 1.442695, %v4211_v11  ;;  %13029 = vpow2.f32 %v4223_v32 }
0x19fc   : > { %v4198_v50 = vpop.xlane.xlu1 %4197  ;;  %v4192_v24 = vpop.xlane.xlu0 %4191  ;;  %4844 = vmax.xlane.f32.xlu0 %v4843_v26  ;;  %4853 = vmax.xlane.f32.xlu1 %v4852_v27 }
0x19fd   : > { %v4214_v52 = vsub.f32 %v15537_v4, %v4198_v50  ;;  %v11989_v53 = vpop.f32.mrf.mxu1  ;;  %v4212_v55 = vsub.f32 %v15541_v61, %v4192_v24  ;;  %v4846_v34 = vsel %vm2187_vm2, %v15621_v21, -inf  ;;  %13031 = vpow2.f32 %v4219_v31 }
0x19fe   : > { %v15629_v56 = vmul.f32 0.5, %v11989_v53 }
0x19ff   : > { %v5120_v57 = vpop.f32.mrf.mxu1  ;;  %v4225_v59 = vmul.f32 1.442695, %v4214_v52  ;;  %v4221_v1 = vmul.f32 1.442695, %v4212_v55 }
0x1a00   : > { %v15633_v62 = vmul.f32 0.5, %v5120_v57  ;;  %v4207_v2 = vpop.xlane.xlu0 %4206  ;;  %v5165_v6 = vsel %vm2187_vm2, %v15629_v56, -inf  ;;  %4847 = vmax.xlane.f32.xlu1 %v4846_v34 }
0x1a01   : > { %v4217_v4 = vsub.f32 %v15543_v44, %v4207_v2  ;;  %5166 = vmax.xlane.f32.xlu0 %v5165_v6  ;;  %v11990_v61 = vpop.f32.mrf.mxu1  ;;  %13033 = vpow2.f32 %v4225_v59 }
0x1a02   : > { %v15638_v7 = vmul.f32 0.5, %v11990_v61  ;;  %v4210_v9 = vpop.xlane.xlu1 %4209  ;;  %v5159_v18 = vsel %vm2187_vm2, %v15633_v62, -inf  ;;  %13035 = vpow2.f32 %v4221_v1 }
0x1a03   : > { %v4231_v13 = vmul.f32 1.442695, %v4217_v4  ;;  %v4218_v15 = vsub.f32 %v15551_v49, %v4210_v9  ;;  %v5123_v16 = vpop.f32.mrf.mxu1 }
0x1a04   : > { %v15641_v17 = vmul.f32 0.5, %v5123_v16  ;;  %v4201_v40 = vpop.xlane.xlu0 %4200  ;;  %v5168_v44 = vsel %vm2187_vm2, %v15638_v7, -inf }
0x1a05   : > { %v4215_v45 = vsub.f32 %v15549_v48, %v4201_v40  ;;  %5160 = vmax.xlane.f32.xlu0 %v5159_v18  ;;  %v11993_v22 = vpop.f32.mrf.mxu1  ;;  %5169 = vmax.xlane.f32.xlu1 %v5168_v44  ;;  %v4233_v23 = vmul.f32 1.442695, %v4218_v15  ;;  %13037 = vpow2.f32 %v4231_v13 }
0x1a06   : > { %v15648_v35 = vmul.f32 0.5, %v11993_v22  ;;  %v4204_v49 = vpop.xlane.xlu1 %4203  ;;  %v5162_v48 = vsel %vm2187_vm2, %v15641_v17, -inf }
0x1a07   : > { %v4227_v37 = vmul.f32 1.442695, %v4215_v45  ;;  %v5136_v38 = vpop.f32.mrf.mxu1  ;;  %v4216_v46 = vsub.f32 %v15555_v12, %v4204_v49  ;;  %13039 = vpow2.f32 %v4233_v23 }
0x1a08   : > { %v15650_v43 = vmul.f32 0.5, %v5136_v38  ;;  %v5177_v47 = vsel %vm2187_vm2, %v15648_v35, -inf  ;;  %v15665_v50 = vpop.eup %13029 }
0x1a09   : > { %5178 = vmax.xlane.f32.xlu0 %v5177_v47  ;;  %v11994_v28 = vpop.f32.mrf.mxu1  ;;  %5163 = vmax.xlane.f32.xlu1 %v5162_v48  ;;  %13041 = vpow2.f32 %v4227_v37  ;;  %v4229_v26 = vmul.f32 1.442695, %v4216_v46  ;;  %v4241_v52 = vsel %vm2187_vm2, %v15665_v50, 0.0 }
0x1a0a   : > { %v15657_v20 = vmul.f32 0.5, %v11994_v28  ;;  %v5171_v12 = vsel %vm2187_vm2, %v15650_v43, -inf  ;;  %v15667_v24 = vpop.eup %13031 }
0x1a0b   : > { %v5139_v11 = vpop.f32.mrf.mxu1  ;;  %13043 = vpow2.f32 %v4229_v26  ;;  %v4235_v34 = vsel %vm2187_vm2, %v15667_v24, 0.0 }
0x1a0c   : > { %v15659_v27 = vmul.f32 0.5, %v5139_v11  ;;  %v5180_v32 = vsel %vm2187_vm2, %v15657_v20, -inf }
0x1a0d   : > { %5172 = vmax.xlane.f32.xlu0 %v5171_v12  ;;  %5181 = vmax.xlane.f32.xlu1 %v5180_v32 }
0x1a0e   : > { %v5174_v53 = vsel %vm2187_vm2, %v15659_v27, -inf  ;;  %v15673_v55 = vpop.eup %13033 }
0x1a0f   : > { %v15675_v31 = vpop.eup %13035  ;;  %v4244_v59 = vsel %vm2187_vm2, %v15673_v55, 0.0 }
0x1a10   : > { %v4238_v61 = vsel %vm2187_vm2, %v15675_v31, 0.0 }
0x1a11   : > { %4242 = vadd.xlane.f32.xlu0 %v4241_v52  ;;  %5175 = vmax.xlane.f32.xlu1 %v5174_v53 }
0x1a12   : > { %v15677_v57 = vpop.eup %13037 }
0x1a13   : > { %v4253_v4 = vsel %vm2187_vm2, %v15677_v57, 0.0 }
0x1a14   : > { %v15683_v2 = vpop.eup %13039 }
0x1a15   : > { %4236 = vadd.xlane.f32.xlu0 %v4235_v34  ;;  %4245 = vadd.xlane.f32.xlu1 %v4244_v59  ;;  %v4256_v9 = vsel %vm2187_vm2, %v15683_v2, 0.0 }
0x1a16   : > { %v15685_v6 = vpop.eup %13041 }
0x1a17   : > { %v4247_v1 = vsel %vm2187_vm2, %v15685_v6, 0.0 }
0x1a18   : > { %v15695_v13 = vpop.eup %13043 }
0x1a19   : > { %4254 = vadd.xlane.f32.xlu0 %v4253_v4  ;;  %4239 = vadd.xlane.f32.xlu1 %v4238_v61  ;;  %v4250_v15 = vsel %vm2187_vm2, %v15695_v13, 0.0 }
0x1a1d   : > { %4248 = vadd.xlane.f32.xlu0 %v4247_v1  ;;  %4257 = vadd.xlane.f32.xlu1 %v4256_v9 }
0x1a21   : > { %4251 = vadd.xlane.f32.xlu1 %v4250_v15 }
0x1a69   : > { %v4510_v16 = vpop.xlane.xlu0 %4509 }
0x1a6a   : > { %v4528_v40 = vsub.f32 %v15563_v33, %v4510_v16 }
0x1a6c   : > { %v4538_v18 = vmul.f32 1.442695, %v4528_v40 }
0x1a6d   : > { %v4504_v44 = vpop.xlane.xlu0 %4503  ;;  %v4513_v45 = vpop.xlane.xlu1 %4512 }
0x1a6e   : > { %13045 = vpow2.f32 %v4538_v18  ;;  %v4526_v22 = vsub.f32 %v15565_v51, %v4504_v44  ;;  %v4529_v23 = vsub.f32 %v15569_v54, %v4513_v45 }
0x1a70   : > { %v4534_v49 = vmul.f32 1.442695, %v4526_v22  ;;  %v4540_v37 = vmul.f32 1.442695, %v4529_v23 }
0x1a71   : > { %v4522_v38 = vpop.xlane.xlu0 %4521  ;;  %v4507_v46 = vpop.xlane.xlu1 %4506 }
0x1a72   : > { %13047 = vpow2.f32 %v4534_v49  ;;  %v4532_v47 = vsub.f32 %v15577_v58, %v4522_v38  ;;  %v4527_v48 = vsub.f32 %v15571_v41, %v4507_v46 }
0x1a73   : > { %13049 = vpow2.f32 %v4540_v37 }
0x1a74   : > { %v4546_v28 = vmul.f32 1.442695, %v4532_v47  ;;  %v4536_v33 = vmul.f32 1.442695, %v4527_v48 }
0x1a75   : > { %v4516_v11 = vpop.xlane.xlu0 %4515  ;;  %v4525_v26 = vpop.xlane.xlu1 %4524 }
0x1a76   : > { %13051 = vpow2.f32 %v4546_v28  ;;  %v4530_v12 = vsub.f32 %v15579_v60, %v4516_v11  ;;  %v4533_v51 = vsub.f32 %v15585_v63, %v4525_v26 }
0x1a77   : > { %13053 = vpow2.f32 %v4536_v33 }
0x1a78   : > { %v4542_v54 = vmul.f32 1.442695, %v4530_v12  ;;  %v4548_v32 = vmul.f32 1.442695, %v4533_v51 }
0x1a79   : > { %v4839_v52 = vpop.xlane.xlu0 %4838  ;;  %v4519_v53 = vpop.xlane.xlu1 %4518 }
0x1a7a   : > { %13055 = vpow2.f32 %v4542_v54  ;;  %v4857_v58 = vsub.f32 %v15593_v14, %v4839_v52  ;;  %v4531_v41 = vsub.f32 %v15587_v3, %v4519_v53 }
0x1a7b   : > { %v15708_v34 = vpop.eup %13045  ;;  %13057 = vpow2.f32 %v4548_v32 }
0x1a7c   : > { %v4867_v59 = vmul.f32 1.442695, %v4857_v58  ;;  %v4544_v4 = vmul.f32 1.442695, %v4531_v41  ;;  %v4556_v60 = vsel %vm2187_vm2, %v15708_v34, 0.0 }
0x1a7d   : > { %v4833_v61 = vpop.xlane.xlu0 %4832  ;;  %4557 = vadd.xlane.f32.xlu0 %v4556_v60  ;;  %v4842_v63 = vpop.xlane.xlu1 %4841 }
0x1a7e   : > { %13059 = vpow2.f32 %v4867_v59  ;;  %v4855_v1 = vsub.f32 %v15595_v8, %v4833_v61  ;;  %v4858_v9 = vsub.f32 %v15601_v42, %v4842_v63 }
0x1a7f   : > { %v15714_v15 = vpop.eup %13047  ;;  %13061 = vpow2.f32 %v4544_v4 }
0x1a80   : > { %v15716_v3 = vpop.eup %13049  ;;  %v4863_v14 = vmul.f32 1.442695, %v4855_v1  ;;  %v4869_v16 = vmul.f32 1.442695, %v4858_v9  ;;  %v4550_v40 = vsel %vm2187_vm2, %v15714_v15, 0.0 }
0x1a81   : > { %v4851_v18 = vpop.xlane.xlu0 %4850  ;;  %4551 = vadd.xlane.f32.xlu0 %v4550_v40  ;;  %v4559_v44 = vsel %vm2187_vm2, %v15716_v3, 0.0  ;;  %v4836_v45 = vpop.xlane.xlu1 %4835 }
0x1a82   : > { %13063 = vpow2.f32 %v4863_v14  ;;  %v4861_v8 = vsub.f32 %v15609_v25, %v4851_v18  ;;  %4560 = vadd.xlane.f32.xlu1 %v4559_v44  ;;  %v4856_v42 = vsub.f32 %v15603_v19, %v4836_v45 }
0x1a83   : > { %v15724_v22 = vpop.eup %13051  ;;  %13065 = vpow2.f32 %v4869_v16 }
0x1a84   : > { %v15726_v23 = vpop.eup %13053  ;;  %v4875_v49 = vmul.f32 1.442695, %v4861_v8  ;;  %v4865_v37 = vmul.f32 1.442695, %v4856_v42  ;;  %v4568_v38 = vsel %vm2187_vm2, %v15724_v22, 0.0 }
0x1a85   : > { %v4845_v46 = vpop.xlane.xlu0 %4844  ;;  %4569 = vadd.xlane.f32.xlu0 %v4568_v38  ;;  %v4553_v47 = vsel %vm2187_vm2, %v15726_v23, 0.0  ;;  %v4854_v48 = vpop.xlane.xlu1 %4853 }
0x1a86   : > { %13067 = vpow2.f32 %v4875_v49  ;;  %v4859_v25 = vsub.f32 %v15611_v10, %v4845_v46  ;;  %4554 = vadd.xlane.f32.xlu1 %v4553_v47  ;;  %v4862_v19 = vsub.f32 %v15618_v5, %v4854_v48 }
0x1a87   : > { %v15734_v28 = vpop.eup %13055  ;;  %13069 = vpow2.f32 %v4865_v37 }
0x1a88   : > { %v15736_v33 = vpop.eup %13057  ;;  %v4871_v11 = vmul.f32 1.442695, %v4859_v25  ;;  %v4877_v26 = vmul.f32 1.442695, %v4862_v19  ;;  %v4562_v12 = vsel %vm2187_vm2, %v15734_v28, 0.0 }
0x1a89   : > { %4563 = vadd.xlane.f32.xlu0 %v4562_v12  ;;  %v4571_v51 = vsel %vm2187_vm2, %v15736_v33, 0.0  ;;  %v4848_v54 = vpop.xlane.xlu1 %4847 }
0x1a8a   : > { %13071 = vpow2.f32 %v4871_v11  ;;  %v5167_v10 = vpop.xlane.xlu0 %5166  ;;  %4572 = vadd.xlane.f32.xlu1 %v4571_v51  ;;  %v4860_v5 = vsub.f32 %v15621_v21, %v4848_v54 }
0x1a8b   : > { %v15743_v32 = vpop.eup %13059  ;;  %13073 = vpow2.f32 %v4877_v26  ;;  %v5185_v52 = vsub.f32 %v15629_v56, %v5167_v10 }
0x1a8c   : > { %v15746_v53 = vpop.eup %13061  ;;  %v4873_v58 = vmul.f32 1.442695, %v4860_v5  ;;  %v4885_v41 = vsel %vm2187_vm2, %v15743_v32, 0.0 }
0x1a8d   : > { %v5195_v59 = vmul.f32 1.442695, %v5185_v52  ;;  %4886 = vadd.xlane.f32.xlu0 %v4885_v41  ;;  %v4565_v4 = vsel %vm2187_vm2, %v15746_v53, 0.0 }
0x1a8e   : > { %13075 = vpow2.f32 %v4873_v58  ;;  %v5161_v60 = vpop.xlane.xlu0 %5160  ;;  %4566 = vadd.xlane.f32.xlu1 %v4565_v4  ;;  %v5170_v21 = vpop.xlane.xlu1 %5169 }
0x1a8f   : > { %v15752_v61 = vpop.eup %13063  ;;  %v5183_v63 = vsub.f32 %v15633_v62, %v5161_v60  ;;  %13077 = vpow2.f32 %v5195_v59  ;;  %v5186_v14 = vsub.f32 %v15638_v7, %v5170_v21 }
0x1a90   : > { %v15755_v56 = vpop.eup %13065  ;;  %v4879_v1 = vsel %vm2187_vm2, %v15752_v61, 0.0 }
0x1a91   : > { %v5191_v9 = vmul.f32 1.442695, %v5183_v63  ;;  %4880 = vadd.xlane.f32.xlu0 %v4879_v1  ;;  %v4888_v16 = vsel %vm2187_vm2, %v15755_v56, 0.0  ;;  %v5197_v8 = vmul.f32 1.442695, %v5186_v14 }
0x1a92   : > { %v15762_v40 = vpop.xlane.xlu0 %5178  ;;  %4889 = vadd.xlane.f32.xlu1 %v4888_v16  ;;  %v5164_v18 = vpop.xlane.xlu1 %5163 }
0x1a93   : > { %v15764_v44 = vpop.eup %13067  ;;  %13079 = vpow2.f32 %v5191_v9  ;;  %v5184_v42 = vsub.f32 %v15641_v17, %v5164_v18 }
0x1a94   : > { %v15766_v62 = vpop.eup %13069  ;;  %v4897_v45 = vsel %vm2187_vm2, %v15764_v44, 0.0  ;;  %13081 = vpow2.f32 %v5197_v8 }
0x1a95   : > { %4898 = vadd.xlane.f32.xlu0 %v4897_v45  ;;  %v4882_v7 = vsel %vm2187_vm2, %v15766_v62, 0.0  ;;  %v5193_v48 = vmul.f32 1.442695, %v5184_v42 }
0x1a96   : > { %v15773_v49 = vpop.xlane.xlu0 %5172  ;;  %4883 = vadd.xlane.f32.xlu1 %v4882_v7  ;;  %v15775_v37 = vpop.xlane.xlu1 %5181 }
0x1a97   : > { %v15777_v38 = vpop.eup %13071  ;;  %13083 = vpow2.f32 %v5193_v48 }
0x1a98   : > { %v15779_v46 = vpop.eup %13073  ;;  %v4891_v47 = vsel %vm2187_vm2, %v15777_v38, 0.0 }
0x1a99   : > { %4892 = vadd.xlane.f32.xlu0 %v4891_v47  ;;  %v4900_v17 = vsel %vm2187_vm2, %v15779_v46, 0.0 }
0x1a9a   : > { %v4243_v25 = vpop.xlane.xlu0 %4242  ;;  %4901 = vadd.xlane.f32.xlu1 %v4900_v17  ;;  %v15785_v19 = vpop.xlane.xlu1 %5175 }
0x1a9b   : > { %v15787_v11 = vpop.eup %13075 }
0x1a9c   : > { %v4894_v26 = vsel %vm2187_vm2, %v15787_v11, 0.0  ;;  %v15791_v12 = vpop.eup %13077 }
0x1a9d   : > { %v5213_v10 = vsel %vm2187_vm2, %v15791_v12, 0.0 }
0x1a9e   : > { %v4237_v51 = vpop.xlane.xlu0 %4236  ;;  %4895 = vadd.xlane.f32.xlu1 %v4894_v26  ;;  %v4246_v54 = vpop.xlane.xlu1 %4245 }
0x1a9f   : > { %13085 = vrcp.f32 %v4246_v54 }
0x1aa0   : > { %v15795_v5 = vpop.eup %13079  ;;  %13087 = vrcp.f32 %v4237_v51 }
0x1aa1   : > { %13089 = vrcp.f32 %v4243_v25  ;;  %v5207_v41 = vsel %vm2187_vm2, %v15795_v5, 0.0  ;;  %v15799_v59 = vpop.eup %13081  ;;  %v5189_v25 = vsub.f32 %v15648_v35, %v15762_v40 }
0x1aa2   : > { %v4255_v52 = vpop.xlane.xlu0 %4254  ;;  %5214 = vadd.xlane.f32.xlu1 %v5213_v10  ;;  %v4240_v58 = vpop.xlane.xlu1 %4239  ;;  %v5216_v21 = vsel %vm2187_vm2, %v15799_v59, 0.0 }
0x1aa3   : > { %13091 = vrcp.f32 %v4240_v58 }
0x1aa4   : > { %v15803_v63 = vpop.eup %13083 }
0x1aa5   : > { %v5210_v9 = vsel %vm2187_vm2, %v15803_v63, 0.0 }
0x1aa6   : > { %v4249_v4 = vpop.xlane.xlu0 %4248  ;;  %5208 = vadd.xlane.f32.xlu1 %v5207_v41  ;;  %v4258_v60 = vpop.xlane.xlu1 %4257 }
0x1aa7   : > { %13093 = vrcp.f32 %v4249_v4  ;;  %v5188_v4 = vsub.f32 %v15659_v27, %v15785_v19 }
0x1aa8   : > { %13095 = vrcp.f32 %v4258_v60 }
0x1aa9   : > { %13097 = vrcp.f32 %v4255_v52  ;;  %v5201_v60 = vmul.f32 1.442695, %v5188_v4 }
0x1aaa   : > { %5217 = vadd.xlane.f32.xlu1 %v5216_v21  ;;  %v4252_v1 = vpop.xlane.xlu1 %4251 }
0x1aab   : > { %13099 = vrcp.f32 %v4252_v1 }
0x1aac   : > { %v13086_v14 = vpop.eup %13085 }
0x1aad   : > { %v13088_v16 = vpop.eup %13087  ;;  %v4270_v8 = vmul.f32 %v13086_v14, %v15673_v55  ;;  %v5203_v55 = vmul.f32 1.442695, %v5189_v25 }
0x1aae   : > { %5211 = vadd.xlane.f32.xlu1 %v5210_v9  ;;  %v13090_v18 = vpop.eup %13089  ;;  %v4267_v42 = vmul.f32 %v13088_v16, %v15667_v24 }
0x1aaf   : > { %4595 = vrot.lane.b32.xlu0 %v15491_v39, %s17531_s30  ;;  %v4269_v47 = vmul.f32 %v13090_v18, %v15665_v50  ;;  %13101 = vpow2.f32 %v5203_v55 }
0x1ab0   : > { %v13092_v45 = vpop.eup %13091 }
0x1ab1   : > { %v4268_v7 = vmul.f32 %v13092_v45, %v15675_v31  ;;  %v4276_v26 = vpack.c.bf16 %v4270_v8, %v4269_v47 }
0x1ab3   : > { %v4275_v48 = vpack.c.bf16 %v4268_v7, %v4267_v42 }
0x1ab4   : > { %v13094_v17 = vpop.eup %13093 }
0x1ab5   : > { %v13096_v51 = vpop.eup %13095  ;;  %11937 = vmatprep.mubr.msk.bf16.mxu0 %vm2187_vm2, %v4275_v48  ;;  %v4271_v24 = vmul.f32 %v13094_v17, %v15685_v6  ;;  %v5187_v6 = vsub.f32 %v15650_v43, %v15773_v49 }
0x1ab6   : > { %v13098_v54 = vpop.eup %13097  ;;  %11938 = vmatmul.mubr.msk.bf16.vlgmr.msra.gmra.mxu0 %vm2187_vm2, %v4276_v26  ;;  %v4274_v50 = vmul.f32 %v13096_v51, %v15683_v2 }
0x1ab7   : > { %v4273_v58 = vmul.f32 %v13098_v54, %v15677_v57  ;;  %v5190_v57 = vsub.f32 %v15657_v20, %v15775_v37 }
0x1ab8   : > { %v13100_v10 = vpop.eup %13099 }
0x1ab9   : > { %v4272_v31 = vmul.f32 %v13100_v10, %v15695_v13  ;;  %v4278_v35 = vpack.c.bf16 %v4274_v50, %v4273_v58  ;;  %v5199_v13 = vmul.f32 1.442695, %v5187_v6  ;;  %v5205_v41 = vmul.f32 1.442695, %v5190_v57 }
0x1abb   : > { %v4277_v52 = vpack.c.bf16 %v4272_v31, %v4271_v24  ;;  %13103 = vpow2.f32 %v5199_v13 }
0x1abc   : > { %v15825_v40 = vpop.eup %13101  ;;  %13105 = vpow2.f32 %v5205_v41 }
0x1abd   : > { %11941 = vmatprep.mubr.msk.bf16.mxu0 %vm2187_vm2, %v4277_v52  ;;  %v5225_v2 = vsel %vm2187_vm2, %v15825_v40, 0.0  ;;  %13107 = vpow2.f32 %v5201_v60 }
0x1abe   : > { %11942 = vmatmul.mubr.msk.bf16.gmra.mxu0 %vm2187_vm2, %v4278_v35 }
0x1abf   : > { %4923 = vrot.lane.b32.xlu1 %v15491_v39, %s17523_s8 }
0x1ac8   : > { %v15835_v21 = vpop.eup %13103 }
0x1ac9   : > { %v5219_v43 = vsel %vm2187_vm2, %v15835_v21, 0.0  ;;  %v15839_v49 = vpop.eup %13105 }
0x1aca   : > { %v5228_v20 = vsel %vm2187_vm2, %v15839_v49, 0.0  ;;  %v15843_v37 = vpop.eup %13107 }
0x1acb   : > { %v5222_v27 = vsel %vm2187_vm2, %v15843_v37, 0.0 }
0x1ace   : > { %5226 = vadd.xlane.f32.xlu0 %v5225_v2 }
0x1ae3   : > { %5220 = vadd.xlane.f32.xlu1 %v5219_v43 }
0x1ae7   : > { %5229 = vadd.xlane.f32.xlu1 %v5228_v20 }
0x1aeb   : > { %5223 = vadd.xlane.f32.xlu1 %v5222_v27 }
0x1afc   : > { %5251 = vrot.lane.b32.xlu1 %v15491_v39, %s17532_s5 }
0x1b06   : > { %v4558_v19 = vpop.xlane.xlu0 %4557 }
0x1b0a   : > { %v4552_v1 = vpop.xlane.xlu0 %4551 }
0x1b0b   : > { %v4561_v9 = vpop.xlane.xlu1 %4560  ;;  %13109 = vrcp.f32 %v4552_v1 }
0x1b0e   : > { %v4570_v14 = vpop.xlane.xlu0 %4569 }
0x1b0f   : > { %v4555_v16 = vpop.xlane.xlu1 %4554 }
0x1b10   : > { %13111 = vrcp.f32 %v4555_v16 }
0x1b11   : > { %13113 = vrcp.f32 %v4561_v9 }
0x1b12   : > { %v4564_v18 = vpop.xlane.xlu0 %4563  ;;  %13115 = vrcp.f32 %v4558_v19 }
0x1b13   : > { %v4573_v45 = vpop.xlane.xlu1 %4572  ;;  %13117 = vrcp.f32 %v4564_v18 }
0x1b16   : > { %v4887_v8 = vpop.xlane.xlu0 %4886 }
0x1b17   : > { %v4567_v42 = vpop.xlane.xlu1 %4566 }
0x1b18   : > { %13119 = vrcp.f32 %v4567_v42  ;;  %v13110_v47 = vpop.eup %13109 }
0x1b19   : > { %13121 = vrcp.f32 %v4573_v45  ;;  %v4582_v25 = vmul.f32 %v13110_v47, %v15714_v15 }
0x1b1a   : > { %v4881_v7 = vpop.xlane.xlu0 %4880  ;;  %13123 = vrcp.f32 %v4570_v14 }
0x1b1b   : > { %v4890_v48 = vpop.xlane.xlu1 %4889  ;;  %13125 = vrcp.f32 %v4881_v7 }
0x1b1d   : > { %v13112_v17 = vpop.eup %13111 }
0x1b1e   : > { %v4899_v39 = vpop.xlane.xlu0 %4898  ;;  %v4583_v26 = vmul.f32 %v13112_v17, %v15726_v23  ;;  %v13114_v10 = vpop.eup %13113 }
0x1b1f   : > { %v4884_v51 = vpop.xlane.xlu1 %4883  ;;  %v13116_v24 = vpop.eup %13115  ;;  %v4585_v58 = vmul.f32 %v13114_v10, %v15716_v3 }
0x1b20   : > { %13127 = vrcp.f32 %v4884_v51  ;;  %v4590_v54 = vpack.c.bf16 %v4583_v26, %v4582_v25  ;;  %v13118_v50 = vpop.eup %13117  ;;  %v4584_v15 = vmul.f32 %v13116_v24, %v15708_v34 }
0x1b21   : > { %v4586_v13 = vmul.f32 %v13118_v50, %v15734_v28  ;;  %13129 = vrcp.f32 %v4890_v48 }
0x1b22   : > { %11957 = vmatprep.mubr.msk.bf16.mxu0 %vm2187_vm2, %v4590_v54  ;;  %v4893_v55 = vpop.xlane.xlu0 %4892  ;;  %v4591_v57 = vpack.c.bf16 %v4585_v58, %v4584_v15 }
0x1b23   : > { %v4902_v31 = vpop.xlane.xlu1 %4901 }
0x1b25   : > { %v13120_v52 = vpop.eup %13119 }
0x1b26   : > { %v4596_v35 = vpop.permute.xlu0 %4595  ;;  %v4587_v6 = vmul.f32 %v13120_v52, %v15746_v53  ;;  %v13122_v41 = vpop.eup %13121 }
0x1b27   : > { %v4896_v23 = vpop.xlane.xlu1 %4895  ;;  %12504 = vmatprep.subr.msk.bf16.mxu0 %vm2250_vm3, %v4596_v35  ;;  %v4610_v2 = vsel %vm2250_vm3, %v4596_v35, 0  ;;  %v13124_v60 = vpop.eup %13123  ;;  %v4589_v43 = vmul.f32 %v13122_v41, %v15736_v33 }
0x1b28   : > { %11956 = vmatpush3.bf16.msra.mxu0 %v4610_v2  ;;  %v4592_v4 = vpack.c.bf16 %v4587_v6, %v4586_v13  ;;  %13131 = vrcp.f32 %v4896_v23  ;;  %v13126_v53 = vpop.eup %13125  ;;  %v4588_v27 = vmul.f32 %v13124_v60, %v15724_v22  ;;  %v12947_v2 = vld [vmem:[%s17516_s2 + $0x18] sm:$0xff]  }
0x1b29   : > { %13133 = vrcp.f32 %v4887_v8  ;;  %v4911_v19 = vmul.f32 %v13126_v53, %v15752_v61 }
0x1b2a   : > { %13135 = vrcp.f32 %v4893_v55  ;;  %v4593_v1 = vpack.c.bf16 %v4589_v43, %v4588_v27 }
0x1b2b   : > { %v5215_v3 = vpop.xlane.xlu1 %5214  ;;  %11958 = vmatmul.mubr.msk.bf16.vlgmr.msra.gmra.mxu0 %vm2187_vm2, %v4591_v57  ;;  %13137 = vrcp.f32 %v4902_v31 }
0x1b2c   : > { %11961 = vmatprep.mubr.msk.bf16.mxu0 %vm2187_vm2, %v4592_v4  ;;  %13139 = vrcp.f32 %v4899_v39  ;;  %v12948_v4 = vld [vmem:[%s17516_s2 + $0x10] sm:$0xff]   ;;  %s17533_s2 = smov 4  }
0x1b2d   : > { %v13128_v34 = vpop.eup %13127 }
0x1b2e   : > { %v4912_v20 = vmul.f32 %v13128_v34, %v15766_v62  ;;  %v13130_v16 = vpop.eup %13129 }
0x1b2f   : > { %v5209_v28 = vpop.xlane.xlu1 %5208  ;;  %v4914_v22 = vmul.f32 %v13130_v16, %v15755_v56 }
0x1b30   : > { %v4919_v9 = vpack.c.bf16 %v4912_v20, %v4911_v19  ;;  %13141 = vrcp.f32 %v5209_v28 }
0x1b33   : > { %v5218_v14 = vpop.xlane.xlu1 %5217  ;;  %11962 = vmatmul.mubr.msk.bf16.gmra.mxu0 %vm2187_vm2, %v4593_v1 }
0x1b34   : > { %11977 = vmatprep.mubr.msk.bf16.mxu0 %vm2187_vm2, %v4919_v9 }
0x1b35   : > { %v13132_v33 = vpop.eup %13131 }
0x1b36   : > { %v13134_v62 = vpop.eup %13133  ;;  %v4916_v61 = vmul.f32 %v13132_v33, %v15787_v11 }
0x1b37   : > { %v5212_v18 = vpop.xlane.xlu1 %5211  ;;  %v13136_v45 = vpop.eup %13135  ;;  %v4913_v42 = vmul.f32 %v13134_v62, %v15743_v32 }
0x1b38   : > { %13143 = vrcp.f32 %v5212_v18  ;;  %v4915_v47 = vmul.f32 %v13136_v45, %v15777_v38  ;;  %v13138_v17 = vpop.eup %13137 }
0x1b39   : > { %v4920_v48 = vpack.c.bf16 %v4914_v22, %v4913_v42  ;;  %v13140_v25 = vpop.eup %13139  ;;  %v4918_v56 = vmul.f32 %v13138_v17, %v15779_v46  ;;  %13145 = vrcp.f32 %v5218_v14 }
0x1b3a   : > { %v4921_v39 = vpack.c.bf16 %v4916_v61, %v4915_v47  ;;  %v4917_v32 = vmul.f32 %v13140_v25, %v15764_v44  ;;  %13147 = vrcp.f32 %v5215_v3 }
0x1b3b   : > { %v4924_v8 = vpop.permute.xlu1 %4923 }
0x1b3c   : > { %12506 = vmatprep.subr.msk.bf16.mxu0 %vm2250_vm3, %v4924_v8  ;;  %v4938_v7 = vsel %vm2250_vm3, %v4924_v8, 0  ;;  %v4922_v51 = vpack.c.bf16 %v4918_v56, %v4917_v32 }
0x1b3d   : > { %11976 = vmatpush3.bf16.msra.mxu0 %v4938_v7  ;;  %v13142_v11 = vpop.eup %13141 }
0x1b3e   : > { %v5239_v54 = vmul.f32 %v13142_v11, %v15795_v5 }
0x1b40   : > { %11978 = vmatmul.mubr.msk.bf16.vlgmr.msra.gmra.mxu0 %vm2187_vm2, %v4920_v48 }
0x1b41   : > { %11981 = vmatprep.mubr.msk.bf16.mxu0 %vm2187_vm2, %v4921_v39 }
0x1b45   : > { %v13144_v26 = vpop.eup %13143 }
0x1b46   : > { %v5240_v10 = vmul.f32 %v13144_v26, %v15803_v63  ;;  %v13146_v46 = vpop.eup %13145 }
0x1b47   : > { %v13148_v5 = vpop.eup %13147  ;;  %v5242_v63 = vmul.f32 %v13146_v46, %v15799_v59 }
0x1b48   : > { %11982 = vmatmul.mubr.msk.bf16.gmra.mxu0 %vm2187_vm2, %v4922_v51  ;;  %v5247_v38 = vpack.c.bf16 %v5240_v10, %v5239_v54  ;;  %v5241_v35 = vmul.f32 %v13148_v5, %v15791_v12 }
0x1b4a   : > { %11997 = vmatprep.mubr.msk.bf16.mxu0 %vm2187_vm2, %v5247_v38  ;;  %v5248_v57 = vpack.c.bf16 %v5242_v63, %v5241_v35 }
0x1b57   : > { %v5227_v31 = vpop.xlane.xlu0 %5226 }
0x1b6c   : > { %v5221_v55 = vpop.xlane.xlu1 %5220 }
0x1b70   : > { %v5230_v24 = vpop.xlane.xlu1 %5229 }
0x1b71   : > { %13149 = vrcp.f32 %v5230_v24 }
0x1b72   : > { %13151 = vrcp.f32 %v5221_v55 }
0x1b73   : > { %13153 = vrcp.f32 %v5227_v31 }
0x1b74   : > { %v5224_v44 = vpop.xlane.xlu1 %5223 }
0x1b75   : > { %13155 = vrcp.f32 %v5224_v44  ;;  %v10982_v44 = vld [vmem:[#allocation40 + $0x1] ss:$0 sm:$0xff] }
0x1b76   : > { %v11939_v50 = vpop.f32.mrf.mxu0 }
0x1b77   : > { %v11235_v52 = vpack.c.bf16 %v11939_v50, %v11939_v50 }
0x1b78   : > { %v5252_v58 = vpop.permute.xlu1 %5251  ;;  %v4328_v6 = vpop.f32.mrf.mxu0 }
0x1b79   : > { %12508 = vmatprep.subr.msk.bf16.mxu0 %vm2250_vm3, %v5252_v58  ;;  %v5266_v15 = vsel %vm2250_vm3, %v5252_v58, 0  ;;  %4393 = vst.msk [vmem:[#allocation3 + $0x8] sm:$0xf] %vm3162_vm10, %v11235_v52  ;;  %v11233_v23 = vpack.c.bf16 %v4328_v6, %v4328_v6  ;;  %v10986_v6 = vld [vmem:[#allocation39 + $0x1] ss:$0 sm:$0xff] }
0x1b7a   : > { %11996 = vmatpush3.bf16.msra.mxu0 %v5266_v15  ;;  %v11940_v13 = vpop.f32.mrf.mxu0 }
0x1b7b   : > { %12015 = vmatprep.subr.bf16.mxu0 %v14391_v0  ;;  %4391 = vst.msk [vmem:[#allocation3] sm:$0xf] %vm3162_vm10, %v11233_v23  ;;  %v11236_v59 = vpack.c.bf16 %v11940_v13, %v11940_v13 }
0x1b7c   : > { %v4331_v41 = vpop.f32.mrf.mxu0 }
0x1b7d   : > { %11998 = vmatmul.mubr.msk.bf16.vlgmr.msra.gmra.mxu0 %vm2187_vm2, %v5248_v57  ;;  %4394 = vst.msk [vmem:[#allocation3 + $0xc] sm:$0xf] %vm3162_vm10, %v11236_v59  ;;  %v11234_v12 = vpack.c.bf16 %v4331_v41, %v4331_v41 }
0x1b7e   : > { %12016 = vmatpush3.bf16.msra.mxu0 %v12947_v2  ;;  %v13150_v60 = vpop.eup %13149  ;;  %v11943_v3 = vpop.f32.mrf.mxu0 }
0x1b7f   : > { %12017 = vmatprep.subr.bf16.mxu0 %v14391_v0  ;;  %v13152_v53 = vpop.eup %13151  ;;  %4392 = vst.msk [vmem:[#allocation3 + $0x4] sm:$0xf] %vm3162_vm10, %v11234_v12  ;;  %v11239_v34 = vpack.c.bf16 %v11943_v3, %v11943_v3  ;;  %v5246_v19 = vmul.f32 %v13150_v60, %v15839_v49 }
0x1b80   : > { %v13154_v43 = vpop.eup %13153  ;;  %v4344_v20 = vpop.f32.mrf.mxu0  ;;  %v5243_v9 = vmul.f32 %v13152_v53, %v15835_v21  ;;  %v12949_v21 = vld [vmem:[%s17515_s28 + $0x18] sm:$0xff]  }
0x1b81   : > { %4397 = vst.msk [vmem:[#allocation3 + $0x18] sm:$0xf] %vm3162_vm10, %v11239_v34  ;;  %v11237_v27 = vpack.c.bf16 %v4344_v20, %v4344_v20  ;;  %v5245_v18 = vmul.f32 %v13154_v43, %v15825_v40  ;;  %v12950_v40 = vld [vmem:[%s17515_s28 + $0x10] sm:$0xff]   ;;  %s17534_s28 = smov 112  }
0x1b82   : > { %v13156_v28 = vpop.eup %13155  ;;  %12018 = vmatpush3.bf16.msra.mxu0 %v12948_v4  ;;  %v11944_v1 = vpop.f32.mrf.mxu0 }
0x1b83   : > { %v5244_v14 = vmul.f32 %v13156_v28, %v15843_v37  ;;  %12023 = vmatprep.subr.bf16.mxu0 %v14391_v0  ;;  %4395 = vst.msk [vmem:[#allocation3 + $0x10] sm:$0xf] %vm3162_vm10, %v11237_v27  ;;  %v11240_v16 = vpack.c.bf16 %v11944_v1, %v11944_v1  ;;  %v5250_v45 = vpack.c.bf16 %v5246_v19, %v5245_v18 }
0x1b84   : > { %v4347_v33 = vpop.f32.mrf.mxu0 }
0x1b85   : > { %v5249_v62 = vpack.c.bf16 %v5244_v14, %v5243_v9  ;;  %4398 = vst.msk [vmem:[#allocation3 + $0x1c] sm:$0xf] %vm3162_vm10, %v11240_v16  ;;  %v11238_v49 = vpack.c.bf16 %v4347_v33, %v4347_v33  ;;  %v12951_v33 = vld [vmem:[#allocation21] sm:$0xff]  }
0x1b86   : > { %12005 = vmatprep.subr.bf16.mxu1 %v12951_v33 }
0x1b87   : > { %12001 = vmatprep.mubr.msk.bf16.mxu0 %vm2187_vm2, %v5249_v62  ;;  %4396 = vst.msk [vmem:[#allocation3 + $0x14] sm:$0xf] %vm3162_vm10, %v11238_v49  ;;  %12006 = vmatpush3.bf16.msra.mxu1 %v12951_v33 }
0x1b88   : > { %12002 = vmatmul.mubr.msk.bf16.gmra.mxu0 %vm2187_vm2, %v5250_v45  ;;  %12031 = vmatprep.subr.bf16.mxu1 %v14391_v0 }
0x1b89   : > { %12019 = vmatprep.mubr.msk.bf16.mxu0 %vm14392_vm0, %v14391_v0 }
0x1b90   : > { %12020 = vmatmul.mubr.msk.bf16.vlgmr.msra.gmra.mxu0 %vm2022_vm1, %v15482_v36 }
0x1b91   : > { %12024 = vmatpush3.bf16.msra.mxu0 %v12949_v21  ;;  %12027 = vmatprep.mubr.msk.bf16.mxu0 %vm14392_vm0, %v14391_v0 }
0x1b92   : > { %12025 = vmatprep.subr.bf16.mxu0 %v14391_v0 }
0x1b95   : > { %12026 = vmatpush3.bf16.msra.mxu0 %v12950_v40 }
0x1b96   : > { %12039 = vmatprep.subr.bf16.mxu0 %v14391_v0 }
0x1b98   : > { %12028 = vmatmul.mubr.msk.bf16.vlgmr.msra.gmra.mxu0 %vm2022_vm1, %v15482_v36 }
0x1b99   : > { %12041 = vmatprep.mubr.msk.bf16.mxu0 %vm14392_vm0, %v14391_v0 }
0x1beb   : > { %v11959_v37 = vpop.f32.mrf.mxu0 }
0x1bec   : > { %v11243_v15 = vpack.c.bf16 %v11959_v37, %v11959_v37 }
0x1bed   : > { %v15918_v22 = vpop.f32.mrf.mxu0 }
0x1bee   : > { %v11241_v43 = vpack.c.bf16 %v15918_v22, %v15918_v22 }
0x1bef   : > { %v15920_v8 = vpop.f32.mrf.mxu0 }
0x1bf0   : > { %v11244_v19 = vpack.c.bf16 %v15920_v8, %v15920_v8 }
0x1bf1   : > { %v15922_v61 = vpop.f32.mrf.mxu0 }
0x1bf2   : > { %v11242_v28 = vpack.c.bf16 %v15922_v61, %v15922_v61 }
0x1bf3   : > { %v11963_v42 = vpop.f32.mrf.mxu0 }
0x1bf4   : > { %v11247_v20 = vpack.c.bf16 %v11963_v42, %v11963_v42 }
0x1bf5   : > { %v4662_v7 = vpop.f32.mrf.mxu0 }
0x1bf6   : > { %v11245_v34 = vpack.c.bf16 %v4662_v7, %v4662_v7 }
0x1bf7   : > { %v15924_v47 = vpop.f32.mrf.mxu0 }
0x1bf8   : > { %v11248_v21 = vpack.c.bf16 %v15924_v47, %v15924_v47 }
0x1bf9   : > { %v15926_v48 = vpop.f32.mrf.mxu0 }
0x1bfa   : > { %v11246_v45 = vpack.c.bf16 %v15926_v48, %v15926_v48 }
0x1c00   : > { %v11979_v17 = vpop.f32.mrf.mxu0 }
0x1c01   : > { %v11251_v60 = vpack.c.bf16 %v11979_v17, %v11979_v17 }
0x1c02   : > { %v4974_v39 = vpop.f32.mrf.mxu0 }
0x1c03   : > { %v11249_v57 = vpack.c.bf16 %v4974_v39, %v4974_v39 }
0x1c04   : > { %v15928_v25 = vpop.f32.mrf.mxu0 }
0x1c05   : > { %v11252_v16 = vpack.c.bf16 %v15928_v25, %v15928_v25 }
0x1c06   : > { %v15930_v36 = vpop.f32.mrf.mxu0 }
0x1c07   : > { %v11250_v9 = vpack.c.bf16 %v15930_v36, %v15930_v36 }
0x1c08   : > { %v11983_v56 = vpop.f32.mrf.mxu0 }
0x1c09   : > { %v11255_v1 = vpack.c.bf16 %v11983_v56, %v11983_v56 }
0x1c0a   : > { %v4990_v11 = vpop.f32.mrf.mxu0 }
0x1c0b   : > { %v11253_v27 = vpack.c.bf16 %v4990_v11, %v4990_v11 }
0x1c0c   : > { %v15932_v32 = vpop.f32.mrf.mxu0 }
0x1c0d   : > { %v11256_v37 = vpack.c.bf16 %v15932_v32, %v15932_v32 }
0x1c0e   : > { %v15934_v26 = vpop.f32.mrf.mxu0 }
0x1c0f   : > { %v11254_v40 = vpack.c.bf16 %v15934_v26, %v15934_v26 }
0x1c3d   : > { %v11999_v51 = vpop.f32.mrf.mxu0 }
0x1c3e   : > { %v11259_v53 = vpack.c.bf16 %v11999_v51, %v11999_v51 }
0x1c3f   : > { %v5302_v54 = vpop.f32.mrf.mxu0 }
0x1c40   : > { %v11257_v3 = vpack.c.bf16 %v5302_v54, %v5302_v54 }
0x1c41   : > { %v15936_v10 = vpop.f32.mrf.mxu0 }
0x1c42   : > { %v11260_v49 = vpack.c.bf16 %v15936_v10, %v15936_v10 }
0x1c43   : > { %v15938_v38 = vpop.f32.mrf.mxu0 }
0x1c44   : > { %v11258_v62 = vpack.c.bf16 %v15938_v38, %v15938_v38 }
0x1c48   : > { %v12003_v55 = vpop.f32.mrf.mxu0 }
0x1c49   : > { %v11263_v18 = vpack.c.bf16 %v12003_v55, %v12003_v55 }
0x1c4a   : > { %v5318_v24 = vpop.f32.mrf.mxu0 }
0x1c4b   : > { %v11261_v14 = vpack.c.bf16 %v5318_v24, %v5318_v24 }
0x1c4c   : > { %v15940_v31 = vpop.f32.mrf.mxu0 }
0x1c4d   : > { %v11264_v8 = vpack.c.bf16 %v15940_v31, %v15940_v31 }
0x1c4e   : > { %v15942_v46 = vpop.f32.mrf.mxu0 }
0x1c4f   : > { %v11262_v22 = vpack.c.bf16 %v15942_v46, %v15942_v46 }
0x1c50   : > { %v5723_v5 = vpop.f32.mrf.mxu0 }
0x1c51   : > { %v5724_v63 = vadd.f32 %v10982_v44, %v5723_v5 }
0x1c52   : > { %v12021_v50 = vpop.f32.mrf.mxu0 }
0x1c53   : > { %v5729_v52 = vpack.c.bf16 %v5724_v63, %v5724_v63 }
0x1c54   : > { %v5726_v58 = vpop.f32.mrf.mxu0 }
0x1c55   : > { %5960 = vrot.lane.b32.xlu0 %v5729_v52, %s17523_s8 }
0x1c56   : > { %v12022_v35 = vpop.f32.mrf.mxu0 }
0x1c58   : > { %v5784_v23 = vpop.f32.mrf.mxu0 }
0x1c59   : > { %v5785_v2 = vadd.f32 %v10986_v6, %v5784_v23  ;;  %4705 = vrot.lane.b32.xlu0 %v11243_v15, %s17533_s2  ;;  %v12956_v15 = vld [vmem:[%s17517_s29 + $0x18] sm:$0xff]  }
0x1c5a   : > { %v12029_v13 = vpop.f32.mrf.mxu0 }
0x1c5b   : > { %v5790_v59 = vpack.c.bf16 %v5785_v2, %v5785_v2  ;;  %v12957_v13 = vld [vmem:[%s17517_s29 + $0x10] sm:$0xff]  }
0x1c5c   : > { %v5787_v41 = vpop.f32.mrf.mxu0 }
0x1c5d   : > { %5029 = vrot.lane.b32.xlu0 %v11249_v57, %s17524_s11  ;;  %5963 = vrot.lane.b32.xlu1 %v5790_v59, %s17523_s8  ;;  %v5856_v12 = vsel %vm2187_vm2, %v5790_v59, 0 }
0x1c5e   : > { %v12030_v4 = vpop.f32.mrf.mxu0  ;;  %12040 = vmatpush3.bf16.xpose.msra.mxu0 %v5856_v12 }
0x1c5f   : > { %12051 = vmatprep.subr.bf16.mxu0 %v14391_v0 }
0x1c61   : > { %5033 = vrot.lane.b32.xlu0 %v11251_v60, %s17524_s11  ;;  %6083 = vrot.lane.b32.xlu1 %v5790_v59, %s17534_s28 }
0x1c65   : > { %5357 = vrot.lane.b32.xlu0 %v11257_v3, %s17535_s16  ;;  %6081 = vrot.lane.b32.xlu1 %v5729_v52, %s17534_s28 }
0x1c66   : > { %12042 = vmatmul.mubr.msk.bf16.vlgmr.msra.gmra.mxu0 %vm2187_vm2, %v5729_v52 }
0x1c67   : > { %12053 = vmatprep.mubr.msk.bf16.mxu0 %vm14392_vm0, %v14391_v0 }
0x1c69   : > { %5361 = vrot.lane.b32.xlu0 %v11259_v53, %s17535_s16  ;;  %6202 = vrot.lane.b32.xlu1 %v5790_v59, %s17536_s15 }
0x1c6d   : > { %4709 = vrot.lane.b32.xlu0 %v11245_v34, %s17533_s2  ;;  %6200 = vrot.lane.b32.xlu1 %v5729_v52, %s17536_s15 }
0x1c71   : > { %4713 = vrot.lane.b32.xlu0 %v11247_v20, %s17533_s2  ;;  %4701 = vrot.lane.b32.xlu1 %v11241_v43, %s17533_s2 }
0x1c75   : > { %5037 = vrot.lane.b32.xlu0 %v11253_v27, %s17524_s11  ;;  %4703 = vrot.lane.b32.xlu1 %v11242_v28, %s17533_s2 }
0x1c79   : > { %5041 = vrot.lane.b32.xlu0 %v11255_v1, %s17524_s11  ;;  %4707 = vrot.lane.b32.xlu1 %v11244_v19, %s17533_s2 }
0x1c7d   : > { %5365 = vrot.lane.b32.xlu0 %v11261_v14, %s17535_s16  ;;  %5031 = vrot.lane.b32.xlu1 %v11250_v9, %s17524_s11 }
0x1c81   : > { %5369 = vrot.lane.b32.xlu0 %v11263_v18, %s17535_s16  ;;  %5035 = vrot.lane.b32.xlu1 %v11252_v16, %s17524_s11 }
0x1c85   : > { %5359 = vrot.lane.b32.xlu1 %v11258_v62, %s17535_s16 }
0x1c89   : > { %5363 = vrot.lane.b32.xlu1 %v11260_v49, %s17535_s16 }
0x1c8d   : > { %4711 = vrot.lane.b32.xlu1 %v11246_v45, %s17533_s2 }
0x1c91   : > { %4715 = vrot.lane.b32.xlu1 %v11248_v21, %s17533_s2 }
0x1c95   : > { %5039 = vrot.lane.b32.xlu1 %v11254_v40, %s17524_s11 }
0x1c99   : > { %5043 = vrot.lane.b32.xlu1 %v11256_v37, %s17524_s11 }
0x1c9d   : > { %5367 = vrot.lane.b32.xlu1 %v11262_v22, %s17535_s16 }
0x1ca1   : > { %5371 = vrot.lane.b32.xlu1 %v11264_v8, %s17535_s16 }
0x1cc7   : > { %v5961_v61 = vpop.permute.xlu0 %5960 }
0x1ccb   : > { %v4706_v42 = vpop.permute.xlu0 %4705 }
0x1ccc   : > { %4727 = vst.msk [vmem:[#allocation3 + $0x8] sm:$0xf] %vm3313_vm11, %v4706_v42 }
0x1ccf   : > { %v5030_v7 = vpop.permute.xlu0 %5029  ;;  %v5964_v47 = vpop.permute.xlu1 %5963 }
0x1cd0   : > { %v5969_v48 = vsel %vm2187_vm2, %v5964_v47, 0 }
0x1cd1   : > { %12052 = vmatpush3.bf16.xpose.msra.mxu0 %v5969_v48 }
0x1cd2   : > { %12063 = vmatprep.subr.bf16.mxu0 %v14391_v0 }
0x1cd3   : > { %v5034_v17 = vpop.permute.xlu0 %5033  ;;  %v6084_v39 = vpop.permute.xlu1 %6083 }
0x1cd4   : > { %5055 = vst.msk [vmem:[#allocation3 + $0x8] sm:$0xf] %vm3455_vm12, %v5034_v17  ;;  %v6089_v56 = vsel %vm2187_vm2, %v6084_v39, 0 }
0x1cd7   : > { %v5358_v25 = vpop.permute.xlu0 %5357  ;;  %v6082_v36 = vpop.permute.xlu1 %6081 }
0x1cd8   : > { %12054 = vmatmul.mubr.msk.bf16.vlgmr.msra.gmra.mxu0 %vm2187_vm2, %v5961_v61 }
0x1cd9   : > { %12064 = vmatpush3.bf16.xpose.msra.mxu0 %v6089_v56  ;;  %12065 = vmatprep.mubr.msk.bf16.mxu0 %vm14392_vm0, %v14391_v0 }
0x1cda   : > { %12075 = vmatprep.subr.bf16.mxu0 %v14391_v0 }
0x1cdb   : > { %v5362_v11 = vpop.permute.xlu0 %5361  ;;  %v6203_v32 = vpop.permute.xlu1 %6202 }
0x1cdc   : > { %5383 = vst.msk [vmem:[#allocation3 + $0x8] sm:$0xf] %vm3597_vm13, %v5362_v11  ;;  %v6208_v54 = vsel %vm2187_vm2, %v6203_v32, 0 }
0x1cdf   : > { %v4710_v26 = vpop.permute.xlu0 %4709  ;;  %v6201_v51 = vpop.permute.xlu1 %6200 }
0x1ce0   : > { %4729 = vst.msk [vmem:[#allocation3 + $0x10] sm:$0xf] %vm3313_vm11, %v4710_v26  ;;  %12066 = vmatmul.mubr.msk.bf16.vlgmr.msra.gmra.mxu0 %vm2187_vm2, %v6082_v36 }
0x1ce1   : > { %12076 = vmatpush3.bf16.xpose.msra.mxu0 %v6208_v54  ;;  %12077 = vmatprep.mubr.msk.bf16.mxu0 %vm14392_vm0, %v14391_v0  ;;  %v10990_v54 = vld [vmem:[#allocation42 + $0x1] ss:$0 sm:$0xff] }
0x1ce2   : > { %12087 = vmatprep.subr.bf16.mxu0 %v14391_v0 }
0x1ce3   : > { %v4714_v10 = vpop.permute.xlu0 %4713  ;;  %v4702_v38 = vpop.permute.xlu1 %4701 }
0x1ce4   : > { %4731 = vst.msk [vmem:[#allocation3 + $0x18] sm:$0xf] %vm3313_vm11, %v4714_v10  ;;  %4725 = vst.msk [vmem:[#allocation3] sm:$0xf] %vm3313_vm11, %v4702_v38 }
0x1ce5   : > { %5053 = vst.msk [vmem:[#allocation3] sm:$0xf] %vm3455_vm12, %v5030_v7 }
0x1ce6   : > { %5381 = vst.msk [vmem:[#allocation3] sm:$0xf] %vm3597_vm13, %v5358_v25 }
0x1ce7   : > { %v5038_v55 = vpop.permute.xlu0 %5037  ;;  %v4704_v24 = vpop.permute.xlu1 %4703 }
0x1ce8   : > { %5057 = vst.msk [vmem:[#allocation3 + $0x10] sm:$0xf] %vm3455_vm12, %v5038_v55  ;;  %12078 = vmatmul.mubr.msk.bf16.vlgmr.msra.gmra.mxu0 %vm2187_vm2, %v6201_v51 }
0x1ce9   : > { %4726 = vst.msk [vmem:[#allocation3 + $0x4] sm:$0xf] %vm3313_vm11, %v4704_v24  ;;  %12091 = vmatprep.mubr.msk.bf16.mxu0 %vm14392_vm0, %v14391_v0 }
0x1ceb   : > { %v5042_v31 = vpop.permute.xlu0 %5041  ;;  %v4708_v46 = vpop.permute.xlu1 %4707 }
0x1cec   : > { %5059 = vst.msk [vmem:[#allocation3 + $0x18] sm:$0xf] %vm3455_vm12, %v5042_v31 }
0x1ced   : > { %4728 = vst.msk [vmem:[#allocation3 + $0xc] sm:$0xf] %vm3313_vm11, %v4708_v46 }
0x1cef   : > { %v5366_v44 = vpop.permute.xlu0 %5365  ;;  %v5032_v5 = vpop.permute.xlu1 %5031 }
0x1cf0   : > { %5385 = vst.msk [vmem:[#allocation3 + $0x10] sm:$0xf] %vm3597_vm13, %v5366_v44 }
0x1cf1   : > { %5054 = vst.msk [vmem:[#allocation3 + $0x4] sm:$0xf] %vm3455_vm12, %v5032_v5 }
0x1cf3   : > { %v5370_v63 = vpop.permute.xlu0 %5369  ;;  %v5036_v50 = vpop.permute.xlu1 %5035 }
0x1cf4   : > { %5387 = vst.msk [vmem:[#allocation3 + $0x18] sm:$0xf] %vm3597_vm13, %v5370_v63 }
0x1cf5   : > { %5056 = vst.msk [vmem:[#allocation3 + $0xc] sm:$0xf] %vm3455_vm12, %v5036_v50 }
0x1cf7   : > { %v5360_v52 = vpop.permute.xlu1 %5359 }
0x1cf8   : > { %5382 = vst.msk [vmem:[#allocation3 + $0x4] sm:$0xf] %vm3597_vm13, %v5360_v52 }
0x1cfb   : > { %v5364_v58 = vpop.permute.xlu1 %5363 }
0x1cfc   : > { %5384 = vst.msk [vmem:[#allocation3 + $0xc] sm:$0xf] %vm3597_vm13, %v5364_v58 }
0x1cff   : > { %v4712_v35 = vpop.permute.xlu1 %4711  ;;  %v12952_v6 = vld [vmem:[#allocation3] sm:$0xff]  }
0x1d00   : > { %4730 = vst.msk [vmem:[#allocation3 + $0x14] sm:$0xf] %vm3313_vm11, %v4712_v35  ;;  %12007 = vmatprep.mubr.msk.bf16.mxu1 %vm3613_vm14, %v12952_v6 }
0x1d03   : > { %v4716_v23 = vpop.permute.xlu1 %4715  ;;  %v12953_v2 = vld [vmem:[#allocation3 + $0x8] sm:$0xff]  }
0x1d04   : > { %4732 = vst.msk [vmem:[#allocation3 + $0x1c] sm:$0xf] %vm3313_vm11, %v4716_v23  ;;  %12008 = vmatmul.mubr.msk.bf16.vlgmr.msra.gmra.mxu1 %vm3613_vm14, %v12953_v2 }
0x1d05   : > { %12032 = vmatpush3.bf16.msra.mxu1 %v12956_v15 }
0x1d06   : > { %12033 = vmatprep.subr.bf16.mxu1 %v14391_v0 }
0x1d07   : > { %v5040_v57 = vpop.permute.xlu1 %5039 }
0x1d08   : > { %5058 = vst.msk [vmem:[#allocation3 + $0x14] sm:$0xf] %vm3455_vm12, %v5040_v57 }
0x1d09   : > { %12034 = vmatpush3.bf16.msra.mxu1 %v12957_v13 }
0x1d0a   : > { %12045 = vmatprep.subr.bf16.mxu1 %v14391_v0 }
0x1d0b   : > { %v5044_v59 = vpop.permute.xlu1 %5043 }
0x1d0c   : > { %5060 = vst.msk [vmem:[#allocation3 + $0x1c] sm:$0xf] %vm3455_vm12, %v5044_v59 }
0x1d0f   : > { %v5368_v41 = vpop.permute.xlu1 %5367 }
0x1d10   : > { %5386 = vst.msk [vmem:[#allocation3 + $0x14] sm:$0xf] %vm3597_vm13, %v5368_v41 }
0x1d13   : > { %v5372_v12 = vpop.permute.xlu1 %5371 }
0x1d14   : > { %5388 = vst.msk [vmem:[#allocation3 + $0x1c] sm:$0xf] %vm3597_vm13, %v5372_v12 }
0x1d17   : > { %v12954_v4 = vld [vmem:[#allocation3 + $0x10] sm:$0xff]  }
0x1d18   : > { %12011 = vmatprep.mubr.msk.bf16.mxu1 %vm3613_vm14, %v12954_v4 }
0x1d1b   : > { %v12955_v60 = vld [vmem:[#allocation3 + $0x18] sm:$0xff]  }
0x1d1c   : > { %12012 = vmatmul.mubr.msk.bf16.gmra.mxu1 %vm3613_vm14, %v12955_v60 }
0x1d1d   : > { %12035 = vmatprep.mubr.msk.bf16.mxu1 %vm14392_vm0, %v14391_v0 }
0x1d24   : > { %12036 = vmatmul.mubr.msk.bf16.vlgmr.msra.gmra.mxu1 %vm2022_vm1, %v15476_v30 }
0x1d25   : > { %12047 = vmatprep.mubr.msk.bf16.mxu1 %vm14392_vm0, %v14391_v0 }
0x1d26   : > { %v5892_v3 = vpop.f32.mrf.mxu0 }
0x1d27   : > { %v5898_v53 = vmul.f32 0.35355338, %v5892_v3 }
0x1d28   : > { %v12043_v34 = vpop.f32.mrf.mxu0 }
0x1d29   : > { %v5899_v43 = vsel %vm2187_vm2, %v5898_v53, -inf }
0x1d2a   : > { %5900 = vmax.xlane.f32.xlu0 %v5899_v43  ;;  %v5895_v20 = vpop.f32.mrf.mxu0 }
0x1d2c   : > { %v12044_v28 = vpop.f32.mrf.mxu0 }
0x1d98   : > { %v6005_v27 = vpop.f32.mrf.mxu0 }
0x1d99   : > { %v6011_v19 = vmul.f32 0.35355338, %v6005_v27 }
0x1d9a   : > { %v12055_v1 = vpop.f32.mrf.mxu0 }
0x1d9b   : > { %v6012_v9 = vsel %vm2187_vm2, %v6011_v19, -inf }
0x1d9c   : > { %v6008_v14 = vpop.f32.mrf.mxu0  ;;  %6013 = vmax.xlane.f32.xlu1 %v6012_v9 }
0x1d9e   : > { %v12056_v16 = vpop.f32.mrf.mxu0 }
0x1da0   : > { %v6125_v30 = vpop.f32.mrf.mxu0 }
0x1da1   : > { %v6131_v18 = vmul.f32 0.35355338, %v6125_v30 }
0x1da2   : > { %v12067_v33 = vpop.f32.mrf.mxu0 }
0x1da3   : > { %v6132_v62 = vsel %vm2187_vm2, %v6131_v18, -inf }
0x1da4   : > { %6133 = vmax.xlane.f32.xlu0 %v6132_v62  ;;  %v6128_v49 = vpop.f32.mrf.mxu0 }
0x1da6   : > { %v12068_v45 = vpop.f32.mrf.mxu0 }
0x1da8   : > { %v6244_v21 = vpop.f32.mrf.mxu0 }
0x1da9   : > { %v6250_v40 = vmul.f32 0.35355338, %v6244_v21 }
0x1daa   : > { %v12079_v37 = vpop.f32.mrf.mxu0 }
0x1dab   : > { %v6251_v22 = vsel %vm2187_vm2, %v6250_v40, -inf }
0x1dac   : > { %6252 = vmax.xlane.f32.xlu0 %v6251_v22  ;;  %v6247_v8 = vpop.f32.mrf.mxu0 }
0x1dae   : > { %v12080_v61 = vpop.f32.mrf.mxu0 }
0x1db3   : > { %v5901_v42 = vpop.xlane.xlu0 %5900 }
0x1db4   : > { %v5902_v7 = vsub.f32 %v5898_v53, %v5901_v42 }
0x1db6   : > { %v5903_v47 = vmul.f32 1.442695, %v5902_v7 }
0x1db8   : > { %13157 = vpow2.f32 %v5903_v47 }
0x1dc4   : > { %v16064_v39 = vpop.f32.mrf.mxu1 }
0x1dc5   : > { %v13158_v48 = vpop.eup %13157 }
0x1dc6   : > { %v5905_v17 = vsel %vm2187_vm2, %v13158_v48, 0.0  ;;  %v16066_v25 = vpop.f32.mrf.mxu1 }
0x1dc7   : > { %5906 = vadd.xlane.f32.xlu0 %v5905_v17 }
0x1dc8   : > { %v16068_v36 = vpop.f32.mrf.mxu1 }
0x1dca   : > { %v16070_v56 = vpop.f32.mrf.mxu1 }
0x1ddc   : > { %v16072_v11 = vpop.f32.mrf.mxu1 }
0x1dde   : > { %v16074_v32 = vpop.f32.mrf.mxu1 }
0x1de0   : > { %v16076_v26 = vpop.f32.mrf.mxu1 }
0x1de2   : > { %v16078_v51 = vpop.f32.mrf.mxu1 }
0x1de4   : > { %v5845_v10 = vpop.f32.mrf.mxu1 }
0x1de5   : > { %v5846_v38 = vadd.f32 %v10990_v54, %v5845_v10 }
0x1de6   : > { %v12037_v55 = vpop.f32.mrf.mxu1 }
0x1de7   : > { %v5851_v24 = vpack.c.bf16 %v5846_v38, %v5846_v38 }
0x1de8   : > { %v5848_v31 = vpop.f32.mrf.mxu1 }
0x1de9   : > { %v5915_v46 = vsel %vm2250_vm3, %v5851_v24, 0 }
0x1dea   : > { %v12038_v44 = vpop.f32.mrf.mxu1  ;;  %12046 = vmatpush3.bf16.msra.mxu1 %v5915_v46  ;;  %v10954_v46 = vld [vmem:[#allocation16] ss:$0 sm:$0xff] }
0x1deb   : > { %12057 = vmatprep.subr.bf16.mxu1 %v14391_v0  ;;  %v5477_v44 = vadd.f32 %v10954_v46, %v16066_v25 }
0x1e25   : > { %v6014_v5 = vpop.xlane.xlu1 %6013 }
0x1e26   : > { %v6015_v63 = vsub.f32 %v6011_v19, %v6014_v5  ;;  %v5485_v5 = vadd.f32 %v16064_v39, %v10954_v46  ;;  %v12959_v39 = vld [vmem:[%s17518_s23 + $0x10] sm:$0xff]  }
0x1e28   : > { %v6016_v50 = vmul.f32 1.442695, %v6015_v63  ;;  %v13374_v63 = vld [vmem:[%s15165_s12] sm:$0xff] }
0x1e2a   : > { %13159 = vpow2.f32 %v6016_v50  ;;  %v5507_v50 = vadd.f32 %v13374_v63, %v5477_v44 }
0x1e2d   : > { %v6134_v52 = vpop.xlane.xlu0 %6133 }
0x1e2e   : > { %v6135_v58 = vsub.f32 %v6131_v18, %v6134_v52  ;;  %v13375_v52 = vld [vmem:[%s15165_s12 + $0x10] sm:$0xff] }
0x1e30   : > { %v6136_v35 = vmul.f32 1.442695, %v6135_v58  ;;  %v5509_v58 = vadd.f32 %v13375_v52, %v5485_v5  ;;  %v11006_v52 = vld [vmem:[%s17519_s10 + $0x1] ss:$0 sm:$0xff] }
0x1e32   : > { %13161 = vpow2.f32 %v6136_v35  ;;  %v5488_v35 = vadd.f32 %v16068_v36, %v10954_v46  ;;  %v5523_v25 = vsel %vm2022_vm1, %v5509_v58, 0.0  ;;  %v13377_v36 = vld [vmem:[%s15165_s12 + $0x20] sm:$0xff] }
0x1e35   : > { %v6253_v13 = vpop.xlane.xlu0 %6252 }
0x1e36   : > { %v6254_v59 = vsub.f32 %v6250_v40, %v6253_v13  ;;  %v5493_v13 = vadd.f32 %v10954_v46, %v16074_v32 }
0x1e37   : > { %v13160_v6 = vpop.eup %13159 }
0x1e38   : > { %v6018_v15 = vsel %vm2187_vm2, %v13160_v6, 0.0  ;;  %v6255_v41 = vmul.f32 1.442695, %v6254_v59  ;;  %v5511_v59 = vadd.f32 %v13377_v36, %v5493_v13 }
0x1e39   : > { %6019 = vadd.xlane.f32.xlu1 %v6018_v15  ;;  %v12958_v15 = vld [vmem:[%s17518_s23 + $0x18] sm:$0xff]  }
0x1e3a   : > { %12088 = vmatpush3.bf16.msra.mxu0 %v12958_v15 }
0x1e3b   : > { %12089 = vmatprep.subr.bf16.mxu0 %v14391_v0 }
0x1e3e   : > { %12090 = vmatpush3.bf16.msra.mxu0 %v12959_v39 }
0x1e3f   : > { %v13162_v23 = vpop.eup %13161 }
0x1e40   : > { %v6138_v2 = vsel %vm2187_vm2, %v13162_v23, 0.0 }
0x1e41   : > { %6139 = vadd.xlane.f32.xlu0 %v6138_v2 }
0x1e4a   : > { %6144 = vrot.lane.b32.xlu1 %v5851_v24, %s17534_s28  ;;  %s17538_s28 = smov 24  }
0x1e50   : > { %v5907_v57 = vpop.xlane.xlu0 %5906 }
0x1e51   : > { %13163 = vrcp.f32 %v5907_v57  ;;  %v5501_v57 = vadd.f32 %v16072_v11, %v10954_v46 }
0x1e52   : > { %13165 = vpow2.f32 %v6255_v41 }
0x1e57   : > { %6025 = vrot.lane.b32.xlu0 %v5851_v24, %s17523_s8 }
0x1e5e   : > { %v13164_v12 = vpop.eup %13163 }
0x1e5f   : > { %v5909_v4 = vmul.f32 %v13164_v12, %v13158_v48  ;;  %v13166_v3 = vpop.eup %13165  ;;  %v13378_v12 = vld [vmem:[%s15165_s12 + $0x30] sm:$0xff] }
0x1e60   : > { %v6257_v53 = vsel %vm2187_vm2, %v13166_v3, 0.0 }
0x1e61   : > { %v5910_v60 = vpack.c.bf16 %v5909_v4, %v5909_v4  ;;  %v5513_v4 = vadd.f32 %v13378_v12, %v5501_v57 }
0x1e63   : > { %12048 = vmatmul.mubr.msk.bf16.vlgmr.msra.gmra.mxu1 %vm2187_vm2, %v5910_v60  ;;  %v5529_v60 = vsel %vm2022_vm1, %v5511_v59, 0.0 }
0x1e64   : > { %12059 = vmatprep.mubr.msk.bf16.mxu1 %vm14392_vm0, %v14391_v0 }
0x1e6e   : > { %6258 = vadd.xlane.f32.xlu1 %v6257_v53 }
0x1e7f   : > { %6263 = vrot.lane.b32.xlu1 %v5851_v24, %s17536_s15  ;;  %s17537_s15 = smov 16  }
0x1ec2   : > { %v6020_v34 = vpop.xlane.xlu1 %6019 }
0x1ec3   : > { %13167 = vrcp.f32 %v6020_v34  ;;  %v5535_v34 = vsel %vm2022_vm1, %v5513_v4, 0.0 }
0x1ec6   : > { %v6145_v1 = vpop.permute.xlu1 %6144 }
0x1ec7   : > { %v6150_v14 = vsel %vm2250_vm3, %v6145_v1, 0  ;;  %v5504_v1 = vadd.f32 %v16076_v26, %v10954_v46 }
0x1eca   : > { %v6140_v43 = vpop.xlane.xlu0 %6139 }
0x1ecb   : > { %13169 = vrcp.f32 %v6140_v43 }
0x1ece   : > { %v6026_v20 = vpop.permute.xlu0 %6025 }
0x1ecf   : > { %v6031_v28 = vsel %vm2250_vm3, %v6026_v20, 0  ;;  %v5480_v20 = vadd.f32 %v10954_v46, %v16070_v56 }
0x1ed0   : > { %v13168_v27 = vpop.eup %13167  ;;  %12058 = vmatpush3.bf16.msra.mxu1 %v6031_v28  ;;  %v5496_v28 = vadd.f32 %v10954_v46, %v16078_v51 }
0x1ed1   : > { %12069 = vmatprep.subr.bf16.mxu1 %v14391_v0  ;;  %v6022_v19 = vmul.f32 %v13168_v27, %v13160_v6  ;;  %v5517_v6 = vsel %vm2022_vm1, %v5507_v50, 0.0  ;;  %v13379_v27 = vld [vmem:[%s15165_s12 + $0x8] sm:$0xff] }
0x1ed3   : > { %v6023_v9 = vpack.c.bf16 %v6022_v19, %v6022_v19  ;;  %v5508_v19 = vadd.f32 %v13379_v27, %v5480_v20  ;;  %v12961_v27 = vld [vmem:[%s17520_s17 + $0x10] sm:$0xff]  }
0x1ed5   : > { %12060 = vmatmul.mubr.msk.bf16.vlgmr.msra.gmra.mxu1 %vm2187_vm2, %v6023_v9  ;;  %v5520_v9 = vsel %vm2022_vm1, %v5508_v19, 0.0 }
0x1ed6   : > { %12070 = vmatpush3.bf16.msra.mxu1 %v6150_v14  ;;  %12071 = vmatprep.mubr.msk.bf16.mxu1 %vm14392_vm0, %v14391_v0  ;;  %v13380_v14 = vld [vmem:[%s15165_s12 + $0x28] sm:$0xff] }
0x1ed7   : > { %12081 = vmatprep.subr.bf16.mxu1 %v14391_v0 }
0x1ed8   : > { %v13170_v16 = vpop.eup %13169 }
0x1ed9   : > { %v6142_v30 = vmul.f32 %v13170_v16, %v13162_v23  ;;  %v13376_v23 = vld [vmem:[%s15165_s12 + $0x18] sm:$0xff]  ;;  %v5512_v16 = vadd.f32 %v13380_v14, %v5496_v28 }
0x1eda   : > { %v16117_v2 = vadd.f32 %v13376_v23, %v5488_v35  ;;  %v12960_v28 = vld [vmem:[%s17520_s17 + $0x18] sm:$0xff]  }
0x1edb   : > { %v6143_v18 = vpack.c.bf16 %v6142_v30, %v6142_v30  ;;  %v13381_v30 = vld [vmem:[%s15165_s12 + $0x38] sm:$0xff]  ;;  %12103 = vmatprep.subr.bf16.mxu0 %v12960_v28  ;;  %s17539_s12 = sld [smem:[#allocation78_spill]] }
0x1edc   : > { %v5526_v41 = vsel %vm2022_vm1, %v16117_v2, 0.0 }
0x1edd   : > { %12072 = vmatmul.mubr.msk.bf16.vlgmr.msra.gmra.mxu1 %vm2187_vm2, %v6143_v18  ;;  %v5514_v18 = vadd.f32 %v13381_v30, %v5504_v1 }
0x1ede   : > { %12083 = vmatprep.mubr.msk.bf16.mxu1 %vm14392_vm0, %v14391_v0 }
0x1ef7   : > { %v6259_v33 = vpop.xlane.xlu1 %6258 }
0x1ef8   : > { %13171 = vrcp.f32 %v6259_v33  ;;  %v5532_v33 = vsel %vm2022_vm1, %v5512_v16, 0.0 }
0x1efb   : > { %v6264_v62 = vpop.permute.xlu1 %6263 }
0x1efc   : > { %v6269_v49 = vsel %vm2250_vm3, %v6264_v62, 0  ;;  %v5538_v62 = vsel %vm2022_vm1, %v5514_v18, 0.0 }
0x1efd   : > { %12082 = vmatpush3.bf16.msra.mxu1 %v6269_v49 }
0x1efe   : > { %12095 = vmatprep.subr.bf16.mxu1 %v14391_v0 }
0x1f05   : > { %v13172_v45 = vpop.eup %13171 }
0x1f06   : > { %v6261_v21 = vmul.f32 %v13172_v45, %v13166_v3 }
0x1f08   : > { %v6262_v40 = vpack.c.bf16 %v6261_v21, %v6261_v21 }
0x1f0a   : > { %12084 = vmatmul.mubr.msk.bf16.vlgmr.msra.gmra.mxu1 %vm2187_vm2, %v6262_v40 }
0x1f0b   : > { %12099 = vmatprep.mubr.msk.bf16.mxu1 %vm14392_vm0, %v14391_v0 }
0x1f23   : > { %v5951_v37 = vpop.f32.mrf.mxu1 }
0x1f24   : > { %v5957_v22 = vpack.c.bf16 %v5951_v37, %v5951_v37 }
0x1f25   : > { %v12049_v8 = vpop.f32.mrf.mxu1 }
0x1f26   : > { %5958 = vst.msk [vmem:[#allocation2] sm:$0xf] %vm2295_vm4, %v5957_v22 }
0x1f27   : > { %v5954_v61 = vpop.f32.mrf.mxu1 }
0x1f29   : > { %v12050_v42 = vpop.f32.mrf.mxu1 }
0x1f95   : > { %v6067_v7 = vpop.f32.mrf.mxu1 }
0x1f96   : > { %v11265_v47 = vpack.c.bf16 %v6067_v7, %v6067_v7 }
0x1f97   : > { %v12061_v48 = vpop.f32.mrf.mxu1 }
0x1f98   : > { %6077 = vrot.lane.b32.xlu1 %v11265_v47, %s17524_s11 }
0x1f99   : > { %v6070_v17 = vpop.f32.mrf.mxu1 }
0x1f9b   : > { %v12062_v54 = vpop.f32.mrf.mxu1 }
0x1f9d   : > { %v6186_v10 = vpop.f32.mrf.mxu1 }
0x1f9e   : > { %v11266_v38 = vpack.c.bf16 %v6186_v10, %v6186_v10 }
0x1f9f   : > { %v12073_v55 = vpop.f32.mrf.mxu1 }
0x1fa0   : > { %6196 = vrot.lane.b32.xlu0 %v11266_v38, %s17537_s15  ;;  %s17541_s15 = sld [smem:[#allocation76_spill]] }
0x1fa1   : > { %v6189_v24 = vpop.f32.mrf.mxu1 }
0x1fa3   : > { %v12074_v31 = vpop.f32.mrf.mxu1 }
0x1fbf   : > { %5518 = vadd.xlane.f32.xlu0 %v5517_v6 }
0x1fc3   : > { %5524 = vadd.xlane.f32.xlu0 %v5523_v25 }
0x1fc7   : > { %5527 = vadd.xlane.f32.xlu0 %v5526_v41 }
0x1fca   : > { %v6305_v32 = vpop.f32.mrf.mxu1 }
0x1fcb   : > { %v11267_v3 = vpack.c.bf16 %v6305_v32, %v6305_v32  ;;  %5530 = vadd.xlane.f32.xlu0 %v5529_v60 }
0x1fcc   : > { %v12085_v53 = vpop.f32.mrf.mxu1 }
0x1fcd   : > { %6315 = vrot.lane.b32.xlu1 %v11267_v3, %s17538_s28  ;;  %s17542_s28 = smov %s17541_s15 }
0x1fce   : > { %v6308_v11 = vpop.f32.mrf.mxu1 }
0x1fcf   : > { %5536 = vadd.xlane.f32.xlu0 %v5535_v34 }
0x1fd0   : > { %v12086_v43 = vpop.f32.mrf.mxu1 }
0x1ff1   : > { %5521 = vadd.xlane.f32.xlu1 %v5520_v9 }
0x1ff5   : > { %5533 = vadd.xlane.f32.xlu1 %v5532_v33 }
0x1ff9   : > { %5539 = vadd.xlane.f32.xlu1 %v5538_v62 }
0x200a   : > { %v6078_v56 = vpop.permute.xlu1 %6077 }
0x200b   : > { %6080 = vst.msk [vmem:[#allocation2] sm:$0xf] %vm2418_vm5, %v6078_v56 }
0x2012   : > { %v6197_v51 = vpop.permute.xlu0 %6196 }
0x2013   : > { %6199 = vst.msk [vmem:[#allocation2] sm:$0xf] %vm2538_vm6, %v6197_v51 }
0x203f   : > { %v6316_v26 = vpop.permute.xlu1 %6315 }
0x2040   : > { %6318 = vst.msk [vmem:[#allocation2] sm:$0xf] %vm2658_vm7, %v6316_v26 }
0x2047   : > { %v6319_v49 = vld [vmem:[#allocation2] sm:$0xf] }
0x2048   : > { %v5519_v45 = vpop.xlane.xlu0 %5518  ;;  %12092 = vmatmul.mubr.msk.bf16.vlgmr.msra.gmra.mxu0 %vm2022_vm1, %v6319_v49 }
0x2049   : > { %v5541_v21 = vmul.f32 0.03125, %v5519_v45  ;;  %12104 = vmatpush3.bf16.msra.mxu0 %v12960_v28 }
0x204a   : > { %12105 = vmatprep.subr.bf16.mxu0 %v12961_v27 }
0x204b   : > { %v16144_v40 = vsub.f32 %v5507_v50, %v5541_v21 }
0x204c   : > { %v5525_v37 = vpop.xlane.xlu0 %5524 }
0x204d   : > { %v5543_v22 = vmul.f32 0.03125, %v5525_v37  ;;  %v5557_v8 = vmul.f32 %v16144_v40, %v16144_v40  ;;  %12106 = vmatpush3.bf16.msra.mxu0 %v12961_v27  ;;  %v13384_v27 = vld [vmem:[%s15169_s13 + $0x10] sm:$0xff] }
0x204e   : > { %12127 = vmatprep.subr.bf16.mxu0 %v14391_v0 }
0x204f   : > { %v16148_v61 = vsub.f32 %v5509_v58, %v5543_v22  ;;  %v5565_v42 = vsel %vm2022_vm1, %v5557_v8, 0.0 }
0x2050   : > { %v5528_v7 = vpop.xlane.xlu0 %5527  ;;  %5566 = vadd.xlane.f32.xlu1 %v5565_v42 }
0x2051   : > { %v5559_v47 = vmul.f32 %v16148_v61, %v16148_v61  ;;  %v5544_v6 = vmul.f32 0.03125, %v5528_v7 }
0x2053   : > { %v5571_v48 = vsel %vm2022_vm1, %v5559_v47, 0.0  ;;  %v16169_v57 = vsub.f32 %v16117_v2, %v5544_v6 }
0x2054   : > { %v5531_v17 = vpop.xlane.xlu0 %5530  ;;  %5572 = vadd.xlane.f32.xlu1 %v5571_v48 }
0x2055   : > { %v5545_v54 = vmul.f32 0.03125, %v5531_v17  ;;  %v5560_v2 = vmul.f32 %v16169_v57, %v16169_v57 }
0x2057   : > { %v16154_v10 = vsub.f32 %v5511_v59, %v5545_v54  ;;  %v5574_v53 = vsel %vm2022_vm1, %v5560_v2, 0.0 }
0x2058   : > { %v5537_v38 = vpop.xlane.xlu0 %5536 }
0x2059   : > { %v5547_v55 = vmul.f32 0.03125, %v5537_v38  ;;  %v5561_v24 = vmul.f32 %v16154_v10, %v16154_v10 }
0x205b   : > { %v16158_v31 = vsub.f32 %v5513_v4, %v5547_v55  ;;  %v5577_v46 = vsel %vm2022_vm1, %v5561_v24, 0.0 }
0x205c   : > { %5578 = vadd.xlane.f32.xlu1 %v5577_v46 }
0x205d   : > { %v5563_v44 = vmul.f32 %v16158_v31, %v16158_v31 }
0x205f   : > { %v5583_v5 = vsel %vm2022_vm1, %v5563_v44, 0.0 }
0x2060   : > { %5584 = vadd.xlane.f32.xlu1 %v5583_v5 }
0x207a   : > { %v5522_v63 = vpop.xlane.xlu1 %5521 }
0x207b   : > { %v5542_v50 = vmul.f32 0.03125, %v5522_v63  ;;  %v10964_v63 = vld [vmem:[#allocation34] ss:$0 sm:$0xff] }
0x207d   : > { %v16165_v15 = vsub.f32 %v5508_v19, %v5542_v50 }
0x207e   : > { %v5534_v58 = vpop.xlane.xlu1 %5533 }
0x207f   : > { %v5546_v36 = vmul.f32 0.03125, %v5534_v58  ;;  %v5558_v41 = vmul.f32 %v16165_v15, %v16165_v15 }
0x2081   : > { %v16174_v32 = vsub.f32 %v5512_v16, %v5546_v36 }
0x2082   : > { %v5540_v12 = vpop.xlane.xlu1 %5539 }
0x2083   : > { %v5548_v60 = vmul.f32 0.03125, %v5540_v12  ;;  %v5562_v11 = vmul.f32 %v16174_v32, %v16174_v32 }
0x2085   : > { %v16179_v3 = vsub.f32 %v5514_v18, %v5548_v60  ;;  %v5580_v34 = vsel %vm2022_vm1, %v5562_v11, 0.0  ;;  %v13383_v11 = vld [vmem:[%s15169_s13 + $0x8] sm:$0xff] }
0x2087   : > { %v5564_v43 = vmul.f32 %v16179_v3, %v16179_v3 }
0x2089   : > { %v5586_v20 = vsel %vm2022_vm1, %v5564_v43, 0.0 }
0x20d9   : > { %v5567_v19 = vpop.xlane.xlu1 %5566 }
0x20da   : > { %v5589_v9 = vmul.f32 0.03125, %v5567_v19 }
0x20dc   : > { %v5597_v16 = vadd.f32 1e-05, %v5589_v9 }
0x20dd   : > { %v5573_v1 = vpop.xlane.xlu1 %5572 }
0x20de   : > { %v5591_v30 = vmul.f32 0.03125, %v5573_v1  ;;  %13173 = vrsqrt.f32 %v5597_v16 }
0x20e0   : > { %v5599_v18 = vadd.f32 1e-05, %v5591_v30 }
0x20e2   : > { %13175 = vrsqrt.f32 %v5599_v18 }
0x20e5   : > { %v5579_v14 = vpop.xlane.xlu1 %5578 }
0x20e6   : > { %v5593_v33 = vmul.f32 0.03125, %v5579_v14 }
0x20e8   : > { %v5601_v49 = vadd.f32 1e-05, %v5593_v33 }
0x20e9   : > { %v5585_v56 = vpop.xlane.xlu1 %5584 }
0x20ea   : > { %v5595_v45 = vmul.f32 0.03125, %v5585_v56  ;;  %13177 = vrsqrt.f32 %v5601_v49  ;;  %v13386_v56 = vld [vmem:[%s15169_s13 + $0x20] sm:$0xff]  ;;  %v13387_v49 = vld [vmem:[%s15169_s13 + $0x28] sm:$0xff] }
0x20eb   : > { %v13174_v38 = vpop.eup %13173 }
0x20ec   : > { %v5603_v7 = vadd.f32 1e-05, %v5595_v45  ;;  %v5613_v46 = vmul.f32 %v13174_v38, %v16144_v40 }
0x20ef   : > { %v13176_v5 = vpop.eup %13175 }
0x20f0   : > { %v5615_v58 = vmul.f32 %v13176_v5, %v16148_v61 }
0x20f7   : > { %v13178_v6 = vpop.eup %13177 }
0x2108   : > { %v6377_v35 = vpop.f32.mrf.mxu0 }
0x2109   : > { %v6378_v23 = vadd.f32 %v11006_v52, %v6377_v35  ;;  %v5627_v35 = vmul.f32 %v10964_v63, %v5613_v46 }
0x210a   : > { %v12093_v13 = vpop.f32.mrf.mxu0 }
0x210b   : > { %v6383_v25 = vadd.f32 %v6378_v23, %v15472_v29  ;;  %v5568_v29 = vsel %vm2022_vm1, %v5558_v41, 0.0  ;;  %v10965_v23 = vld [vmem:[#allocation33] ss:$0 sm:$0xff] }
0x210c   : > { %v6380_v39 = vpop.f32.mrf.mxu0  ;;  %v16199_v36 = vadd.f32 %v10965_v23, %v5627_v35 }
0x210d   : > { %v6388_v59 = vsel %vm2022_vm1, %v6383_v25, 0.0  ;;  %v5629_v39 = vmul.f32 %v10964_v63, %v5615_v58  ;;  %v16262_v58 = vld [vmem:[%s14989_s25] sm:$0xff]  ;;  %s17540_s25 = sld [smem:[#allocation79_spill]] }
0x210e   : > { %6389 = vadd.xlane.f32.xlu0 %v6388_v59  ;;  %v12094_v4 = vpop.f32.mrf.mxu0  ;;  %v5617_v59 = vmul.f32 %v13178_v6, %v16154_v10 }
0x210f   : > { %v16205_v60 = vadd.f32 %v10965_v23, %v5629_v39 }
0x2110   : > { %v5631_v10 = vmul.f32 %v10964_v63, %v5617_v59 }
0x2111   : > { %v6418_v19 = vadd.f32 %v13384_v27, %v16205_v60 }
0x2112   : > { %5569 = vadd.xlane.f32.xlu0 %v5568_v29  ;;  %v13382_v29 = vld [vmem:[%s15169_s13] sm:$0xff]  ;;  %v16223_v16 = vadd.f32 %v10965_v23, %v5631_v10 }
0x2113   : > { %v6416_v2 = vadd.f32 %v13382_v29, %v16199_v36 }
0x2116   : > { %5575 = vadd.xlane.f32.xlu0 %v5574_v53 }
0x211a   : > { %5581 = vadd.xlane.f32.xlu0 %v5580_v34 }
0x211e   : > { %5587 = vadd.xlane.f32.xlu0 %v5586_v20 }
0x2197   : > { %v6390_v62 = vpop.xlane.xlu0 %6389 }
0x2198   : > { %v6391_v51 = vmul.f32 0.03125, %v6390_v62 }
0x219a   : > { %v16191_v26 = vsub.f32 %v6383_v25, %v6391_v51  ;;  %v6420_v51 = vadd.f32 %v13386_v56, %v16223_v16 }
0x219b   : > { %v5570_v21 = vpop.xlane.xlu0 %5569 }
0x219c   : > { %v5590_v37 = vmul.f32 0.03125, %v5570_v21  ;;  %v6393_v22 = vmul.f32 %v16191_v26, %v16191_v26 }
0x219e   : > { %v5598_v8 = vadd.f32 1e-05, %v5590_v37  ;;  %v6394_v42 = vsel %vm2022_vm1, %v6393_v22, 0.0 }
0x219f   : > { %6395 = vadd.xlane.f32.xlu1 %v6394_v42  ;;  %v5576_v47 = vpop.xlane.xlu0 %5575  ;;  %v13388_v42 = vld [vmem:[%s15169_s13 + $0x30] sm:$0xff] }
0x21a0   : > { %13179 = vrsqrt.f32 %v5598_v8  ;;  %v5592_v48 = vmul.f32 0.03125, %v5576_v47  ;;  %v12963_v8 = vld [vmem:[%s14647_s21 + $0x10] sm:$0xff]   ;;  %v13389_v47 = vld [vmem:[%s15169_s13 + $0x38] sm:$0xff] }
0x21a1   : > { %13181 = vrsqrt.f32 %v5603_v7 }
0x21a2   : > { %v5600_v17 = vadd.f32 1e-05, %v5592_v48 }
0x21a3   : > { %v5582_v54 = vpop.xlane.xlu0 %5581 }
0x21a4   : > { %13183 = vrsqrt.f32 %v5600_v17  ;;  %v5594_v55 = vmul.f32 0.03125, %v5582_v54  ;;  %v12964_v54 = vld [vmem:[%s17437_s6 + $0x18] sm:$0xff]  }
0x21a6   : > { %v5602_v24 = vadd.f32 1e-05, %v5594_v55 }
0x21a7   : > { %v5588_v44 = vpop.xlane.xlu0 %5587 }
0x21a8   : > { %13185 = vrsqrt.f32 %v5602_v24  ;;  %v5596_v50 = vmul.f32 0.03125, %v5588_v44  ;;  %v11010_v44 = vld [vmem:[#allocation27 + $0x1] ss:$0 sm:$0xff] }
0x21aa   : > { %v5604_v52 = vadd.f32 1e-05, %v5596_v50 }
0x21ac   : > { %13187 = vrsqrt.f32 %v5604_v52 }
0x21ad   : > { %v13180_v13 = vpop.eup %13179 }
0x21ae   : > { %v5614_v25 = vmul.f32 %v13180_v13, %v16165_v15  ;;  %v13182_v40 = vpop.eup %13181 }
0x21af   : > { %v5619_v15 = vmul.f32 %v13182_v40, %v16158_v31  ;;  %v13385_v31 = vld [vmem:[%s15169_s13 + $0x18] sm:$0xff] }
0x21b0   : > { %v5628_v41 = vmul.f32 %v10964_v63, %v5614_v25 }
0x21b1   : > { %v13184_v12 = vpop.eup %13183  ;;  %v5633_v1 = vmul.f32 %v10964_v63, %v5619_v15 }
0x21b2   : > { %v5616_v61 = vmul.f32 %v13184_v12, %v16169_v57  ;;  %v16203_v4 = vadd.f32 %v10965_v23, %v5628_v41 }
0x21b3   : > { %v16236_v21 = vadd.f32 %v10965_v23, %v5633_v1 }
0x21b4   : > { %v5630_v53 = vmul.f32 %v10964_v63, %v5616_v61  ;;  %v6417_v34 = vadd.f32 %v13383_v11, %v16203_v4  ;;  %v6612_v13 = vpack.c.bf16 %v16203_v4, %v16199_v36 }
0x21b5   : > { %v13186_v43 = vpop.eup %13185  ;;  %v6422_v7 = vadd.f32 %v13388_v42, %v16236_v21 }
0x21b6   : > { %v16212_v20 = vadd.f32 %v10965_v23, %v5630_v53  ;;  %v5618_v57 = vmul.f32 %v13186_v43, %v16174_v32  ;;  %v16215_v28 = vpack.c.bf16 %v6417_v34, %v6416_v2  ;;  %v11028_v2 = vld [vmem:[#allocation43 + $0x1] ss:$0 sm:$0xff] }
0x21b8   : > { %12107 = vmatprep.mubr.msk.bf16.mxu0 %vm2022_vm1, %v16215_v28  ;;  %v6419_v9 = vadd.f32 %v13385_v31, %v16212_v20  ;;  %v5632_v14 = vmul.f32 %v10964_v63, %v5618_v57 }
0x21b9   : > { %v13188_v32 = vpop.eup %13187 }
0x21ba   : > { %v5620_v30 = vmul.f32 %v13188_v32, %v16179_v3  ;;  %v16226_v18 = vpack.c.bf16 %v6419_v9, %v6418_v19  ;;  %v16228_v33 = vadd.f32 %v10965_v23, %v5632_v14  ;;  %v12962_v3 = vld [vmem:[%s14647_s21 + $0x18] sm:$0xff]  }
0x21bb   : > { %12096 = vmatpush3.bf16.msra.mxu1 %v12962_v3 }
0x21bc   : > { %v5634_v62 = vmul.f32 %v10964_v63, %v5620_v30  ;;  %12108 = vmatmul.mubr.msk.bf16.vlgmr.msra.gmra.mxu0 %vm2022_vm1, %v16226_v18  ;;  %v6421_v45 = vadd.f32 %v13387_v49, %v16228_v33  ;;  %12097 = vmatprep.subr.bf16.mxu1 %v14391_v0  ;;  %v11011_v63 = vld [vmem:[#allocation25 + $0x1] ss:$0 sm:$0xff]  ;;  %v6614_v25 = vpack.c.bf16 %v16228_v33, %v16223_v16  ;;  %v11024_v49 = vld [vmem:[#allocation46 + $0x1] ss:$0 sm:$0xff] }
0x21be   : > { %v16239_v37 = vpack.c.bf16 %v6421_v45, %v6420_v51  ;;  %v16241_v22 = vadd.f32 %v10965_v23, %v5634_v62  ;;  %v12965_v23 = vld [vmem:[%s17437_s6 + $0x10] sm:$0xff]  }
0x21bf   : > { %12098 = vmatpush3.bf16.msra.mxu1 %v12963_v8 }
0x21c0   : > { %12111 = vmatprep.mubr.msk.bf16.mxu0 %vm2022_vm1, %v16239_v37  ;;  %v6423_v48 = vadd.f32 %v13389_v47, %v16241_v22  ;;  %12115 = vmatprep.subr.bf16.mxu1 %v12964_v54  ;;  %v6615_v39 = vpack.c.bf16 %v16241_v22, %v16236_v21 }
0x21c2   : > { %v16251_v17 = vpack.c.bf16 %v6423_v48, %v6422_v7 }
0x21c4   : > { %12112 = vmatmul.mubr.msk.bf16.gmra.mxu0 %vm2022_vm1, %v16251_v17 }
0x21c5   : > { %12135 = vmatprep.mubr.msk.bf16.mxu0 %vm14392_vm0, %v14391_v0 }
0x2228   : > { %v6396_v38 = vpop.xlane.xlu1 %6395 }
0x2229   : > { %v6397_v55 = vmul.f32 0.03125, %v6396_v38 }
0x222b   : > { %v6398_v24 = vadd.f32 1e-05, %v6397_v55 }
0x222d   : > { %13189 = vrsqrt.f32 %v6398_v24 }
0x223a   : > { %v13190_v46 = vpop.eup %13189 }
0x223b   : > { %v6400_v5 = vmul.f32 %v13190_v46, %v16191_v26  ;;  %v6613_v26 = vpack.c.bf16 %v16212_v20, %v16205_v60 }
0x223d   : > { %v6407_v50 = vmul.f32 %v11010_v44, %v6400_v5  ;;  %v11035_v44 = vld [vmem:[#allocation48 + $0x1] ss:$0 sm:$0xff] }
0x223f   : > { %v16259_v52 = vadd.f32 %v11011_v63, %v6407_v50 }
0x2241   : > { %v6415_v35 = vadd.f32 %v16262_v58, %v16259_v52 }
0x2243   : > { %v6442_v6 = vpack.c.bf16 %v6415_v35, %v6415_v35 }
0x2245   : > { %12100 = vmatmul.mubr.msk.bf16.vlgmr.msra.gmra.mxu1 %vm2022_vm1, %v6442_v6 }
0x2246   : > { %12116 = vmatpush3.bf16.msra.mxu1 %v12964_v54  ;;  %12119 = vmatprep.mubr.msk.bf16.mxu1 %vm2022_vm1, %v6612_v13 }
0x2247   : > { %12117 = vmatprep.subr.bf16.mxu1 %v12965_v23 }
0x224a   : > { %12118 = vmatpush3.bf16.msra.mxu1 %v12965_v23 }
0x224b   : > { %12139 = vmatprep.subr.bf16.mxu1 %v14391_v0 }
0x224d   : > { %12120 = vmatmul.mubr.msk.bf16.vlgmr.msra.gmra.mxu1 %vm2022_vm1, %v6613_v26 }
0x224e   : > { %12123 = vmatprep.mubr.msk.bf16.mxu1 %vm2022_vm1, %v6614_v25 }
0x2255   : > { %12124 = vmatmul.mubr.msk.bf16.gmra.mxu1 %vm2022_vm1, %v6615_v39 }
0x2256   : > { %12147 = vmatprep.mubr.msk.bf16.mxu1 %vm14392_vm0, %v14391_v0 }
0x227c   : > { %v12109_v40 = vpop.f32.mrf.mxu0 }
0x227d   : > { %v6586_v9 = vadd.f32 %v12109_v40, %v11028_v2 }
0x227e   : > { %v6577_v59 = vpop.f32.mrf.mxu0 }
0x227f   : > { %v6578_v62 = vadd.f32 %v11028_v2, %v6577_v59 }
0x2280   : > { %v12110_v41 = vpop.f32.mrf.mxu0 }
0x2281   : > { %v6589_v1 = vadd.f32 %v12110_v41, %v11028_v2 }
0x2282   : > { %v6580_v12 = vpop.f32.mrf.mxu0 }
0x2283   : > { %v16293_v14 = vpack.c.bf16 %v6589_v1, %v6586_v9  ;;  %v6581_v32 = vadd.f32 %v11028_v2, %v6580_v12 }
0x2284   : > { %v12113_v61 = vpop.f32.mrf.mxu0 }
0x2285   : > { %v6602_v53 = vadd.f32 %v12113_v61, %v11028_v2  ;;  %v6724_v30 = vsel %vm3048_vm8, %v16293_v14, 0  ;;  %v16298_v56 = vpack.c.bf16 %v6581_v32, %v6578_v62 }
0x2286   : > { %v6593_v29 = vpop.f32.mrf.mxu0 }
0x2287   : > { %v6594_v27 = vadd.f32 %v11028_v2, %v6593_v29  ;;  %v6721_v51 = vsel %vm3048_vm8, %v16298_v56, 0 }
0x2288   : > { %v12114_v15 = vpop.f32.mrf.mxu0 }
0x2289   : > { %v6605_v11 = vadd.f32 %v12114_v15, %v11028_v2 }
0x228a   : > { %v6596_v34 = vpop.f32.mrf.mxu0 }
0x228b   : > { %v16283_v10 = vpack.c.bf16 %v6605_v11, %v6602_v53  ;;  %v6597_v43 = vadd.f32 %v11028_v2, %v6596_v34 }
0x228d   : > { %v6730_v57 = vsel %vm3048_vm8, %v16283_v10, 0  ;;  %v16288_v19 = vpack.c.bf16 %v6597_v43, %v6594_v27 }
0x228e   : > { %12128 = vmatpush3.bf16.xpose.msra.mxu0 %v6730_v57 }
0x228f   : > { %12129 = vmatprep.subr.bf16.mxu0 %v14391_v0  ;;  %v6727_v31 = vsel %vm3048_vm8, %v16288_v19, 0 }
0x2296   : > { %12130 = vmatpush3.bf16.xpose.msra.mxu0 %v6727_v31 }
0x2297   : > { %12131 = vmatprep.subr.bf16.mxu0 %v14391_v0 }
0x229e   : > { %12132 = vmatpush3.bf16.xpose.msra.mxu0 %v6724_v30 }
0x229f   : > { %12133 = vmatprep.subr.bf16.mxu0 %v14391_v0 }
0x22a6   : > { %12134 = vmatpush3.bf16.xpose.msra.mxu0 %v6721_v51 }
0x22a7   : > { %12163 = vmatprep.subr.bf16.mxu0 %v14391_v0 }
0x2305   : > { %v6500_v45 = vpop.f32.mrf.mxu1 }
0x2306   : > { %v6501_v3 = vadd.f32 %v11024_v49, %v6500_v45 }
0x2307   : > { %v12101_v8 = vpop.f32.mrf.mxu1 }
0x2308   : > { %v16303_v42 = vpack.c.bf16 %v6501_v3, %v6501_v3 }
0x2309   : > { %v6503_v7 = vpop.f32.mrf.mxu1 }
0x230a   : > { %12136 = vmatmul.mubr.msk.bf16.vlgmr.msra.gmra.mxu0 %vm3048_vm8, %v16303_v42 }
0x230b   : > { %v12102_v47 = vpop.f32.mrf.mxu1  ;;  %12171 = vmatprep.mubr.msk.bf16.mxu0 %vm14392_vm0, %v14391_v0 }
0x230d   : > { %v12121_v48 = vpop.f32.mrf.mxu1 }
0x230e   : > { %v6691_v39 = vadd.f32 %v12121_v48, %v11035_v44 }
0x230f   : > { %v6682_v54 = vpop.f32.mrf.mxu1 }
0x2310   : > { %v6683_v41 = vadd.f32 %v11035_v44, %v6682_v54 }
0x2311   : > { %v12122_v38 = vpop.f32.mrf.mxu1 }
0x2312   : > { %v6694_v26 = vadd.f32 %v12122_v38, %v11035_v44 }
0x2313   : > { %v6685_v55 = vpop.f32.mrf.mxu1 }
0x2314   : > { %v16317_v40 = vpack.c.bf16 %v6694_v26, %v6691_v39  ;;  %v6686_v59 = vadd.f32 %v11035_v44, %v6685_v55 }
0x2315   : > { %v12125_v24 = vpop.f32.mrf.mxu1 }
0x2316   : > { %v6707_v63 = vadd.f32 %v12125_v24, %v11035_v44  ;;  %v16321_v12 = vpack.c.bf16 %v6686_v59, %v6683_v41 }
0x2317   : > { %v6698_v46 = vpop.f32.mrf.mxu1 }
0x2318   : > { %v6699_v13 = vadd.f32 %v11035_v44, %v6698_v46 }
0x2319   : > { %v12126_v5 = vpop.f32.mrf.mxu1 }
0x231a   : > { %v6710_v50 = vadd.f32 %v12126_v5, %v11035_v44 }
0x231b   : > { %v6701_v35 = vpop.f32.mrf.mxu1 }
0x231c   : > { %v16309_v6 = vpack.c.bf16 %v6710_v50, %v6707_v63  ;;  %v6702_v23 = vadd.f32 %v11035_v44, %v6701_v35 }
0x231e   : > { %12140 = vmatpush3.bf16.msra.mxu1 %v16309_v6  ;;  %v16313_v25 = vpack.c.bf16 %v6702_v23, %v6699_v13 }
0x231f   : > { %12141 = vmatprep.subr.bf16.mxu1 %v14391_v0 }
0x2322   : > { %12142 = vmatpush3.bf16.msra.mxu1 %v16313_v25 }
0x2323   : > { %12143 = vmatprep.subr.bf16.mxu1 %v14391_v0 }
0x2326   : > { %12144 = vmatpush3.bf16.msra.mxu1 %v16317_v40 }
0x2327   : > { %12145 = vmatprep.subr.bf16.mxu1 %v14391_v0 }
0x232a   : > { %12146 = vmatpush3.bf16.msra.mxu1 %v16321_v12 }
0x232b   : > { %12151 = vmatprep.subr.bf16.mxu1 %v14391_v0 }
0x23ca   : > { %v6766_v61 = vpop.f32.mrf.mxu0 }
0x23cb   : > { %v6772_v29 = vmul.f32 0.5, %v6766_v61 }
0x23cc   : > { %v12137_v2 = vpop.f32.mrf.mxu0 }
0x23cd   : > { %v6773_v15 = vsel %vm3105_vm9, %v6772_v29, -inf }
0x23ce   : > { %6774 = vmax.xlane.f32.xlu0 %v6773_v15  ;;  %v6769_v53 = vpop.f32.mrf.mxu0 }
0x23d0   : > { %v12138_v11 = vpop.f32.mrf.mxu0 }
0x23e4   : > { %6843 = vrot.lane.b32.xlu0 %v16283_v10, %s17531_s30 }
0x23e8   : > { %6831 = vrot.lane.b32.xlu0 %v16303_v42, %s17531_s30 }
0x23ec   : > { %6923 = vrot.lane.b32.xlu0 %v16309_v6, %s17531_s30 }
0x2457   : > { %v6775_v34 = vpop.xlane.xlu0 %6774 }
0x2458   : > { %v6776_v43 = vsub.f32 %v6772_v29, %v6775_v34 }
0x245a   : > { %v6777_v57 = vmul.f32 1.442695, %v6776_v43 }
0x245b   : > { %v6844_v27 = vpop.permute.xlu0 %6843 }
0x245c   : > { %13191 = vpow2.f32 %v6777_v57  ;;  %v6858_v45 = vsel %vm3048_vm8, %v6844_v27, 0 }
0x245f   : > { %v6832_v1 = vpop.permute.xlu0 %6831 }
0x2463   : > { %v6924_v31 = vpop.permute.xlu0 %6923 }
0x2464   : > { %12164 = vmatpush3.bf16.msra.mxu0 %v6924_v31 }
0x2465   : > { %12165 = vmatprep.subr.bf16.mxu0 %v14391_v0 }
0x2469   : > { %v13192_v9 = vpop.eup %13191 }
0x246a   : > { %v6779_v32 = vsel %vm3105_vm9, %v13192_v9, 0.0 }
0x246b   : > { %6780 = vadd.xlane.f32.xlu1 %v6779_v32 }
0x247c   : > { %6841 = vrot.lane.b32.xlu1 %v16288_v19, %s17531_s30 }
0x2480   : > { %6839 = vrot.lane.b32.xlu1 %v16293_v14, %s17531_s30 }
0x2484   : > { %6837 = vrot.lane.b32.xlu1 %v16298_v56, %s17531_s30 }
0x24f4   : > { %v6781_v30 = vpop.xlane.xlu1 %6780 }
0x24f5   : > { %13193 = vrcp.f32 %v6781_v30 }
0x24f8   : > { %v6842_v3 = vpop.permute.xlu1 %6841 }
0x24f9   : > { %v6855_v8 = vsel %vm3048_vm8, %v6842_v3, 0 }
0x24fc   : > { %v6840_v7 = vpop.permute.xlu1 %6839 }
0x24fd   : > { %v6852_v47 = vsel %vm3048_vm8, %v6840_v7, 0 }
0x2500   : > { %v6838_v48 = vpop.permute.xlu1 %6837 }
0x2501   : > { %v6849_v54 = vsel %vm3048_vm8, %v6838_v48, 0 }
0x2502   : > { %v13194_v62 = vpop.eup %13193 }
0x2503   : > { %v6783_v51 = vmul.f32 %v13194_v62, %v13192_v9 }
0x2505   : > { %v6784_v49 = vpack.c.bf16 %v6783_v51, %v6783_v51 }
0x2507   : > { %12148 = vmatmul.mubr.msk.bf16.vlgmr.msra.gmra.mxu1 %vm3105_vm9, %v6784_v49 }
0x2508   : > { %12152 = vmatpush3.bf16.xpose.msra.mxu1 %v6858_v45  ;;  %12159 = vmatprep.mubr.msk.bf16.mxu1 %vm14392_vm0, %v14391_v0 }
0x2509   : > { %12153 = vmatprep.subr.bf16.mxu1 %v14391_v0 }
0x2510   : > { %12154 = vmatpush3.bf16.xpose.msra.mxu1 %v6855_v8 }
0x2511   : > { %12155 = vmatprep.subr.bf16.mxu1 %v14391_v0 }
0x2518   : > { %12156 = vmatpush3.bf16.xpose.msra.mxu1 %v6852_v47 }
0x2519   : > { %12157 = vmatprep.subr.bf16.mxu1 %v14391_v0 }
0x2520   : > { %12158 = vmatpush3.bf16.xpose.msra.mxu1 %v6849_v54 }
0x2521   : > { %12187 = vmatprep.subr.bf16.mxu1 %v14391_v0 }
0x2527   : > { %12160 = vmatmul.mubr.msk.bf16.vlgmr.msra.gmra.mxu1 %vm3048_vm8, %v6832_v1 }
0x2528   : > { %12195 = vmatprep.mubr.msk.bf16.mxu1 %vm14392_vm0, %v14391_v0 }
0x25c7   : > { %v6822_v38 = vpop.f32.mrf.mxu1 }
0x25c8   : > { %v6828_v55 = vpack.c.bf16 %v6822_v38, %v6822_v38 }
0x25c9   : > { %v12149_v24 = vpop.f32.mrf.mxu1 }
0x25ca   : > { %6829 = vst.msk [vmem:[#allocation2] sm:$0xf] %vm3162_vm10, %v6828_v55 }
0x25cb   : > { %v6825_v46 = vpop.f32.mrf.mxu1 }
0x25cd   : > { %v12150_v44 = vpop.f32.mrf.mxu1 }
0x25e7   : > { %v6894_v5 = vpop.f32.mrf.mxu1 }
0x25e8   : > { %v6900_v63 = vmul.f32 0.5, %v6894_v5 }
0x25e9   : > { %v12161_v50 = vpop.f32.mrf.mxu1 }
0x25ea   : > { %v6901_v35 = vsel %vm3105_vm9, %v6900_v63, -inf }
0x25eb   : > { %6902 = vmax.xlane.f32.xlu1 %v6901_v35  ;;  %v6897_v23 = vpop.f32.mrf.mxu1 }
0x25ed   : > { %v12162_v13 = vpop.f32.mrf.mxu1 }
0x25fc   : > { %6921 = vrot.lane.b32.xlu1 %v16313_v25, %s17531_s30 }
0x2600   : > { %6919 = vrot.lane.b32.xlu1 %v16317_v40, %s17531_s30 }
0x2604   : > { %6988 = vrot.lane.b32.xlu1 %v16283_v10, %s17523_s8 }
0x2608   : > { %6984 = vrot.lane.b32.xlu1 %v16293_v14, %s17523_s8 }
0x260c   : > { %6980 = vrot.lane.b32.xlu1 %v16303_v42, %s17523_s8 }
0x2610   : > { %7062 = vrot.lane.b32.xlu1 %v16313_v25, %s17523_s8 }
0x2674   : > { %v6903_v26 = vpop.xlane.xlu1 %6902 }
0x2675   : > { %v6904_v39 = vsub.f32 %v6900_v63, %v6903_v26 }
0x2677   : > { %v6905_v59 = vmul.f32 1.442695, %v6904_v39 }
0x2678   : > { %v6922_v41 = vpop.permute.xlu1 %6921 }
0x2679   : > { %13195 = vpow2.f32 %v6905_v59  ;;  %12166 = vmatpush3.bf16.msra.mxu0 %v6922_v41 }
0x267a   : > { %12167 = vmatprep.subr.bf16.mxu0 %v14391_v0 }
0x267c   : > { %v6920_v61 = vpop.permute.xlu1 %6919 }
0x267d   : > { %12168 = vmatpush3.bf16.msra.mxu0 %v6920_v61 }
0x267e   : > { %12169 = vmatprep.subr.bf16.mxu0 %v14391_v0 }
0x2680   : > { %v6989_v43 = vpop.permute.xlu1 %6988 }
0x2681   : > { %v7003_v27 = vsel %vm3048_vm8, %v6989_v43, 0 }
0x2684   : > { %v6985_v9 = vpop.permute.xlu1 %6984 }
0x2685   : > { %v6997_v32 = vsel %vm3048_vm8, %v6985_v9, 0 }
0x2686   : > { %v13196_v29 = vpop.eup %13195 }
0x2687   : > { %v6907_v2 = vsel %vm3105_vm9, %v13196_v29, 0.0 }
0x2688   : > { %6908 = vadd.xlane.f32.xlu0 %v6907_v2  ;;  %v6981_v51 = vpop.permute.xlu1 %6980 }
0x268c   : > { %v7063_v63 = vpop.permute.xlu1 %7062 }
0x269e   : > { %6917 = vrot.lane.b32.xlu0 %v16321_v12, %s17531_s30 }
0x26a2   : > { %6986 = vrot.lane.b32.xlu0 %v16288_v19, %s17523_s8 }
0x26a6   : > { %6982 = vrot.lane.b32.xlu0 %v16298_v56, %s17523_s8 }
0x2711   : > { %v6909_v15 = vpop.xlane.xlu0 %6908 }
0x2712   : > { %13197 = vrcp.f32 %v6909_v15 }
0x2715   : > { %v6918_v53 = vpop.permute.xlu0 %6917 }
0x2716   : > { %12170 = vmatpush3.bf16.msra.mxu0 %v6918_v53 }
0x2717   : > { %12175 = vmatprep.subr.bf16.mxu0 %v14391_v0 }
0x2719   : > { %v6987_v1 = vpop.permute.xlu0 %6986 }
0x271a   : > { %v7000_v31 = vsel %vm3048_vm8, %v6987_v1, 0 }
0x271d   : > { %v6983_v30 = vpop.permute.xlu0 %6982 }
0x271e   : > { %v6994_v62 = vsel %vm3048_vm8, %v6983_v30, 0 }
0x271f   : > { %v13198_v11 = vpop.eup %13197 }
0x2720   : > { %v6911_v34 = vmul.f32 %v13198_v11, %v13196_v29 }
0x2722   : > { %v6912_v57 = vpack.c.bf16 %v6911_v34, %v6911_v34 }
0x2724   : > { %12172 = vmatmul.mubr.msk.bf16.vlgmr.msra.gmra.mxu0 %vm3105_vm9, %v6912_v57 }
0x2725   : > { %12176 = vmatpush3.bf16.xpose.msra.mxu0 %v7003_v27  ;;  %12183 = vmatprep.mubr.msk.bf16.mxu0 %vm14392_vm0, %v14391_v0 }
0x2726   : > { %12177 = vmatprep.subr.bf16.mxu0 %v14391_v0 }
0x272d   : > { %12178 = vmatpush3.bf16.xpose.msra.mxu0 %v7000_v31 }
0x272e   : > { %12179 = vmatprep.subr.bf16.mxu0 %v14391_v0 }
0x2735   : > { %12180 = vmatpush3.bf16.xpose.msra.mxu0 %v6997_v32 }
0x2736   : > { %12181 = vmatprep.subr.bf16.mxu0 %v14391_v0 }
0x273d   : > { %12182 = vmatpush3.bf16.xpose.msra.mxu0 %v6994_v62 }
0x273e   : > { %12211 = vmatprep.subr.bf16.mxu0 %v14391_v0 }
0x2744   : > { %12184 = vmatmul.mubr.msk.bf16.vlgmr.msra.gmra.mxu0 %vm3048_vm8, %v6981_v51 }
0x2745   : > { %12219 = vmatprep.mubr.msk.bf16.mxu0 %vm14392_vm0, %v14391_v0 }
0x27e4   : > { %v16392_v49 = vpop.f32.mrf.mxu0 }
0x27e5   : > { %v11268_v30 = vpack.c.bf16 %v16392_v49, %v16392_v49 }
0x27e6   : > { %v12173_v45 = vpop.f32.mrf.mxu0 }
0x27e8   : > { %v6969_v3 = vpop.f32.mrf.mxu0 }
0x27ea   : > { %v12174_v8 = vpop.f32.mrf.mxu0 }
0x2804   : > { %v7039_v7 = vpop.f32.mrf.mxu0 }
0x2805   : > { %v7045_v47 = vmul.f32 0.5, %v7039_v7 }
0x2806   : > { %v12185_v48 = vpop.f32.mrf.mxu0 }
0x2807   : > { %v7046_v54 = vsel %vm3105_vm9, %v7045_v47, -inf }
0x2808   : > { %7047 = vmax.xlane.f32.xlu0 %v7046_v54  ;;  %v7042_v38 = vpop.f32.mrf.mxu0 }
0x280a   : > { %v12186_v55 = vpop.f32.mrf.mxu0 }
0x281e   : > { %7064 = vrot.lane.b32.xlu0 %v16309_v6, %s17523_s8 }
0x2822   : > { %7060 = vrot.lane.b32.xlu0 %v16317_v40, %s17523_s8 }
0x2826   : > { %7129 = vrot.lane.b32.xlu0 %v16283_v10, %s17532_s5 }
0x282a   : > { %7125 = vrot.lane.b32.xlu0 %v16293_v14, %s17532_s5 }
0x282e   : > { %7121 = vrot.lane.b32.xlu0 %v16303_v42, %s17532_s5 }
0x2832   : > { %7205 = vrot.lane.b32.xlu0 %v16309_v6, %s17532_s5 }
0x2891   : > { %v7048_v24 = vpop.xlane.xlu0 %7047 }
0x2892   : > { %v7049_v46 = vsub.f32 %v7045_v47, %v7048_v24 }
0x2894   : > { %v7050_v44 = vmul.f32 1.442695, %v7049_v46 }
0x2895   : > { %v7065_v5 = vpop.permute.xlu0 %7064 }
0x2896   : > { %13199 = vpow2.f32 %v7050_v44  ;;  %12188 = vmatpush3.bf16.msra.mxu1 %v7065_v5 }
0x2897   : > { %12189 = vmatprep.subr.bf16.mxu1 %v14391_v0 }
0x2899   : > { %v7061_v50 = vpop.permute.xlu0 %7060 }
0x289a   : > { %12190 = vmatpush3.bf16.msra.mxu1 %v7063_v63 }
0x289b   : > { %12191 = vmatprep.subr.bf16.mxu1 %v14391_v0 }
0x289d   : > { %v7130_v10 = vpop.permute.xlu0 %7129 }
0x289e   : > { %12192 = vmatpush3.bf16.msra.mxu1 %v7061_v50  ;;  %v7144_v61 = vsel %vm3048_vm8, %v7130_v10, 0 }
0x289f   : > { %12193 = vmatprep.subr.bf16.mxu1 %v14391_v0 }
0x28a1   : > { %v7126_v14 = vpop.permute.xlu0 %7125 }
0x28a2   : > { %v7138_v29 = vsel %vm3048_vm8, %v7126_v14, 0 }
0x28a3   : > { %v13200_v42 = vpop.eup %13199 }
0x28a4   : > { %v7052_v6 = vsel %vm3105_vm9, %v13200_v42, 0.0 }
0x28a5   : > { %7053 = vadd.xlane.f32.xlu1 %v7052_v6  ;;  %v7122_v35 = vpop.permute.xlu0 %7121 }
0x28a9   : > { %v7206_v23 = vpop.permute.xlu0 %7205 }
0x28aa   : > { %12212 = vmatpush3.bf16.msra.mxu0 %v7206_v23 }
0x28ab   : > { %12213 = vmatprep.subr.bf16.mxu0 %v14391_v0 }
0x28b6   : > { %7058 = vrot.lane.b32.xlu1 %v16321_v12, %s17523_s8 }
0x28ba   : > { %7127 = vrot.lane.b32.xlu1 %v16288_v19, %s17532_s5 }
0x28be   : > { %7123 = vrot.lane.b32.xlu1 %v16298_v56, %s17532_s5 }
0x292e   : > { %v7054_v13 = vpop.xlane.xlu1 %7053 }
0x292f   : > { %13201 = vrcp.f32 %v7054_v13 }
0x2932   : > { %v7059_v26 = vpop.permute.xlu1 %7058 }
0x2933   : > { %12194 = vmatpush3.bf16.msra.mxu1 %v7059_v26 }
0x2934   : > { %12199 = vmatprep.subr.bf16.mxu1 %v14391_v0 }
0x2936   : > { %v7128_v19 = vpop.permute.xlu1 %7127 }
0x2937   : > { %v7141_v56 = vsel %vm3048_vm8, %v7128_v19, 0 }
0x293a   : > { %v7124_v2 = vpop.permute.xlu1 %7123 }
0x293b   : > { %v7135_v15 = vsel %vm3048_vm8, %v7124_v2, 0  ;;  %v12967_v2 = vld [vmem:[%s17525_s14 + $0x18] sm:$0xff]  }
0x293c   : > { %v13202_v39 = vpop.eup %13201 }
0x293d   : > { %v7056_v59 = vmul.f32 %v13202_v39, %v13200_v42  ;;  %v11053_v42 = vld [vmem:[#allocation45 + $0x1] ss:$0 sm:$0xff] }
0x293f   : > { %v7057_v41 = vpack.c.bf16 %v7056_v59, %v7056_v59 }
0x2941   : > { %12196 = vmatmul.mubr.msk.bf16.vlgmr.msra.gmra.mxu1 %vm3105_vm9, %v7057_v41 }
0x2942   : > { %12200 = vmatpush3.bf16.xpose.msra.mxu1 %v7144_v61  ;;  %12207 = vmatprep.mubr.msk.bf16.mxu1 %vm14392_vm0, %v14391_v0 }
0x2943   : > { %12201 = vmatprep.subr.bf16.mxu1 %v14391_v0 }
0x294a   : > { %12202 = vmatpush3.bf16.xpose.msra.mxu1 %v7141_v56 }
0x294b   : > { %12203 = vmatprep.subr.bf16.mxu1 %v14391_v0 }
0x2952   : > { %12204 = vmatpush3.bf16.xpose.msra.mxu1 %v7138_v29 }
0x2953   : > { %12205 = vmatprep.subr.bf16.mxu1 %v14391_v0 }
0x295a   : > { %12206 = vmatpush3.bf16.xpose.msra.mxu1 %v7135_v15  ;;  %v12969_v15 = vld [vmem:[%s17528_s20 + $0x18] sm:$0xff]  }
0x295b   : > { %12229 = vmatprep.subr.bf16.mxu1 %v14391_v0 }
0x2961   : > { %12208 = vmatmul.mubr.msk.bf16.vlgmr.msra.gmra.mxu1 %vm3048_vm8, %v7122_v35 }
0x2962   : > { %12233 = vmatprep.mubr.msk.bf16.mxu1 %vm14392_vm0, %v14391_v0  ;;  %12230 = vmatpush3.bf16.msra.mxu1 %v12967_v2 }
0x2963   : > { %12231 = vmatprep.subr.bf16.mxu1 %v14391_v0 }
0x2a01   : > { %v7107_v53 = vpop.f32.mrf.mxu1 }
0x2a02   : > { %v11269_v7 = vpack.c.bf16 %v7107_v53, %v7107_v53  ;;  %v12971_v53 = vld [vmem:[%s17526_s9 + $0x38] sm:$0xff]  }
0x2a03   : > { %v12197_v11 = vpop.f32.mrf.mxu1 }
0x2a04   : > { %v12972_v11 = vld [vmem:[%s17526_s9 + $0x30] sm:$0xff]  }
0x2a05   : > { %v7110_v34 = vpop.f32.mrf.mxu1 }
0x2a07   : > { %v12198_v43 = vpop.f32.mrf.mxu1 }
0x2a21   : > { %v7180_v57 = vpop.f32.mrf.mxu1 }
0x2a22   : > { %v7186_v27 = vmul.f32 0.5, %v7180_v57 }
0x2a23   : > { %v12209_v1 = vpop.f32.mrf.mxu1 }
0x2a24   : > { %v7187_v31 = vsel %vm3105_vm9, %v7186_v27, -inf  ;;  %v11057_v1 = vld [vmem:[#allocation28 + $0x1] ss:$0 sm:$0xff] }
0x2a25   : > { %7188 = vmax.xlane.f32.xlu1 %v7187_v31  ;;  %v7183_v9 = vpop.f32.mrf.mxu1 }
0x2a26   : > { %v11058_v9 = vld [vmem:[%s17527_s19 + $0x1] ss:$0 sm:$0xff] }
0x2a27   : > { %v12210_v32 = vpop.f32.mrf.mxu1 }
0x2a36   : > { %7203 = vrot.lane.b32.xlu1 %v16313_v25, %s17532_s5 }
0x2a3a   : > { %7201 = vrot.lane.b32.xlu1 %v16317_v40, %s17532_s5 }
0x2a3e   : > { %6976 = vrot.lane.b32.xlu1 %v11268_v30, %s17533_s2 }
0x2aae   : > { %v7189_v62 = vpop.xlane.xlu1 %7188 }
0x2aaf   : > { %v7190_v51 = vsub.f32 %v7186_v27, %v7189_v62 }
0x2ab1   : > { %v7191_v45 = vmul.f32 1.442695, %v7190_v51  ;;  %v12970_v51 = vld [vmem:[%s17528_s20 + $0x10] sm:$0xff]  }
0x2ab2   : > { %v7204_v3 = vpop.permute.xlu1 %7203 }
0x2ab3   : > { %13203 = vpow2.f32 %v7191_v45  ;;  %12214 = vmatpush3.bf16.msra.mxu0 %v7204_v3  ;;  %v12973_v45 = vld [vmem:[%s17526_s9 + $0x28] sm:$0xff]   ;;  %v11063_v3 = vld [vmem:[#allocation22 + $0x1] ss:$0 sm:$0xff] }
0x2ab4   : > { %12215 = vmatprep.subr.bf16.mxu0 %v14391_v0 }
0x2ab6   : > { %v7202_v8 = vpop.permute.xlu1 %7201 }
0x2ab7   : > { %12216 = vmatpush3.bf16.msra.mxu0 %v7202_v8 }
0x2ab8   : > { %12217 = vmatprep.subr.bf16.mxu0 %v14391_v0 }
0x2aba   : > { %v6977_v25 = vpop.permute.xlu1 %6976 }
0x2abb   : > { %6979 = vst.msk [vmem:[#allocation2] sm:$0xf] %vm3313_vm11, %v6977_v25 }
0x2ac0   : > { %v13204_v40 = vpop.eup %13203 }
0x2ac1   : > { %v7193_v49 = vsel %vm3105_vm9, %v13204_v40, 0.0 }
0x2ac2   : > { %7194 = vadd.xlane.f32.xlu0 %v7193_v49 }
0x2ad8   : > { %7199 = vrot.lane.b32.xlu0 %v16321_v12, %s17532_s5  ;;  %v12966_v12 = vld [vmem:[#allocation49 + $0x8] sm:$0xff]  }
0x2adc   : > { %7117 = vrot.lane.b32.xlu0 %v11269_v7, %s17524_s11 }
0x2b4b   : > { %v7195_v47 = vpop.xlane.xlu0 %7194 }
0x2b4c   : > { %13205 = vrcp.f32 %v7195_v47 }
0x2b4f   : > { %v7200_v48 = vpop.permute.xlu0 %7199 }
0x2b50   : > { %12218 = vmatpush3.bf16.msra.mxu0 %v7200_v48 }
0x2b51   : > { %12223 = vmatprep.subr.bf16.mxu0 %v14391_v0 }
0x2b53   : > { %v7118_v54 = vpop.permute.xlu0 %7117 }
0x2b54   : > { %7120 = vst.msk [vmem:[#allocation2] sm:$0xf] %vm3455_vm12, %v7118_v54  ;;  %v11095_v54 = vld [vmem:[#allocation18 + $0x1] ss:$0 sm:$0xff] }
0x2b59   : > { %v13206_v38 = vpop.eup %13205 }
0x2b5a   : > { %v7197_v55 = vmul.f32 %v13206_v38, %v13204_v40 }
0x2b5c   : > { %v7198_v24 = vpack.c.bf16 %v7197_v55, %v7197_v55 }
0x2b5e   : > { %12220 = vmatmul.mubr.msk.bf16.vlgmr.msra.gmra.mxu0 %vm3105_vm9, %v7198_v24 }
0x2b5f   : > { %12225 = vmatprep.mubr.msk.bf16.mxu0 %vm14392_vm0, %v14391_v0  ;;  %12224 = vmatpush3.bf16.msra.mxu0 %v12966_v12 }
0x2b60   : > { %12237 = vmatprep.subr.bf16.mxu0 %v14391_v0 }
0x2c1e   : > { %v7248_v46 = vpop.f32.mrf.mxu0 }
0x2c1f   : > { %v11270_v44 = vpack.c.bf16 %v7248_v46, %v7248_v46 }
0x2c20   : > { %v12221_v5 = vpop.f32.mrf.mxu0 }
0x2c21   : > { %7258 = vrot.lane.b32.xlu1 %v11270_v44, %s17535_s16 }
0x2c22   : > { %v7251_v63 = vpop.f32.mrf.mxu0 }
0x2c24   : > { %v12222_v50 = vpop.f32.mrf.mxu0 }
0x2c93   : > { %v7259_v10 = vpop.permute.xlu1 %7258 }
0x2c94   : > { %7261 = vst.msk [vmem:[#allocation2] sm:$0xf] %vm3597_vm13, %v7259_v10 }
0x2c9b   : > { %v7262_v14 = vld [vmem:[#allocation2] sm:$0xf] }
0x2c9c   : > { %12226 = vmatmul.mubr.msk.bf16.vlgmr.msra.gmra.mxu0 %vm3613_vm14, %v7262_v14 }
0x2c9d   : > { %12245 = vmatprep.mubr.msk.bf16.mxu0 %vm14392_vm0, %v14391_v0  ;;  %12238 = vmatpush3.bf16.msra.mxu0 %v12971_v53 }
0x2c9e   : > { %12239 = vmatprep.subr.bf16.mxu0 %v14391_v0 }
0x2ca1   : > { %12240 = vmatpush3.bf16.msra.mxu0 %v12972_v11 }
0x2ca2   : > { %12241 = vmatprep.subr.bf16.mxu0 %v14391_v0 }
0x2ca5   : > { %12242 = vmatpush3.bf16.msra.mxu0 %v12973_v45  ;;  %v11082_v45 = vld [vmem:[#allocation30 + $0x1] ss:$0 sm:$0xff] }
0x2ca6   : > { %12243 = vmatprep.subr.bf16.mxu0 %v14391_v0 }
0x2d5c   : > { %v7314_v6 = vpop.f32.mrf.mxu0 }
0x2d5d   : > { %v7315_v35 = vadd.f32 %v11053_v42, %v7314_v6 }
0x2d5e   : > { %v12227_v23 = vpop.f32.mrf.mxu0 }
0x2d5f   : > { %v7320_v13 = vadd.f32 %v7315_v35, %v16259_v52  ;;  %v12968_v52 = vld [vmem:[%s17525_s14 + $0x10] sm:$0xff]  }
0x2d60   : > { %v7317_v26 = vpop.f32.mrf.mxu0  ;;  %12232 = vmatpush3.bf16.msra.mxu1 %v12968_v52 }
0x2d61   : > { %v7325_v39 = vsel %vm2022_vm1, %v7320_v13, 0.0  ;;  %12249 = vmatprep.subr.bf16.mxu1 %v12969_v15 }
0x2d62   : > { %7326 = vadd.xlane.f32.xlu0 %v7325_v39  ;;  %v12228_v59 = vpop.f32.mrf.mxu0  ;;  %v11075_v39 = vld [vmem:[#allocation24 + $0x1] ss:$0 sm:$0xff] }
0x2deb   : > { %v7327_v41 = vpop.xlane.xlu0 %7326 }
0x2dec   : > { %v7328_v61 = vmul.f32 0.03125, %v7327_v41 }
0x2dee   : > { %v7329_v19 = vsub.f32 %v7320_v13, %v7328_v61 }
0x2df0   : > { %v7330_v56 = vmul.f32 %v7329_v19, %v7329_v19 }
0x2df2   : > { %v7331_v29 = vsel %vm2022_vm1, %v7330_v56, 0.0 }
0x2df3   : > { %7332 = vadd.xlane.f32.xlu1 %v7331_v29 }
0x2e7c   : > { %v7333_v34 = vpop.xlane.xlu1 %7332 }
0x2e7d   : > { %v7334_v43 = vmul.f32 0.03125, %v7333_v34 }
0x2e7f   : > { %v7335_v57 = vadd.f32 1e-05, %v7334_v43  ;;  %v12975_v43 = vld [vmem:[%s17529_s24 + $0x18] sm:$0xff]  }
0x2e81   : > { %13207 = vrsqrt.f32 %v7335_v57  ;;  %v12976_v57 = vld [vmem:[%s17530_s27 + $0x18] sm:$0xff]  }
0x2e8e   : > { %v13208_v27 = vpop.eup %13207 }
0x2e8f   : > { %v7337_v31 = vmul.f32 %v13208_v27, %v7329_v19  ;;  %v12977_v27 = vld [vmem:[%s17529_s24 + $0x10] sm:$0xff]  }
0x2e91   : > { %v7344_v32 = vmul.f32 %v11057_v1, %v7337_v31  ;;  %v12978_v1 = vld [vmem:[%s17530_s27 + $0x10] sm:$0xff]  }
0x2e93   : > { %v7351_v30 = vadd.f32 %v11058_v9, %v7344_v32 }
0x2e95   : > { %v7352_v62 = vpack.c.bf16 %v7351_v30, %v7351_v30 }
0x2e97   : > { %12234 = vmatmul.mubr.msk.bf16.vlgmr.msra.gmra.mxu1 %vm2022_vm1, %v7352_v62  ;;  %v11081_v62 = vld [vmem:[#allocation31 + $0x1] ss:$0 sm:$0xff] }
0x2e98   : > { %12250 = vmatpush3.bf16.msra.mxu1 %v12969_v15  ;;  %12253 = vmatprep.mubr.msk.bf16.mxu1 %vm2022_vm1, %v16215_v28  ;;  %v12974_v28 = vld [vmem:[%s17526_s9 + $0x20] sm:$0xff]  }
0x2e99   : > { %12251 = vmatprep.subr.bf16.mxu1 %v12970_v51  ;;  %12244 = vmatpush3.bf16.msra.mxu0 %v12974_v28 }
0x2e9a   : > { %12261 = vmatprep.subr.bf16.mxu0 %v14391_v0 }
0x2e9c   : > { %12252 = vmatpush3.bf16.msra.mxu1 %v12970_v51 }
0x2e9d   : > { %12269 = vmatprep.subr.bf16.mxu1 %v14391_v0 }
0x2e9f   : > { %12254 = vmatmul.mubr.msk.bf16.vlgmr.msra.gmra.mxu1 %vm2022_vm1, %v16226_v18 }
0x2ea0   : > { %12257 = vmatprep.mubr.msk.bf16.mxu1 %vm2022_vm1, %v16239_v37  ;;  %12270 = vmatpush3.bf16.msra.mxu1 %v12975_v43 }
0x2ea1   : > { %12271 = vmatprep.subr.bf16.mxu1 %v14391_v0 }
0x2ea4   : > { %12272 = vmatpush3.bf16.msra.mxu1 %v12977_v27 }
0x2ea7   : > { %12258 = vmatmul.mubr.msk.bf16.gmra.mxu1 %vm2022_vm1, %v16251_v17 }
0x2ea8   : > { %12273 = vmatprep.mubr.msk.bf16.mxu1 %vm14392_vm0, %v14391_v0 }
0x2f57   : > { %v7415_v8 = vpop.f32.mrf.mxu1 }
0x2f58   : > { %v7416_v18 = vadd.f32 %v11063_v3, %v7415_v8 }
0x2f59   : > { %v12235_v25 = vpop.f32.mrf.mxu1 }
0x2f5a   : > { %v7421_v40 = vmax.f32 %v7416_v18, 0.0 }
0x2f5b   : > { %v7418_v37 = vpop.f32.mrf.mxu1 }
0x2f5c   : > { %v7422_v49 = vpack.c.bf16 %v7421_v40, %v7421_v40  ;;  %v11106_v40 = vld [vmem:[#allocation19 + $0x1] ss:$0 sm:$0xff] }
0x2f5d   : > { %v12236_v7 = vpop.f32.mrf.mxu1 }
0x2f5e   : > { %12246 = vmatmul.mubr.msk.bf16.vlgmr.msra.gmra.mxu0 %vm3105_vm9, %v7422_v49  ;;  %v11102_v49 = vld [vmem:[#allocation15 + $0x1] ss:$0 sm:$0xff] }
0x2f5f   : > { %v12255_v17 = vpop.f32.mrf.mxu1  ;;  %12265 = vmatprep.mubr.msk.bf16.mxu0 %vm14392_vm0, %v14391_v0  ;;  %12262 = vmatpush3.bf16.msra.mxu0 %v12976_v57 }
0x2f60   : > { %v7621_v50 = vadd.f32 %v12255_v17, %v11095_v54  ;;  %12263 = vmatprep.subr.bf16.mxu0 %v14391_v0 }
0x2f61   : > { %v7612_v47 = vpop.f32.mrf.mxu1 }
0x2f62   : > { %v7613_v55 = vadd.f32 %v11095_v54, %v7612_v47 }
0x2f63   : > { %v12256_v48 = vpop.f32.mrf.mxu1  ;;  %12264 = vmatpush3.bf16.msra.mxu0 %v12978_v1 }
0x2f64   : > { %v7624_v46 = vadd.f32 %v12256_v48, %v11095_v54 }
0x2f65   : > { %v7615_v38 = vpop.f32.mrf.mxu1 }
0x2f66   : > { %v7616_v24 = vadd.f32 %v11095_v54, %v7615_v38  ;;  %v16495_v14 = vpack.c.bf16 %v7624_v46, %v7621_v50 }
0x2f67   : > { %v12259_v12 = vpop.f32.mrf.mxu1 }
0x2f68   : > { %v16491_v44 = vpack.c.bf16 %v7616_v24, %v7613_v55  ;;  %v7637_v5 = vadd.f32 %v12259_v12, %v11095_v54 }
0x2f69   : > { %v7628_v63 = vpop.f32.mrf.mxu1 }
0x2f6a   : > { %8081 = vrot.lane.b32.xlu1 %v16491_v44, %s17531_s30  ;;  %v7629_v35 = vadd.f32 %v11095_v54, %v7628_v63 }
0x2f6b   : > { %v12260_v10 = vpop.f32.mrf.mxu1 }
0x2f6c   : > { %v7640_v42 = vadd.f32 %v12260_v10, %v11095_v54 }
0x2f6d   : > { %v7631_v6 = vpop.f32.mrf.mxu1 }
0x2f6e   : > { %v16497_v23 = vpack.c.bf16 %v7640_v42, %v7637_v5  ;;  %v7632_v13 = vadd.f32 %v11095_v54, %v7631_v6  ;;  %8083 = vrot.lane.b32.xlu1 %v16495_v14, %s17531_s30 }
0x2f70   : > { %v16501_v26 = vpack.c.bf16 %v7632_v13, %v7629_v35 }
0x2f72   : > { %8085 = vrot.lane.b32.xlu1 %v16501_v26, %s17531_s30 }
0x2fdc   : > { %v8082_v50 = vpop.permute.xlu1 %8081 }
0x2fe0   : > { %v8084_v10 = vpop.permute.xlu1 %8083 }
0x2fe4   : > { %v8086_v42 = vpop.permute.xlu1 %8085 }
0x301e   : > { %v7501_v59 = vpop.f32.mrf.mxu0 }
0x301f   : > { %v7502_v41 = vadd.f32 %v11075_v39, %v7501_v59 }
0x3020   : > { %v12247_v61 = vpop.f32.mrf.mxu0 }
0x3021   : > { %v7507_v19 = vadd.f32 %v7502_v41, %v7351_v30 }
0x3022   : > { %v7504_v56 = vpop.f32.mrf.mxu0 }
0x3023   : > { %v7512_v29 = vsel %vm2022_vm1, %v7507_v19, 0.0 }
0x3024   : > { %7513 = vadd.xlane.f32.xlu0 %v7512_v29  ;;  %v12248_v2 = vpop.f32.mrf.mxu0 }
0x30ad   : > { %v7514_v52 = vpop.xlane.xlu0 %7513 }
0x30ae   : > { %v7515_v15 = vmul.f32 0.03125, %v7514_v52 }
0x30b0   : > { %v7516_v53 = vsub.f32 %v7507_v19, %v7515_v15 }
0x30b2   : > { %v7517_v11 = vmul.f32 %v7516_v53, %v7516_v53 }
0x30b4   : > { %v7518_v34 = vsel %vm2022_vm1, %v7517_v11, 0.0 }
0x30b5   : > { %7519 = vadd.xlane.f32.xlu0 %v7518_v34 }
0x313e   : > { %v7520_v31 = vpop.xlane.xlu0 %7519 }
0x313f   : > { %v7521_v9 = vmul.f32 0.03125, %v7520_v31 }
0x3141   : > { %v7522_v32 = vadd.f32 1e-05, %v7521_v9 }
0x3143   : > { %13209 = vrsqrt.f32 %v7522_v32 }
0x3150   : > { %v13210_v30 = vpop.eup %13209 }
0x3151   : > { %v7524_v51 = vmul.f32 %v13210_v30, %v7516_v53 }
0x3153   : > { %v7531_v28 = vmul.f32 %v11081_v62, %v7524_v51 }
0x3155   : > { %v16513_v3 = vadd.f32 %v11082_v45, %v7531_v28 }
0x3157   : > { %v7712_v8 = vpack.c.bf16 %v16513_v3, %v16513_v3  ;;  %v7539_v18 = vadd.f32 %v16262_v58, %v16513_v3 }
0x3159   : > { %12274 = vmatmul.mubr.msk.bf16.vlgmr.msra.gmra.mxu1 %vm2022_vm1, %v7712_v8  ;;  %v16520_v25 = vpack.c.bf16 %v7539_v18, %v7539_v18 }
0x315b   : > { %12266 = vmatmul.mubr.msk.bf16.vlgmr.msra.gmra.mxu0 %vm2022_vm1, %v16520_v25 }
0x315c   : > { %12279 = vmatprep.mubr.msk.bf16.mxu0 %vm3048_vm8, %v16491_v44 }
0x3219   : > { %v7770_v37 = vpop.f32.mrf.mxu1 }
0x321a   : > { %v7771_v7 = vadd.f32 %v11106_v40, %v7770_v37 }
0x321b   : > { %v7705_v17 = vpop.f32.mrf.mxu0  ;;  %v12275_v47 = vpop.f32.mrf.mxu1 }
0x321c   : > { %v16526_v48 = vpack.c.bf16 %v7771_v7, %v7771_v7  ;;  %v7706_v54 = vadd.f32 %v11102_v49, %v7705_v17 }
0x321d   : > { %v12267_v58 = vpop.f32.mrf.mxu0  ;;  %v7773_v38 = vpop.f32.mrf.mxu1 }
0x321e   : > { %v7711_v55 = vpack.c.bf16 %v7706_v54, %v7706_v54  ;;  %12510 = vmatprep.subr.msk.bf16.mxu1 %vm2250_vm3, %v16526_v48  ;;  %v7970_v24 = vsel %vm2250_vm3, %v16526_v48, 0 }
0x321f   : > { %v7708_v12 = vpop.f32.mrf.mxu0  ;;  %v12276_v46 = vpop.f32.mrf.mxu1  ;;  %12288 = vmatpush3.bf16.msra.mxu1 %v7970_v24 }
0x3220   : > { %8090 = vrot.lane.b32.xlu0 %v7711_v55, %s17531_s30  ;;  %12509 = vmatprep.subr.msk.bf16.mxu0 %vm3048_vm8, %v7711_v55  ;;  %v7790_v5 = vsel %vm3048_vm8, %v7711_v55, 0 }
0x3221   : > { %8419 = vrot.lane.b32.xlu1 %v7711_v55, %s17523_s8  ;;  %v12268_v63 = vpop.f32.mrf.mxu0  ;;  %12278 = vmatpush3.bf16.xpose.msra.mxu0 %v7790_v5 }
0x3224   : > { %8087 = vrot.lane.b32.xlu0 %v16497_v23, %s17531_s30 }
0x3225   : > { %8413 = vrot.lane.b32.xlu1 %v16495_v14, %s17523_s8 }
0x3228   : > { %8411 = vrot.lane.b32.xlu0 %v16491_v44, %s17523_s8  ;;  %12280 = vmatmul.mubr.msk.bf16.vlgmr.msra.gmra.mxu0 %vm3048_vm8, %v16495_v14 }
0x3229   : > { %8417 = vrot.lane.b32.xlu1 %v16497_v23, %s17523_s8  ;;  %12283 = vmatprep.mubr.msk.bf16.mxu0 %vm3048_vm8, %v16501_v26 }
0x322c   : > { %8415 = vrot.lane.b32.xlu0 %v16501_v26, %s17523_s8 }
0x322d   : > { %8739 = vrot.lane.b32.xlu1 %v16491_v44, %s17532_s5 }
0x3230   : > { %8747 = vrot.lane.b32.xlu0 %v7711_v55, %s17532_s5  ;;  %12284 = vmatmul.mubr.msk.bf16.gmra.mxu0 %vm3048_vm8, %v16497_v23 }
0x3231   : > { %8743 = vrot.lane.b32.xlu1 %v16501_v26, %s17532_s5  ;;  %12299 = vmatprep.mubr.msk.bf16.mxu0 %vm3048_vm8, %v8082_v50 }
0x3234   : > { %8741 = vrot.lane.b32.xlu0 %v16495_v14, %s17532_s5 }
0x3238   : > { %8745 = vrot.lane.b32.xlu0 %v16497_v23, %s17532_s5 }
0x3292   : > { %v8091_v44 = vpop.permute.xlu0 %8090 }
0x3293   : > { %12511 = vmatprep.subr.msk.bf16.mxu0 %vm3048_vm8, %v8091_v44  ;;  %v8105_v6 = vsel %vm3048_vm8, %v8091_v44, 0  ;;  %v8420_v35 = vpop.permute.xlu1 %8419 }
0x3294   : > { %12298 = vmatpush3.bf16.xpose.msra.mxu0 %v8105_v6  ;;  %v8434_v14 = vsel %vm3048_vm8, %v8420_v35, 0 }
0x3295   : > { %12513 = vmatprep.subr.msk.bf16.mxu0 %vm3048_vm8, %v8420_v35 }
0x3296   : > { %v8088_v13 = vpop.permute.xlu0 %8087 }
0x3297   : > { %v8414_v59 = vpop.permute.xlu1 %8413 }
0x329a   : > { %v8412_v26 = vpop.permute.xlu0 %8411 }
0x329b   : > { %12300 = vmatmul.mubr.msk.bf16.vlgmr.msra.gmra.mxu0 %vm3048_vm8, %v8084_v10  ;;  %v8418_v61 = vpop.permute.xlu1 %8417 }
0x329c   : > { %12303 = vmatprep.mubr.msk.bf16.mxu0 %vm3048_vm8, %v8086_v42  ;;  %12318 = vmatpush3.bf16.xpose.msra.mxu0 %v8434_v14 }
0x329e   : > { %v8416_v23 = vpop.permute.xlu0 %8415 }
0x329f   : > { %v8740_v19 = vpop.permute.xlu1 %8739 }
0x32a2   : > { %v8748_v39 = vpop.permute.xlu0 %8747 }
0x32a3   : > { %12304 = vmatmul.mubr.msk.bf16.gmra.mxu0 %vm3048_vm8, %v8088_v13  ;;  %12515 = vmatprep.subr.msk.bf16.mxu0 %vm3048_vm8, %v8748_v39  ;;  %v8762_v41 = vsel %vm3048_vm8, %v8748_v39, 0  ;;  %v8744_v29 = vpop.permute.xlu1 %8743 }
0x32a4   : > { %12319 = vmatprep.mubr.msk.bf16.mxu0 %vm3048_vm8, %v8412_v26 }
0x32a6   : > { %v8742_v56 = vpop.permute.xlu0 %8741 }
0x32aa   : > { %v8746_v2 = vpop.permute.xlu0 %8745 }
0x32ab   : > { %12320 = vmatmul.mubr.msk.bf16.vlgmr.msra.gmra.mxu0 %vm3048_vm8, %v8414_v59 }
0x32ac   : > { %12338 = vmatpush3.bf16.xpose.msra.mxu0 %v8762_v41  ;;  %12323 = vmatprep.mubr.msk.bf16.mxu0 %vm3048_vm8, %v8416_v23 }
0x32b3   : > { %12324 = vmatmul.mubr.msk.bf16.gmra.mxu0 %vm3048_vm8, %v8418_v61 }
0x32b4   : > { %12339 = vmatprep.mubr.msk.bf16.mxu0 %vm3048_vm8, %v8740_v19 }
0x32bb   : > { %12340 = vmatmul.mubr.msk.bf16.vlgmr.msra.gmra.mxu0 %vm3048_vm8, %v8742_v56 }
0x32bc   : > { %12343 = vmatprep.mubr.msk.bf16.mxu0 %vm3048_vm8, %v8744_v29 }
0x32c3   : > { %12344 = vmatmul.mubr.msk.bf16.gmra.mxu0 %vm3048_vm8, %v8746_v2 }
0x32e8   : > { %v12281_v52 = vpop.f32.mrf.mxu0 }
0x32e9   : > { %v16579_v15 = vmul.f32 0.5, %v12281_v52 }
0x32ea   : > { %v7826_v53 = vpop.f32.mrf.mxu0 }
0x32eb   : > { %v16581_v11 = vmul.f32 0.5, %v7826_v53  ;;  %v7871_v34 = vsel %vm2187_vm2, %v16579_v15, -inf }
0x32ec   : > { %7872 = vmax.xlane.f32.xlu0 %v7871_v34  ;;  %v12282_v43 = vpop.f32.mrf.mxu0 }
0x32ed   : > { %v16585_v57 = vmul.f32 0.5, %v12282_v43  ;;  %v7865_v27 = vsel %vm2187_vm2, %v16581_v11, -inf }
0x32ee   : > { %7866 = vmax.xlane.f32.xlu1 %v7865_v27  ;;  %v7829_v1 = vpop.f32.mrf.mxu0 }
0x32ef   : > { %v16589_v31 = vmul.f32 0.5, %v7829_v1  ;;  %v7874_v9 = vsel %vm2187_vm2, %v16585_v57, -inf }
0x32f0   : > { %7875 = vmax.xlane.f32.xlu0 %v7874_v9  ;;  %v12285_v32 = vpop.f32.mrf.mxu0 }
0x32f1   : > { %v16593_v30 = vmul.f32 0.5, %v12285_v32  ;;  %v7868_v45 = vsel %vm2187_vm2, %v16589_v31, -inf }
0x32f2   : > { %v7842_v62 = vpop.f32.mrf.mxu0 }
0x32f3   : > { %v16595_v51 = vmul.f32 0.5, %v7842_v62  ;;  %v7883_v28 = vsel %vm2187_vm2, %v16593_v30, -inf }
0x32f4   : > { %7869 = vmax.xlane.f32.xlu0 %v7868_v45  ;;  %7884 = vmax.xlane.f32.xlu1 %v7883_v28  ;;  %v12286_v8 = vpop.f32.mrf.mxu0 }
0x32f5   : > { %v16601_v18 = vmul.f32 0.5, %v12286_v8  ;;  %v7877_v49 = vsel %vm2187_vm2, %v16595_v51, -inf }
0x32f6   : > { %v7845_v40 = vpop.f32.mrf.mxu0 }
0x32f7   : > { %v16603_v37 = vmul.f32 0.5, %v7845_v40  ;;  %v7886_v7 = vsel %vm2187_vm2, %v16601_v18, -inf }
0x32f8   : > { %7878 = vmax.xlane.f32.xlu1 %v7877_v49  ;;  %7887 = vmax.xlane.f32.xlu0 %v7886_v7 }
0x32f9   : > { %v7880_v17 = vsel %vm2187_vm2, %v16603_v37, -inf }
0x32fc   : > { %7881 = vmax.xlane.f32.xlu0 %v7880_v17 }
0x335b   : > { %v12301_v47 = vpop.f32.mrf.mxu0 }
0x335c   : > { %v16611_v54 = vmul.f32 0.5, %v12301_v47 }
0x335d   : > { %v8141_v58 = vpop.f32.mrf.mxu0 }
0x335e   : > { %v16613_v38 = vmul.f32 0.5, %v8141_v58  ;;  %v8186_v55 = vsel %vm2187_vm2, %v16611_v54, -inf }
0x335f   : > { %8187 = vmax.xlane.f32.xlu1 %v8186_v55  ;;  %v12302_v24 = vpop.f32.mrf.mxu0 }
0x3360   : > { %v16617_v12 = vmul.f32 0.5, %v12302_v24  ;;  %v8180_v63 = vsel %vm2187_vm2, %v16613_v38, -inf }
0x3361   : > { %v8144_v46 = vpop.f32.mrf.mxu0 }
0x3362   : > { %v16619_v5 = vmul.f32 0.5, %v8144_v46  ;;  %v8189_v50 = vsel %vm2187_vm2, %v16617_v12, -inf }
0x3363   : > { %8181 = vmax.xlane.f32.xlu1 %v8180_v63  ;;  %v12305_v10 = vpop.f32.mrf.mxu0  ;;  %8190 = vmax.xlane.f32.xlu0 %v8189_v50 }
0x3364   : > { %v16625_v42 = vmul.f32 0.5, %v12305_v10  ;;  %v8183_v13 = vsel %vm2187_vm2, %v16619_v5, -inf }
0x3365   : > { %v8157_v44 = vpop.f32.mrf.mxu0 }
0x3366   : > { %v16627_v6 = vmul.f32 0.5, %v8157_v44  ;;  %v8198_v35 = vsel %vm2187_vm2, %v16625_v42, -inf }
0x3367   : > { %8199 = vmax.xlane.f32.xlu1 %v8198_v35  ;;  %v12306_v26 = vpop.f32.mrf.mxu0  ;;  %8184 = vmax.xlane.f32.xlu0 %v8183_v13 }
0x3368   : > { %v16633_v14 = vmul.f32 0.5, %v12306_v26  ;;  %v8192_v59 = vsel %vm2187_vm2, %v16627_v6, -inf }
0x3369   : > { %v8160_v23 = vpop.f32.mrf.mxu0 }
0x336a   : > { %v16635_v39 = vmul.f32 0.5, %v8160_v23  ;;  %v8201_v41 = vsel %vm2187_vm2, %v16633_v14, -inf }
0x336b   : > { %8193 = vmax.xlane.f32.xlu1 %v8192_v59  ;;  %v12321_v61 = vpop.f32.mrf.mxu0  ;;  %8202 = vmax.xlane.f32.xlu0 %v8201_v41 }
0x336c   : > { %v16641_v19 = vmul.f32 0.5, %v12321_v61  ;;  %v8195_v52 = vsel %vm2187_vm2, %v16635_v39, -inf }
0x336d   : > { %v8470_v56 = vpop.f32.mrf.mxu0 }
0x336e   : > { %v16643_v29 = vmul.f32 0.5, %v8470_v56  ;;  %v8515_v2 = vsel %vm2187_vm2, %v16641_v19, -inf }
0x336f   : > { %8516 = vmax.xlane.f32.xlu1 %v8515_v2  ;;  %v12322_v53 = vpop.f32.mrf.mxu0  ;;  %8196 = vmax.xlane.f32.xlu0 %v8195_v52 }
0x3370   : > { %v16649_v34 = vmul.f32 0.5, %v12322_v53  ;;  %v8509_v1 = vsel %vm2187_vm2, %v16643_v29, -inf }
0x3371   : > { %v8473_v43 = vpop.f32.mrf.mxu0 }
0x3372   : > { %v16651_v27 = vmul.f32 0.5, %v8473_v43  ;;  %v8518_v9 = vsel %vm2187_vm2, %v16649_v34, -inf }
0x3373   : > { %8510 = vmax.xlane.f32.xlu1 %v8509_v1  ;;  %v12325_v32 = vpop.f32.mrf.mxu0  ;;  %8519 = vmax.xlane.f32.xlu0 %v8518_v9 }
0x3374   : > { %v16657_v62 = vmul.f32 0.5, %v12325_v32  ;;  %v8512_v49 = vsel %vm2187_vm2, %v16651_v27, -inf }
0x3375   : > { %v16659_v45 = vpop.xlane.xlu0 %7872  ;;  %v8486_v28 = vpop.f32.mrf.mxu0 }
0x3376   : > { %v16661_v8 = vmul.f32 0.5, %v8486_v28  ;;  %v8527_v40 = vsel %vm2187_vm2, %v16657_v62, -inf }
0x3377   : > { %8528 = vmax.xlane.f32.xlu1 %v8527_v40  ;;  %v12326_v7 = vpop.f32.mrf.mxu0  ;;  %8513 = vmax.xlane.f32.xlu0 %v8512_v49 }
0x3378   : > { %v16667_v17 = vmul.f32 0.5, %v12326_v7  ;;  %v8521_v55 = vsel %vm2187_vm2, %v16661_v8, -inf }
0x3379   : > { %v7876_v47 = vpop.xlane.xlu0 %7875  ;;  %v8489_v58 = vpop.f32.mrf.mxu0 }
0x337a   : > { %v7892_v24 = vsub.f32 %v16585_v57, %v7876_v47  ;;  %v16672_v46 = vmul.f32 0.5, %v8489_v58  ;;  %v8530_v50 = vsel %vm2187_vm2, %v16667_v17, -inf }
0x337b   : > { %8522 = vmax.xlane.f32.xlu1 %v8521_v55  ;;  %v12341_v63 = vpop.f32.mrf.mxu0  ;;  %8531 = vmax.xlane.f32.xlu0 %v8530_v50 }
0x337c   : > { %v16676_v10 = vmul.f32 0.5, %v12341_v63  ;;  %v7903_v23 = vmul.f32 1.442695, %v7892_v24  ;;  %v8524_v57 = vsel %vm2187_vm2, %v16672_v46, -inf }
0x337d   : > { %v7870_v44 = vpop.xlane.xlu0 %7869  ;;  %v8798_v13 = vpop.f32.mrf.mxu0 }
0x337e   : > { %v7890_v35 = vsub.f32 %v16589_v31, %v7870_v44  ;;  %v8843_v26 = vsel %vm2187_vm2, %v16676_v10, -inf  ;;  %v16681_v59 = vmul.f32 0.5, %v8798_v13  ;;  %13211 = vpow2.f32 %v7903_v23 }
0x337f   : > { %8844 = vmax.xlane.f32.xlu1 %v8843_v26  ;;  %v12342_v41 = vpop.f32.mrf.mxu0  ;;  %8525 = vmax.xlane.f32.xlu0 %v8524_v57 }
0x3380   : > { %v16685_v61 = vmul.f32 0.5, %v12342_v41  ;;  %v7899_v2 = vmul.f32 1.442695, %v7890_v35  ;;  %v8837_v53 = vsel %vm2187_vm2, %v16681_v59, -inf }
0x3381   : > { %v7888_v56 = vpop.xlane.xlu0 %7887  ;;  %v8801_v31 = vpop.f32.mrf.mxu0 }
0x3382   : > { %v7896_v52 = vsub.f32 %v16601_v18, %v7888_v56  ;;  %v16690_v43 = vmul.f32 0.5, %v8801_v31  ;;  %v8846_v1 = vsel %vm2187_vm2, %v16685_v61, -inf  ;;  %13213 = vpow2.f32 %v7899_v2 }
0x3383   : > { %8838 = vmax.xlane.f32.xlu1 %v8837_v53  ;;  %v12345_v9 = vpop.f32.mrf.mxu0  ;;  %8847 = vmax.xlane.f32.xlu0 %v8846_v1  ;;  %v7867_v53 = vpop.xlane.xlu1 %7866  ;;  %v7891_v1 = vsub.f32 %v16579_v15, %v16659_v45 }
0x3384   : > { %v16694_v32 = vmul.f32 0.5, %v12345_v9  ;;  %v7911_v40 = vmul.f32 1.442695, %v7896_v52  ;;  %v8840_v58 = vsel %vm2187_vm2, %v16690_v43, -inf }
0x3385   : > { %v7882_v28 = vpop.xlane.xlu0 %7881  ;;  %v8814_v49 = vpop.f32.mrf.mxu0 }
0x3386   : > { %v16696_v18 = vmul.f32 0.5, %v8814_v49  ;;  %v7894_v7 = vsub.f32 %v16603_v37, %v7882_v28  ;;  %v8855_v47 = vsel %vm2187_vm2, %v16694_v32, -inf  ;;  %13215 = vpow2.f32 %v7911_v40 }
0x3387   : > { %8856 = vmax.xlane.f32.xlu1 %v8855_v47  ;;  %v12346_v55 = vpop.f32.mrf.mxu0  ;;  %8841 = vmax.xlane.f32.xlu0 %v8840_v58  ;;  %v7885_v9 = vpop.xlane.xlu1 %7884  ;;  %v7901_v28 = vmul.f32 1.442695, %v7891_v1  ;;  %v7889_v40 = vsub.f32 %v16581_v11, %v7867_v53 }
0x3388   : > { %v16703_v24 = vmul.f32 0.5, %v12346_v55  ;;  %v7907_v50 = vmul.f32 1.442695, %v7894_v7  ;;  %v8849_v35 = vsel %vm2187_vm2, %v16696_v18, -inf  ;;  %v7895_v7 = vsub.f32 %v16593_v30, %v7885_v9 }
0x3389   : > { %v8817_v63 = vpop.f32.mrf.mxu0  ;;  %v7897_v49 = vmul.f32 1.442695, %v7889_v40 }
0x338a   : > { %v16705_v44 = vmul.f32 0.5, %v8817_v63  ;;  %v8858_v37 = vsel %vm2187_vm2, %v16703_v24, -inf  ;;  %13217 = vpow2.f32 %v7907_v50  ;;  %v7909_v58 = vmul.f32 1.442695, %v7895_v7 }
0x338b   : > { %8850 = vmax.xlane.f32.xlu1 %v8849_v35  ;;  %8859 = vmax.xlane.f32.xlu0 %v8858_v37  ;;  %v16713_v26 = vpop.eup %13211  ;;  %13219 = vpow2.f32 %v7901_v28  ;;  %v7879_v47 = vpop.xlane.xlu1 %7878 }
0x338c   : > { %v8852_v13 = vsel %vm2187_vm2, %v16705_v44, -inf  ;;  %v7922_v57 = vsel %vm2187_vm2, %v16713_v26, 0.0  ;;  %13221 = vpow2.f32 %v7897_v49  ;;  %v7893_v55 = vsub.f32 %v16595_v51, %v7879_v47 }
0x338d   : > { %13223 = vpow2.f32 %v7909_v58 }
0x338e   : > { %v7905_v63 = vmul.f32 1.442695, %v7893_v55 }
0x338f   : > { %8853 = vmax.xlane.f32.xlu0 %v8852_v13  ;;  %v16715_v23 = vpop.eup %13213 }
0x3390   : > { %v7916_v56 = vsel %vm2187_vm2, %v16715_v23, 0.0  ;;  %13225 = vpow2.f32 %v7905_v63 }
0x3393   : > { %7923 = vadd.xlane.f32.xlu0 %v7922_v57  ;;  %v16719_v41 = vpop.eup %13215 }
0x3394   : > { %v7934_v2 = vsel %vm2187_vm2, %v16719_v41, 0.0 }
0x3397   : > { %7917 = vadd.xlane.f32.xlu0 %v7916_v56  ;;  %v16725_v52 = vpop.eup %13217 }
0x3398   : > { %v7928_v31 = vsel %vm2187_vm2, %v16725_v52, 0.0  ;;  %v16736_v50 = vpop.eup %13219 }
0x3399   : > { %v7919_v15 = vsel %vm2187_vm2, %v16736_v50, 0.0  ;;  %v16740_v45 = vpop.eup %13221 }
0x339a   : > { %v7913_v11 = vsel %vm2187_vm2, %v16740_v45, 0.0  ;;  %v16744_v30 = vpop.eup %13223 }
0x339b   : > { %7935 = vadd.xlane.f32.xlu0 %v7934_v2  ;;  %v7931_v51 = vsel %vm2187_vm2, %v16744_v30, 0.0 }
0x339c   : > { %8273 = vrot.lane.b32.xlu1 %v16526_v48, %s17531_s30 }
0x339d   : > { %v16748_v35 = vpop.eup %13225 }
0x339e   : > { %v7925_v37 = vsel %vm2187_vm2, %v16748_v35, 0.0 }
0x339f   : > { %7929 = vadd.xlane.f32.xlu0 %v7928_v31 }
0x33c0   : > { %7920 = vadd.xlane.f32.xlu1 %v7919_v15 }
0x33c4   : > { %7914 = vadd.xlane.f32.xlu1 %v7913_v11 }
0x33c8   : > { %7932 = vadd.xlane.f32.xlu1 %v7931_v51 }
0x33cc   : > { %7926 = vadd.xlane.f32.xlu1 %v7925_v37 }
0x33e8   : > { %v8188_v13 = vpop.xlane.xlu1 %8187 }
0x33e9   : > { %v8206_v57 = vsub.f32 %v16611_v54, %v8188_v13 }
0x33eb   : > { %v8216_v56 = vmul.f32 1.442695, %v8206_v57 }
0x33ec   : > { %v8182_v2 = vpop.xlane.xlu1 %8181  ;;  %v8191_v31 = vpop.xlane.xlu0 %8190 }
0x33ed   : > { %13227 = vpow2.f32 %v8216_v56  ;;  %v8204_v53 = vsub.f32 %v16613_v38, %v8182_v2  ;;  %v8207_v1 = vsub.f32 %v16617_v12, %v8191_v31 }
0x33ef   : > { %v8212_v9 = vmul.f32 1.442695, %v8204_v53  ;;  %v8218_v28 = vmul.f32 1.442695, %v8207_v1 }
0x33f0   : > { %v8200_v40 = vpop.xlane.xlu1 %8199  ;;  %v8185_v49 = vpop.xlane.xlu0 %8184 }
0x33f1   : > { %13229 = vpow2.f32 %v8212_v9  ;;  %v8210_v7 = vsub.f32 %v16625_v42, %v8200_v40  ;;  %v8205_v47 = vsub.f32 %v16619_v5, %v8185_v49 }
0x33f2   : > { %13231 = vpow2.f32 %v8218_v28 }
0x33f3   : > { %v8224_v58 = vmul.f32 1.442695, %v8210_v7  ;;  %v8214_v54 = vmul.f32 1.442695, %v8205_v47 }
0x33f4   : > { %v8194_v55 = vpop.xlane.xlu1 %8193  ;;  %v8203_v63 = vpop.xlane.xlu0 %8202 }
0x33f5   : > { %13233 = vpow2.f32 %v8224_v58  ;;  %v8208_v15 = vsub.f32 %v16627_v6, %v8194_v55  ;;  %v8211_v38 = vsub.f32 %v16633_v14, %v8203_v63 }
0x33f6   : > { %13235 = vpow2.f32 %v8214_v54 }
0x33f7   : > { %v8220_v12 = vmul.f32 1.442695, %v8208_v15  ;;  %v8226_v11 = vmul.f32 1.442695, %v8211_v38 }
0x33f8   : > { %v8517_v51 = vpop.xlane.xlu1 %8516  ;;  %v8197_v37 = vpop.xlane.xlu0 %8196 }
0x33f9   : > { %13237 = vpow2.f32 %v8220_v12  ;;  %v8535_v42 = vsub.f32 %v16641_v19, %v8517_v51  ;;  %v8209_v5 = vsub.f32 %v16635_v39, %v8197_v37 }
0x33fa   : > { %v16761_v13 = vpop.eup %13227  ;;  %13239 = vpow2.f32 %v8226_v11 }
0x33fb   : > { %v8545_v57 = vmul.f32 1.442695, %v8535_v42  ;;  %v8222_v56 = vmul.f32 1.442695, %v8209_v5  ;;  %v8234_v6 = vsel %vm2187_vm2, %v16761_v13, 0.0 }
0x33fc   : > { %v8511_v2 = vpop.xlane.xlu1 %8510  ;;  %8235 = vadd.xlane.f32.xlu1 %v8234_v6  ;;  %v8520_v14 = vpop.xlane.xlu0 %8519 }
0x33fd   : > { %13241 = vpow2.f32 %v8545_v57  ;;  %v8533_v31 = vsub.f32 %v16643_v29, %v8511_v2  ;;  %v8536_v53 = vsub.f32 %v16649_v34, %v8520_v14 }
0x33fe   : > { %v16767_v1 = vpop.eup %13229  ;;  %13243 = vpow2.f32 %v8222_v56 }
0x33ff   : > { %v16769_v39 = vpop.eup %13231  ;;  %v8541_v19 = vmul.f32 1.442695, %v8533_v31  ;;  %v8547_v9 = vmul.f32 1.442695, %v8536_v53  ;;  %v8228_v28 = vsel %vm2187_vm2, %v16767_v1, 0.0 }
0x3400   : > { %v8529_v40 = vpop.xlane.xlu1 %8528  ;;  %8229 = vadd.xlane.f32.xlu1 %v8228_v28  ;;  %v8237_v49 = vsel %vm2187_vm2, %v16769_v39, 0.0  ;;  %v8514_v7 = vpop.xlane.xlu0 %8513 }
0x3401   : > { %13245 = vpow2.f32 %v8541_v19  ;;  %v8539_v29 = vsub.f32 %v16657_v62, %v8529_v40  ;;  %8238 = vadd.xlane.f32.xlu0 %v8237_v49  ;;  %v8534_v34 = vsub.f32 %v16651_v27, %v8514_v7 }
0x3402   : > { %v16777_v47 = vpop.eup %13233  ;;  %13247 = vpow2.f32 %v8547_v9 }
0x3403   : > { %v16779_v58 = vpop.eup %13235  ;;  %v8553_v54 = vmul.f32 1.442695, %v8539_v29  ;;  %v8543_v55 = vmul.f32 1.442695, %v8534_v34  ;;  %v8246_v63 = vsel %vm2187_vm2, %v16777_v47, 0.0 }
0x3404   : > { %v8523_v15 = vpop.xlane.xlu1 %8522  ;;  %8247 = vadd.xlane.f32.xlu1 %v8246_v63  ;;  %v8231_v38 = vsel %vm2187_vm2, %v16779_v58, 0.0  ;;  %v8532_v27 = vpop.xlane.xlu0 %8531 }
0x3405   : > { %13249 = vpow2.f32 %v8553_v54  ;;  %v8537_v62 = vsub.f32 %v16661_v8, %v8523_v15  ;;  %8232 = vadd.xlane.f32.xlu0 %v8231_v38  ;;  %v8540_v11 = vsub.f32 %v16667_v17, %v8532_v27 }
0x3406   : > { %v16786_v12 = vpop.eup %13237  ;;  %13251 = vpow2.f32 %v8543_v55 }
0x3407   : > { %v16789_v51 = vpop.eup %13239  ;;  %v8549_v37 = vmul.f32 1.442695, %v8537_v62  ;;  %v8240_v42 = vsel %vm2187_vm2, %v16786_v12, 0.0  ;;  %v8555_v5 = vmul.f32 1.442695, %v8540_v11 }
0x3408   : > { %v8845_v57 = vpop.xlane.xlu1 %8844  ;;  %8241 = vadd.xlane.f32.xlu1 %v8240_v42  ;;  %v8249_v56 = vsel %vm2187_vm2, %v16789_v51, 0.0  ;;  %v8526_v6 = vpop.xlane.xlu0 %8525 }
0x3409   : > { %13253 = vpow2.f32 %v8549_v37  ;;  %v8863_v8 = vsub.f32 %v16676_v10, %v8845_v57  ;;  %8250 = vadd.xlane.f32.xlu0 %v8249_v56  ;;  %v8538_v17 = vsub.f32 %v16672_v46, %v8526_v6 }
0x340a   : > { %v16796_v2 = vpop.eup %13241  ;;  %13255 = vpow2.f32 %v8555_v5 }
0x340b   : > { %v16799_v14 = vpop.eup %13243  ;;  %v8563_v31 = vsel %vm2187_vm2, %v16796_v2, 0.0  ;;  %v8873_v53 = vmul.f32 1.442695, %v8863_v8  ;;  %v8551_v19 = vmul.f32 1.442695, %v8538_v17 }
0x340c   : > { %v8839_v9 = vpop.xlane.xlu1 %8838  ;;  %8564 = vadd.xlane.f32.xlu1 %v8563_v31  ;;  %v8243_v28 = vsel %vm2187_vm2, %v16799_v14, 0.0  ;;  %v8848_v40 = vpop.xlane.xlu0 %8847 }
0x340d   : > { %v8861_v10 = vsub.f32 %v16681_v59, %v8839_v9  ;;  %8244 = vadd.xlane.f32.xlu0 %v8243_v28  ;;  %13257 = vpow2.f32 %v8551_v19  ;;  %v8864_v7 = vsub.f32 %v16685_v61, %v8848_v40 }
0x340e   : > { %v16806_v49 = vpop.eup %13245  ;;  %13259 = vpow2.f32 %v8873_v53 }
0x340f   : > { %v16808_v46 = vpop.eup %13247  ;;  %v8557_v29 = vsel %vm2187_vm2, %v16806_v49, 0.0  ;;  %v8869_v34 = vmul.f32 1.442695, %v8861_v10  ;;  %v8875_v38 = vmul.f32 1.442695, %v8864_v7 }
0x3410   : > { %8558 = vadd.xlane.f32.xlu1 %v8557_v29  ;;  %v8566_v54 = vsel %vm2187_vm2, %v16808_v46, 0.0  ;;  %v8857_v55 = vpop.xlane.xlu1 %8856  ;;  %v8842_v59 = vpop.xlane.xlu0 %8841 }
0x3411   : > { %8567 = vadd.xlane.f32.xlu0 %v8566_v54  ;;  %13261 = vpow2.f32 %v8869_v34  ;;  %v8862_v62 = vsub.f32 %v16690_v43, %v8842_v59  ;;  %v8867_v8 = vsub.f32 %v16694_v32, %v8857_v55 }
0x3412   : > { %v16815_v63 = vpop.eup %13249  ;;  %13263 = vpow2.f32 %v8875_v38 }
0x3413   : > { %v16817_v15 = vpop.eup %13251  ;;  %v8575_v61 = vsel %vm2187_vm2, %v16815_v63, 0.0  ;;  %v8871_v43 = vmul.f32 1.442695, %v8862_v62  ;;  %v8881_v53 = vmul.f32 1.442695, %v8867_v8 }
0x3414   : > { %8576 = vadd.xlane.f32.xlu1 %v8575_v61  ;;  %v8560_v27 = vsel %vm2187_vm2, %v16817_v15, 0.0  ;;  %v8851_v11 = vpop.xlane.xlu1 %8850  ;;  %v8860_v57 = vpop.xlane.xlu0 %8859 }
0x3415   : > { %8561 = vadd.xlane.f32.xlu0 %v8560_v27  ;;  %v8865_v42 = vsub.f32 %v16696_v18, %v8851_v11  ;;  %v8868_v19 = vsub.f32 %v16703_v24, %v8860_v57 }
0x3416   : > { %v16824_v37 = vpop.eup %13253 }
0x3417   : > { %v16827_v5 = vpop.eup %13255  ;;  %v8569_v56 = vsel %vm2187_vm2, %v16824_v37, 0.0  ;;  %v8877_v6 = vmul.f32 1.442695, %v8865_v42  ;;  %v8883_v10 = vmul.f32 1.442695, %v8868_v19 }
0x3418   : > { %8570 = vadd.xlane.f32.xlu1 %v8569_v56  ;;  %v8578_v17 = vsel %vm2187_vm2, %v16827_v5, 0.0  ;;  %v16834_v31 = vpop.permute.xlu1 %8273  ;;  %v8854_v28 = vpop.xlane.xlu0 %8853 }
0x3419   : > { %8579 = vadd.xlane.f32.xlu0 %v8578_v17  ;;  %13265 = vpow2.f32 %v8877_v6  ;;  %12512 = vmatprep.subr.msk.bf16.mxu1 %vm2250_vm3, %v16834_v31  ;;  %v8866_v40 = vsub.f32 %v16705_v44, %v8854_v28 }
0x341a   : > { %v16838_v18 = vpop.eup %13257  ;;  %13267 = vpow2.f32 %v8871_v43 }
0x341b   : > { %v8572_v32 = vsel %vm2187_vm2, %v16838_v18, 0.0  ;;  %v16843_v9 = vpop.eup %13259  ;;  %13269 = vpow2.f32 %v8881_v53  ;;  %v8879_v24 = vmul.f32 1.442695, %v8866_v40 }
0x341c   : > { %v8891_v7 = vsel %vm2187_vm2, %v16843_v9, 0.0  ;;  %13271 = vpow2.f32 %v8883_v10  ;;  %v7924_v8 = vpop.xlane.xlu0 %7923 }
0x341d   : > { %8573 = vadd.xlane.f32.xlu0 %v8572_v32  ;;  %13273 = vpow2.f32 %v8879_v24 }
0x341e   : > { %v16848_v29 = vpop.eup %13261 }
0x341f   : > { %v16850_v34 = vpop.eup %13263  ;;  %v8885_v54 = vsel %vm2187_vm2, %v16848_v29, 0.0 }
0x3420   : > { %v8894_v59 = vsel %vm2187_vm2, %v16850_v34, 0.0  ;;  %v7918_v43 = vpop.xlane.xlu0 %7917 }
0x3421   : > { %8892 = vadd.xlane.f32.xlu0 %v8891_v7 }
0x3424   : > { %v7936_v17 = vpop.xlane.xlu0 %7935 }
0x3425   : > { %8886 = vadd.xlane.f32.xlu0 %v8885_v54 }
0x3426   : > { %v16854_v55 = vpop.eup %13265 }
0x3427   : > { %v8897_v44 = vsel %vm2187_vm2, %v16854_v55, 0.0  ;;  %v16860_v38 = vpop.eup %13267 }
0x3428   : > { %8898 = vadd.xlane.f32.xlu1 %v8897_v44  ;;  %v8888_v61 = vsel %vm2187_vm2, %v16860_v38, 0.0  ;;  %v16864_v62 = vpop.eup %13269  ;;  %v7930_v19 = vpop.xlane.xlu0 %7929 }
0x3429   : > { %8895 = vadd.xlane.f32.xlu0 %v8894_v59  ;;  %v8903_v27 = vsel %vm2187_vm2, %v16864_v62, 0.0  ;;  %v16868_v11 = vpop.eup %13271 }
0x342a   : > { %v8906_v42 = vsel %vm2187_vm2, %v16868_v11, 0.0  ;;  %v16872_v57 = vpop.eup %13273 }
0x342b   : > { %v8900_v56 = vsel %vm2187_vm2, %v16872_v57, 0.0 }
0x342d   : > { %8889 = vadd.xlane.f32.xlu0 %v8888_v61 }
0x3431   : > { %8904 = vadd.xlane.f32.xlu0 %v8903_v27 }
0x3435   : > { %8907 = vadd.xlane.f32.xlu0 %v8906_v42 }
0x3439   : > { %8901 = vadd.xlane.f32.xlu0 %v8900_v56  ;;  %8929 = vrot.lane.b32.xlu1 %v16526_v48, %s17532_s5 }
0x3449   : > { %v7921_v6 = vpop.xlane.xlu1 %7920 }
0x344a   : > { %13275 = vrcp.f32 %v7921_v6 }
0x344b   : > { %13277 = vrcp.f32 %v7918_v43 }
0x344c   : > { %13279 = vrcp.f32 %v7924_v8  ;;  %v8288_v8 = vsel %vm2250_vm3, %v16834_v31, 0 }
0x344d   : > { %v7915_v53 = vpop.xlane.xlu1 %7914 }
0x344e   : > { %13281 = vrcp.f32 %v7915_v53 }
0x344f   : > { %8601 = vrot.lane.b32.xlu0 %v16526_v48, %s17523_s8 }
0x3451   : > { %v7933_v32 = vpop.xlane.xlu1 %7932 }
0x3452   : > { %13283 = vrcp.f32 %v7933_v32 }
0x3453   : > { %13285 = vrcp.f32 %v7930_v19 }
0x3454   : > { %13287 = vrcp.f32 %v7936_v17 }
0x3455   : > { %v7927_v28 = vpop.xlane.xlu1 %7926 }
0x3456   : > { %13289 = vrcp.f32 %v7927_v28 }
0x3457   : > { %v13276_v10 = vpop.eup %13275 }
0x3458   : > { %v13278_v40 = vpop.eup %13277  ;;  %v7947_v54 = vmul.f32 %v13276_v10, %v16736_v50 }
0x3459   : > { %v13280_v7 = vpop.eup %13279  ;;  %v7946_v59 = vmul.f32 %v13278_v40, %v16715_v23 }
0x345a   : > { %v7948_v61 = vmul.f32 %v13280_v7, %v16713_v26 }
0x345b   : > { %v13282_v24 = vpop.eup %13281 }
0x345c   : > { %v7945_v44 = vmul.f32 %v13282_v24, %v16740_v45  ;;  %v7954_v27 = vpack.c.bf16 %v7948_v61, %v7947_v54 }
0x345e   : > { %v7953_v48 = vpack.c.bf16 %v7946_v59, %v7945_v44 }
0x345f   : > { %v13284_v42 = vpop.eup %13283 }
0x3460   : > { %12289 = vmatprep.mubr.msk.bf16.mxu1 %vm2187_vm2, %v7953_v48  ;;  %v13286_v56 = vpop.eup %13285  ;;  %v7951_v45 = vmul.f32 %v13284_v42, %v16744_v30 }
0x3461   : > { %12290 = vmatmul.mubr.msk.bf16.vlgmr.msra.gmra.mxu1 %vm2187_vm2, %v7954_v27  ;;  %v13288_v43 = vpop.eup %13287  ;;  %v7950_v26 = vmul.f32 %v13286_v56, %v16725_v52 }
0x3462   : > { %12308 = vmatpush3.bf16.msra.mxu1 %v8288_v8  ;;  %v7952_v6 = vmul.f32 %v13288_v43, %v16719_v41 }
0x3463   : > { %v13290_v50 = vpop.eup %13289 }
0x3464   : > { %v7949_v23 = vmul.f32 %v13290_v50, %v16748_v35  ;;  %v7956_v53 = vpack.c.bf16 %v7952_v6, %v7951_v45 }
0x3466   : > { %v7955_v17 = vpack.c.bf16 %v7950_v26, %v7949_v23 }
0x3468   : > { %12293 = vmatprep.mubr.msk.bf16.mxu1 %vm2187_vm2, %v7955_v17 }
0x3469   : > { %12294 = vmatmul.mubr.msk.bf16.gmra.mxu1 %vm2187_vm2, %v7956_v53 }
0x3485   : > { %v8236_v19 = vpop.xlane.xlu1 %8235 }
0x3489   : > { %v8230_v32 = vpop.xlane.xlu1 %8229 }
0x348a   : > { %v8239_v31 = vpop.xlane.xlu0 %8238 }
0x348b   : > { %13291 = vrcp.f32 %v8239_v31 }
0x348c   : > { %13293 = vrcp.f32 %v8230_v32 }
0x348d   : > { %v8248_v28 = vpop.xlane.xlu1 %8247  ;;  %13295 = vrcp.f32 %v8236_v19 }
0x348e   : > { %v8233_v30 = vpop.xlane.xlu0 %8232 }
0x348f   : > { %13297 = vrcp.f32 %v8233_v30 }
0x3491   : > { %v8242_v35 = vpop.xlane.xlu1 %8241 }
0x3492   : > { %v8251_v10 = vpop.xlane.xlu0 %8250 }
0x3493   : > { %13299 = vrcp.f32 %v8251_v10 }
0x3494   : > { %13301 = vrcp.f32 %v8242_v35 }
0x3495   : > { %v8565_v41 = vpop.xlane.xlu1 %8564  ;;  %13303 = vrcp.f32 %v8248_v28 }
0x3496   : > { %v8245_v52 = vpop.xlane.xlu0 %8244 }
0x3497   : > { %13305 = vrcp.f32 %v8245_v52 }
0x3498   : > { %v13292_v40 = vpop.eup %13291 }
0x3499   : > { %v13294_v7 = vpop.eup %13293  ;;  %v8559_v24 = vpop.xlane.xlu1 %8558  ;;  %v8263_v61 = vmul.f32 %v13292_v40, %v16769_v39 }
0x349a   : > { %v8568_v54 = vpop.xlane.xlu0 %8567  ;;  %v13296_v44 = vpop.eup %13295  ;;  %13307 = vrcp.f32 %v8559_v24  ;;  %v8260_v48 = vmul.f32 %v13294_v7, %v16767_v1 }
0x349b   : > { %v8262_v42 = vmul.f32 %v13296_v44, %v16761_v13 }
0x349c   : > { %v13298_v59 = vpop.eup %13297 }
0x349d   : > { %v8261_v27 = vmul.f32 %v13298_v59, %v16779_v58  ;;  %v8269_v43 = vpack.c.bf16 %v8263_v61, %v8262_v42 }
0x349e   : > { %v8562_v56 = vpop.xlane.xlu0 %8561 }
0x349f   : > { %13309 = vrcp.f32 %v8562_v56  ;;  %v8268_v8 = vpack.c.bf16 %v8261_v27, %v8260_v48 }
0x34a0   : > { %v13300_v50 = vpop.eup %13299  ;;  %13311 = vrcp.f32 %v8568_v54 }
0x34a1   : > { %12309 = vmatprep.mubr.msk.bf16.mxu1 %vm2187_vm2, %v8268_v8  ;;  %v13302_v45 = vpop.eup %13301  ;;  %v8267_v6 = vmul.f32 %v13300_v50, %v16789_v51 }
0x34a2   : > { %12310 = vmatmul.mubr.msk.bf16.vlgmr.msra.gmra.mxu1 %vm2187_vm2, %v8269_v43  ;;  %v8580_v23 = vpop.xlane.xlu0 %8579  ;;  %v13304_v26 = vpop.eup %13303  ;;  %v8264_v1 = vmul.f32 %v13302_v45, %v16786_v12 }
0x34a3   : > { %v8266_v17 = vmul.f32 %v13304_v26, %v16777_v47  ;;  %v8577_v12 = vpop.xlane.xlu1 %8576 }
0x34a4   : > { %v13306_v39 = vpop.eup %13305 }
0x34a5   : > { %v8265_v58 = vmul.f32 %v13306_v39, %v16799_v14  ;;  %v8271_v19 = vpack.c.bf16 %v8267_v6, %v8266_v17 }
0x34a6   : > { %v8574_v13 = vpop.xlane.xlu0 %8573 }
0x34a7   : > { %v8270_v53 = vpack.c.bf16 %v8265_v58, %v8264_v1  ;;  %v13308_v32 = vpop.eup %13307  ;;  %v8571_v47 = vpop.xlane.xlu1 %8570  ;;  %13313 = vrcp.f32 %v8574_v13 }
0x34a8   : > { %v8589_v30 = vmul.f32 %v13308_v32, %v16806_v49  ;;  %13315 = vrcp.f32 %v8565_v41 }
0x34a9   : > { %12313 = vmatprep.mubr.msk.bf16.mxu1 %vm2187_vm2, %v8270_v53  ;;  %13317 = vrcp.f32 %v8571_v47 }
0x34aa   : > { %12314 = vmatmul.mubr.msk.bf16.gmra.mxu1 %vm2187_vm2, %v8271_v19  ;;  %v8893_v31 = vpop.xlane.xlu0 %8892  ;;  %13319 = vrcp.f32 %v8580_v23 }
0x34ac   : > { %v13310_v28 = vpop.eup %13309 }
0x34ad   : > { %v8590_v51 = vmul.f32 %v13310_v28, %v16817_v15  ;;  %v13312_v49 = vpop.eup %13311 }
0x34ae   : > { %v8887_v35 = vpop.xlane.xlu0 %8886  ;;  %v8592_v48 = vmul.f32 %v13312_v49, %v16808_v46 }
0x34af   : > { %v8597_v10 = vpack.c.bf16 %v8590_v51, %v8589_v30 }
0x34b1   : > { %12329 = vmatprep.mubr.msk.bf16.mxu1 %vm2187_vm2, %v8597_v10  ;;  %v8899_v15 = vpop.xlane.xlu1 %8898 }
0x34b2   : > { %v8896_v14 = vpop.xlane.xlu0 %8895 }
0x34b4   : > { %v13314_v44 = vpop.eup %13313 }
0x34b5   : > { %v13316_v59 = vpop.eup %13315  ;;  %v8594_v41 = vmul.f32 %v13314_v44, %v16838_v18  ;;  %v8930_v56 = vpop.permute.xlu1 %8929 }
0x34b6   : > { %v8890_v52 = vpop.xlane.xlu0 %8889  ;;  %v13318_v61 = vpop.eup %13317  ;;  %v8591_v27 = vmul.f32 %v13316_v59, %v16796_v2  ;;  %v8944_v18 = vsel %vm2250_vm3, %v8930_v56, 0 }
0x34b7   : > { %13321 = vrcp.f32 %v8890_v52  ;;  %v8593_v8 = vmul.f32 %v13318_v61, %v16824_v37  ;;  %v13320_v46 = vpop.eup %13319 }
0x34b8   : > { %13323 = vrcp.f32 %v8577_v12  ;;  %v8598_v43 = vpack.c.bf16 %v8592_v48, %v8591_v27  ;;  %v8596_v26 = vmul.f32 %v13320_v46, %v16827_v5 }
0x34b9   : > { %13325 = vrcp.f32 %v8887_v35  ;;  %v8599_v50 = vpack.c.bf16 %v8594_v41, %v8593_v8  ;;  %v12980_v35 = vld [vmem:[%s17539_s12] sm:$0xff]  }
0x34ba   : > { %v8905_v40 = vpop.xlane.xlu0 %8904  ;;  %13327 = vrcp.f32 %v8896_v14 }
0x34be   : > { %v8908_v7 = vpop.xlane.xlu0 %8907 }
0x34c2   : > { %v8902_v24 = vpop.xlane.xlu0 %8901 }
0x34c3   : > { %13329 = vrcp.f32 %v8902_v24 }
0x34c4   : > { %13331 = vrcp.f32 %v8893_v31  ;;  %v13322_v45 = vpop.eup %13321 }
0x34c5   : > { %13333 = vrcp.f32 %v8899_v15  ;;  %v13324_v2 = vpop.eup %13323  ;;  %v8918_v37 = vmul.f32 %v13322_v45, %v16860_v38 }
0x34c6   : > { %v8602_v54 = vpop.permute.xlu0 %8601  ;;  %v13326_v23 = vpop.eup %13325  ;;  %13335 = vrcp.f32 %v8908_v7  ;;  %v8595_v39 = vmul.f32 %v13324_v2, %v16815_v63 }
0x34c7   : > { %v8616_v42 = vsel %vm2250_vm3, %v8602_v54, 0  ;;  %12514 = vmatprep.subr.msk.bf16.mxu1 %vm2250_vm3, %v8602_v54  ;;  %13337 = vrcp.f32 %v8905_v40  ;;  %v8917_v6 = vmul.f32 %v13326_v23, %v16848_v29  ;;  %v13328_v58 = vpop.eup %13327  ;;  %v12979_v29 = vld [vmem:[%s17539_s12 + $0x8] sm:$0xff]  }
0x34c8   : > { %12328 = vmatpush3.bf16.msra.mxu1 %v8616_v42  ;;  %v8600_v1 = vpack.c.bf16 %v8596_v26, %v8595_v39  ;;  %v8920_v19 = vmul.f32 %v13328_v58, %v16850_v34 }
0x34c9   : > { %12516 = vmatprep.subr.msk.bf16.mxu1 %vm2250_vm3, %v8930_v56  ;;  %v8925_v13 = vpack.c.bf16 %v8918_v37, %v8917_v6 }
0x34cb   : > { %12330 = vmatmul.mubr.msk.bf16.vlgmr.msra.gmra.mxu1 %vm2187_vm2, %v8598_v43 }
0x34cc   : > { %12333 = vmatprep.mubr.msk.bf16.mxu1 %vm2187_vm2, %v8599_v50  ;;  %12348 = vmatpush3.bf16.msra.mxu1 %v8944_v18 }
0x34cd   : > { %12367 = vmatprep.subr.bf16.mxu1 %v14391_v0 }
0x34d0   : > { %v13330_v17 = vpop.eup %13329 }
0x34d1   : > { %v13332_v53 = vpop.eup %13331  ;;  %v8922_v38 = vmul.f32 %v13330_v17, %v16872_v57 }
0x34d2   : > { %v13334_v5 = vpop.eup %13333  ;;  %v8919_v32 = vmul.f32 %v13332_v53, %v16843_v9 }
0x34d3   : > { %12334 = vmatmul.mubr.msk.bf16.gmra.mxu1 %vm2187_vm2, %v8600_v1  ;;  %v8921_v63 = vmul.f32 %v13334_v5, %v16854_v55  ;;  %v13336_v28 = vpop.eup %13335 }
0x34d4   : > { %12349 = vmatprep.mubr.msk.bf16.mxu1 %vm2187_vm2, %v8925_v13  ;;  %v8926_v31 = vpack.c.bf16 %v8920_v19, %v8919_v32  ;;  %v13338_v51 = vpop.eup %13337  ;;  %v8924_v12 = vmul.f32 %v13336_v28, %v16868_v11 }
0x34d5   : > { %v8927_v30 = vpack.c.bf16 %v8922_v38, %v8921_v63  ;;  %v8923_v34 = vmul.f32 %v13338_v51, %v16864_v62  ;;  %v12981_v51 = vld [vmem:[#allocation21 + $0x8] sm:$0xff]  }
0x34d6   : > { %12357 = vmatprep.subr.bf16.mxu0 %v12981_v51 }
0x34d7   : > { %v8928_v9 = vpack.c.bf16 %v8924_v12, %v8923_v34  ;;  %12358 = vmatpush3.bf16.msra.mxu0 %v12981_v51 }
0x34db   : > { %12350 = vmatmul.mubr.msk.bf16.vlgmr.msra.gmra.mxu1 %vm2187_vm2, %v8926_v31 }
0x34dc   : > { %12353 = vmatprep.mubr.msk.bf16.mxu1 %vm2187_vm2, %v8927_v30  ;;  %12368 = vmatpush3.bf16.msra.mxu1 %v12979_v29 }
0x34dd   : > { %12369 = vmatprep.subr.bf16.mxu1 %v14391_v0 }
0x34e0   : > { %12370 = vmatpush3.bf16.msra.mxu1 %v12980_v35 }
0x34e3   : > { %12354 = vmatmul.mubr.msk.bf16.gmra.mxu1 %vm2187_vm2, %v8928_v9 }
0x34e4   : > { %12371 = vmatprep.mubr.msk.bf16.mxu1 %vm14392_vm0, %v14391_v0 }
0x34eb   : > { %12372 = vmatmul.mubr.msk.bf16.vlgmr.msra.gmra.mxu1 %vm2022_vm1, %v16520_v25 }
0x3521   : > { %v12291_v55 = vpop.f32.mrf.mxu1 }
0x3522   : > { %v11273_v57 = vpack.c.bf16 %v12291_v55, %v12291_v55 }
0x3523   : > { %v8006_v10 = vpop.f32.mrf.mxu1 }
0x3524   : > { %8071 = vst.msk [vmem:[#allocation3 + $0x8] sm:$0xf] %vm3162_vm10, %v11273_v57  ;;  %v11271_v11 = vpack.c.bf16 %v8006_v10, %v8006_v10 }
0x3525   : > { %v12292_v14 = vpop.f32.mrf.mxu1 }
0x3526   : > { %8069 = vst.msk [vmem:[#allocation3] sm:$0xf] %vm3162_vm10, %v11271_v11  ;;  %v11274_v62 = vpack.c.bf16 %v12292_v14, %v12292_v14 }
0x3527   : > { %v8009_v47 = vpop.f32.mrf.mxu1 }
0x3528   : > { %8072 = vst.msk [vmem:[#allocation3 + $0xc] sm:$0xf] %vm3162_vm10, %v11274_v62  ;;  %v11272_v52 = vpack.c.bf16 %v8009_v47, %v8009_v47 }
0x3529   : > { %v12295_v40 = vpop.f32.mrf.mxu1 }
0x352a   : > { %8070 = vst.msk [vmem:[#allocation3 + $0x4] sm:$0xf] %vm3162_vm10, %v11272_v52  ;;  %v11277_v7 = vpack.c.bf16 %v12295_v40, %v12295_v40 }
0x352b   : > { %v8022_v49 = vpop.f32.mrf.mxu1 }
0x352c   : > { %8075 = vst.msk [vmem:[#allocation3 + $0x18] sm:$0xf] %vm3162_vm10, %v11277_v7  ;;  %v11275_v25 = vpack.c.bf16 %v8022_v49, %v8022_v49 }
0x352d   : > { %v12296_v15 = vpop.f32.mrf.mxu1 }
0x352e   : > { %8073 = vst.msk [vmem:[#allocation3 + $0x10] sm:$0xf] %vm3162_vm10, %v11275_v25  ;;  %v11278_v24 = vpack.c.bf16 %v12296_v15, %v12296_v15 }
0x352f   : > { %v8025_v44 = vpop.f32.mrf.mxu1 }
0x3530   : > { %8076 = vst.msk [vmem:[#allocation3 + $0x1c] sm:$0xf] %vm3162_vm10, %v11278_v24  ;;  %v11276_v59 = vpack.c.bf16 %v8025_v44, %v8025_v44 }
0x3532   : > { %8074 = vst.msk [vmem:[#allocation3 + $0x14] sm:$0xf] %vm3162_vm10, %v11276_v59 }
0x3562   : > { %v12311_v61 = vpop.f32.mrf.mxu1 }
0x3563   : > { %v11281_v48 = vpack.c.bf16 %v12311_v61, %v12311_v61 }
0x3564   : > { %v8324_v54 = vpop.f32.mrf.mxu1 }
0x3565   : > { %8383 = vrot.lane.b32.xlu0 %v11281_v48, %s17533_s2  ;;  %v11279_v27 = vpack.c.bf16 %v8324_v54, %v8324_v54 }
0x3566   : > { %v12312_v41 = vpop.f32.mrf.mxu1 }
0x3567   : > { %v11282_v8 = vpack.c.bf16 %v12312_v41, %v12312_v41 }
0x3568   : > { %v8327_v42 = vpop.f32.mrf.mxu1 }
0x3569   : > { %8379 = vrot.lane.b32.xlu0 %v11279_v27, %s17533_s2  ;;  %v11280_v50 = vpack.c.bf16 %v8327_v42, %v8327_v42 }
0x356a   : > { %v12315_v56 = vpop.f32.mrf.mxu1 }
0x356b   : > { %v11285_v2 = vpack.c.bf16 %v12315_v56, %v12315_v56 }
0x356c   : > { %v8340_v43 = vpop.f32.mrf.mxu1 }
0x356d   : > { %8385 = vrot.lane.b32.xlu0 %v11282_v8, %s17533_s2  ;;  %v11283_v26 = vpack.c.bf16 %v8340_v43, %v8340_v43 }
0x356e   : > { %v12316_v46 = vpop.f32.mrf.mxu1 }
0x356f   : > { %v11286_v45 = vpack.c.bf16 %v12316_v46, %v12316_v46 }
0x3570   : > { %v8343_v18 = vpop.f32.mrf.mxu1 }
0x3571   : > { %8381 = vrot.lane.b32.xlu0 %v11280_v50, %s17533_s2  ;;  %8393 = vrot.lane.b32.xlu1 %v11286_v45, %s17533_s2  ;;  %v11284_v23 = vpack.c.bf16 %v8343_v18, %v8343_v18 }
0x3575   : > { %8391 = vrot.lane.b32.xlu0 %v11285_v2, %s17533_s2  ;;  %8389 = vrot.lane.b32.xlu1 %v11284_v23, %s17533_s2 }
0x3579   : > { %8387 = vrot.lane.b32.xlu0 %v11283_v26, %s17533_s2 }
0x358b   : > { %v12331_v37 = vpop.f32.mrf.mxu1 }
0x358c   : > { %v11289_v39 = vpack.c.bf16 %v12331_v37, %v12331_v37 }
0x358d   : > { %v8652_v6 = vpop.f32.mrf.mxu1 }
0x358e   : > { %8711 = vrot.lane.b32.xlu0 %v11289_v39, %s17524_s11  ;;  %v11287_v58 = vpack.c.bf16 %v8652_v6, %v8652_v6 }
0x358f   : > { %v12332_v1 = vpop.f32.mrf.mxu1 }
0x3590   : > { %v11290_v13 = vpack.c.bf16 %v12332_v1, %v12332_v1 }
0x3591   : > { %v8655_v17 = vpop.f32.mrf.mxu1 }
0x3592   : > { %8707 = vrot.lane.b32.xlu0 %v11287_v58, %s17524_s11  ;;  %8713 = vrot.lane.b32.xlu1 %v11290_v13, %s17524_s11  ;;  %v11288_v5 = vpack.c.bf16 %v8655_v17, %v8655_v17 }
0x3593   : > { %v12335_v53 = vpop.f32.mrf.mxu1 }
0x3594   : > { %v11293_v57 = vpack.c.bf16 %v12335_v53, %v12335_v53 }
0x3595   : > { %v8668_v19 = vpop.f32.mrf.mxu1 }
0x3596   : > { %v11291_v38 = vpack.c.bf16 %v8668_v19, %v8668_v19  ;;  %8709 = vrot.lane.b32.xlu1 %v11288_v5, %s17524_s11 }
0x3597   : > { %v12336_v32 = vpop.f32.mrf.mxu1 }
0x3598   : > { %8715 = vrot.lane.b32.xlu0 %v11291_v38, %s17524_s11  ;;  %v11294_v62 = vpack.c.bf16 %v12336_v32, %v12336_v32 }
0x3599   : > { %v8671_v63 = vpop.f32.mrf.mxu1 }
0x359a   : > { %v11292_v29 = vpack.c.bf16 %v8671_v63, %v8671_v63  ;;  %v11174_v63 = vld [vmem:[#allocation16 + $0x1] ss:$0 sm:$0xff] }
0x359b   : > { %v12351_v31 = vpop.f32.mrf.mxu1 }
0x359c   : > { %v11297_v28 = vpack.c.bf16 %v12351_v31, %v12351_v31  ;;  %8717 = vrot.lane.b32.xlu1 %v11292_v29, %s17524_s11 }
0x359d   : > { %v8980_v30 = vpop.f32.mrf.mxu1 }
0x359e   : > { %9039 = vrot.lane.b32.xlu0 %v11297_v28, %s17535_s16  ;;  %v11295_v12 = vpack.c.bf16 %v8980_v30, %v8980_v30 }
0x359f   : > { %v12352_v35 = vpop.f32.mrf.mxu1 }
0x35a0   : > { %v11298_v34 = vpack.c.bf16 %v12352_v35, %v12352_v35 }
0x35a1   : > { %v8983_v9 = vpop.f32.mrf.mxu1 }
0x35a2   : > { %9035 = vrot.lane.b32.xlu0 %v11295_v12, %s17535_s16  ;;  %9041 = vrot.lane.b32.xlu1 %v11298_v34, %s17535_s16  ;;  %v11296_v10 = vpack.c.bf16 %v8983_v9, %v8983_v9 }
0x35a3   : > { %v12355_v55 = vpop.f32.mrf.mxu1 }
0x35a4   : > { %v11301_v7 = vpack.c.bf16 %v12355_v55, %v12355_v55 }
0x35a5   : > { %v8996_v11 = vpop.f32.mrf.mxu1 }
0x35a6   : > { %8719 = vrot.lane.b32.xlu0 %v11293_v57, %s17524_s11  ;;  %9037 = vrot.lane.b32.xlu1 %v11296_v10, %s17535_s16  ;;  %v11299_v47 = vpack.c.bf16 %v8996_v11, %v8996_v11 }
0x35a7   : > { %v12356_v14 = vpop.f32.mrf.mxu1 }
0x35a8   : > { %v11302_v24 = vpack.c.bf16 %v12356_v14, %v12356_v14 }
0x35a9   : > { %v8999_v52 = vpop.f32.mrf.mxu1 }
0x35aa   : > { %9043 = vrot.lane.b32.xlu0 %v11299_v47, %s17535_s16  ;;  %8721 = vrot.lane.b32.xlu1 %v11294_v62, %s17524_s11  ;;  %v11300_v49 = vpack.c.bf16 %v8999_v52, %v8999_v52 }
0x35ab   : > { %v16971_v40 = vpop.f32.mrf.mxu1 }
0x35ad   : > { %v12373_v25 = vpop.f32.mrf.mxu1 }
0x35ae   : > { %9047 = vrot.lane.b32.xlu0 %v11301_v7, %s17535_s16  ;;  %9045 = vrot.lane.b32.xlu1 %v11300_v49, %s17535_s16 }
0x35af   : > { %v9408_v15 = vpop.f32.mrf.mxu1 }
0x35b1   : > { %v12374_v44 = vpop.f32.mrf.mxu1 }
0x35b2   : > { %9049 = vrot.lane.b32.xlu1 %v11302_v24, %s17535_s16 }
0x35d7   : > { %v8384_v59 = vpop.permute.xlu0 %8383 }
0x35d8   : > { %8405 = vst.msk [vmem:[#allocation3 + $0x8] sm:$0xf] %vm3313_vm11, %v8384_v59 }
0x35db   : > { %v8380_v61 = vpop.permute.xlu0 %8379 }
0x35dc   : > { %8403 = vst.msk [vmem:[#allocation3] sm:$0xf] %vm3313_vm11, %v8380_v61 }
0x35df   : > { %v8386_v48 = vpop.permute.xlu0 %8385 }
0x35e0   : > { %8406 = vst.msk [vmem:[#allocation3 + $0xc] sm:$0xf] %vm3313_vm11, %v8386_v48 }
0x35e3   : > { %v8394_v54 = vpop.permute.xlu1 %8393  ;;  %v8382_v41 = vpop.permute.xlu0 %8381 }
0x35e4   : > { %8410 = vst.msk [vmem:[#allocation3 + $0x1c] sm:$0xf] %vm3313_vm11, %v8394_v54  ;;  %8404 = vst.msk [vmem:[#allocation3 + $0x4] sm:$0xf] %vm3313_vm11, %v8382_v41 }
0x35e7   : > { %v8390_v27 = vpop.permute.xlu1 %8389  ;;  %v8392_v42 = vpop.permute.xlu0 %8391 }
0x35e8   : > { %8408 = vst.msk [vmem:[#allocation3 + $0x14] sm:$0xf] %vm3313_vm11, %v8390_v27  ;;  %8409 = vst.msk [vmem:[#allocation3 + $0x18] sm:$0xf] %vm3313_vm11, %v8392_v42 }
0x35eb   : > { %v8388_v56 = vpop.permute.xlu0 %8387 }
0x35ec   : > { %8407 = vst.msk [vmem:[#allocation3 + $0x10] sm:$0xf] %vm3313_vm11, %v8388_v56 }
0x3600   : > { %v8712_v8 = vpop.permute.xlu0 %8711 }
0x3601   : > { %8733 = vst.msk [vmem:[#allocation3 + $0x8] sm:$0xf] %vm3455_vm12, %v8712_v8 }
0x3604   : > { %v8714_v43 = vpop.permute.xlu1 %8713  ;;  %v8708_v46 = vpop.permute.xlu0 %8707 }
0x3605   : > { %8734 = vst.msk [vmem:[#allocation3 + $0xc] sm:$0xf] %vm3455_vm12, %v8714_v43  ;;  %8731 = vst.msk [vmem:[#allocation3] sm:$0xf] %vm3455_vm12, %v8708_v46 }
0x3608   : > { %v8710_v50 = vpop.permute.xlu1 %8709 }
0x3609   : > { %8732 = vst.msk [vmem:[#allocation3 + $0x4] sm:$0xf] %vm3455_vm12, %v8710_v50 }
0x360a   : > { %v8716_v45 = vpop.permute.xlu0 %8715 }
0x360b   : > { %8735 = vst.msk [vmem:[#allocation3 + $0x10] sm:$0xf] %vm3455_vm12, %v8716_v45 }
0x360e   : > { %v8718_v18 = vpop.permute.xlu1 %8717 }
0x360f   : > { %8736 = vst.msk [vmem:[#allocation3 + $0x14] sm:$0xf] %vm3455_vm12, %v8718_v18 }
0x3610   : > { %v9040_v2 = vpop.permute.xlu0 %9039 }
0x3611   : > { %9061 = vst.msk [vmem:[#allocation3 + $0x8] sm:$0xf] %vm3597_vm13, %v9040_v2 }
0x3614   : > { %v9042_v23 = vpop.permute.xlu1 %9041  ;;  %v9036_v26 = vpop.permute.xlu0 %9035 }
0x3615   : > { %9062 = vst.msk [vmem:[#allocation3 + $0xc] sm:$0xf] %vm3597_vm13, %v9042_v23  ;;  %9059 = vst.msk [vmem:[#allocation3] sm:$0xf] %vm3597_vm13, %v9036_v26 }
0x3618   : > { %v9038_v37 = vpop.permute.xlu1 %9037  ;;  %v8720_v39 = vpop.permute.xlu0 %8719 }
0x3619   : > { %9060 = vst.msk [vmem:[#allocation3 + $0x4] sm:$0xf] %vm3597_vm13, %v9038_v37 }
0x361a   : > { %8737 = vst.msk [vmem:[#allocation3 + $0x18] sm:$0xf] %vm3455_vm12, %v8720_v39 }
0x361c   : > { %v8722_v6 = vpop.permute.xlu1 %8721  ;;  %v9044_v1 = vpop.permute.xlu0 %9043  ;;  %v12983_v53 = vld [vmem:[#allocation3 + $0x8] sm:$0xff]  }
0x361d   : > { %8738 = vst.msk [vmem:[#allocation3 + $0x1c] sm:$0xf] %vm3455_vm12, %v8722_v6 }
0x361e   : > { %9063 = vst.msk [vmem:[#allocation3 + $0x10] sm:$0xf] %vm3597_vm13, %v9044_v1 }
0x3620   : > { %v9046_v58 = vpop.permute.xlu1 %9045  ;;  %v9048_v13 = vpop.permute.xlu0 %9047  ;;  %v12982_v17 = vld [vmem:[#allocation3] sm:$0xff]  }
0x3621   : > { %9064 = vst.msk [vmem:[#allocation3 + $0x14] sm:$0xf] %vm3597_vm13, %v9046_v58  ;;  %9065 = vst.msk [vmem:[#allocation3 + $0x18] sm:$0xf] %vm3597_vm13, %v9048_v13  ;;  %12359 = vmatprep.mubr.msk.bf16.mxu0 %vm3613_vm14, %v12982_v17 }
0x3622   : > { %12360 = vmatmul.mubr.msk.bf16.vlgmr.msra.gmra.mxu0 %vm3613_vm14, %v12983_v53 }
0x3624   : > { %v9050_v5 = vpop.permute.xlu1 %9049 }
0x3625   : > { %9066 = vst.msk [vmem:[#allocation3 + $0x1c] sm:$0xf] %vm3597_vm13, %v9050_v5 }
0x3628   : > { %v12984_v19 = vld [vmem:[#allocation3 + $0x10] sm:$0xff]  }
0x3629   : > { %12363 = vmatprep.mubr.msk.bf16.mxu0 %vm3613_vm14, %v12984_v19 }
0x362c   : > { %v12985_v38 = vld [vmem:[#allocation3 + $0x18] sm:$0xff]  }
0x362d   : > { %12364 = vmatmul.mubr.msk.bf16.gmra.mxu0 %vm3613_vm14, %v12985_v38 }
0x36e2   : > { %v12361_v32 = vpop.f32.mrf.mxu0 }
0x36e3   : > { %v9164_v31 = vadd.f32 %v12361_v32, %v11174_v63 }
0x36e4   : > { %v9155_v29 = vpop.f32.mrf.mxu0 }
0x36e5   : > { %v9156_v28 = vadd.f32 %v11174_v63, %v9155_v29  ;;  %v9188_v12 = vadd.f32 %v9164_v31, %v16205_v60 }
0x36e6   : > { %v12362_v30 = vpop.f32.mrf.mxu0 }
0x36e7   : > { %v9186_v51 = vadd.f32 %v9156_v28, %v16199_v36  ;;  %v9167_v34 = vadd.f32 %v12362_v30, %v11174_v63  ;;  %v9204_v62 = vsel %vm2022_vm1, %v9188_v12, 0.0 }
0x36e8   : > { %v9158_v35 = vpop.f32.mrf.mxu0 }
0x36e9   : > { %v9159_v9 = vadd.f32 %v11174_v63, %v9158_v35  ;;  %v9198_v55 = vsel %vm2022_vm1, %v9186_v51, 0.0  ;;  %v9189_v10 = vadd.f32 %v9167_v34, %v16212_v20 }
0x36ea   : > { %9199 = vadd.xlane.f32.xlu0 %v9198_v55 }
0x36eb   : > { %v9187_v57 = vadd.f32 %v9159_v9, %v16203_v4  ;;  %v9207_v7 = vsel %vm2022_vm1, %v9189_v10, 0.0 }
0x36ed   : > { %v12365_v11 = vpop.f32.mrf.mxu0  ;;  %v9201_v14 = vsel %vm2022_vm1, %v9187_v57, 0.0 }
0x36ee   : > { %9202 = vadd.xlane.f32.xlu1 %v9201_v14  ;;  %9205 = vadd.xlane.f32.xlu0 %v9204_v62  ;;  %v9180_v47 = vadd.f32 %v12365_v11, %v11174_v63  ;;  %v12988_v11 = vld [vmem:[%s17540_s25] sm:$0xff]  }
0x36ef   : > { %v9171_v36 = vpop.f32.mrf.mxu0  ;;  %v12989_v14 = vld [vmem:[%s17542_s28] sm:$0xff]  }
0x36f0   : > { %v9172_v52 = vadd.f32 %v11174_v63, %v9171_v36  ;;  %v9192_v4 = vadd.f32 %v9180_v47, %v16236_v21 }
0x36f1   : > { %v12366_v60 = vpop.f32.mrf.mxu0 }
0x36f2   : > { %v9190_v49 = vadd.f32 %v9172_v52, %v16223_v16  ;;  %9208 = vadd.xlane.f32.xlu0 %v9207_v7  ;;  %v9183_v20 = vadd.f32 %v12366_v60, %v11174_v63  ;;  %v9216_v48 = vsel %vm2022_vm1, %v9192_v4, 0.0 }
0x36f3   : > { %v9174_v25 = vpop.f32.mrf.mxu0 }
0x36f4   : > { %v9175_v15 = vadd.f32 %v11174_v63, %v9174_v25  ;;  %v9210_v24 = vsel %vm2022_vm1, %v9190_v49, 0.0  ;;  %v9193_v59 = vadd.f32 %v9183_v20, %v16241_v22 }
0x36f5   : > { %9211 = vadd.xlane.f32.xlu1 %v9210_v24 }
0x36f6   : > { %v9191_v44 = vadd.f32 %v9175_v15, %v16228_v33  ;;  %v9219_v16 = vsel %vm2022_vm1, %v9193_v59, 0.0 }
0x36f8   : > { %v9213_v61 = vsel %vm2022_vm1, %v9191_v44, 0.0 }
0x36f9   : > { %9214 = vadd.xlane.f32.xlu0 %v9213_v61  ;;  %9217 = vadd.xlane.f32.xlu1 %v9216_v48 }
0x36fd   : > { %9220 = vadd.xlane.f32.xlu0 %v9219_v16 }
0x3773   : > { %v9200_v54 = vpop.xlane.xlu0 %9199 }
0x3774   : > { %v9222_v21 = vmul.f32 0.03125, %v9200_v54 }
0x3776   : > { %v17020_v41 = vsub.f32 %v9186_v51, %v9222_v21 }
0x3777   : > { %v9203_v27 = vpop.xlane.xlu1 %9202  ;;  %v9206_v42 = vpop.xlane.xlu0 %9205 }
0x3778   : > { %v9223_v56 = vmul.f32 0.03125, %v9203_v27  ;;  %v9224_v8 = vmul.f32 0.03125, %v9206_v42  ;;  %v9238_v33 = vmul.f32 %v17020_v41, %v17020_v41  ;;  %v11184_v42 = vld [vmem:[#allocation34 + $0x1] ss:$0 sm:$0xff] }
0x377a   : > { %v17024_v22 = vsub.f32 %v9187_v57, %v9223_v56  ;;  %v17026_v43 = vsub.f32 %v9188_v12, %v9224_v8  ;;  %v9246_v46 = vsel %vm2022_vm1, %v9238_v33, 0.0  ;;  %v12986_v57 = vld [vmem:[%s17540_s25 + $0x8] sm:$0xff]  }
0x377b   : > { %9247 = vadd.xlane.f32.xlu1 %v9246_v46  ;;  %v9209_v50 = vpop.xlane.xlu0 %9208  ;;  %12387 = vmatprep.subr.bf16.mxu0 %v12986_v57 }
0x377c   : > { %v9225_v45 = vmul.f32 0.03125, %v9209_v50  ;;  %v9239_v18 = vmul.f32 %v17024_v22, %v17024_v22  ;;  %v9240_v2 = vmul.f32 %v17026_v43, %v17026_v43  ;;  %12388 = vmatpush3.bf16.msra.mxu0 %v12986_v57  ;;  %v17067_v50 = vld [vmem:[#allocation33 + $0x1] ss:$0 sm:$0xff] }
0x377d   : > { %12389 = vmatprep.subr.bf16.mxu0 %v12988_v11 }
0x377e   : > { %v17033_v23 = vsub.f32 %v9189_v10, %v9225_v45  ;;  %v9212_v26 = vpop.xlane.xlu1 %9211  ;;  %v9249_v37 = vsel %vm2022_vm1, %v9239_v18, 0.0  ;;  %v9252_v39 = vsel %vm2022_vm1, %v9240_v2, 0.0  ;;  %v12987_v10 = vld [vmem:[%s17541_s15 + $0x8] sm:$0xff]   ;;  %s17543_s15 = sld [smem:[#allocation118_spill]] }
0x377f   : > { %v9226_v6 = vmul.f32 0.03125, %v9212_v26  ;;  %9250 = vadd.xlane.f32.xlu0 %v9249_v37  ;;  %9253 = vadd.xlane.f32.xlu1 %v9252_v39 }
0x3780   : > { %v9241_v1 = vmul.f32 %v17033_v23, %v17033_v23  ;;  %12375 = vmatprep.subr.bf16.mxu1 %v12987_v10  ;;  %12390 = vmatpush3.bf16.msra.mxu0 %v12988_v11 }
0x3781   : > { %v17039_v58 = vsub.f32 %v9190_v49, %v9226_v6  ;;  %12376 = vmatpush3.bf16.msra.mxu1 %v12987_v10  ;;  %12411 = vmatprep.subr.bf16.mxu0 %v14391_v0  ;;  %v13394_v10 = vld [vmem:[%s15169_s13 + $0x18] sm:$0xff] }
0x3782   : > { %v9218_v13 = vpop.xlane.xlu1 %9217  ;;  %v9215_v17 = vpop.xlane.xlu0 %9214  ;;  %v9255_v53 = vsel %vm2022_vm1, %v9241_v1, 0.0  ;;  %12377 = vmatprep.subr.bf16.mxu1 %v12989_v14 }
0x3783   : > { %v9228_v5 = vmul.f32 0.03125, %v9218_v13  ;;  %v9227_v19 = vmul.f32 0.03125, %v9215_v17  ;;  %9256 = vadd.xlane.f32.xlu0 %v9255_v53  ;;  %v9242_v38 = vmul.f32 %v17039_v58, %v17039_v58 }
0x3784   : > { %s17071_s6 = scalar_lea.vmem %s17543_s15, %s15161_s7  ;;  %s10262_s7 = scalar_lea.sflag [#allocation6], %s14983_s3 }
0x3785   : > { %v17044_v32 = vsub.f32 %v9192_v4, %v9228_v5  ;;  %v17046_v63 = vsub.f32 %v9191_v44, %v9227_v19  ;;  %v9258_v29 = vsel %vm2022_vm1, %v9242_v38, 0.0  ;;  %12378 = vmatpush3.bf16.msra.mxu1 %v12989_v14 }
0x3786   : > { %9259 = vadd.xlane.f32.xlu1 %v9258_v29  ;;  %v9221_v31 = vpop.xlane.xlu0 %9220  ;;  %12399 = vmatprep.subr.bf16.mxu1 %v14391_v0 }
0x3787   : > { %v9229_v28 = vmul.f32 0.03125, %v9221_v31  ;;  %v9244_v30 = vmul.f32 %v17044_v32, %v17044_v32  ;;  %v9243_v51 = vmul.f32 %v17046_v63, %v17046_v63  ;;  %v13391_v31 = vld [vmem:[%s15169_s13] sm:$0xff] }
0x3789   : > { %v17053_v35 = vsub.f32 %v9193_v59, %v9229_v28  ;;  %v9264_v12 = vsel %vm2022_vm1, %v9244_v30, 0.0  ;;  %v9261_v34 = vsel %vm2022_vm1, %v9243_v51, 0.0  ;;  %v13392_v30 = vld [vmem:[%s15169_s13 + $0x8] sm:$0xff] }
0x378a   : > { %9265 = vadd.xlane.f32.xlu1 %v9264_v12  ;;  %9262 = vadd.xlane.f32.xlu0 %v9261_v34 }
0x378b   : > { %v9245_v9 = vmul.f32 %v17053_v35, %v17053_v35 }
0x378d   : > { %v9267_v55 = vsel %vm2022_vm1, %v9245_v9, 0.0 }
0x378e   : > { %9268 = vadd.xlane.f32.xlu0 %v9267_v55 }
0x3804   : > { %v9248_v62 = vpop.xlane.xlu1 %9247 }
0x3805   : > { %v9270_v36 = vmul.f32 0.03125, %v9248_v62 }
0x3807   : > { %v9278_v47 = vadd.f32 1e-05, %v9270_v36 }
0x3808   : > { %v9254_v52 = vpop.xlane.xlu1 %9253  ;;  %v9251_v60 = vpop.xlane.xlu0 %9250 }
0x3809   : > { %13339 = vrsqrt.f32 %v9278_v47  ;;  %v9272_v7 = vmul.f32 0.03125, %v9254_v52  ;;  %v9271_v49 = vmul.f32 0.03125, %v9251_v60 }
0x380b   : > { %v9280_v25 = vadd.f32 1e-05, %v9272_v7  ;;  %v9279_v4 = vadd.f32 1e-05, %v9271_v49 }
0x380c   : > { %v9257_v20 = vpop.xlane.xlu0 %9256 }
0x380d   : > { %13341 = vrsqrt.f32 %v9280_v25  ;;  %v9273_v15 = vmul.f32 0.03125, %v9257_v20 }
0x380e   : > { %13343 = vrsqrt.f32 %v9279_v4 }
0x380f   : > { %v9281_v24 = vadd.f32 1e-05, %v9273_v15  ;;  %v9260_v44 = vpop.xlane.xlu1 %9259  ;;  %v13395_v15 = vld [vmem:[%s15169_s13 + $0x20] sm:$0xff] }
0x3810   : > { %v9274_v59 = vmul.f32 0.03125, %v9260_v44  ;;  %v13396_v44 = vld [vmem:[%s15169_s13 + $0x28] sm:$0xff] }
0x3811   : > { %13345 = vrsqrt.f32 %v9281_v24 }
0x3812   : > { %v9282_v61 = vadd.f32 1e-05, %v9274_v59 }
0x3813   : > { %v9266_v48 = vpop.xlane.xlu1 %9265  ;;  %v9263_v16 = vpop.xlane.xlu0 %9262 }
0x3814   : > { %13347 = vrsqrt.f32 %v9282_v61  ;;  %v9276_v54 = vmul.f32 0.03125, %v9266_v48  ;;  %v9275_v21 = vmul.f32 0.03125, %v9263_v16  ;;  %v13397_v16 = vld [vmem:[%s15169_s13 + $0x30] sm:$0xff] }
0x3816   : > { %v13340_v27 = vpop.eup %13339  ;;  %v9284_v56 = vadd.f32 1e-05, %v9276_v54  ;;  %v9283_v8 = vadd.f32 1e-05, %v9275_v21  ;;  %v13398_v21 = vld [vmem:[%s15169_s13 + $0x38] sm:$0xff] }
0x3817   : > { %v9294_v33 = vmul.f32 %v13340_v27, %v17020_v41  ;;  %v9269_v46 = vpop.xlane.xlu0 %9268 }
0x3818   : > { %13349 = vrsqrt.f32 %v9284_v56  ;;  %v9277_v45 = vmul.f32 0.03125, %v9269_v46 }
0x3819   : > { %13351 = vrsqrt.f32 %v9283_v8  ;;  %v9308_v18 = vmul.f32 %v11184_v42, %v9294_v33 }
0x381a   : > { %v13342_v2 = vpop.eup %13341  ;;  %v9285_v26 = vadd.f32 1e-05, %v9277_v45 }
0x381b   : > { %v13344_v37 = vpop.eup %13343  ;;  %v9296_v39 = vmul.f32 %v13342_v2, %v17026_v43  ;;  %v9322_v6 = vadd.f32 %v17067_v50, %v9308_v18 }
0x381c   : > { %v9295_v41 = vmul.f32 %v13344_v37, %v17024_v22  ;;  %13353 = vrsqrt.f32 %v9285_v26 }
0x381d   : > { %v9310_v1 = vmul.f32 %v11184_v42, %v9296_v39  ;;  %10253 = vst.msk [vmem:[%s17071_s6] sm:$0xff] %vm2022_vm1, %v9322_v6  ;;  %v9330_v28 = vadd.f32 %v13391_v31, %v9322_v6 }
0x381e   : > { %v13346_v13 = vpop.eup %13345  ;;  %v9309_v17 = vmul.f32 %v11184_v42, %v9295_v41 }
0x381f   : > { %v9324_v53 = vadd.f32 %v17067_v50, %v9310_v1  ;;  %v9297_v5 = vmul.f32 %v13346_v13, %v17033_v23 }
0x3820   : > { %v9323_v19 = vadd.f32 %v17067_v50, %v9309_v17 }
0x3821   : > { %v13348_v43 = vpop.eup %13347  ;;  %10255 = vst.msk [vmem:[%s17071_s6 + $0x10] sm:$0xff] %vm2022_vm1, %v9324_v53  ;;  %v9311_v38 = vmul.f32 %v11184_v42, %v9297_v5 }
0x3822   : > { %v9298_v22 = vmul.f32 %v13348_v43, %v17039_v58  ;;  %v9516_v29 = vpack.c.bf16 %v9323_v19, %v9322_v6  ;;  %10254 = vst.msk [vmem:[%s17071_s6 + $0x8] sm:$0xff] %vm2022_vm1, %v9323_v19  ;;  %v9331_v51 = vadd.f32 %v13392_v30, %v9323_v19  ;;  %v13393_v58 = vld [vmem:[%s15169_s13 + $0x10] sm:$0xff]  ;;  %v11197_v6 = vld [vmem:[#allocation12] ss:$0 sm:$0xff]  ;;  %s17544_s13 = sld [smem:[#allocation117_spill]] }
0x3823   : > { %v9325_v23 = vadd.f32 %v17067_v50, %v9311_v38  ;;  %v9332_v57 = vadd.f32 %v13393_v58, %v9324_v53 }
0x3824   : > { %12391 = vmatprep.mubr.msk.bf16.mxu0 %vm2022_vm1, %v9516_v29  ;;  %v9412_v12 = vpack.c.bf16 %v9331_v51, %v9330_v28  ;;  %v9312_v34 = vmul.f32 %v11184_v42, %v9298_v22 }
0x3825   : > { %v13350_v9 = vpop.eup %13349  ;;  %10256 = vst.msk [vmem:[%s17071_s6 + $0x18] sm:$0xff] %vm2022_vm1, %v9325_v23  ;;  %v9517_v55 = vpack.c.bf16 %v9325_v23, %v9324_v53  ;;  %v9333_v11 = vadd.f32 %v13394_v10, %v9325_v23  ;;  %v11190_v53 = vld [vmem:[#allocation7] ss:$0 sm:$0xff] }
0x3826   : > { %v13352_v14 = vpop.eup %13351  ;;  %v9300_v62 = vmul.f32 %v13350_v9, %v17044_v32  ;;  %12379 = vmatprep.mubr.msk.bf16.mxu1 %vm2022_vm1, %v9412_v12  ;;  %v9326_v36 = vadd.f32 %v17067_v50, %v9312_v34 }
0x3827   : > { %v9299_v47 = vmul.f32 %v13352_v14, %v17046_v63  ;;  %12392 = vmatmul.mubr.msk.bf16.vlgmr.msra.gmra.mxu0 %vm2022_vm1, %v9517_v55  ;;  %v9413_v52 = vpack.c.bf16 %v9333_v11, %v9332_v57 }
0x3828   : > { %v9314_v60 = vmul.f32 %v11184_v42, %v9300_v62  ;;  %10257 = vst.msk [vmem:[%s17071_s6 + $0x20] sm:$0xff] %vm2022_vm1, %v9326_v36  ;;  %v9334_v24 = vadd.f32 %v13395_v15, %v9326_v36 }
0x3829   : > { %v13354_v7 = vpop.eup %13353  ;;  %12380 = vmatmul.mubr.msk.bf16.vlgmr.msra.gmra.mxu1 %vm2022_vm1, %v9413_v52  ;;  %v9313_v49 = vmul.f32 %v11184_v42, %v9299_v47 }
0x382a   : > { %v9301_v32 = vmul.f32 %v13354_v7, %v17053_v35  ;;  %v9328_v25 = vadd.f32 %v17067_v50, %v9314_v60 }
0x382b   : > { %v9327_v4 = vadd.f32 %v17067_v50, %v9313_v49 }
0x382c   : > { %v9315_v63 = vmul.f32 %v11184_v42, %v9301_v32  ;;  %10259 = vst.msk [vmem:[%s17071_s6 + $0x30] sm:$0xff] %vm2022_vm1, %v9328_v25  ;;  %v9336_v54 = vadd.f32 %v13397_v16, %v9328_v25 }
0x382d   : > { %v9518_v20 = vpack.c.bf16 %v9327_v4, %v9326_v36  ;;  %10258 = vst.msk [vmem:[%s17071_s6 + $0x28] sm:$0xff] %vm2022_vm1, %v9327_v4  ;;  %v9335_v59 = vadd.f32 %v13396_v44, %v9327_v4 }
0x382e   : > { %v9329_v61 = vadd.f32 %v17067_v50, %v9315_v63 }
0x382f   : > { %12395 = vmatprep.mubr.msk.bf16.mxu0 %vm2022_vm1, %v9518_v20  ;;  %v9414_v35 = vpack.c.bf16 %v9335_v59, %v9334_v24 }
0x3830   : > { %v9519_v48 = vpack.c.bf16 %v9329_v61, %v9328_v25  ;;  %10260 = vst.msk [vmem:[%s17071_s6 + $0x38] sm:$0xff] %vm2022_vm1, %v9329_v61  ;;  %v9337_v27 = vadd.f32 %v13398_v21, %v9329_v61  ;;  %v11186_v25 = vld [vmem:[#allocation10] ss:$0 sm:$0xff]  ;;  %s17545_s6 = sshll.u32 %s14983_s3, 3 }
0x3831   : > { %12383 = vmatprep.mubr.msk.bf16.mxu1 %vm2022_vm1, %v9414_v35  ;;  %v9406_v63 = vadd.f32 %v11186_v25, %v16971_v40 }
0x3832   : > { %12396 = vmatmul.mubr.msk.bf16.gmra.mxu0 %vm2022_vm1, %v9519_v48  ;;  %v9415_v42 = vpack.c.bf16 %v9337_v27, %v9336_v54 }
0x3833   : > { %12419 = vmatprep.mubr.msk.bf16.mxu0 %vm14392_vm0, %v14391_v0  ;;  %v17161_v20 = vpack.c.bf16 %v9406_v63, %v9406_v63 }
0x3834   : > { %12384 = vmatmul.mubr.msk.bf16.gmra.mxu1 %vm2022_vm1, %v9415_v42 }
0x3835   : > { %12407 = vmatprep.mubr.msk.bf16.mxu1 %vm14392_vm0, %v14391_v0 }
0x38e7   : > { %v12393_v56 = vpop.f32.mrf.mxu0 }
0x38e8   : > { %v9594_v9 = vadd.f32 %v12393_v56, %v11197_v6 }
0x38e9   : > { %v12381_v8 = vpop.f32.mrf.mxu1  ;;  %v9585_v33 = vpop.f32.mrf.mxu0 }
0x38ea   : > { %v9586_v11 = vadd.f32 %v11197_v6, %v9585_v33  ;;  %v9490_v47 = vadd.f32 %v12381_v8, %v11190_v53 }
0x38eb   : > { %v9481_v46 = vpop.f32.mrf.mxu1  ;;  %v12394_v50 = vpop.f32.mrf.mxu0 }
0x38ec   : > { %v9597_v51 = vadd.f32 %v12394_v50, %v11197_v6  ;;  %v9482_v49 = vadd.f32 %v11190_v53, %v9481_v46 }
0x38ed   : > { %v12382_v45 = vpop.f32.mrf.mxu1  ;;  %v9588_v18 = vpop.f32.mrf.mxu0 }
0x38ee   : > { %v17137_v58 = vpack.c.bf16 %v9597_v51, %v9594_v9  ;;  %v9589_v57 = vadd.f32 %v11197_v6, %v9588_v18  ;;  %v9493_v14 = vadd.f32 %v12382_v45, %v11190_v53 }
0x38ef   : > { %v9484_v2 = vpop.f32.mrf.mxu1 }
0x38f0   : > { %v17143_v62 = vpack.c.bf16 %v9589_v57, %v9586_v11  ;;  %v17150_v52 = vpack.c.bf16 %v9493_v14, %v9490_v47  ;;  %v9485_v60 = vadd.f32 %v11190_v53, %v9484_v2 }
0x38f2   : > { %v12397_v26 = vpop.f32.mrf.mxu0  ;;  %v9627_v7 = vsel %vm3048_vm8, %v17150_v52, 0  ;;  %v17155_v32 = vpack.c.bf16 %v9485_v60, %v9482_v49 }
0x38f3   : > { %v9610_v13 = vadd.f32 %v12397_v26, %v11197_v6 }
0x38f4   : > { %v12385_v37 = vpop.f32.mrf.mxu1  ;;  %v9601_v39 = vpop.f32.mrf.mxu0  ;;  %v9624_v4 = vsel %vm3048_vm8, %v17155_v32, 0 }
0x38f5   : > { %v9506_v43 = vadd.f32 %v12385_v37, %v11190_v53  ;;  %v9602_v28 = vadd.f32 %v11197_v6, %v9601_v39 }
0x38f6   : > { %v9497_v41 = vpop.f32.mrf.mxu1  ;;  %v12398_v1 = vpop.f32.mrf.mxu0 }
0x38f7   : > { %v9613_v17 = vadd.f32 %v12398_v1, %v11197_v6  ;;  %v9498_v55 = vadd.f32 %v11190_v53, %v9497_v41 }
0x38f8   : > { %v12386_v5 = vpop.f32.mrf.mxu1  ;;  %v9604_v19 = vpop.f32.mrf.mxu0 }
0x38f9   : > { %v17124_v38 = vpack.c.bf16 %v9613_v17, %v9610_v13  ;;  %v9509_v22 = vadd.f32 %v12386_v5, %v11190_v53  ;;  %v9605_v29 = vadd.f32 %v11197_v6, %v9604_v19 }
0x38fa   : > { %v9500_v31 = vpop.f32.mrf.mxu1 }
0x38fb   : > { %v17126_v30 = vpack.c.bf16 %v9509_v22, %v9506_v43  ;;  %12412 = vmatpush3.bf16.msra.mxu0 %v17124_v38  ;;  %v17130_v23 = vpack.c.bf16 %v9605_v29, %v9602_v28  ;;  %v9501_v12 = vadd.f32 %v11190_v53, %v9500_v31 }
0x38fc   : > { %12413 = vmatprep.subr.bf16.mxu0 %v14391_v0 }
0x38fd   : > { %v9633_v34 = vsel %vm3048_vm8, %v17126_v30, 0  ;;  %v17139_v10 = vpack.c.bf16 %v9501_v12, %v9498_v55 }
0x38fe   : > { %12400 = vmatpush3.bf16.xpose.msra.mxu1 %v9633_v34 }
0x38ff   : > { %12414 = vmatpush3.bf16.msra.mxu0 %v17130_v23  ;;  %12401 = vmatprep.subr.bf16.mxu1 %v14391_v0  ;;  %v9630_v36 = vsel %vm3048_vm8, %v17139_v10, 0 }
0x3900   : > { %12415 = vmatprep.subr.bf16.mxu0 %v14391_v0 }
0x3903   : > { %12416 = vmatpush3.bf16.msra.mxu0 %v17137_v58 }
0x3904   : > { %12417 = vmatprep.subr.bf16.mxu0 %v14391_v0 }
0x3906   : > { %12402 = vmatpush3.bf16.xpose.msra.mxu1 %v9630_v36 }
0x3907   : > { %12418 = vmatpush3.bf16.msra.mxu0 %v17143_v62  ;;  %12403 = vmatprep.subr.bf16.mxu1 %v14391_v0 }
0x3908   : > { %12423 = vmatprep.subr.bf16.mxu0 %v14391_v0 }
0x390e   : > { %12404 = vmatpush3.bf16.xpose.msra.mxu1 %v9627_v7 }
0x390f   : > { %12405 = vmatprep.subr.bf16.mxu1 %v14391_v0 }
0x3916   : > { %12406 = vmatpush3.bf16.xpose.msra.mxu1 %v9624_v4 }
0x3917   : > { %12435 = vmatprep.subr.bf16.mxu1 %v14391_v0 }
0x391d   : > { %12408 = vmatmul.mubr.msk.bf16.vlgmr.msra.gmra.mxu1 %vm3048_vm8, %v17161_v20 }
0x391e   : > { %12443 = vmatprep.mubr.msk.bf16.mxu1 %vm14392_vm0, %v14391_v0 }
0x39dd   : > { %v9669_v15 = vpop.f32.mrf.mxu1 }
0x39de   : > { %v9675_v24 = vmul.f32 0.5, %v9669_v15 }
0x39df   : > { %v12409_v44 = vpop.f32.mrf.mxu1 }
0x39e0   : > { %v9676_v59 = vsel %vm3105_vm9, %v9675_v24, -inf }
0x39e1   : > { %9677 = vmax.xlane.f32.xlu1 %v9676_v59  ;;  %v9672_v61 = vpop.f32.mrf.mxu1 }
0x39e3   : > { %v12410_v35 = vpop.f32.mrf.mxu1 }
0x39f2   : > { %9746 = vrot.lane.b32.xlu1 %v17126_v30, %s17531_s30 }
0x39f6   : > { %9742 = vrot.lane.b32.xlu1 %v17150_v52, %s17531_s30 }
0x39fa   : > { %9740 = vrot.lane.b32.xlu1 %v17155_v32, %s17531_s30 }
0x3a6a   : > { %v9678_v40 = vpop.xlane.xlu1 %9677 }
0x3a6b   : > { %v9679_v48 = vsub.f32 %v9675_v24, %v9678_v40 }
0x3a6d   : > { %v9680_v16 = vmul.f32 1.442695, %v9679_v48 }
0x3a6e   : > { %v9747_v50 = vpop.permute.xlu1 %9746 }
0x3a6f   : > { %13355 = vpow2.f32 %v9680_v16  ;;  %v9761_v18 = vsel %vm3048_vm8, %v9747_v50, 0 }
0x3a72   : > { %v9743_v26 = vpop.permute.xlu1 %9742 }
0x3a73   : > { %v9755_v37 = vsel %vm3048_vm8, %v9743_v26, 0 }
0x3a76   : > { %v9741_v39 = vpop.permute.xlu1 %9740 }
0x3a77   : > { %v9752_v6 = vsel %vm3048_vm8, %v9741_v39, 0 }
0x3a7c   : > { %v13356_v54 = vpop.eup %13355 }
0x3a7d   : > { %v9682_v21 = vsel %vm3105_vm9, %v13356_v54, 0.0 }
0x3a7e   : > { %9683 = vadd.xlane.f32.xlu0 %v9682_v21 }
0x3a94   : > { %9744 = vrot.lane.b32.xlu0 %v17139_v10, %s17531_s30 }
0x3a98   : > { %9734 = vrot.lane.b32.xlu0 %v17161_v20, %s17531_s30 }
0x3a9c   : > { %9826 = vrot.lane.b32.xlu0 %v17124_v38, %s17531_s30 }
0x3b07   : > { %v9684_v27 = vpop.xlane.xlu0 %9683 }
0x3b08   : > { %13357 = vrcp.f32 %v9684_v27 }
0x3b0b   : > { %v9745_v42 = vpop.permute.xlu0 %9744 }
0x3b0c   : > { %v9758_v2 = vsel %vm3048_vm8, %v9745_v42, 0 }
0x3b0f   : > { %v9735_v56 = vpop.permute.xlu0 %9734 }
0x3b13   : > { %v9827_v8 = vpop.permute.xlu0 %9826 }
0x3b14   : > { %12436 = vmatpush3.bf16.msra.mxu1 %v9827_v8 }
0x3b15   : > { %v13358_v33 = vpop.eup %13357  ;;  %12437 = vmatprep.subr.bf16.mxu1 %v14391_v0 }
0x3b16   : > { %v9686_v46 = vmul.f32 %v13358_v33, %v13356_v54 }
0x3b18   : > { %v9687_v45 = vpack.c.bf16 %v9686_v46, %v9686_v46 }
0x3b1a   : > { %12420 = vmatmul.mubr.msk.bf16.vlgmr.msra.gmra.mxu0 %vm3105_vm9, %v9687_v45 }
0x3b1b   : > { %12424 = vmatpush3.bf16.xpose.msra.mxu0 %v9761_v18  ;;  %12431 = vmatprep.mubr.msk.bf16.mxu0 %vm14392_vm0, %v14391_v0 }
0x3b1c   : > { %12425 = vmatprep.subr.bf16.mxu0 %v14391_v0 }
0x3b23   : > { %12426 = vmatpush3.bf16.xpose.msra.mxu0 %v9758_v2 }
0x3b24   : > { %12427 = vmatprep.subr.bf16.mxu0 %v14391_v0 }
0x3b2b   : > { %12428 = vmatpush3.bf16.xpose.msra.mxu0 %v9755_v37 }
0x3b2c   : > { %12429 = vmatprep.subr.bf16.mxu0 %v14391_v0 }
0x3b33   : > { %12430 = vmatpush3.bf16.xpose.msra.mxu0 %v9752_v6 }
0x3b34   : > { %12459 = vmatprep.subr.bf16.mxu0 %v14391_v0 }
0x3b3a   : > { %12432 = vmatmul.mubr.msk.bf16.vlgmr.msra.gmra.mxu0 %vm3048_vm8, %v9735_v56 }
0x3b3b   : > { %12467 = vmatprep.mubr.msk.bf16.mxu0 %vm14392_vm0, %v14391_v0 }
0x3bda   : > { %v9725_v41 = vpop.f32.mrf.mxu0 }
0x3bdb   : > { %v9731_v1 = vpack.c.bf16 %v9725_v41, %v9725_v41 }
0x3bdc   : > { %v12421_v13 = vpop.f32.mrf.mxu0 }
0x3bdd   : > { %9732 = vst.msk [vmem:[#allocation2] sm:$0xf] %vm3162_vm10, %v9731_v1 }
0x3bde   : > { %v9728_v17 = vpop.f32.mrf.mxu0 }
0x3be0   : > { %v12422_v53 = vpop.f32.mrf.mxu0 }
0x3bfa   : > { %v9797_v5 = vpop.f32.mrf.mxu0 }
0x3bfb   : > { %v9803_v19 = vmul.f32 0.5, %v9797_v5 }
0x3bfc   : > { %v12433_v43 = vpop.f32.mrf.mxu0 }
0x3bfd   : > { %v9804_v22 = vsel %vm3105_vm9, %v9803_v19, -inf }
0x3bfe   : > { %9805 = vmax.xlane.f32.xlu1 %v9804_v22  ;;  %v9800_v29 = vpop.f32.mrf.mxu0 }
0x3c00   : > { %v12434_v31 = vpop.f32.mrf.mxu0 }
0x3c0f   : > { %9824 = vrot.lane.b32.xlu1 %v17130_v23, %s17531_s30 }
0x3c13   : > { %9822 = vrot.lane.b32.xlu1 %v17137_v58, %s17531_s30 }
0x3c17   : > { %9891 = vrot.lane.b32.xlu1 %v17126_v30, %s17523_s8 }
0x3c1b   : > { %9887 = vrot.lane.b32.xlu1 %v17150_v52, %s17523_s8 }
0x3c1f   : > { %9883 = vrot.lane.b32.xlu1 %v17161_v20, %s17523_s8 }
0x3c23   : > { %9965 = vrot.lane.b32.xlu1 %v17130_v23, %s17523_s8 }
0x3c87   : > { %v9806_v28 = vpop.xlane.xlu1 %9805 }
0x3c88   : > { %v9807_v51 = vsub.f32 %v9803_v19, %v9806_v28 }
0x3c8a   : > { %v9808_v12 = vmul.f32 1.442695, %v9807_v51 }
0x3c8b   : > { %v9825_v34 = vpop.permute.xlu1 %9824 }
0x3c8c   : > { %13359 = vpow2.f32 %v9808_v12  ;;  %12438 = vmatpush3.bf16.msra.mxu1 %v9825_v34 }
0x3c8d   : > { %12439 = vmatprep.subr.bf16.mxu1 %v14391_v0 }
0x3c8f   : > { %v9823_v9 = vpop.permute.xlu1 %9822 }
0x3c90   : > { %12440 = vmatpush3.bf16.msra.mxu1 %v9823_v9 }
0x3c91   : > { %12441 = vmatprep.subr.bf16.mxu1 %v14391_v0 }
0x3c93   : > { %v9892_v60 = vpop.permute.xlu1 %9891 }
0x3c94   : > { %v9906_v49 = vsel %vm3048_vm8, %v9892_v60, 0 }
0x3c97   : > { %v9888_v63 = vpop.permute.xlu1 %9887 }
0x3c98   : > { %v9900_v15 = vsel %vm3048_vm8, %v9888_v63, 0 }
0x3c99   : > { %v13360_v55 = vpop.eup %13359 }
0x3c9a   : > { %v9810_v57 = vsel %vm3105_vm9, %v13360_v55, 0.0 }
0x3c9b   : > { %9811 = vadd.xlane.f32.xlu0 %v9810_v57  ;;  %v9884_v59 = vpop.permute.xlu1 %9883 }
0x3c9f   : > { %v9966_v45 = vpop.permute.xlu1 %9965 }
0x3cb1   : > { %9820 = vrot.lane.b32.xlu0 %v17143_v62, %s17531_s30  ;;  %s11221_s30 = sshll.u32 %s14685_s26, 7 }
0x3cb5   : > { %9889 = vrot.lane.b32.xlu0 %v17139_v10, %s17523_s8 }
0x3cb9   : > { %9885 = vrot.lane.b32.xlu0 %v17155_v32, %s17523_s8 }
0x3d24   : > { %v9812_v11 = vpop.xlane.xlu0 %9811 }
0x3d25   : > { %13361 = vrcp.f32 %v9812_v11 }
0x3d28   : > { %v9821_v14 = vpop.permute.xlu0 %9820 }
0x3d29   : > { %12442 = vmatpush3.bf16.msra.mxu1 %v9821_v14 }
0x3d2a   : > { %12447 = vmatprep.subr.bf16.mxu1 %v14391_v0 }
0x3d2c   : > { %v9890_v25 = vpop.permute.xlu0 %9889 }
0x3d2d   : > { %v9903_v4 = vsel %vm3048_vm8, %v9890_v25, 0 }
0x3d30   : > { %v9886_v24 = vpop.permute.xlu0 %9885 }
0x3d31   : > { %v9897_v44 = vsel %vm3048_vm8, %v9886_v24, 0 }
0x3d32   : > { %v13362_v36 = vpop.eup %13361 }
0x3d33   : > { %v9814_v47 = vmul.f32 %v13362_v36, %v13360_v55 }
0x3d35   : > { %v9815_v7 = vpack.c.bf16 %v9814_v47, %v9814_v47 }
0x3d37   : > { %12444 = vmatmul.mubr.msk.bf16.vlgmr.msra.gmra.mxu1 %vm3105_vm9, %v9815_v7 }
0x3d38   : > { %12448 = vmatpush3.bf16.xpose.msra.mxu1 %v9906_v49  ;;  %12455 = vmatprep.mubr.msk.bf16.mxu1 %vm14392_vm0, %v14391_v0 }
0x3d39   : > { %12449 = vmatprep.subr.bf16.mxu1 %v14391_v0 }
0x3d40   : > { %12450 = vmatpush3.bf16.xpose.msra.mxu1 %v9903_v4 }
0x3d41   : > { %12451 = vmatprep.subr.bf16.mxu1 %v14391_v0 }
0x3d48   : > { %12452 = vmatpush3.bf16.xpose.msra.mxu1 %v9900_v15 }
0x3d49   : > { %12453 = vmatprep.subr.bf16.mxu1 %v14391_v0 }
0x3d50   : > { %12454 = vmatpush3.bf16.xpose.msra.mxu1 %v9897_v44 }
0x3d51   : > { %12483 = vmatprep.subr.bf16.mxu1 %v14391_v0 }
0x3d57   : > { %12456 = vmatmul.mubr.msk.bf16.vlgmr.msra.gmra.mxu1 %vm3048_vm8, %v9884_v59 }
0x3d58   : > { %12491 = vmatprep.mubr.msk.bf16.mxu1 %vm14392_vm0, %v14391_v0 }
0x3df7   : > { %v17234_v61 = vpop.f32.mrf.mxu1 }
0x3df8   : > { %v11303_v55 = vpack.c.bf16 %v17234_v61, %v17234_v61 }
0x3df9   : > { %v12445_v35 = vpop.f32.mrf.mxu1 }
0x3dfb   : > { %v9872_v40 = vpop.f32.mrf.mxu1 }
0x3dfd   : > { %v12446_v48 = vpop.f32.mrf.mxu1 }
0x3e17   : > { %v9942_v16 = vpop.f32.mrf.mxu1 }
0x3e18   : > { %v9948_v54 = vmul.f32 0.5, %v9942_v16 }
0x3e19   : > { %v12457_v21 = vpop.f32.mrf.mxu1 }
0x3e1a   : > { %v9949_v27 = vsel %vm3105_vm9, %v9948_v54, -inf }
0x3e1b   : > { %9950 = vmax.xlane.f32.xlu0 %v9949_v27  ;;  %v9945_v42 = vpop.f32.mrf.mxu1 }
0x3e1d   : > { %v12458_v56 = vpop.f32.mrf.mxu1 }
0x3e31   : > { %9967 = vrot.lane.b32.xlu0 %v17124_v38, %s17523_s8 }
0x3e35   : > { %9963 = vrot.lane.b32.xlu0 %v17137_v58, %s17523_s8 }
0x3e39   : > { %10032 = vrot.lane.b32.xlu0 %v17126_v30, %s17532_s5 }
0x3e3d   : > { %10028 = vrot.lane.b32.xlu0 %v17150_v52, %s17532_s5 }
0x3e41   : > { %10024 = vrot.lane.b32.xlu0 %v17161_v20, %s17532_s5 }
0x3e45   : > { %10108 = vrot.lane.b32.xlu0 %v17124_v38, %s17532_s5 }
0x3ea4   : > { %v9951_v8 = vpop.xlane.xlu0 %9950 }
0x3ea5   : > { %v9952_v33 = vsub.f32 %v9948_v54, %v9951_v8  ;;  %v11215_v54 = vld [vmem:[#allocation9] ss:$0 sm:$0xff] }
0x3ea7   : > { %v9953_v46 = vmul.f32 1.442695, %v9952_v33 }
0x3ea8   : > { %v9968_v50 = vpop.permute.xlu0 %9967 }
0x3ea9   : > { %13363 = vpow2.f32 %v9953_v46  ;;  %12460 = vmatpush3.bf16.msra.mxu0 %v9968_v50 }
0x3eaa   : > { %12461 = vmatprep.subr.bf16.mxu0 %v14391_v0 }
0x3eac   : > { %v9964_v18 = vpop.permute.xlu0 %9963 }
0x3ead   : > { %12462 = vmatpush3.bf16.msra.mxu0 %v9966_v45 }
0x3eae   : > { %12463 = vmatprep.subr.bf16.mxu0 %v14391_v0 }
0x3eb0   : > { %v10033_v30 = vpop.permute.xlu0 %10032 }
0x3eb1   : > { %12464 = vmatpush3.bf16.msra.mxu0 %v9964_v18  ;;  %v10047_v13 = vsel %vm3048_vm8, %v10033_v30, 0 }
0x3eb2   : > { %12465 = vmatprep.subr.bf16.mxu0 %v14391_v0 }
0x3eb4   : > { %v10029_v52 = vpop.permute.xlu0 %10028 }
0x3eb5   : > { %v10041_v17 = vsel %vm3048_vm8, %v10029_v52, 0 }
0x3eb6   : > { %v13364_v20 = vpop.eup %13363 }
0x3eb7   : > { %v9955_v38 = vsel %vm3105_vm9, %v13364_v20, 0.0 }
0x3eb8   : > { %9956 = vadd.xlane.f32.xlu1 %v9955_v38  ;;  %v10025_v2 = vpop.permute.xlu0 %10024 }
0x3ebc   : > { %v10109_v26 = vpop.permute.xlu0 %10108 }
0x3ebd   : > { %12484 = vmatpush3.bf16.msra.mxu1 %v10109_v26 }
0x3ebe   : > { %12485 = vmatprep.subr.bf16.mxu1 %v14391_v0 }
0x3ec9   : > { %9961 = vrot.lane.b32.xlu1 %v17143_v62, %s17523_s8  ;;  %s14403_s8 = smov [#allocation51]  }
0x3eca   : > { %s14185_s15 = sshll.u32 %s14403_s8, 4  ;;  %s14186_s15 = int_to_ptr.vmem [resolvable:$false] %s14185_s15 }
0x3ecb   : > { %s14187_s9 = scalar_lea.vmem %s14186_s15, 256 }
0x3ecd   : > { %10030 = vrot.lane.b32.xlu1 %v17139_v10, %s17532_s5 }
0x3ed1   : > { %10026 = vrot.lane.b32.xlu1 %v17155_v32, %s17532_s5 }
0x3f41   : > { %v9957_v37 = vpop.xlane.xlu1 %9956 }
0x3f42   : > { %13365 = vrcp.f32 %v9957_v37  ;;  %v11219_v37 = vld [vmem:[#allocation36] ss:$0 sm:$0xff] }
0x3f45   : > { %v9962_v39 = vpop.permute.xlu1 %9961 }
0x3f46   : > { %12466 = vmatpush3.bf16.msra.mxu0 %v9962_v39 }
0x3f47   : > { %12471 = vmatprep.subr.bf16.mxu0 %v14391_v0 }
0x3f49   : > { %v10031_v10 = vpop.permute.xlu1 %10030 }
0x3f4a   : > { %v10044_v32 = vsel %vm3048_vm8, %v10031_v10, 0 }
0x3f4d   : > { %v10027_v53 = vpop.permute.xlu1 %10026 }
0x3f4e   : > { %v10038_v5 = vsel %vm3048_vm8, %v10027_v53, 0 }
0x3f4f   : > { %v13366_v6 = vpop.eup %13365 }
0x3f50   : > { %v9959_v41 = vmul.f32 %v13366_v6, %v13364_v20 }
0x3f52   : > { %v9960_v1 = vpack.c.bf16 %v9959_v41, %v9959_v41 }
0x3f54   : > { %12468 = vmatmul.mubr.msk.bf16.vlgmr.msra.gmra.mxu0 %vm3105_vm9, %v9960_v1 }
0x3f55   : > { %12472 = vmatpush3.bf16.xpose.msra.mxu0 %v10047_v13  ;;  %12479 = vmatprep.mubr.msk.bf16.mxu0 %vm14392_vm0, %v14391_v0 }
0x3f56   : > { %12473 = vmatprep.subr.bf16.mxu0 %v14391_v0 }
0x3f5d   : > { %12474 = vmatpush3.bf16.xpose.msra.mxu0 %v10044_v32 }
0x3f5e   : > { %12475 = vmatprep.subr.bf16.mxu0 %v14391_v0 }
0x3f65   : > { %12476 = vmatpush3.bf16.xpose.msra.mxu0 %v10041_v17 }
0x3f66   : > { %12477 = vmatprep.subr.bf16.mxu0 %v14391_v0 }
0x3f6d   : > { %12478 = vmatpush3.bf16.xpose.msra.mxu0 %v10038_v5 }
0x3f74   : > { %12480 = vmatmul.mubr.msk.bf16.vlgmr.msra.gmra.mxu0 %vm3048_vm8, %v10025_v2  ;;  %v11218_v2 = vld [vmem:[#allocation37] ss:$0 sm:$0xff] }
0x4014   : > { %v10010_v19 = vpop.f32.mrf.mxu0 }
0x4015   : > { %v11304_v7 = vpack.c.bf16 %v10010_v19, %v10010_v19 }
0x4016   : > { %v12469_v43 = vpop.f32.mrf.mxu0 }
0x4018   : > { %v10013_v22 = vpop.f32.mrf.mxu0 }
0x401a   : > { %v12470_v29 = vpop.f32.mrf.mxu0 }
0x4034   : > { %v10083_v31 = vpop.f32.mrf.mxu0 }
0x4035   : > { %v10089_v28 = vmul.f32 0.5, %v10083_v31 }
0x4036   : > { %v12481_v51 = vpop.f32.mrf.mxu0 }
0x4037   : > { %v10090_v12 = vsel %vm3105_vm9, %v10089_v28, -inf }
0x4038   : > { %10091 = vmax.xlane.f32.xlu1 %v10090_v12  ;;  %v10086_v34 = vpop.f32.mrf.mxu0 }
0x403a   : > { %v12482_v9 = vpop.f32.mrf.mxu0 }
0x4049   : > { %10106 = vrot.lane.b32.xlu1 %v17130_v23, %s17532_s5 }
0x404d   : > { %10104 = vrot.lane.b32.xlu1 %v17137_v58, %s17532_s5 }
0x4051   : > { %9879 = vrot.lane.b32.xlu1 %v11303_v55, %s17533_s2  ;;  %s10278_s2 = scalar_lea.hbm %s17544_s13, %s11221_s30 }
0x40c1   : > { %v10092_v57 = vpop.xlane.xlu1 %10091 }
0x40c2   : > { %v10093_v11 = vsub.f32 %v10089_v28, %v10092_v57 }
0x40c4   : > { %v10094_v14 = vmul.f32 1.442695, %v10093_v11 }
0x40c5   : > { %v10107_v36 = vpop.permute.xlu1 %10106 }
0x40c6   : > { %13367 = vpow2.f32 %v10094_v14  ;;  %12486 = vmatpush3.bf16.msra.mxu1 %v10107_v36 }
0x40c7   : > { %12487 = vmatprep.subr.bf16.mxu1 %v14391_v0 }
0x40c9   : > { %v10105_v47 = vpop.permute.xlu1 %10104 }
0x40ca   : > { %12488 = vmatpush3.bf16.msra.mxu1 %v10105_v47 }
0x40cb   : > { %12489 = vmatprep.subr.bf16.mxu1 %v14391_v0 }
0x40cd   : > { %v9880_v23 = vpop.permute.xlu1 %9879 }
0x40ce   : > { %9882 = vst.msk [vmem:[#allocation2] sm:$0xf] %vm3313_vm11, %v9880_v23 }
0x40d3   : > { %v13368_v58 = vpop.eup %13367 }
0x40d4   : > { %v10096_v60 = vsel %vm3105_vm9, %v13368_v58, 0.0 }
0x40d5   : > { %10097 = vadd.xlane.f32.xlu0 %v10096_v60 }
0x40eb   : > { %10102 = vrot.lane.b32.xlu0 %v17143_v62, %s17532_s5  ;;  %v12990_v62 = vld [vmem:[#allocation13] sm:$0xff]  }
0x40ef   : > { %10020 = vrot.lane.b32.xlu0 %v11304_v7, %s17524_s11 }
0x415e   : > { %v10098_v49 = vpop.xlane.xlu0 %10097 }
0x415f   : > { %13369 = vrcp.f32 %v10098_v49 }
0x4162   : > { %v10103_v25 = vpop.permute.xlu0 %10102 }
0x4163   : > { %12490 = vmatpush3.bf16.msra.mxu1 %v10103_v25 }
0x4164   : > { %12495 = vmatprep.subr.bf16.mxu1 %v14391_v0 }
0x4166   : > { %v10021_v4 = vpop.permute.xlu0 %10020 }
0x4167   : > { %10023 = vst.msk [vmem:[#allocation2] sm:$0xf] %vm3455_vm12, %v10021_v4 }
0x416c   : > { %v13370_v63 = vpop.eup %13369 }
0x416d   : > { %v10100_v15 = vmul.f32 %v13370_v63, %v13368_v58 }
0x416f   : > { %v10101_v24 = vpack.c.bf16 %v10100_v15, %v10100_v15 }
0x4171   : > { %12492 = vmatmul.mubr.msk.bf16.vlgmr.msra.gmra.mxu1 %vm3105_vm9, %v10101_v24 }
0x4172   : > { %12497 = vmatprep.mubr.msk.bf16.mxu1 %vm14392_vm0, %v14391_v0  ;;  %12496 = vmatpush3.bf16.msra.mxu1 %v12990_v62 }
0x4231   : > { %v10151_v44 = vpop.f32.mrf.mxu1 }
0x4232   : > { %v11305_v59 = vpack.c.bf16 %v10151_v44, %v10151_v44 }
0x4233   : > { %v12493_v61 = vpop.f32.mrf.mxu1 }
0x4234   : > { %10161 = vrot.lane.b32.xlu1 %v11305_v59, %s17535_s16  ;;  %s1945_s16 = scalar_lea.vmem [#allocation51], %s17545_s6 }
0x4235   : > { %v10154_v35 = vpop.f32.mrf.mxu1  ;;  %s10280_s5 = sshll.u32 %s1945_s16, 4  ;;  %s10281_s5 = int_to_ptr.vmem [resolvable:$true] %s10280_s5 }
0x4236   : > { %s14181_s11 = scalar_lea.vmem %s10281_s5, 128  ;;  %p14188_p0 = scmp.lt.s32.totalorder %s10281_s5, %s14186_s15 }
0x4237   : > { %v12494_v40 = vpop.f32.mrf.mxu1  ;;  %p14182_p7 = scmp.ne.s32.totalorder %s10281_s5, %s14181_s11  ;;  %p14189_p11 = scmp.lt.s32.totalorder %s14187_s9, %s14181_s11 }
0x4239   : > { %p14183_p10 = pnand %p14182_p7, %p17546_p9  ;;  %p14190_p2 = por %p14189_p11, %p14188_p0 }
0x423b   : > { %p14184_p12 = pneg %p14183_p10 }
0x423d   : > { %p14191_p4 = pnand %p14190_p2, %p14184_p12 }
0x42a6   : > { %v10162_v48 = vpop.permute.xlu1 %10161 }
0x42a7   : > { %10164 = vst.msk [vmem:[#allocation2] sm:$0xf] %vm3597_vm13, %v10162_v48 }
0x42ae   : > { %v10165_v16 = vld [vmem:[#allocation2] sm:$0xf] }
0x42af   : > { %12498 = vmatmul.mubr.msk.bf16.vlgmr.msra.gmra.mxu1 %vm3613_vm14, %v10165_v16 }
0x436f   : > { %v10216_v21 = vpop.f32.mrf.mxu1 }
0x4370   : > { %v10217_v27 = vadd.f32 %v11215_v54, %v10216_v21 }
0x4371   : > { %v12499_v42 = vpop.f32.mrf.mxu1 }
0x4372   : > { %v10222_v0 = vadd.f32 %v10217_v27, %v16513_v3 }
0x4373   : > { %v10219_v56 = vpop.f32.mrf.mxu1 }
0x4374   : > { %v10225_v8 = vsel %vm2022_vm1, %v10222_v0, 0.0 }
0x4375   : > { %10226 = vadd.xlane.f32.xlu0 %v10225_v8  ;;  %v12500_v33 = vpop.f32.mrf.mxu1 }
0x43fe   : > { %v10227_v46 = vpop.xlane.xlu0 %10226 }
0x43ff   : > { %v10228_v50 = vmul.f32 0.03125, %v10227_v46 }
0x4401   : > { %v10229_v45 = vsub.f32 %v10222_v0, %v10228_v50 }
0x4403   : > { %v10230_v18 = vmul.f32 %v10229_v45, %v10229_v45 }
0x4405   : > { %v10231_v30 = vsel %vm2022_vm1, %v10230_v18, 0.0 }
0x4406   : > { %10232 = vadd.xlane.f32.xlu1 %v10231_v30 }
0x448f   : > { %v10233_v52 = vpop.xlane.xlu1 %10232 }
0x4490   : > { %v10234_v20 = vmul.f32 0.03125, %v10233_v52 }
0x4492   : > { %v10235_v38 = vadd.f32 1e-05, %v10234_v20 }
0x4494   : > { %13371 = vrsqrt.f32 %v10235_v38 }
0x44a1   : > { %v13372_v3 = vpop.eup %13371 }
0x44a2   : > { %v10237_v26 = vmul.f32 %v13372_v3, %v10229_v45 }
0x44a4   : > { %v10244_v39 = vmul.f32 %v11218_v2, %v10237_v26 }
0x44a6   : > { %v10251_v6 = vadd.f32 %v11219_v37, %v10244_v39 }
0x44a8   : > { %10252 = vst.msk [vmem:[%s1945_s16] sm:$0xff] %vm2022_vm1, %v10251_v6 }
0x44a9   : > { %14194 = shalt.err (!%p14191_p4)
}
0x44aa   : > { %s14195_s26 = scalar_lea.hbm %s10278_s2, 128  ;;  %s14199_s3 = scalar_lea.hbm %s17544_s13, 256 }
0x44ab   : > { %p14196_p5 = scmp.ne.s32.totalorder %s10278_s2, %s14195_s26  ;;  %p14200_p6 = scmp.lt.s32.totalorder %s10278_s2, %s17544_s13 }
0x44ac   : > { %p14201_p1 = scmp.lt.s32.totalorder %s14199_s3, %s14195_s26 }
0x44ad   : > { %p14197_p8 = pnand %p14196_p5, %p17546_p9 }
0x44ae   : > { %p14202_p3 = por %p14201_p1, %p14200_p6 }
0x44af   : > { %p14198_p13 = pneg %p14197_p8 }
0x44b1   : > { %p14203_p7 = pnand %p14202_p3, %p14198_p13 }
0x44b3   : > { %14206 = shalt.err (!%p14203_p7)
}
0x44b4   : > { %12635 = dma.vmem_to_hbm [thread:$0]  (%p17546_p9), %s10281_s5, 128, %s10278_s2, %s10262_s7  }
0x44b5 PF: > { %s10295_s9 = sand.u32 1, %s14293_s0   ;;  %p17547_p10 = scmp.ne.s32.totalorder %s17481_s1, 0 }
0x44b6   : > { %p17548_p12 = scmp.ge.s32.totalorder %s14305_s18, 2  ;;  %s10296_s30 = scalar_lea.sflag [#allocation6], %s10295_s9 }
0x44b8   : > { %p12730_p0 = pnand %p17548_p12, %p17547_p10 }
0x44ba   : > { %p12731_p11 = pneg %p12730_p0 }
0x44bc   : > { %14288 = dma.done.wait (%p12731_p11), %s10296_s30, 128  }
0x44bd   : > { %14290 = vsyncadd (%p12731_p11), %s10296_s30, 4294967168  ;;  %s17549_s0 = sld [smem:[#allocation119_spill]]  ;;  %p130_p2 = scmp.ge.s32.totalorder %s14932_s22, 4  }
0x44be   : > { %s17550_s15 = sld [smem:[#allocation120_spill]]  ;;  %s17552_s18 = smov %s14932_s22 }
0x44bf   : > { %s17551_s16 = sld [smem:[#allocation121_spill]]  ;;  %132 = sbr.rel (!%p130_p2) target bundleno = 131 (0x83), region = 481 }
0x44c4   :  { %10309 = vsyncpa [#allocation5], 1 }
0x44c5   :  { %10311 = vsyncpa [#allocation5 + $0x1], 1 }
0x44c6   :  { %10312 = vsyncpa [#allocation8], 1 }
0x44c7   :  { %10313 = vsyncpa [#allocation11], 1 }
0x44c8   :  { %10314 = vsyncpa [#allocation14], 1 }
0x44c9   :  { %10315 = vsyncpa [#allocation17], 1 }
0x44ca   :  { %10316 = vsyncpa [#allocation20], 1 }
0x44cb   :  { %10317 = vsyncpa [#allocation23], 1 }
0x44cc   :  { %10318 = vsyncpa [#allocation26], 1 }
0x44cd   :  { %10319 = vsyncpa [#allocation29], 1 }
0x44ce   :  { %10320 = vsyncpa [#allocation32], 1 }
0x44cf   :  { %10321 = vsyncpa [#allocation35], 1 }
0x44d0   :  { %10322 = vsyncpa [#allocation38], 1 }
0x44d1   :  { %10323 = vsyncpa [#allocation41], 1 }
0x44d2   :  { %10324 = vsyncpa [#allocation44], 1 }
0x44d3   :  { %10325 = vsyncpa [#allocation47], 1 }
0x44d4   :  { %10326 = vsyncpa [#allocation50], 1 }
0x44d5   :  { %10327 = vsyncpa [#allocation6], 1 }
0x44d6   :  { %10329 = vsyncpa [#allocation6 + $0x1], 1 }

</bundles_post_ra>
